<compile_context>
chip_gen: v5e
topology: v5e:2x2
jax: 0.10.0
libtpu: 0.0.40
codegen_flags: <defaults>
</compile_context>

<pallas_src>
import functools

import jax
import jax.numpy as jnp
from jax.experimental import pallas as pl
from jax.experimental.pallas import tpu as pltpu

# f32 matmuls everywhere (kernel and reference) so the kNN neighbour selection is
# stable between the Pallas kernel and the pure-JAX reference.
jax.config.update("jax_default_matmul_precision", "highest")

_BIG = 1e30
_BN_EPS = 1e-5


def _silu(v):
    return v * (1.0 / (1.0 + jnp.exp(-v)))


# -----------------------------------------------------------------------------
# Fused DynamicEdgeConvPN kernel: knn_graph + EdgeConv(max) + nn(x)
# -----------------------------------------------------------------------------
def _dec_pn_kernel(xq_ref, pq_ref, bq_ref,            # query-row tiles (TILE_M, .)
                   xa_ref, pa_ref, ba_ref,            # fully resident  (N, .)
                   wq_ref, wr_ref, br_ref,            # edge layer 1 (hoisted split)
                   we2_ref, be2_ref, we3_ref, be3_ref,
                   wn1_ref, bn1_ref, wn2_ref, bn2_ref, wn3_ref, bn3_ref,
                   out_ref, *, k):
    tile = pl.program_id(0)
    tm = xq_ref.shape[0]
    n = xa_ref.shape[0]
    big = jnp.float32(_BIG)

    xq = xq_ref[...]                                   # (TM, F)
    pq = pq_ref[...]                                   # (TM, D)
    bq = bq_ref[...]                                   # (TM, 1) int32
    pa = pa_ref[...]                                   # (N, D)
    ba = ba_ref[...]                                   # (N, 1) int32

    # Pairwise squared distances restricted to same-batch, no self loops.
    sq_q = jnp.sum(pq * pq, axis=-1, keepdims=True)                   # (TM, 1)
    sq_a = jnp.sum(pa * pa, axis=-1, keepdims=True)                   # (N, 1)
    dist = (sq_q + jnp.transpose(sq_a)
            - 2.0 * jnp.dot(pq, jnp.transpose(pa),
                            preferred_element_type=jnp.float32))       # (TM, N)

    col_id = jax.lax.broadcasted_iota(jnp.int32, (tm, n), 1)
    row_id = tile * tm + jax.lax.broadcasted_iota(jnp.int32, (tm, n), 0)
    valid = (bq == jnp.transpose(ba)) & (row_id != col_id)
    dist = jnp.where(valid, dist, big)

    # Float index trick for the argmin tie-break (exact for N < 2^24; switch to an
    # int32 min-reduction if N can ever grow beyond that).
    col_f = col_id.astype(jnp.float32)
    n_f = jnp.float32(n)

    # Hoisted edge-MLP layer-1 terms:
    #   h1 = silu( x_i @ (W1[:F]-W1[F:]) + b1  +  onehot @ (x @ W1[F:]) )
    q_all = jnp.dot(xa_ref[...], wq_ref[...],
                    preferred_element_type=jnp.float32)                # (N, H1)
    r_q = jnp.dot(xq, wr_ref[...],
                  preferred_element_type=jnp.float32) + br_ref[...]    # (TM, H1)

    we2 = we2_ref[...]; be2 = be2_ref[...]
    we3 = we3_ref[...]; be3 = be3_ref[...]
    cp = we3.shape[1]                                  # padded (lane-dense) width

    def body(_, carry):
        d, acc = carry
        rowmin = jnp.min(d, axis=1, keepdims=True)                     # (TM, 1)
        is_min = d <= rowmin
        idx = jnp.min(jnp.where(is_min, col_f, n_f), axis=1,
                      keepdims=True)                                   # (TM, 1)
        onehot = col_f == idx                                          # (TM, N) bool
        gath = jnp.dot(onehot.astype(jnp.float32), q_all,
                       preferred_element_type=jnp.float32)             # (TM, H1)
        h1 = _silu(r_q + gath)
        h2 = _silu(jnp.dot(h1, we2, preferred_element_type=jnp.float32) + be2)
        msg = _silu(jnp.dot(h2, we3, preferred_element_type=jnp.float32) + be3)
        has_nbr = rowmin < 0.5 * big                                   # (TM, 1)
        acc = jnp.where(has_nbr, jnp.maximum(acc, msg), acc)
        d = jnp.where(onehot, big, d)        # remove selected neighbour
        return d, acc

    acc0 = jnp.full((tm, cp), -big, dtype=jnp.float32)
    _, acc = jax.lax.fori_loop(0, k, body, (dist, acc0))
    edge_out = jnp.where(acc > -0.5 * big, acc, 0.0)   # isolated nodes -> 0

    # Per-node MLP branch nn(x).
    hn1 = _silu(jnp.dot(xq, wn1_ref[...], preferred_element_type=jnp.float32)
                + bn1_ref[...])
    hn2 = _silu(jnp.dot(hn1, wn2_ref[...], preferred_element_type=jnp.float32)
                + bn2_ref[...])
    x_out = _silu(jnp.dot(hn2, wn3_ref[...], preferred_element_type=jnp.float32)
                  + bn3_ref[...])

    out_ref[...] = edge_out + x_out


# -----------------------------------------------------------------------------
# global_mean_pool + final Linear (tiny readout kernel)
# -----------------------------------------------------------------------------
def _readout_kernel(x_ref, b_ref, w_ref, bias_ref, out_ref):
    x = x_ref[...]                                     # (N, C)
    b = b_ref[...]                                     # (N, 1) int32
    g = out_ref.shape[0]
    n = x.shape[0]
    gid = jax.lax.broadcasted_iota(jnp.int32, (g, n), 0)
    sel = (gid == jnp.transpose(b)).astype(jnp.float32)                # (G, N)
    cnt = jnp.maximum(jnp.sum(sel, axis=1, keepdims=True), 1.0)
    pooled = jnp.dot(sel, x, preferred_element_type=jnp.float32) / cnt
    out_ref[...] = (jnp.dot(pooled, w_ref[...],
                            preferred_element_type=jnp.float32) + bias_ref[...])


# -----------------------------------------------------------------------------
# Wrappers
# -----------------------------------------------------------------------------
def _round_up(v, m):
    return (v + m - 1) // m * m


def _vmem_capacity_bytes():
    try:
        return int(pltpu.get_tpu_info().vmem_capacity_bytes)
    except Exception:
        return 64 << 20            # conservative fallback (v7x-sized VMEM)


def _vmem_limit_bytes(cap):
    # Raise the scoped VMEM limit but keep headroom below physical capacity
    # (v7x: 64 MiB, v5e/v6e: 128 MiB).
    return int(min(100 << 20, max(32 << 20, cap - (16 << 20))))


def _pick_tile_m(n, cap):
    if n <= 8:
        return max(n, 1)
    # ~6 live (tile_m, n)-sized f32/i32 temporaries in the k-loop (dist carry,
    # col ids, masks, one-hot) plus I/O double-buffering headroom.
    budget = max(cap // 3, 8 << 20)
    tm = budget // (6 * 4 * n)
    tm = int(max(8, min(512, tm)))
    tm = (tm // 8) * 8
    return max(8, min(tm, (n // 8) * 8))


def dynamic_edge_conv_pn(x, pos, batch, p, *, k, tile_m=None):
    """One fused DynamicEdgeConvPN layer: knn_graph + EdgeConv(max) + nn(x)."""
    n, f = x.shape
    dp = pos.shape[1]
    cp = p["we3"].shape[1]
    h1 = p["w_q"].shape[1]
    h2 = p["we2"].shape[1]
    hn1 = p["wn1"].shape[1]
    hn2 = p["wn2"].shape[1]

    batch2d = batch.reshape(n, 1).astype(jnp.int32)

    cap = _vmem_capacity_bytes()
    if tile_m is None:
        tm = _pick_tile_m(n, cap)
    else:
        tm = int(tile_m)
        tm = n if n <= 8 else max(8, (min(tm, n) // 8) * 8)
    grid = (pl.cdiv(n, tm),)

    weights = [p["w_q"], p["w_r"], p["b_r"], p["we2"], p["be2"], p["we3"], p["be3"],
               p["wn1"], p["bn1"], p["wn2"], p["bn2"], p["wn3"], p["bn3"]]

    tiled = lambda r, c: pl.BlockSpec((r, c), lambda i: (i, 0))
    resident = lambda shape: pl.BlockSpec(shape, lambda i: (0,) * len(shape))

    in_specs = ([tiled(tm, f), tiled(tm, dp), tiled(tm, 1),
                 resident((n, f)), resident((n, dp)), resident((n, 1))]
                + [resident(w.shape) for w in weights])
    out_spec = pl.BlockSpec((tm, cp), lambda i: (i, 0))

    flops = int(2 * n * n * dp
                + k * 2 * n * n * h1
                + k * 2 * n * (h1 * h2 + h2 * cp)
                + 2 * n * (2 * f * h1 + f * hn1 + hn1 * hn2 + hn2 * cp))
    transc = int(n * (k + 1) * (h1 + h2 + cp))
    bytes_acc = int(4 * (2 * n * (f + dp + 1) + n * cp)
                    + 4 * sum(int(w.size) for w in weights))

    out = pl.pallas_call(
        functools.partial(_dec_pn_kernel, k=k),
        out_shape=jax.ShapeDtypeStruct((n, cp), jnp.float32),
        grid=grid,
        in_specs=in_specs,
        out_specs=out_spec,
        compiler_params=pltpu.CompilerParams(
            dimension_semantics=("parallel",),
            vmem_limit_bytes=_vmem_limit_bytes(cap)),
        cost_estimate=pl.CostEstimate(flops=flops, transcendentals=transc,
                                      bytes_accessed=bytes_acc),
    )(x, pos, batch2d, x, pos, batch2d, *weights)

    return out[:, :p["c_out"]]


def global_mean_pool_linear(x, batch, w, b, *, num_graphs):
    n = x.shape[0]
    batch2d = batch.reshape(n, 1).astype(jnp.int32)
    vmem = pl.BlockSpec(memory_space=pltpu.MemorySpace.VMEM)
    return pl.pallas_call(
        _readout_kernel,
        out_shape=jax.ShapeDtypeStruct((num_graphs, w.shape[1]), jnp.float32),
        in_specs=[vmem] * 4,
        out_specs=vmem,
    )(x, batch2d, w, b.reshape(1, -1))


def dgcnn_forward(x, pos, batch, params, *, k, num_graphs, tile_m=None):
    h1 = dynamic_edge_conv_pn(x, pos, batch, params["conv1"], k=k, tile_m=tile_m)
    h2 = dynamic_edge_conv_pn(h1, h1, batch, params["conv2"], k=k, tile_m=tile_m)
    return global_mean_pool_linear(h2, batch, params["out_w"], params["out_b"],
                                   num_graphs=num_graphs)


# -----------------------------------------------------------------------------
# Parameter construction (MLPStack = [Linear -> BatchNorm1d -> SiLU] * 3)
# -----------------------------------------------------------------------------
def _make_mlpstack(key, dims):
    layers = []
    for i, kk in enumerate(jax.random.split(key, len(dims) - 1)):
        din, dout = dims[i], dims[i + 1]
        k1, k2, k3, k4, k5, k6 = jax.random.split(kk, 6)
        layers.append(dict(
            w=jax.random.normal(k1, (din, dout), jnp.float32) / jnp.sqrt(din),
            b=0.1 * jax.random.normal(k2, (dout,), jnp.float32),
            gamma=1.0 + 0.1 * jax.random.normal(k3, (dout,), jnp.float32),
            beta=0.1 * jax.random.normal(k4, (dout,), jnp.float32),
            mean=0.1 * jax.random.normal(k5, (dout,), jnp.float32),
            var=0.5 + jax.random.uniform(k6, (dout,), jnp.float32),
        ))
    return layers


def _fold_bn(layer):
    # TODO(synk): BatchNorm1d is folded in inference mode (running stats);
    # training-mode batch statistics have no per-layer Pallas equivalent here.
    s = layer["gamma"] / jnp.sqrt(layer["var"] + _BN_EPS)
    return layer["w"] * s[None, :], (layer["b"] - layer["mean"]) * s + layer["beta"]


def _prepare_conv_params(edge_layers, nn_layers):
    (we1, be1), (we2, be2), (we3, be3) = [_fold_bn(l) for l in edge_layers]
    (wn1, bn1), (wn2, bn2), (wn3, bn3) = [_fold_bn(l) for l in nn_layers]
    f = wn1.shape[0]
    assert we1.shape[0] == 2 * f
    c = we3.shape[1]
    cp = _round_up(c, 128)                  # lane-dense (unmasked) output stores
    padw = lambda w: jnp.pad(w, ((0, 0), (0, cp - c)))
    padb = lambda b: jnp.pad(b, ((0, cp - c),))[None, :]
    return dict(
        w_q=we1[f:], w_r=we1[:f] - we1[f:], b_r=be1[None, :],
        we2=we2, be2=be2[None, :], we3=padw(we3), be3=padb(be3),
        wn1=wn1, bn1=bn1[None, :], wn2=wn2, bn2=bn2[None, :],
        wn3=padw(wn3), bn3=padb(bn3),
        c_out=c,
    )


# -----------------------------------------------------------------------------
# Pure-JAX reference (unfolded BN, explicit kNN) for verification
# -----------------------------------------------------------------------------
def _mlpstack_ref(v, layers):
    for l in layers:
        y = v @ l["w"] + l["b"]
        y = (y - l["mean"]) / jnp.sqrt(l["var"] + _BN_EPS) * l["gamma"] + l["beta"]
        v = _silu(y)
    return v


def _conv_ref(x, pos, batch, edge_layers, nn_layers, k):
    n = x.shape[0]
    big = jnp.float32(_BIG)
    sq = jnp.sum(pos * pos, axis=-1)
    d = sq[:, None] + sq[None, :] - 2.0 * (pos @ pos.T)
    valid = (batch[:, None] == batch[None, :]) & (~jnp.eye(n, dtype=bool))
    d = jnp.where(valid, d, big)
    idx = jnp.argsort(d, axis=1)[:, :k]
    ok = jnp.take_along_axis(d, idx, axis=1) < 0.5 * big
    xj = x[idx]
    xi = jnp.broadcast_to(x[:, None, :], xj.shape)
    feat = jnp.concatenate([xi, xj - xi], axis=-1)
    msg = _mlpstack_ref(feat.reshape(n * k, -1), edge_layers).reshape(n, k, -1)
    msg = jnp.where(ok[:, :, None], msg, -big)
    edge_out = jnp.max(msg, axis=1)
    edge_out = jnp.where(edge_out > -0.5 * big, edge_out, 0.0)
    return edge_out + _mlpstack_ref(x, nn_layers)


def _reference_forward(x, pos, batch, raw, out_w, out_b, *, k, num_graphs):
    h1 = _conv_ref(x, pos, batch, raw["conv1_edge"], raw["conv1_nn"], k)
    h2 = _conv_ref(h1, h1, batch, raw["conv2_edge"], raw["conv2_nn"], k)
    sel = jax.nn.one_hot(batch, num_graphs, dtype=jnp.float32)          # (N, G)
    pooled = (sel.T @ h2) / jnp.maximum(sel.sum(axis=0)[:, None], 1.0)
    return pooled @ out_w + out_b[None, :], h1, h2


# -----------------------------------------------------------------------------
if __name__ == "__main__":
    K = 7
    NUM_GRAPHS, NODES_PER_GRAPH = 4, 48
    N = NUM_GRAPHS * NODES_PER_GRAPH              # 192 nodes total
    F, D = 5, 3                                   # conv1: nn in = 5, edge_nn in = 10

    key = jax.random.PRNGKey(0)
    kx, kp, k1, k2, k3, k4, k5, k6 = jax.random.split(key, 8)

    x = jax.random.normal(kx, (N, F), jnp.float32)
    pos = jax.random.normal(kp, (N, D), jnp.float32)
    batch = jnp.repeat(jnp.arange(NUM_GRAPHS, dtype=jnp.int32), NODES_PER_GRAPH)

    raw = {
        "conv1_edge": _make_mlpstack(k1, [2 * F, 32, 32, 32]),
        "conv1_nn":   _make_mlpstack(k2, [F, 32, 32, 32]),
        "conv2_edge": _make_mlpstack(k3, [64, 64, 64, 64]),
        "conv2_nn":   _make_mlpstack(k4, [32, 64, 64, 64]),
    }
    out_w = 0.2 * jax.random.normal(k5, (64, 1), jnp.float32)
    out_b = 0.1 * jax.random.normal(k6, (1,), jnp.float32)

    params = {
        "conv1": _prepare_conv_params(raw["conv1_edge"], raw["conv1_nn"]),
        "conv2": _prepare_conv_params(raw["conv2_edge"], raw["conv2_nn"]),
        "out_w": out_w, "out_b": out_b,
    }

    # Pallas forward. tile_m=64 -> 3-step "parallel" grid (exercises the pipeline).
    out = dgcnn_forward(x, pos, batch, params, k=K, num_graphs=NUM_GRAPHS, tile_m=64)
    out = jax.block_until_ready(out)

    # Layer-wise + end-to-end verification against the pure-JAX reference.
    ref_out, ref_h1, ref_h2 = _reference_forward(
        x, pos, batch, raw, out_w, out_b, k=K, num_graphs=NUM_GRAPHS)
    h1 = dynamic_edge_conv_pn(x, pos, batch, params["conv1"], k=K, tile_m=64)
    h2 = dynamic_edge_conv_pn(h1, h1, batch, params["conv2"], k=K, tile_m=64)

    assert out.shape == (NUM_GRAPHS, 1)
    assert jnp.allclose(h1, ref_h1, rtol=1e-3, atol=1e-3), \
        float(jnp.max(jnp.abs(h1 - ref_h1)))
    assert jnp.allclose(h2, ref_h2, rtol=1e-3, atol=1e-3), \
        float(jnp.max(jnp.abs(h2 - ref_h2)))
    assert jnp.allclose(out, ref_out, rtol=1e-3, atol=1e-3), \
        float(jnp.max(jnp.abs(out - ref_out)))

    print("KERNEL_OK")
</pallas_src>

<mosaic_0001>
module attributes {stable_mosaic.version = 11 : i64} {
  func.func @_dec_pn_kernel(%arg0: i32, %arg1: memref<64x5xf32, #tpu.memory_space<vmem>>, %arg2: memref<64x3xf32, #tpu.memory_space<vmem>>, %arg3: memref<64x1xi32, #tpu.memory_space<vmem>>, %arg4: memref<192x5xf32, #tpu.memory_space<vmem>>, %arg5: memref<192x3xf32, #tpu.memory_space<vmem>>, %arg6: memref<192x1xi32, #tpu.memory_space<vmem>>, %arg7: memref<5x32xf32, #tpu.memory_space<vmem>>, %arg8: memref<5x32xf32, #tpu.memory_space<vmem>>, %arg9: memref<1x32xf32, #tpu.memory_space<vmem>>, %arg10: memref<32x32xf32, #tpu.memory_space<vmem>>, %arg11: memref<1x32xf32, #tpu.memory_space<vmem>>, %arg12: memref<32x128xf32, #tpu.memory_space<vmem>>, %arg13: memref<1x128xf32, #tpu.memory_space<vmem>>, %arg14: memref<5x32xf32, #tpu.memory_space<vmem>>, %arg15: memref<1x32xf32, #tpu.memory_space<vmem>>, %arg16: memref<32x32xf32, #tpu.memory_space<vmem>>, %arg17: memref<1x32xf32, #tpu.memory_space<vmem>>, %arg18: memref<32x128xf32, #tpu.memory_space<vmem>>, %arg19: memref<1x128xf32, #tpu.memory_space<vmem>>, %arg20: memref<64x128xf32, #tpu.memory_space<vmem>>) attributes {dimension_semantics = [#tpu.dimension_semantics<parallel>], iteration_bounds = array<i64: 3>, scalar_prefetch = 0 : i64, scratch_operands = 0 : i64, tpu.core_type = #tpu.core_type<tc>, window_params = [{transform_indices = @transform_0, window_bounds = array<i64: 64, 5>}, {transform_indices = @transform_1, window_bounds = array<i64: 64, 3>}, {transform_indices = @transform_2, window_bounds = array<i64: 64, 1>}, {pipeline_mode = #tpu.pipeline_mode<synchronous>, transform_indices = @transform_3, window_bounds = array<i64: 192, 5>}, {pipeline_mode = #tpu.pipeline_mode<synchronous>, transform_indices = @transform_4, window_bounds = array<i64: 192, 3>}, {pipeline_mode = #tpu.pipeline_mode<synchronous>, transform_indices = @transform_5, window_bounds = array<i64: 192, 1>}, {pipeline_mode = #tpu.pipeline_mode<synchronous>, transform_indices = @transform_6, window_bounds = array<i64: 5, 32>}, {pipeline_mode = #tpu.pipeline_mode<synchronous>, transform_indices = @transform_7, window_bounds = array<i64: 5, 32>}, {pipeline_mode = #tpu.pipeline_mode<synchronous>, transform_indices = @transform_8, window_bounds = array<i64: 1, 32>}, {pipeline_mode = #tpu.pipeline_mode<synchronous>, transform_indices = @transform_9, window_bounds = array<i64: 32, 32>}, {pipeline_mode = #tpu.pipeline_mode<synchronous>, transform_indices = @transform_10, window_bounds = array<i64: 1, 32>}, {pipeline_mode = #tpu.pipeline_mode<synchronous>, transform_indices = @transform_11, window_bounds = array<i64: 32, 128>}, {pipeline_mode = #tpu.pipeline_mode<synchronous>, transform_indices = @transform_12, window_bounds = array<i64: 1, 128>}, {pipeline_mode = #tpu.pipeline_mode<synchronous>, transform_indices = @transform_13, window_bounds = array<i64: 5, 32>}, {pipeline_mode = #tpu.pipeline_mode<synchronous>, transform_indices = @transform_14, window_bounds = array<i64: 1, 32>}, {pipeline_mode = #tpu.pipeline_mode<synchronous>, transform_indices = @transform_15, window_bounds = array<i64: 32, 32>}, {pipeline_mode = #tpu.pipeline_mode<synchronous>, transform_indices = @transform_16, window_bounds = array<i64: 1, 32>}, {pipeline_mode = #tpu.pipeline_mode<synchronous>, transform_indices = @transform_17, window_bounds = array<i64: 32, 128>}, {pipeline_mode = #tpu.pipeline_mode<synchronous>, transform_indices = @transform_18, window_bounds = array<i64: 1, 128>}, {transform_indices = @transform_19, window_bounds = array<i64: 64, 128>}]} {
    %c0 = arith.constant 0 : index
    %c0_0 = arith.constant 0 : index
    %0 = vector.load %arg1[%c0, %c0_0] : memref<64x5xf32, #tpu.memory_space<vmem>>, vector<64x5xf32>
    %c0_1 = arith.constant 0 : index
    %c0_2 = arith.constant 0 : index
    %1 = vector.load %arg2[%c0_1, %c0_2] : memref<64x3xf32, #tpu.memory_space<vmem>>, vector<64x3xf32>
    %c0_3 = arith.constant 0 : index
    %c0_4 = arith.constant 0 : index
    %2 = vector.load %arg3[%c0_3, %c0_4] : memref<64x1xi32, #tpu.memory_space<vmem>>, vector<64x1xi32>
    %c0_5 = arith.constant 0 : index
    %c0_6 = arith.constant 0 : index
    %3 = vector.load %arg5[%c0_5, %c0_6] : memref<192x3xf32, #tpu.memory_space<vmem>>, vector<192x3xf32>
    %c0_7 = arith.constant 0 : index
    %c0_8 = arith.constant 0 : index
    %4 = vector.load %arg6[%c0_7, %c0_8] : memref<192x1xi32, #tpu.memory_space<vmem>>, vector<192x1xi32>
    %5 = arith.mulf %1, %1 : vector<64x3xf32>
    %cst = arith.constant dense<0.000000e+00> : vector<64xf32>
    %6 = vector.multi_reduction <add>, %5, %cst [1] : vector<64x3xf32> to vector<64xf32>
    %7 = vector.shape_cast %6 : vector<64xf32> to vector<64x1xf32>
    %8 = arith.mulf %3, %3 : vector<192x3xf32>
    %cst_9 = arith.constant dense<0.000000e+00> : vector<192xf32>
    %9 = vector.multi_reduction <add>, %8, %cst_9 [1] : vector<192x3xf32> to vector<192xf32>
    %10 = vector.shape_cast %9 : vector<192xf32> to vector<192x1xf32>
    %11 = tpu.transpose %10, [1, 0] : vector<192x1xf32> -> vector<1x192xf32>
    %12 = vector.broadcast %7 : vector<64x1xf32> to vector<64x192xf32>
    %13 = vector.broadcast %11 : vector<1x192xf32> to vector<64x192xf32>
    %14 = arith.addf %12, %13 : vector<64x192xf32>
    %15 = tpu.transpose %3, [1, 0] : vector<192x3xf32> -> vector<3x192xf32>
    %cst_10 = arith.constant dense<0.000000e+00> : vector<64x192xf32>
    %16 = tpu.matmul %1, %15, %cst_10 {dimension_numbers = #tpu.dot_dimension_numbers<[1], [0], [0], [1], [0, 0, 1, 1], [], []>, precision = #tpu.contract_precision<fp32>} : vector<64x3xf32>, vector<3x192xf32>, vector<64x192xf32> -> vector<64x192xf32>
    %cst_11 = arith.constant 2.000000e+00 : f32
    %17 = vector.broadcast %cst_11 : f32 to vector<64x192xf32>
    %18 = arith.mulf %17, %16 : vector<64x192xf32>
    %19 = arith.subf %14, %18 : vector<64x192xf32>
    %20 = tpu.iota {dimensions = array<i32: 1>} : vector<64x192xi32>
    %c64_i32 = arith.constant 64 : i32
    %21 = arith.muli %arg0, %c64_i32 : i32
    %22 = tpu.iota {dimensions = array<i32: 0>} : vector<64x192xi32>
    %23 = vector.broadcast %21 : i32 to vector<64x192xi32>
    %24 = arith.addi %23, %22 : vector<64x192xi32>
    %25 = tpu.transpose %4, [1, 0] : vector<192x1xi32> -> vector<1x192xi32>
    %26 = vector.broadcast %2 : vector<64x1xi32> to vector<64x192xi32>
    %27 = vector.broadcast %25 : vector<1x192xi32> to vector<64x192xi32>
    %28 = arith.cmpi eq, %26, %27 : vector<64x192xi32>
    %29 = arith.cmpi ne, %24, %20 : vector<64x192xi32>
    %30 = arith.andi %28, %29 : vector<64x192xi1>
    %cst_12 = arith.constant 1.000000e+30 : f32
    %31 = vector.broadcast %cst_12 : f32 to vector<64x192xf32>
    %32 = arith.select %30, %19, %31 : vector<64x192xi1>, vector<64x192xf32>
    %33 = arith.sitofp %20 : vector<64x192xi32> to vector<64x192xf32>
    %c0_13 = arith.constant 0 : index
    %c0_14 = arith.constant 0 : index
    %34 = vector.load %arg4[%c0_13, %c0_14] : memref<192x5xf32, #tpu.memory_space<vmem>>, vector<192x5xf32>
    %c0_15 = arith.constant 0 : index
    %c0_16 = arith.constant 0 : index
    %35 = vector.load %arg7[%c0_15, %c0_16] : memref<5x32xf32, #tpu.memory_space<vmem>>, vector<5x32xf32>
    %cst_17 = arith.constant dense<0.000000e+00> : vector<192x32xf32>
    %36 = tpu.matmul %34, %35, %cst_17 {dimension_numbers = #tpu.dot_dimension_numbers<[1], [0], [0], [1], [0, 0, 1, 1], [], []>, precision = #tpu.contract_precision<fp32>} : vector<192x5xf32>, vector<5x32xf32>, vector<192x32xf32> -> vector<192x32xf32>
    %c0_18 = arith.constant 0 : index
    %c0_19 = arith.constant 0 : index
    %37 = vector.load %arg8[%c0_18, %c0_19] : memref<5x32xf32, #tpu.memory_space<vmem>>, vector<5x32xf32>
    %cst_20 = arith.constant dense<0.000000e+00> : vector<64x32xf32>
    %38 = tpu.matmul %0, %37, %cst_20 {dimension_numbers = #tpu.dot_dimension_numbers<[1], [0], [0], [1], [0, 0, 1, 1], [], []>, precision = #tpu.contract_precision<fp32>} : vector<64x5xf32>, vector<5x32xf32>, vector<64x32xf32> -> vector<64x32xf32>
    %c0_21 = arith.constant 0 : index
    %c0_22 = arith.constant 0 : index
    %39 = vector.load %arg9[%c0_21, %c0_22] : memref<1x32xf32, #tpu.memory_space<vmem>>, vector<1x32xf32>
    %40 = vector.broadcast %39 : vector<1x32xf32> to vector<64x32xf32>
    %41 = arith.addf %38, %40 : vector<64x32xf32>
    %c0_23 = arith.constant 0 : index
    %c0_24 = arith.constant 0 : index
    %42 = vector.load %arg10[%c0_23, %c0_24] : memref<32x32xf32, #tpu.memory_space<vmem>>, vector<32x32xf32>
    %c0_25 = arith.constant 0 : index
    %c0_26 = arith.constant 0 : index
    %43 = vector.load %arg11[%c0_25, %c0_26] : memref<1x32xf32, #tpu.memory_space<vmem>>, vector<1x32xf32>
    %c0_27 = arith.constant 0 : index
    %c0_28 = arith.constant 0 : index
    %44 = vector.load %arg12[%c0_27, %c0_28] : memref<32x128xf32, #tpu.memory_space<vmem>>, vector<32x128xf32>
    %c0_29 = arith.constant 0 : index
    %c0_30 = arith.constant 0 : index
    %45 = vector.load %arg13[%c0_29, %c0_30] : memref<1x128xf32, #tpu.memory_space<vmem>>, vector<1x128xf32>
    %cst_31 = arith.constant 0.000000e+00 : f32
    %cst_32 = arith.constant 1.000000e+30 : f32
    %46 = arith.subf %cst_31, %cst_32 : f32
    %47 = vector.broadcast %46 : f32 to vector<64x128xf32>
    %cst_33 = arith.constant 1.920000e+02 : f32
    %cst_34 = arith.constant 1.000000e+30 : f32
    %c0_i32 = arith.constant 0 : i32
    %c7_i32 = arith.constant 7 : i32
    %48 = arith.addi %c0_i32, %c7_i32 : i32
    %c1_i32 = arith.constant 1 : i32
    %49:2 = scf.for %arg21 = %c0_i32 to %48 step %c1_i32 iter_args(%arg22 = %32, %arg23 = %47) -> (vector<64x192xf32>, vector<64x128xf32>)  : i32 {
      %cst_64 = arith.constant dense<0x7F800000> : vector<64xf32>
      %96 = vector.multi_reduction <minimumf>, %arg22, %cst_64 [1] : vector<64x192xf32> to vector<64xf32>
      %97 = vector.shape_cast %96 : vector<64xf32> to vector<64x1xf32>
      %98 = vector.broadcast %97 : vector<64x1xf32> to vector<64x192xf32>
      %99 = arith.cmpf ole, %arg22, %98 : vector<64x192xf32>
      %100 = vector.broadcast %cst_33 : f32 to vector<64x192xf32>
      %101 = arith.select %99, %33, %100 : vector<64x192xi1>, vector<64x192xf32>
      %cst_65 = arith.constant dense<0x7F800000> : vector<64xf32>
      %102 = vector.multi_reduction <minimumf>, %101, %cst_65 [1] : vector<64x192xf32> to vector<64xf32>
      %103 = vector.shape_cast %102 : vector<64xf32> to vector<64x1xf32>
      %104 = vector.broadcast %103 : vector<64x1xf32> to vector<64x192xf32>
      %105 = arith.cmpf oeq, %33, %104 : vector<64x192xf32>
      %106 = arith.extui %105 : vector<64x192xi1> to vector<64x192xi32>
      %107 = arith.sitofp %106 : vector<64x192xi32> to vector<64x192xf32>
      %cst_66 = arith.constant dense<0.000000e+00> : vector<64x32xf32>
      %108 = tpu.matmul %107, %36, %cst_66 {dimension_numbers = #tpu.dot_dimension_numbers<[1], [0], [0], [1], [0, 0, 1, 1], [], []>, precision = #tpu.contract_precision<fp32>} : vector<64x192xf32>, vector<192x32xf32>, vector<64x32xf32> -> vector<64x32xf32>
      %109 = arith.addf %41, %108 : vector<64x32xf32>
      %cst_67 = arith.constant 0.000000e+00 : f32
      %110 = vector.broadcast %cst_67 : f32 to vector<64x32xf32>
      %111 = arith.subf %110, %109 : vector<64x32xf32>
      %112 = math.exp %111 : vector<64x32xf32>
      %cst_68 = arith.constant 1.000000e+00 : f32
      %113 = vector.broadcast %cst_68 : f32 to vector<64x32xf32>
      %114 = arith.addf %113, %112 : vector<64x32xf32>
      %cst_69 = arith.constant 1.000000e+00 : f32
      %115 = vector.broadcast %cst_69 : f32 to vector<64x32xf32>
      %116 = arith.divf %115, %114 : vector<64x32xf32>
      %117 = arith.mulf %109, %116 : vector<64x32xf32>
      %cst_70 = arith.constant dense<0.000000e+00> : vector<64x32xf32>
      %118 = tpu.matmul %117, %42, %cst_70 {dimension_numbers = #tpu.dot_dimension_numbers<[1], [0], [0], [1], [0, 0, 1, 1], [], []>, precision = #tpu.contract_precision<fp32>} : vector<64x32xf32>, vector<32x32xf32>, vector<64x32xf32> -> vector<64x32xf32>
      %119 = vector.broadcast %43 : vector<1x32xf32> to vector<64x32xf32>
      %120 = arith.addf %118, %119 : vector<64x32xf32>
      %cst_71 = arith.constant 0.000000e+00 : f32
      %121 = vector.broadcast %cst_71 : f32 to vector<64x32xf32>
      %122 = arith.subf %121, %120 : vector<64x32xf32>
      %123 = math.exp %122 : vector<64x32xf32>
      %cst_72 = arith.constant 1.000000e+00 : f32
      %124 = vector.broadcast %cst_72 : f32 to vector<64x32xf32>
      %125 = arith.addf %124, %123 : vector<64x32xf32>
      %cst_73 = arith.constant 1.000000e+00 : f32
      %126 = vector.broadcast %cst_73 : f32 to vector<64x32xf32>
      %127 = arith.divf %126, %125 : vector<64x32xf32>
      %128 = arith.mulf %120, %127 : vector<64x32xf32>
      %cst_74 = arith.constant dense<0.000000e+00> : vector<64x128xf32>
      %129 = tpu.matmul %128, %44, %cst_74 {dimension_numbers = #tpu.dot_dimension_numbers<[1], [0], [0], [1], [0, 0, 1, 1], [], []>, precision = #tpu.contract_precision<fp32>} : vector<64x32xf32>, vector<32x128xf32>, vector<64x128xf32> -> vector<64x128xf32>
      %130 = vector.broadcast %45 : vector<1x128xf32> to vector<64x128xf32>
      %131 = arith.addf %129, %130 : vector<64x128xf32>
      %cst_75 = arith.constant 0.000000e+00 : f32
      %132 = vector.broadcast %cst_75 : f32 to vector<64x128xf32>
      %133 = arith.subf %132, %131 : vector<64x128xf32>
      %134 = math.exp %133 : vector<64x128xf32>
      %cst_76 = arith.constant 1.000000e+00 : f32
      %135 = vector.broadcast %cst_76 : f32 to vector<64x128xf32>
      %136 = arith.addf %135, %134 : vector<64x128xf32>
      %cst_77 = arith.constant 1.000000e+00 : f32
      %137 = vector.broadcast %cst_77 : f32 to vector<64x128xf32>
      %138 = arith.divf %137, %136 : vector<64x128xf32>
      %139 = arith.mulf %131, %138 : vector<64x128xf32>
      %cst_78 = arith.constant 5.000000e-01 : f32
      %140 = arith.mulf %cst_78, %cst_34 : f32
      %141 = vector.broadcast %140 : f32 to vector<64x1xf32>
      %142 = arith.cmpf olt, %97, %141 : vector<64x1xf32>
      %143 = arith.maximumf %arg23, %139 : vector<64x128xf32>
      %144 = vector.shape_cast %142 : vector<64x1xi1> to vector<64x1xi1>
      %145 = vector.broadcast %144 : vector<64x1xi1> to vector<64x128xi1>
      %146 = arith.select %145, %143, %arg23 : vector<64x128xi1>, vector<64x128xf32>
      %147 = vector.broadcast %cst_34 : f32 to vector<64x192xf32>
      %148 = arith.select %105, %147, %arg22 : vector<64x192xi1>, vector<64x192xf32>
      scf.yield %148, %146 : vector<64x192xf32>, vector<64x128xf32>
    }
    %cst_35 = arith.constant -5.000000e-01 : f32
    %cst_36 = arith.constant 1.000000e+30 : f32
    %50 = arith.mulf %cst_35, %cst_36 : f32
    %51 = vector.broadcast %50 : f32 to vector<64x128xf32>
    %52 = arith.cmpf ogt, %49#1, %51 : vector<64x128xf32>
    %cst_37 = arith.constant 0.000000e+00 : f32
    %53 = vector.broadcast %cst_37 : f32 to vector<64x128xf32>
    %54 = arith.select %52, %49#1, %53 : vector<64x128xi1>, vector<64x128xf32>
    %c0_38 = arith.constant 0 : index
    %c0_39 = arith.constant 0 : index
    %55 = vector.load %arg14[%c0_38, %c0_39] : memref<5x32xf32, #tpu.memory_space<vmem>>, vector<5x32xf32>
    %cst_40 = arith.constant dense<0.000000e+00> : vector<64x32xf32>
    %56 = tpu.matmul %0, %55, %cst_40 {dimension_numbers = #tpu.dot_dimension_numbers<[1], [0], [0], [1], [0, 0, 1, 1], [], []>, precision = #tpu.contract_precision<fp32>} : vector<64x5xf32>, vector<5x32xf32>, vector<64x32xf32> -> vector<64x32xf32>
    %c0_41 = arith.constant 0 : index
    %c0_42 = arith.constant 0 : index
    %57 = vector.load %arg15[%c0_41, %c0_42] : memref<1x32xf32, #tpu.memory_space<vmem>>, vector<1x32xf32>
    %58 = vector.broadcast %57 : vector<1x32xf32> to vector<64x32xf32>
    %59 = arith.addf %56, %58 : vector<64x32xf32>
    %cst_43 = arith.constant 0.000000e+00 : f32
    %60 = vector.broadcast %cst_43 : f32 to vector<64x32xf32>
    %61 = arith.subf %60, %59 : vector<64x32xf32>
    %62 = math.exp %61 : vector<64x32xf32>
    %cst_44 = arith.constant 1.000000e+00 : f32
    %63 = vector.broadcast %cst_44 : f32 to vector<64x32xf32>
    %64 = arith.addf %63, %62 : vector<64x32xf32>
    %cst_45 = arith.constant 1.000000e+00 : f32
    %65 = vector.broadcast %cst_45 : f32 to vector<64x32xf32>
    %66 = arith.divf %65, %64 : vector<64x32xf32>
    %67 = arith.mulf %59, %66 : vector<64x32xf32>
    %c0_46 = arith.constant 0 : index
    %c0_47 = arith.constant 0 : index
    %68 = vector.load %arg16[%c0_46, %c0_47] : memref<32x32xf32, #tpu.memory_space<vmem>>, vector<32x32xf32>
    %cst_48 = arith.constant dense<0.000000e+00> : vector<64x32xf32>
    %69 = tpu.matmul %67, %68, %cst_48 {dimension_numbers = #tpu.dot_dimension_numbers<[1], [0], [0], [1], [0, 0, 1, 1], [], []>, precision = #tpu.contract_precision<fp32>} : vector<64x32xf32>, vector<32x32xf32>, vector<64x32xf32> -> vector<64x32xf32>
    %c0_49 = arith.constant 0 : index
    %c0_50 = arith.constant 0 : index
    %70 = vector.load %arg17[%c0_49, %c0_50] : memref<1x32xf32, #tpu.memory_space<vmem>>, vector<1x32xf32>
    %71 = vector.broadcast %70 : vector<1x32xf32> to vector<64x32xf32>
    %72 = arith.addf %69, %71 : vector<64x32xf32>
    %cst_51 = arith.constant 0.000000e+00 : f32
    %73 = vector.broadcast %cst_51 : f32 to vector<64x32xf32>
    %74 = arith.subf %73, %72 : vector<64x32xf32>
    %75 = math.exp %74 : vector<64x32xf32>
    %cst_52 = arith.constant 1.000000e+00 : f32
    %76 = vector.broadcast %cst_52 : f32 to vector<64x32xf32>
    %77 = arith.addf %76, %75 : vector<64x32xf32>
    %cst_53 = arith.constant 1.000000e+00 : f32
    %78 = vector.broadcast %cst_53 : f32 to vector<64x32xf32>
    %79 = arith.divf %78, %77 : vector<64x32xf32>
    %80 = arith.mulf %72, %79 : vector<64x32xf32>
    %c0_54 = arith.constant 0 : index
    %c0_55 = arith.constant 0 : index
    %81 = vector.load %arg18[%c0_54, %c0_55] : memref<32x128xf32, #tpu.memory_space<vmem>>, vector<32x128xf32>
    %cst_56 = arith.constant dense<0.000000e+00> : vector<64x128xf32>
    %82 = tpu.matmul %80, %81, %cst_56 {dimension_numbers = #tpu.dot_dimension_numbers<[1], [0], [0], [1], [0, 0, 1, 1], [], []>, precision = #tpu.contract_precision<fp32>} : vector<64x32xf32>, vector<32x128xf32>, vector<64x128xf32> -> vector<64x128xf32>
    %c0_57 = arith.constant 0 : index
    %c0_58 = arith.constant 0 : index
    %83 = vector.load %arg19[%c0_57, %c0_58] : memref<1x128xf32, #tpu.memory_space<vmem>>, vector<1x128xf32>
    %84 = vector.broadcast %83 : vector<1x128xf32> to vector<64x128xf32>
    %85 = arith.addf %82, %84 : vector<64x128xf32>
    %cst_59 = arith.constant 0.000000e+00 : f32
    %86 = vector.broadcast %cst_59 : f32 to vector<64x128xf32>
    %87 = arith.subf %86, %85 : vector<64x128xf32>
    %88 = math.exp %87 : vector<64x128xf32>
    %cst_60 = arith.constant 1.000000e+00 : f32
    %89 = vector.broadcast %cst_60 : f32 to vector<64x128xf32>
    %90 = arith.addf %89, %88 : vector<64x128xf32>
    %cst_61 = arith.constant 1.000000e+00 : f32
    %91 = vector.broadcast %cst_61 : f32 to vector<64x128xf32>
    %92 = arith.divf %91, %90 : vector<64x128xf32>
    %93 = arith.mulf %85, %92 : vector<64x128xf32>
    %94 = arith.addf %54, %93 : vector<64x128xf32>
    %c0_62 = arith.constant 0 : index
    %c0_63 = arith.constant 0 : index
    %95 = vector.load %arg20[%c0_62, %c0_63] : memref<64x128xf32, #tpu.memory_space<vmem>>, vector<64x128xf32>
    tpu.vector_store %arg20[%c0_62, %c0_63], %94 {strides = array<i32>} : memref<64x128xf32, #tpu.memory_space<vmem>>, vector<64x128xf32>,
    return
  }
  func.func @transform_0(%arg0: i32) -> (i32, i32) {
    %c0_i32 = arith.constant 0 : i32
    %c0_i32_0 = arith.constant 0 : i32
    return %arg0, %c0_i32 : i32, i32
  }
  func.func @transform_1(%arg0: i32) -> (i32, i32) {
    %c0_i32 = arith.constant 0 : i32
    %c0_i32_0 = arith.constant 0 : i32
    return %arg0, %c0_i32 : i32, i32
  }
  func.func @transform_2(%arg0: i32) -> (i32, i32) {
    %c0_i32 = arith.constant 0 : i32
    %c0_i32_0 = arith.constant 0 : i32
    return %arg0, %c0_i32 : i32, i32
  }
  func.func @transform_3(%arg0: i32) -> (i32, i32) {
    %c0_i32 = arith.constant 0 : i32
    %c0_i32_0 = arith.constant 0 : i32
    %c0_i32_1 = arith.constant 0 : i32
    return %c0_i32, %c0_i32_0 : i32, i32
  }
  func.func @transform_4(%arg0: i32) -> (i32, i32) {
    %c0_i32 = arith.constant 0 : i32
    %c0_i32_0 = arith.constant 0 : i32
    %c0_i32_1 = arith.constant 0 : i32
    return %c0_i32, %c0_i32_0 : i32, i32
  }
  func.func @transform_5(%arg0: i32) -> (i32, i32) {
    %c0_i32 = arith.constant 0 : i32
    %c0_i32_0 = arith.constant 0 : i32
    %c0_i32_1 = arith.constant 0 : i32
    return %c0_i32, %c0_i32_0 : i32, i32
  }
  func.func @transform_6(%arg0: i32) -> (i32, i32) {
    %c0_i32 = arith.constant 0 : i32
    %c0_i32_0 = arith.constant 0 : i32
    %c0_i32_1 = arith.constant 0 : i32
    return %c0_i32, %c0_i32_0 : i32, i32
  }
  func.func @transform_7(%arg0: i32) -> (i32, i32) {
    %c0_i32 = arith.constant 0 : i32
    %c0_i32_0 = arith.constant 0 : i32
    %c0_i32_1 = arith.constant 0 : i32
    return %c0_i32, %c0_i32_0 : i32, i32
  }
  func.func @transform_8(%arg0: i32) -> (i32, i32) {
    %c0_i32 = arith.constant 0 : i32
    %c0_i32_0 = arith.constant 0 : i32
    %c0_i32_1 = arith.constant 0 : i32
    return %c0_i32, %c0_i32_0 : i32, i32
  }
  func.func @transform_9(%arg0: i32) -> (i32, i32) {
    %c0_i32 = arith.constant 0 : i32
    %c0_i32_0 = arith.constant 0 : i32
    %c0_i32_1 = arith.constant 0 : i32
    return %c0_i32, %c0_i32_0 : i32, i32
  }
  func.func @transform_10(%arg0: i32) -> (i32, i32) {
    %c0_i32 = arith.constant 0 : i32
    %c0_i32_0 = arith.constant 0 : i32
    %c0_i32_1 = arith.constant 0 : i32
    return %c0_i32, %c0_i32_0 : i32, i32
  }
  func.func @transform_11(%arg0: i32) -> (i32, i32) {
    %c0_i32 = arith.constant 0 : i32
    %c0_i32_0 = arith.constant 0 : i32
    %c0_i32_1 = arith.constant 0 : i32
    return %c0_i32, %c0_i32_0 : i32, i32
  }
  func.func @transform_12(%arg0: i32) -> (i32, i32) {
    %c0_i32 = arith.constant 0 : i32
    %c0_i32_0 = arith.constant 0 : i32
    %c0_i32_1 = arith.constant 0 : i32
    return %c0_i32, %c0_i32_0 : i32, i32
  }
  func.func @transform_13(%arg0: i32) -> (i32, i32) {
    %c0_i32 = arith.constant 0 : i32
    %c0_i32_0 = arith.constant 0 : i32
    %c0_i32_1 = arith.constant 0 : i32
    return %c0_i32, %c0_i32_0 : i32, i32
  }
  func.func @transform_14(%arg0: i32) -> (i32, i32) {
    %c0_i32 = arith.constant 0 : i32
    %c0_i32_0 = arith.constant 0 : i32
    %c0_i32_1 = arith.constant 0 : i32
    return %c0_i32, %c0_i32_0 : i32, i32
  }
  func.func @transform_15(%arg0: i32) -> (i32, i32) {
    %c0_i32 = arith.constant 0 : i32
    %c0_i32_0 = arith.constant 0 : i32
    %c0_i32_1 = arith.constant 0 : i32
    return %c0_i32, %c0_i32_0 : i32, i32
  }
  func.func @transform_16(%arg0: i32) -> (i32, i32) {
    %c0_i32 = arith.constant 0 : i32
    %c0_i32_0 = arith.constant 0 : i32
    %c0_i32_1 = arith.constant 0 : i32
    return %c0_i32, %c0_i32_0 : i32, i32
  }
  func.func @transform_17(%arg0: i32) -> (i32, i32) {
    %c0_i32 = arith.constant 0 : i32
    %c0_i32_0 = arith.constant 0 : i32
    %c0_i32_1 = arith.constant 0 : i32
    return %c0_i32, %c0_i32_0 : i32, i32
  }
  func.func @transform_18(%arg0: i32) -> (i32, i32) {
    %c0_i32 = arith.constant 0 : i32
    %c0_i32_0 = arith.constant 0 : i32
    %c0_i32_1 = arith.constant 0 : i32
    return %c0_i32, %c0_i32_0 : i32, i32
  }
  func.func @transform_19(%arg0: i32) -> (i32, i32) {
    %c0_i32 = arith.constant 0 : i32
    %c0_i32_0 = arith.constant 0 : i32
    return %arg0, %c0_i32 : i32, i32
  }
}

</mosaic_0001>

<bundles_post_ra>
// kernel: tpu_custom_call.1
= control target key start
LH: loop header
LB: loop body
LE: loop exit
PB: predicated region body
PF: predicated region fallthrough
CT: control target
= control target key end

     0   :  { %s13306_s0 = inlined_call_operand.vmem [shape: f32[192,5], index: 0, kind: input, shape index: {}]   ;;  %s13307_s1 = inlined_call_operand.vmem [shape: f32[192,3], index: 1, kind: input, shape index: {}]   ;;  %s13308_s2 = inlined_call_operand.vmem [shape: s32[192,1], index: 2, kind: input, shape index: {}]   ;;  %s13309_s3 = inlined_call_operand.vmem [shape: f32[192,5], index: 3, kind: input, shape index: {}]   ;;  %s13310_s4 = inlined_call_operand.vmem [shape: f32[192,3], index: 4, kind: input, shape index: {}]   ;;  %s13311_s5 = inlined_call_operand.vmem [shape: s32[192,1], index: 5, kind: input, shape index: {}]   ;;  %s13312_s6 = inlined_call_operand.vmem [shape: f32[5,32], index: 6, kind: input, shape index: {}]   ;;  %s13313_s7 = inlined_call_operand.vmem [shape: f32[5,32], index: 7, kind: input, shape index: {}]   ;;  %s13314_s8 = inlined_call_operand.vmem [shape: f32[1,32], index: 8, kind: input, shape index: {}]   ;;  %s13315_s9 = inlined_call_operand.vmem [shape: f32[32,32], index: 9, kind: input, shape index: {}]   ;;  %s13316_s10 = inlined_call_operand.vmem [shape: f32[1,32], index: 10, kind: input, shape index: {}]   ;;  %s13317_s11 = inlined_call_operand.vmem [shape: f32[32,128], index: 11, kind: input, shape index: {}]   ;;  %s13318_s12 = inlined_call_operand.vmem [shape: f32[1,128], index: 12, kind: input, shape index: {}]   ;;  %s13319_s13 = inlined_call_operand.vmem [shape: f32[5,32], index: 13, kind: input, shape index: {}]   ;;  %s13320_s14 = inlined_call_operand.vmem [shape: f32[1,32], index: 14, kind: input, shape index: {}]   ;;  %s13321_s15 = inlined_call_operand.vmem [shape: f32[32,32], index: 15, kind: input, shape index: {}]   ;;  %s13322_s16 = inlined_call_operand.vmem [shape: f32[1,32], index: 16, kind: input, shape index: {}]   ;;  %s13323_s17 = inlined_call_operand.vmem [shape: f32[32,128], index: 17, kind: input, shape index: {}]   ;;  %s13324_s18 = inlined_call_operand.vmem [shape: f32[1,128], index: 18, kind: input, shape index: {}]   ;;  %s13325_s19 = inlined_call_operand.hbm [shape: f32[192,128], index: 19, kind: output, shape index: {}]  }
   0x1   :  { %13541 = sst [smem:[#allocation133_spill]] %s13306_s0 }
   0x2   :  { %13542 = sst [smem:[#allocation134_spill]] %s13307_s1 }
   0x3   :  { %13543 = sst [smem:[#allocation135_spill]] %s13308_s2 }
   0x4   :  { %13544 = sst [smem:[#allocation136_spill]] %s13309_s3 }
   0x5   :  { %13545 = sst [smem:[#allocation137_spill]] %s13310_s4 }
   0x6   :  { %13546 = sst [smem:[#allocation138_spill]] %s13311_s5 }
   0x7   :  { %13547 = sst [smem:[#allocation139_spill]] %s13312_s6 }
   0x8   :  { %24 = vsyncpa [#allocation3], 0 }
   0x9   :  { %26 = vsyncpa [#allocation3 + $0x1], 0  ;;  %s9057_s0 = smov 0   ;;  %s9059_s30 = smov 0  }
   0xa   :  { %s9061_s20 = smov 0   ;;  %s9063_s21 = smov 0  }
   0xb LB: > { %13548 = sst [smem:[#allocation5_spill]] %s8846_s20  ;;  %s9078_s1 = sadd.s32 4294967295, %s8850_s21   ;;  %s8850_s21 = sphi %s9063_s21, %s14042_s21   ;;  %s8846_s20 = sphi %s9061_s20, %s14044_s20   ;;  %s8842_s30 = sphi %s9059_s30, %s14046_s30   ;;  %s8838_s0 = sphi %s9057_s0, %s14045_s0  }
   0xc   : > { %s8160_s22 = sadd.s32 4294967294, %s8850_s21   ;;  %s9082_s2 = sadd.s32 1, %s8850_s21  }
   0xd   : > { %13549 = sst [smem:[#allocation6_spill]] %s9082_s2  ;;  %s453_s23 = sadd.s32 1, %s8846_s20 }
   0xe   : > { %s450_s24 = ssub.s32 %s8850_s21, %s9082_s2  ;;  %p463_p0 = scmp.ne.s32.totalorder %s8846_s20, %s8842_s30 }
   0xf   : > { %p451_p1 = scmp.eq.s32.totalorder %s450_s24, 0  ;;  %p464_p2 = scmp.eq.s32.totalorder %s9078_s1, 2 }
  0x10   : > { %p469_p3 = scmp.ne.s32.totalorder %s8842_s30, %s8838_s0  ;;  %p470_p4 = scmp.eq.s32.totalorder %s8160_s22, 2 }
  0x11   : > { %s9093_s25 = scalar_select %p451_p1, %s8846_s20, %s453_s23  }
  0x12   : > { %p9095_p5 = por %p464_p2, %p463_p0  ;;  %p9099_p6 = por %p470_p4, %p469_p3 }
  0x13   : > { %13550 = sst [smem:[#allocation7_spill]] %s9093_s25  ;;  %p8163_p7 = scmp.ge.s32.totalorder %s8850_s21, 1 }
  0x14   : > { %p563_p8 = scmp.lt.s32.totalorder %s8850_s21, 4 }
  0x16   : > { %p564_p9 = pnand %p8163_p7, %p563_p8 }
  0x18   : > { %567 = sbr.rel (%p564_p9) target bundleno = 2719 (0xa9f), region = 96 }
  0x1d   : > { %s13328_s27 = sand.u32 1, %s8842_s30   ;;  %s13553_s4 = sld [smem:[#allocation137_spill]]  ;;  %vm728_vm0 = vcmask 23552   ;;  %vm13515_vm1 = vcmask 1044480   ;;  %vm2274_vm2 = vcmask 39936  }
  0x1e   : > { %s8165_s24 = sshll.u32 %s9078_s1, 3  ;;  %s9119_s25 = sshll.u32 %s13328_s27, 6 }
  0x1f   : > { %p630_p10 = scmp.lt.s32.totalorder %s8165_s24, 23  ;;  %s13554_s27 = sld [smem:[#allocation134_spill]] }
  0x20   : > { %s13606_s5 = sld [smem:[#allocation138_spill]]  ;;  %s11037_s22 = scalar_lea.vmem [#allocation2], %s9119_s25 }
  0x21   : > { %s14048_s24 = smov (!%p630_p10, %s8165_s24), 23  ;;  %s13607_s6 = sld [smem:[#allocation139_spill]] }
  0x22   : > { %s9153_s20 = sshll.u32 %s14048_s24, 3  ;;  %s13612_s28 = sld [smem:[#allocation136_spill]] }
  0x23   : > { %v9109_v0 = vld [vmem:[%s13553_s4 + $0x78] sm:$0xff]  ;;  %v9114_v1 = vld [vmem:[%s13553_s4 + $0x70] sm:$0xff]  ;;  %v9128_v4 = vld [vmem:[%s13553_s4 + $0x68] sm:$0xff]  ;;  %s13630_s24 = sld [smem:[#allocation135_spill]]  ;;  %s11103_s25 = smov 0  }
  0x24   : > { %v1001_v2 = vsel %vm728_vm0, %v9109_v0, 0  ;;  %v998_v3 = vsel %vm728_vm0, %v9114_v1, 0  ;;  %v9133_v5 = vld [vmem:[%s13553_s4 + $0x60] sm:$0xff]  ;;  %v995_v8 = vsel %vm728_vm0, %v9128_v4, 0  ;;  %v9158_v13 = vld [vmem:[%s13553_s4 + $0x58] sm:$0xff]  ;;  %v9173_v16 = vld [vmem:[%s13553_s4 + $0x50] sm:$0xff] }
  0x25   : > { %v9135_v6 = vand.u32 4294901760, %v1001_v2  ;;  %v9137_v7 = vand.u32 4294901760, %v998_v3  ;;  %v9141_v9 = vand.u32 4294901760, %v995_v8  ;;  %v992_v10 = vsel %vm728_vm0, %v9133_v5, 0  ;;  %s9165_s2 = scalar_lea.vmem %s13554_s27, %s9153_s20  ;;  %v9249_v49 = vld [vmem:[%s13553_s4 + $0x48] sm:$0xff]  ;;  %v9259_v52 = vld [vmem:[%s13553_s4] sm:$0xff] }
  0x26   : > { %v9168_v15 = vand.u32 4294901760, %v992_v10  ;;  %v9176_v17 = vld [vmem:[%s9165_s2 + $0x20] sm:$0xff]  ;;  %v9179_v18 = vld [vmem:[%s9165_s2 + $0x10] sm:$0xff]  ;;  %v989_v24 = vsel %vm728_vm0, %v9158_v13, 0  ;;  %v9199_v26 = vld [vmem:[%s9165_s2 + $0x28] sm:$0xff]  ;;  %v986_v27 = vsel %vm728_vm0, %v9173_v16, 0  ;;  %v753_v60 = vmul.f32 %v9259_v52, %v9259_v52 }
  0x27   : > { %1028 = vmatpush.xpose.msra.mxu0 %v9135_v6  ;;  %v9147_v11 = vsub.f32 %v1001_v2, %v9135_v6  ;;  %1343 = vmatpush.xpose.msra.mxu3 %v9135_v6  ;;  %v9151_v12 = vsub.f32 %v998_v3, %v9137_v7  ;;  %v9182_v19 = vld [vmem:[%s9165_s2] sm:$0xff]  ;;  %v9185_v20 = vsub.f32 %v995_v8, %v9141_v9  ;;  %v9213_v32 = vld [vmem:[%s9165_s2 + $0x18] sm:$0xff]  ;;  %v9220_v35 = vld [vmem:[%s9165_s2 + $0x8] sm:$0xff]  ;;  %v9222_v36 = vand.u32 4294901760, %v989_v24 }
  0x28   : > { %v724_v22 = vmul.f32 %v9176_v17, %v9176_v17  ;;  %v722_v23 = vmul.f32 %v9179_v18, %v9179_v18  ;;  %v720_v25 = vmul.f32 %v9182_v19, %v9182_v19  ;;  %v9210_v31 = vsub.f32 %v992_v10, %v9168_v15  ;;  %v9262_v53 = vld [vmem:[%s9165_s2 + $0x38] sm:$0xff]  ;;  %v9267_v54 = vld [vmem:[%s13553_s4 + $0x40] sm:$0xff]  ;;  %v9274_v57 = vld [vmem:[%s9165_s2 + $0x30] sm:$0xff]  ;;  %s13645_s2 = sld [smem:[#allocation133_spill]] }
  0x29   : > { %1255 = vmatpush.xpose.msra.mxu2 %v9147_v11  ;;  %v13343_v14 = vand.u32 4294901760, %v9147_v11  ;;  %v13342_v21 = vand.u32 4294901760, %v9151_v12  ;;  %v13339_v37 = vand.u32 4294901760, %v9185_v20  ;;  %v725_v39 = vmul.f32 %v9199_v26, %v9199_v26  ;;  %v9297_v10 = vld [vmem:[%s13553_s4 + $0x38] sm:$0xff]  ;;  %s10262_s23 = scalar_lea.vmem %s13630_s24, %s9153_s20 }
  0x2a   : > { %v741_v28 = vsel %vm728_vm0, %v724_v22, 0.0  ;;  %v735_v29 = vsel %vm728_vm0, %v722_v23, 0.0  ;;  %v729_v33 = vsel %vm728_vm0, %v720_v25, 0.0  ;;  %v723_v40 = vmul.f32 %v9213_v32, %v9213_v32 }
  0x2b   : > { %1030 = vmatpush.xpose.msra.mxu0 %v9137_v7  ;;  %1345 = vmatpush.xpose.msra.mxu3 %v9137_v7  ;;  %v1127_v30 = vsub.f32 %v9147_v11, %v13343_v14  ;;  %v1133_v34 = vsub.f32 %v9151_v12, %v13342_v21  ;;  %v9231_v41 = vand.u32 4294901760, %v986_v27  ;;  %v721_v43 = vmul.f32 %v9220_v35, %v9220_v35 }
  0x2c   : > { %742 = vadd.xlane.f32.xlu2 %v741_v28  ;;  %736 = vadd.xlane.f32.xlu1 %v735_v29  ;;  %v13338_v44 = vand.u32 4294901760, %v9210_v31  ;;  %v1139_v45 = vsub.f32 %v9185_v20, %v13339_v37  ;;  %v9241_v46 = vsub.f32 %v989_v24, %v9222_v36  ;;  %v744_v47 = vsel %vm728_vm0, %v725_v39, 0.0  ;;  %v678_v29 = vld [vmem:[%s13553_s4 + $0x30] sm:$0xff] }
  0x2d   : > { %1258 = vmatpush.xpose.msra.mxu2 %v9151_v12  ;;  %730 = vadd.xlane.f32.xlu0 %v729_v33  ;;  %v1128_v38 = vand.u32 4294901760, %v1127_v30  ;;  %v1134_v42 = vand.u32 4294901760, %v1133_v34  ;;  %v738_v48 = vsel %vm728_vm0, %v723_v40, 0.0  ;;  %v732_v50 = vsel %vm728_vm0, %v721_v43, 0.0  ;;  %v9329_v40 = vld [vmem:[%s13553_s4 + $0x8] sm:$0xff] }
  0x2e   : > { %v9254_v51 = vsub.f32 %v986_v27, %v9231_v41  ;;  %v1140_v55 = vand.u32 4294901760, %v1139_v45  ;;  %v1145_v56 = vsub.f32 %v9210_v31, %v13338_v44  ;;  %v983_v58 = vsel %vm728_vm0, %v9249_v49, 0  ;;  %v677_v45 = vld [vmem:[%s13553_s4 + $0x28] sm:$0xff]  ;;  %s10371_s27 = scalar_lea.vmem %s13645_s2, %s9153_s20  ;;  %s13437_s20 = sshll.u32 %s9078_s1, 6 }
  0x2f   : > { %1032 = vmatpush.xpose.msra.mxu0 %v9141_v9  ;;  %1347 = vmatpush.xpose.msra.mxu3 %v9141_v9  ;;  %v13337_v59 = vand.u32 4294901760, %v9241_v46  ;;  %v727_v61 = vmul.f32 %v9262_v53, %v9262_v53  ;;  %v9284_v62 = vand.u32 4294901760, %v983_v58  ;;  %v980_v63 = vsel %vm728_vm0, %v9267_v54, 0 }
  0x30   : > { %1129 = vmatpush.xpose.msra.mxu1 %v1128_v38  ;;  %v726_v2 = vmul.f32 %v9274_v57, %v9274_v57  ;;  %v9291_v3 = vand.u32 4294901760, %v980_v63  ;;  %v13333_v8 = vand.u32 4294901760, %v9254_v51  ;;  %v1146_v22 = vand.u32 4294901760, %v1145_v56  ;;  %v674_v38 = vld [vmem:[%s13553_s4 + $0x10] sm:$0xff] }
  0x31   : > { %1261 = vmatpush.xpose.msra.mxu2 %v9185_v20  ;;  %v1151_v23 = vsub.f32 %v9241_v46, %v13337_v59  ;;  %v9304_v24 = vsub.f32 %v983_v58, %v9284_v62  ;;  %v777_v25 = vsel %vm728_vm0, %v753_v60, 0.0  ;;  %v750_v27 = vsel %vm728_vm0, %v727_v61, 0.0 }
  0x32   : > { %v977_v28 = vsel %vm728_vm0, %v9297_v10, 0  ;;  %v747_v30 = vsel %vm728_vm0, %v726_v2, 0.0  ;;  %v1157_v33 = vsub.f32 %v9254_v51, %v13333_v8  ;;  %v9320_v34 = vsub.f32 %v980_v63, %v9291_v3 }
  0x33   : > { %1034 = vmatpush.xpose.msra.mxu0 %v9168_v15  ;;  %1349 = vmatpush.xpose.msra.mxu3 %v9168_v15  ;;  %v1152_v39 = vand.u32 4294901760, %v1151_v23  ;;  %v13332_v43 = vand.u32 4294901760, %v9304_v24  ;;  %v754_v56 = vmul.f32 %v9329_v40, %v9329_v40  ;;  %v971_v60 = vsel %vm728_vm0, %v677_v45, 0 }
  0x34   : > { %1135 = vmatpush.xpose.msra.mxu1 %v1134_v42  ;;  %745 = vadd.xlane.f32.xlu2 %v744_v47  ;;  %v9331_v42 = vand.u32 4294901760, %v977_v28  ;;  %v974_v47 = vsel %vm728_vm0, %v678_v29, 0  ;;  %v13331_v58 = vand.u32 4294901760, %v9320_v34 }
  0x35   : > { %1264 = vmatpush.xpose.msra.mxu2 %v9210_v31  ;;  %739 = vadd.xlane.f32.xlu1 %v738_v48  ;;  %v675_v48 = vld [vmem:[%s13553_s4 + $0x18] sm:$0xff]  ;;  %v1163_v61 = vsub.f32 %v9304_v24, %v13332_v43  ;;  %v9354_v2 = vand.u32 4294901760, %v974_v47  ;;  %v759_v43 = vmul.f32 %v678_v29, %v678_v29 }
  0x36   : > { %733 = vadd.xlane.f32.xlu0 %v732_v50  ;;  %v755_v50 = vmul.f32 %v674_v38, %v674_v38  ;;  %v9352_v63 = vsub.f32 %v977_v28, %v9331_v42  ;;  %v676_v28 = vld [vmem:[%s13553_s4 + $0x20] sm:$0xff]  ;;  %v965_v29 = vsel %vm728_vm0, %v675_v48, 0 }
  0x37   : > { %1036 = vmatpush.xpose.msra.mxu0 %v9222_v36  ;;  %1351 = vmatpush.xpose.msra.mxu3 %v9222_v36 }
  0x38   : > { %1141 = vmatpush.xpose.msra.mxu1 %v1140_v55  ;;  %v1158_v55 = vand.u32 4294901760, %v1157_v33  ;;  %v783_v23 = vsel %vm728_vm0, %v755_v50, 0.0  ;;  %v9364_v33 = vand.u32 4294901760, %v971_v60  ;;  %v9371_v50 = vsub.f32 %v974_v47, %v9354_v2 }
  0x39   : > { %1267 = vmatpush.xpose.msra.mxu2 %v9241_v46 }
  0x3a   : > { %13555 = vst [vmem:[#allocation8_spill] sm:$0xff] %v9364_v33 }
  0x3b   : > { %1038 = vmatpush.xpose.msra.mxu0 %v9231_v41  ;;  %1353 = vmatpush.xpose.msra.mxu3 %v9231_v41 }
  0x3c   : > { %1147 = vmatpush.xpose.msra.mxu1 %v1146_v22  ;;  %778 = vadd.xlane.f32.xlu2 %v777_v25  ;;  %v756_v22 = vmul.f32 %v675_v48, %v675_v48 }
  0x3d   : > { %1270 = vmatpush.xpose.msra.mxu2 %v9254_v51  ;;  %751 = vadd.xlane.f32.xlu1 %v750_v27  ;;  %v780_v27 = vsel %vm728_vm0, %v754_v56, 0.0  ;;  %v13336_v56 = vand.u32 4294901760, %v9352_v63 }
  0x3e   : > { %748 = vadd.xlane.f32.xlu0 %v747_v30  ;;  %v786_v25 = vsel %vm728_vm0, %v756_v22, 0.0  ;;  %v1169_v30 = vsub.f32 %v9320_v34, %v13331_v58  ;;  %v968_v22 = vsel %vm728_vm0, %v676_v28, 0  ;;  %v758_v58 = vmul.f32 %v677_v45, %v677_v45 }
  0x3f   : > { %1040 = vmatpush.xpose.msra.mxu0 %v9284_v62  ;;  %1355 = vmatpush.xpose.msra.mxu3 %v9284_v62  ;;  %v9377_v8 = vand.u32 4294901760, %v968_v22 }
  0x40   : > { %1153 = vmatpush.xpose.msra.mxu1 %v1152_v39  ;;  %v1164_v39 = vand.u32 4294901760, %v1163_v61  ;;  %v1170_v47 = vand.u32 4294901760, %v1169_v30  ;;  %v1175_v61 = vsub.f32 %v9352_v63, %v13336_v56  ;;  %v792_v45 = vsel %vm728_vm0, %v758_v58, 0.0 }
  0x41   : > { %1273 = vmatpush.xpose.msra.mxu2 %v9304_v24  ;;  %13556 = vst [vmem:[#allocation9_spill] sm:$0xff] %v9377_v8  ;;  %v9401_v58 = vand.u32 4294901760, %v965_v29 }
  0x43   : > { %1042 = vmatpush.xpose.msra.mxu0 %v9291_v3  ;;  %1357 = vmatpush.xpose.msra.mxu3 %v9291_v3  ;;  %13557 = vst [vmem:[#allocation10_spill] sm:$0xff] %v9401_v58 }
  0x44   : > { %1159 = vmatpush.xpose.msra.mxu1 %v1158_v55  ;;  %787 = vadd.xlane.f32.xlu2 %v786_v25  ;;  %v757_v55 = vmul.f32 %v676_v28, %v676_v28  ;;  %v13334_v25 = vand.u32 4294901760, %v9371_v50  ;;  %v962_v28 = vsel %vm728_vm0, %v674_v38, 0  ;;  %v932_v38 = vsel %vm728_vm0, %v9182_v19, 0 }
  0x45   : > { %1276 = vmatpush.xpose.msra.mxu2 %v9320_v34  ;;  %784 = vadd.xlane.f32.xlu1 %v783_v23  ;;  %v9384_v23 = vsub.f32 %v971_v60, %v9364_v33  ;;  %v1176_v60 = vand.u32 4294901760, %v1175_v61  ;;  %v959_v61 = vsel %vm728_vm0, %v9329_v40, 0  ;;  %v9429_v40 = vsub.f32 %v965_v29, %v9401_v58 }
  0x46   : > { %781 = vadd.xlane.f32.xlu0 %v780_v27  ;;  %v795_v27 = vsel %vm728_vm0, %v759_v43, 0.0  ;;  %v789_v30 = vsel %vm728_vm0, %v757_v55, 0.0  ;;  %v1181_v48 = vsub.f32 %v9371_v50, %v13334_v25  ;;  %v762_v55 = vmul.f32 %v9249_v49, %v9249_v49  ;;  %v9438_v25 = vld [vmem:[%s13553_s4 + $0xb0] sm:$0xff] }
  0x47   : > { %1044 = vmatpush.xpose.msra.mxu0 %v9331_v42  ;;  %1359 = vmatpush.xpose.msra.mxu3 %v9331_v42  ;;  %v13335_v43 = vand.u32 4294901760, %v9384_v23  ;;  %13559 = vst [vmem:[#allocation12_spill] sm:$0xff] %v9429_v40  ;;  %v1022_v37 = vsel %vm728_vm0, %v9438_v25, 0 }
  0x48   : > { %1165 = vmatpush.xpose.msra.mxu1 %v1164_v39  ;;  %v9395_v39 = vsub.f32 %v968_v22, %v9377_v8  ;;  %v761_v22 = vmul.f32 %v9267_v54, %v9267_v54  ;;  %v1182_v49 = vand.u32 4294901760, %v1181_v48  ;;  %v804_v29 = vsel %vm728_vm0, %v762_v55, 0.0 }
  0x49   : > { %1279 = vmatpush.xpose.msra.mxu2 %v9352_v63  ;;  %v1187_v54 = vsub.f32 %v9384_v23, %v13335_v43  ;;  %v9445_v43 = vand.u32 4294901760, %v959_v61  ;;  %v13341_v55 = vand.u32 4294901760, %v9429_v40 }
  0x4a   : > { %v13340_v19 = vand.u32 4294901760, %v9395_v39  ;;  %v801_v48 = vsel %vm728_vm0, %v761_v22, 0.0 }
  0x4b   : > { %1046 = vmatpush.xpose.msra.mxu0 %v9354_v2  ;;  %1361 = vmatpush.xpose.msra.mxu3 %v9354_v2  ;;  %13560 = vst [vmem:[#allocation13_spill] sm:$0xff] %v9445_v43 }
  0x4c   : > { %1171 = vmatpush.xpose.msra.mxu1 %v1170_v47  ;;  %796 = vadd.xlane.f32.xlu2 %v795_v27  ;;  %v9411_v47 = vand.u32 4294901760, %v962_v28  ;;  %v9422_v27 = vld [vmem:[%s13553_s4 + $0xb8] sm:$0xff]  ;;  %v1193_v22 = vsub.f32 %v9395_v39, %v13340_v19 }
  0x4d   : > { %1282 = vmatpush.xpose.msra.mxu2 %v9371_v50  ;;  %793 = vadd.xlane.f32.xlu1 %v792_v45  ;;  %v760_v45 = vmul.f32 %v9297_v10, %v9297_v10  ;;  %v1025_v10 = vsel %vm728_vm0, %v9422_v27, 0 }
  0x4e   : > { %790 = vadd.xlane.f32.xlu0 %v789_v30  ;;  %13558 = vst [vmem:[#allocation11_spill] sm:$0xff] %v9411_v47  ;;  %v9433_v30 = vand.u32 4294901760, %v932_v38  ;;  %v9450_v59 = vsub.f32 %v962_v28, %v9411_v47  ;;  %v9452_v44 = vand.u32 4294901760, %v1025_v10  ;;  %v935_v28 = vsel %vm728_vm0, %v9220_v35, 0 }
  0x4f   : > { %1048 = vmatpush.xpose.msra.mxu0 %v9364_v33  ;;  %1363 = vmatpush.xpose.msra.mxu3 %v9364_v33  ;;  %v798_v56 = vsel %vm728_vm0, %v760_v45, 0.0  ;;  %v9479_v35 = vand.u32 4294901760, %v1022_v37 }
  0x50   : > { %1177 = vmatpush.xpose.msra.mxu1 %v1176_v60  ;;  %v956_v60 = vsel %vm728_vm0, %v9259_v52, 0  ;;  %13561 = vst [vmem:[#allocation14_spill] sm:$0xff] %v9450_v59  ;;  %v1188_v52 = vand.u32 4294901760, %v1187_v54  ;;  %v9462_v45 = vsub.f32 %v932_v38, %v9433_v30  ;;  %v765_v54 = vmul.f32 %v9133_v5, %v9133_v5 }
  0x51   : > { %1285 = vmatpush.xpose.msra.mxu2 %v9384_v23  ;;  %v9471_v19 = vand.u32 4294901760, %v956_v60  ;;  %v763_v38 = vmul.f32 %v9173_v16, %v9173_v16  ;;  %v1199_v5 = vsub.f32 %v9429_v40, %v13341_v55  ;;  %v9492_v16 = vld [vmem:[%s13553_s4 + $0xa8] sm:$0xff] }
  0x52   : > { %13562 = vst [vmem:[#allocation15_spill] sm:$0xff] %v9462_v45  ;;  %v813_v55 = vsel %vm728_vm0, %v765_v54, 0.0 }
  0x53   : > { %1050 = vmatpush.xpose.msra.mxu0 %v9377_v8  ;;  %1365 = vmatpush.xpose.msra.mxu3 %v9377_v8  ;;  %13563 = vst [vmem:[#allocation16_spill] sm:$0xff] %v9471_v19  ;;  %v807_v21 = vsel %vm728_vm0, %v763_v38, 0.0  ;;  %v9515_v8 = vsub.f32 %v956_v60, %v9471_v19  ;;  %v938_v38 = vsel %vm728_vm0, %v9179_v18, 0  ;;  %v767_v60 = vmul.f32 %v9114_v1, %v9114_v1 }
  0x54   : > { %1183 = vmatpush.xpose.msra.mxu1 %v1182_v49  ;;  %805 = vadd.xlane.f32.xlu2 %v804_v29  ;;  %v764_v49 = vmul.f32 %v9158_v13, %v9158_v13  ;;  %v9486_v13 = vsub.f32 %v959_v61, %v9445_v43  ;;  %v1019_v61 = vsel %vm728_vm0, %v9492_v16, 0  ;;  %v9508_v29 = vsub.f32 %v1022_v37, %v9479_v35 }
  0x55   : > { %1288 = vmatpush.xpose.msra.mxu2 %v9395_v39  ;;  %802 = vadd.xlane.f32.xlu1 %v801_v48  ;;  %v9477_v48 = vsub.f32 %v1025_v10, %v9452_v44  ;;  %v9494_v10 = vand.u32 4294901760, %v935_v28  ;;  %13567 = vst [vmem:[#allocation19_spill] sm:$0xff] %v9515_v8  ;;  %v766_v18 = vmul.f32 %v9128_v4, %v9128_v4 }
  0x56   : > { %799 = vadd.xlane.f32.xlu0 %v798_v56  ;;  %v1194_v56 = vand.u32 4294901760, %v1193_v22  ;;  %13564 = vst [vmem:[#allocation17_spill] sm:$0xff] %v9486_v13  ;;  %v810_v22 = vsel %vm728_vm0, %v764_v49, 0.0  ;;  %v13566_v49 = vand.u32 4294901760, %v9450_v59 }
  0x57   : > { %1052 = vmatpush.xpose.msra.mxu0 %v9401_v58  ;;  %1367 = vmatpush.xpose.msra.mxu3 %v9401_v58  ;;  %v1200_v58 = vand.u32 4294901760, %v1199_v5  ;;  %v9521_v14 = vsub.f32 %v935_v28, %v9494_v10  ;;  %v13568_v28 = vand.u32 4294901760, %v9477_v48 }
  0x58   : > { %1189 = vmatpush.xpose.msra.mxu1 %v1188_v52  ;;  %v9497_v52 = vand.u32 4294901760, %v9462_v45  ;;  %v1205_v54 = vsub.f32 %v9450_v59, %v13566_v49  ;;  %v816_v49 = vsel %vm728_vm0, %v766_v18, 0.0  ;;  %v13573_v18 = vand.u32 4294901760, %v9515_v8 }
  0x59   : > { %1291 = vmatpush.xpose.msra.mxu2 %v9429_v40  ;;  %v1685_v5 = vsub.f32 %v9477_v48, %v13568_v28  ;;  %v9547_v4 = vand.u32 4294901760, %v9521_v14  ;;  %v692_v28 = vld [vmem:[%s13553_s4 + $0xa0] sm:$0xff] }
  0x5a   : > { %13565 = vst [vmem:[#allocation18_spill] sm:$0xff] %v9497_v52  ;;  %v1062_v37 = vsub.f32 %v9462_v45, %v9497_v52 }
  0x5b   : > { %1054 = vmatpush.xpose.msra.mxu0 %v9411_v47  ;;  %1369 = vmatpush.xpose.msra.mxu3 %v9411_v47  ;;  %v13348_v47 = vand.u32 4294901760, %v9486_v13  ;;  %13570 = vst [vmem:[#allocation21_spill] sm:$0xff] %v9547_v4 }
  0x5c   : > { %1195 = vmatpush.xpose.msra.mxu1 %v1194_v56  ;;  %814 = vadd.xlane.f32.xlu2 %v813_v55  ;;  %v9525_v56 = vand.u32 4294901760, %v1019_v61  ;;  %v9537_v55 = vand.u32 4294901760, %v938_v38 }
  0x5d   : > { %1294 = vmatpush.xpose.msra.mxu2 %v9450_v59  ;;  %811 = vadd.xlane.f32.xlu1 %v810_v22  ;;  %v1211_v1 = vsub.f32 %v9486_v13, %v13348_v47  ;;  %v768_v47 = vmul.f32 %v9109_v0, %v9109_v0  ;;  %v13571_v22 = vand.u32 4294901760, %v9147_v11  ;;  %v13572_v59 = vand.u32 4294901760, %v9508_v29 }
  0x5e   : > { %808 = vadd.xlane.f32.xlu0 %v807_v21  ;;  %v1206_v21 = vand.u32 4294901760, %v1205_v54  ;;  %v819_v54 = vsel %vm728_vm0, %v767_v60, 0.0  ;;  %v9571_v0 = vsub.f32 %v938_v38, %v9537_v55  ;;  %v1217_v11 = vsub.f32 %v9515_v8, %v13573_v18 }
  0x5f   : > { %1056 = vmatpush.xpose.msra.mxu0 %v9445_v43  ;;  %1371 = vmatpush.xpose.msra.mxu3 %v9445_v43  ;;  %v9544_v43 = vand.u32 4294901760, %v1062_v37  ;;  %v1016_v37 = vsel %vm728_vm0, %v692_v28, 0  ;;  %v1691_v60 = vsub.f32 %v9508_v29, %v13572_v59  ;;  %v1070_v59 = vsub.f32 %v9521_v14, %v9547_v4 }
  0x60   : > { %1201 = vmatpush.xpose.msra.mxu1 %v1200_v58  ;;  %v9553_v58 = vsub.f32 %v1019_v61, %v9525_v56  ;;  %v689_v61 = vld [vmem:[%s13553_s4 + $0x88] sm:$0xff]  ;;  %v9587_v38 = vand.u32 4294901760, %v1016_v37  ;;  %v822_v18 = vsel %vm728_vm0, %v768_v47, 0.0  ;;  %v690_v47 = vld [vmem:[%s13553_s4 + $0x90] sm:$0xff] }
  0x61   : > { %1297 = vmatpush.xpose.msra.mxu2 %v9486_v13  ;;  %13569 = vst [vmem:[#allocation20_spill] sm:$0xff] %v9544_v43  ;;  %v1686_v13 = vand.u32 4294901760, %v1685_v5  ;;  %v9580_v5 = vld [vmem:[%s13553_s4 + $0x80] sm:$0xff] }
  0x63   : > { %1058 = vmatpush.xpose.msra.mxu0 %v9471_v19  ;;  %1373 = vmatpush.xpose.msra.mxu3 %v9471_v19  ;;  %v1212_v19 = vand.u32 4294901760, %v1211_v1  ;;  %v770_v1 = vmul.f32 %v689_v61, %v689_v61 }
  0x64   : > { %1207 = vmatpush.xpose.msra.mxu1 %v1206_v21  ;;  %823 = vadd.xlane.f32.xlu2 %v822_v18 }
  0x65   : > { %1300 = vmatpush.xpose.msra.mxu2 %v9515_v8  ;;  %820 = vadd.xlane.f32.xlu1 %v819_v54  ;;  %v769_v54 = vmul.f32 %v9580_v5, %v9580_v5  ;;  %v828_v33 = vsel %vm728_vm0, %v770_v1, 0.0 }
  0x66   : > { %1064 = vmatmul.f32.vlgmr.msra.gmra.mxu0 %v9544_v43  ;;  %817 = vadd.xlane.f32.xlu0 %v816_v49  ;;  %v1692_v43 = vand.u32 4294901760, %v1691_v60  ;;  %v1218_v49 = vand.u32 4294901760, %v1217_v11  ;;  %v9610_v60 = vsub.f32 %v1016_v37, %v9587_v38  ;;  %v944_v37 = vsel %vm728_vm0, %v9176_v17, 0 }
  0x67   : > { %1426 = vmatpush.xpose.msrb.mxu0 %v13571_v22  ;;  %v941_v22 = vsel %vm728_vm0, %v9213_v32, 0  ;;  %1377 = vmatmul.f32.vlgmr.msra.gmra.mxu3 %v9497_v52  ;;  %v691_v32 = vld [vmem:[%s13553_s4 + $0x98] sm:$0xff]  ;;  %v13574_v52 = vand.u32 4294901760, %v9151_v12  ;;  %v825_v12 = vsel %vm728_vm0, %v769_v54, 0.0  ;;  %v13576_v17 = vand.u32 4294901760, %v9185_v20 }
  0x68   : > { %1303 = vmatmul.f32.vlgmr.msra.gmra.mxu2 %v9462_v45  ;;  %1687 = vmatpush.xpose.msrb.mxu3 %v1686_v13  ;;  %v1013_v8 = vsel %vm728_vm0, %v691_v32, 0  ;;  %v9599_v21 = vand.u32 4294901760, %v941_v22  ;;  %v9607_v13 = vand.u32 4294901760, %v1070_v59  ;;  %v9613_v45 = vand.u32 4294901760, %v9571_v0 }
  0x69   : > { %1213 = vmatpush.xpose.msra.mxu1 %v1212_v19  ;;  %1594 = vmatpush.xpose.msrb.mxu2 %v9452_v44  ;;  %v13575_v19 = vand.u32 4294901760, %v9553_v58  ;;  %v9619_v40 = vand.u32 4294901760, %v1013_v8  ;;  %v1010_v59 = vsel %vm728_vm0, %v690_v47, 0 }
  0x6a   : > { %v9627_v18 = vsub.f32 %v941_v22, %v9599_v21  ;;  %v1078_v1 = vsub.f32 %v9571_v0, %v9613_v45 }
  0x6b   : > { %1430 = vmatpush.xpose.msrb.mxu0 %v13574_v52  ;;  %v1697_v11 = vsub.f32 %v9553_v58, %v13575_v19  ;;  %v771_v52 = vmul.f32 %v690_v47, %v690_v47  ;;  %v1007_v47 = vsel %vm728_vm0, %v689_v61, 0  ;;  %v9636_v19 = vand.u32 4294901760, %v1010_v59 }
  0x6c   : > { %1693 = vmatpush.xpose.msrb.mxu3 %v1692_v43  ;;  %v1702_v43 = vand.u32 4294901760, %v9610_v60  ;;  %v9639_v22 = vsub.f32 %v1013_v8, %v9619_v40  ;;  %v9648_v20 = vand.u32 4294901760, %v1007_v47  ;;  %v9654_v8 = vand.u32 4294901760, %v9627_v18 }
  0x6d   : > { %1219 = vmatpush.xpose.msra.mxu1 %v1218_v49  ;;  %1596 = vmatpush.xpose.msrb.mxu2 %v9479_v35  ;;  %v1698_v54 = vand.u32 4294901760, %v1697_v11  ;;  %v773_v49 = vmul.f32 %v692_v28, %v692_v28  ;;  %v9644_v11 = vand.u32 4294901760, %v944_v37  ;;  %v9650_v28 = vand.u32 4294901760, %v1078_v1 }
  0x6e   : > { %829 = vadd.xlane.f32.xlu1 %v828_v33  ;;  %1072 = vmatmul.f32.gmra.mxu0 %v9607_v13  ;;  %v831_v33 = vsel %vm728_vm0, %v771_v52, 0.0  ;;  %v1703_v61 = vsub.f32 %v9610_v60, %v1702_v43  ;;  %v9663_v52 = vsub.f32 %v1010_v59, %v9636_v19  ;;  %v772_v1 = vmul.f32 %v691_v32, %v691_v32 }
  0x6f   : > { %826 = vadd.xlane.f32.xlu0 %v825_v12  ;;  %1434 = vmatpush.xpose.msrb.mxu0 %v13576_v17  ;;  %v13577_v12 = vand.u32 4294901760, %v9210_v31  ;;  %v1708_v17 = vand.u32 4294901760, %v9639_v22  ;;  %v774_v31 = vmul.f32 %v9492_v16, %v9492_v16  ;;  %v1004_v59 = vsel %vm728_vm0, %v9580_v5, 0 }
  0x70   : > { %1221 = vmatmul.f32.vlgmr.msra.gmra.mxu1 %v9433_v30  ;;  %1308 = vmatmul.f32.gmra.mxu2 %v9521_v14  ;;  %v1086_v32 = vsub.f32 %v9627_v18, %v9654_v8  ;;  %v834_v16 = vsel %vm728_vm0, %v772_v1, 0.0 }
  0x71   : > { %1521 = vmatpush.xpose.msrb.mxu1 %v9135_v6  ;;  %1383 = vmatmul.f32.gmra.mxu3 %v9547_v4  ;;  %v837_v6 = vsel %vm728_vm0, %v773_v49, 0.0  ;;  %v947_v4 = vsel %vm728_vm0, %v9199_v26, 0  ;;  %v9675_v49 = vsub.f32 %v1007_v47, %v9648_v20  ;;  %v13578_v26 = vand.u32 4294901760, %v9241_v46 }
  0x72   : > { %1598 = vmatpush.xpose.msrb.mxu2 %v9525_v56  ;;  %1699 = vmatpush.xpose.msrb.mxu3 %v1698_v54  ;;  %v9667_v54 = vsub.f32 %v944_v37, %v9644_v11  ;;  %v1704_v37 = vand.u32 4294901760, %v1703_v61  ;;  %v1709_v5 = vsub.f32 %v9639_v22, %v1708_v17  ;;  %v1714_v47 = vand.u32 4294901760, %v9663_v52 }
  0x73   : > { %1438 = vmatpush.xpose.msrb.mxu0 %v13577_v12  ;;  %832 = vadd.xlane.f32.xlu2 %v831_v33  ;;  %v9694_v33 = vand.u32 4294901760, %v1004_v59  ;;  %v840_v46 = vsel %vm728_vm0, %v774_v31, 0.0  ;;  %v9701_v61 = vand.u32 4294901760, %v1086_v32  ;;  %v1720_v32 = vand.u32 4294901760, %v9675_v49 }
  0x74   : > { %v9704_v12 = vand.u32 4294901760, %v9667_v54  ;;  %v1715_v31 = vsub.f32 %v9663_v52, %v1714_v47 }
  0x75   : > { %1523 = vmatpush.xpose.msrb.mxu1 %v9137_v7  ;;  %v776_v7 = vmul.f32 %v9422_v27, %v9422_v27  ;;  %v9699_v27 = vand.u32 4294901760, %v947_v4 }
  0x76   : > { %838 = vadd.xlane.f32.xlu1 %v837_v6  ;;  %1080 = vmatmul.f32.gmra.mxu0 %v9650_v28  ;;  %v13579_v6 = vand.u32 4294901760, %v9254_v51  ;;  %v775_v51 = vmul.f32 %v9438_v25, %v9438_v25  ;;  %v1721_v25 = vsub.f32 %v9675_v49, %v1720_v32 }
  0x77   : > { %1442 = vmatpush.xpose.msrb.mxu0 %v13578_v26  ;;  %1600 = vmatpush.xpose.msrb.mxu2 %v9587_v38  ;;  %v846_v1 = vsel %vm728_vm0, %v776_v7, 0.0  ;;  %v9721_v26 = vsub.f32 %v947_v4, %v9699_v27  ;;  %v1094_v7 = vsub.f32 %v9667_v54, %v9704_v12 }
  0x78   : > { %1225 = vmatmul.f32.gmra.mxu1 %v9494_v10  ;;  %1313 = vmatmul.f32.gmra.mxu2 %v9571_v0  ;;  %v843_v4 = vsel %vm728_vm0, %v775_v51, 0.0  ;;  %v13582_v51 = vand.u32 4294901760, %v9352_v63  ;;  %v13584_v63 = vand.u32 4294901760, %v9477_v48 }
  0x79   : > { %1525 = vmatpush.xpose.msrb.mxu1 %v9141_v9  ;;  %1389 = vmatmul.f32.gmra.mxu3 %v9613_v45  ;;  %v1710_v9 = vand.u32 4294901760, %v1709_v5  ;;  %v9741_v5 = vand.u32 4294901760, %v1094_v7 }
  0x7a   : > { %1705 = vmatpush.xpose.msrb.mxu3 %v1704_v37  ;;  %835 = vadd.xlane.f32.xlu0 %v834_v16  ;;  %v9715_v37 = vsub.f32 %v1004_v59, %v9694_v33  ;;  %v950_v16 = vsel %vm728_vm0, %v9274_v57, 0  ;;  %v13580_v59 = vand.u32 4294901760, %v9304_v24 }
  0x7b   : > { %1446 = vmatpush.xpose.msrb.mxu0 %v13579_v6  ;;  %1602 = vmatpush.xpose.msrb.mxu2 %v9619_v40  ;;  %v9739_v24 = vand.u32 4294901760, %v950_v16  ;;  %v13581_v6 = vand.u32 4294901760, %v9320_v34  ;;  %v953_v34 = vsel %vm728_vm0, %v9262_v53, 0  ;;  %v13583_v53 = vand.u32 4294901760, %v9371_v50 }
  0x7c   : > { %841 = vadd.xlane.f32.xlu2 %v840_v46  ;;  %v1726_v57 = vand.u32 4294901760, %v9715_v37  ;;  %v9744_v46 = vand.u32 4294901760, %v9721_v26 }
  0x7d   : > { %1527 = vmatpush.xpose.msrb.mxu1 %v9168_v15  ;;  %v1716_v15 = vand.u32 4294901760, %v1715_v31 }
  0x7e   : > { %847 = vadd.xlane.f32.xlu1 %v846_v1  ;;  %1088 = vmatmul.f32.gmra.mxu0 %v9701_v61  ;;  %v1722_v1 = vand.u32 4294901760, %v1721_v25  ;;  %v1102_v31 = vsub.f32 %v9721_v26, %v9744_v46  ;;  %v13585_v25 = vand.u32 4294901760, %v9384_v23  ;;  %v13587_v23 = vand.u32 4294901760, %v9395_v39  ;;  %v13591_v39 = vld [vmem:[#allocation8_spill] sm:$0xff] }
  0x7f   : > { %1450 = vmatpush.xpose.msrb.mxu0 %v13580_v59  ;;  %1711 = vmatpush.xpose.msrb.mxu3 %v1710_v9  ;;  %v9754_v9 = vsub.f32 %v950_v16, %v9739_v24 }
  0x80   : > { %1229 = vmatmul.f32.gmra.mxu1 %v9537_v55  ;;  %1318 = vmatmul.f32.gmra.mxu2 %v9627_v18  ;;  %v9770_v16 = vand.u32 4294901760, %v1102_v31  ;;  %v13592_v31 = vld [vmem:[#allocation14_spill] sm:$0xff] }
  0x81   : > { %1529 = vmatpush.xpose.msrb.mxu1 %v9222_v36  ;;  %1395 = vmatmul.f32.gmra.mxu3 %v9654_v8  ;;  %v1727_v36 = vsub.f32 %v9715_v37, %v1726_v57  ;;  %v9773_v59 = vand.u32 4294901760, %v9754_v9 }
  0x82   : > { %1604 = vmatpush.xpose.msrb.mxu2 %v9636_v19  ;;  %844 = vadd.xlane.f32.xlu0 %v843_v4  ;;  %v13586_v4 = vand.u32 4294901760, %v9508_v29 }
  0x83   : > { %1454 = vmatpush.xpose.msrb.mxu0 %v13581_v6  ;;  %1717 = vmatpush.xpose.msrb.mxu3 %v1716_v15  ;;  %v1728_v7 = vand.u32 4294901760, %v1727_v36  ;;  %v1110_v15 = vsub.f32 %v9754_v9, %v9773_v59  ;;  %v13588_v6 = vand.u32 4294901760, %v9553_v58 }
  0x85   : > { %1531 = vmatpush.xpose.msrb.mxu1 %v9231_v41  ;;  %v9768_v41 = vand.u32 4294901760, %v953_v34 }
  0x86   : > { %1096 = vmatmul.f32.gmra.mxu0 %v9741_v5  ;;  %1606 = vmatpush.xpose.msrb.mxu2 %v9648_v20 }
  0x87   : > { %1458 = vmatpush.xpose.msrb.mxu0 %v13582_v51  ;;  %1723 = vmatpush.xpose.msrb.mxu3 %v1722_v1  ;;  %v13589_v1 = vld [vmem:[#allocation12_spill] sm:$0xff]  ;;  %v13594_v51 = vld [vmem:[#allocation9_spill] sm:$0xff] }
  0x88   : > { %1233 = vmatmul.f32.gmra.mxu1 %v9599_v21  ;;  %1323 = vmatmul.f32.gmra.mxu2 %v9667_v54  ;;  %v13590_v36 = vand.u32 4294901760, %v13589_v1 }
  0x89   : > { %1533 = vmatpush.xpose.msrb.mxu1 %v9284_v62  ;;  %1401 = vmatmul.f32.gmra.mxu3 %v9704_v12  ;;  %v9783_v62 = vsub.f32 %v953_v34, %v9768_v41  ;;  %v13593_v34 = vand.u32 4294901760, %v13592_v31 }
  0x8a   : > { %1608 = vmatpush.xpose.msrb.mxu2 %v9694_v33 }
  0x8b   : > { %1462 = vmatpush.xpose.msrb.mxu0 %v13583_v53  ;;  %1729 = vmatpush.xpose.msrb.mxu3 %v1728_v7  ;;  %v9797_v50 = vand.u32 4294901760, %v9783_v62  ;;  %v13595_v7 = vld [vmem:[#allocation17_spill] sm:$0xff] }
  0x8c   : > { %v13596_v53 = vand.u32 4294901760, %v13595_v7 }
  0x8d   : > { %1535 = vmatpush.xpose.msrb.mxu1 %v9291_v3  ;;  %v9794_v3 = vand.u32 4294901760, %v1110_v15 }
  0x8e   : > { %1920 = vmatpush.xpose.msra.mxu2 %v13584_v63  ;;  %1104 = vmatmul.f32.gmra.mxu0 %v9770_v16 }
  0x8f   : > { %1991 = vmatpush.xpose.msra.mxu3 %v9452_v44  ;;  %1466 = vmatpush.xpose.msrb.mxu0 %v13585_v25 }
  0x90   : > { %1237 = vmatmul.f32.gmra.mxu1 %v9644_v11  ;;  %1328 = vmatmul.f32.gmra.mxu2 %v9721_v26 }
  0x91   : > { %1537 = vmatpush.xpose.msrb.mxu1 %v9331_v42  ;;  %1407 = vmatmul.f32.gmra.mxu3 %v9744_v46  ;;  %v1118_v42 = vsub.f32 %v9783_v62, %v9797_v50 }
  0x92   : > { %1924 = vmatpush.xpose.msra.mxu2 %v13586_v4 }
  0x93   : > { %1993 = vmatpush.xpose.msra.mxu3 %v9479_v35  ;;  %1470 = vmatpush.xpose.msrb.mxu0 %v13587_v23  ;;  %v13600_v23 = vld [vmem:[#allocation11_spill] sm:$0xff] }
  0x95   : > { %1539 = vmatpush.xpose.msrb.mxu1 %v9354_v2  ;;  %v9817_v2 = vand.u32 4294901760, %v1118_v42  ;;  %v13601_v42 = vld [vmem:[#allocation20_spill] sm:$0xff] }
  0x96   : > { %1112 = vmatmul.f32.gmra.mxu0 %v9794_v3  ;;  %1928 = vmatpush.xpose.msra.mxu2 %v13588_v6 }
  0x97   : > { %1474 = vmatpush.xpose.msrb.mxu0 %v13590_v36  ;;  %1995 = vmatpush.xpose.msra.mxu3 %v9525_v56 }
  0x98   : > { %1241 = vmatmul.f32.gmra.mxu1 %v9699_v27  ;;  %1333 = vmatmul.f32.gmra.mxu2 %v9754_v9 }
  0x99   : > { %1541 = vmatpush.xpose.msrb.mxu1 %v13591_v39  ;;  %1413 = vmatmul.f32.gmra.mxu3 %v9773_v59 }
  0x9a   : > { %1932 = vmatpush.xpose.msra.mxu2 %v1702_v43  ;;  %v13597_v43 = vld [vmem:[#allocation10_spill] sm:$0xff] }
  0x9b   : > { %1478 = vmatpush.xpose.msrb.mxu0 %v13593_v34  ;;  %1997 = vmatpush.xpose.msra.mxu3 %v9587_v38 }
  0x9d   : > { %1543 = vmatpush.xpose.msrb.mxu1 %v13594_v51  ;;  %v700_v51 = vld [vmem:[%s13606_s5 + $0x20] sm:$0xff] }
  0x9e   : > { %1120 = vmatmul.f32.gmra.mxu0 %v9817_v2  ;;  %1936 = vmatpush.xpose.msra.mxu2 %v1708_v17  ;;  %v13598_v17 = vld [vmem:[#allocation19_spill] sm:$0xff] }
  0x9f   : > { %1482 = vmatpush.xpose.msrb.mxu0 %v13596_v53  ;;  %1999 = vmatpush.xpose.msra.mxu3 %v9619_v40  ;;  %v9835_v63 = vpop.xlane.xlu2 %742  ;;  %v9837_v15 = vpop.xlane.xlu1 %736  ;;  %v13599_v4 = vand.u32 4294901760, %v13598_v17 }
  0xa0   : > { %1245 = vmatmul.f32.gmra.mxu1 %v9739_v24  ;;  %1338 = vmatmul.f32.gmra.mxu2 %v9783_v62  ;;  %v9839_v25 = vpop.xlane.xlu0 %730 }
  0xa1   : > { %1545 = vmatpush.xpose.msrb.mxu1 %v13597_v43  ;;  %1419 = vmatmul.f32.gmra.mxu3 %v9797_v50  ;;  %v701_v43 = vld [vmem:[%s13606_s5 + $0x28] sm:$0xff] }
  0xa2   : > { %1940 = vmatpush.xpose.msra.mxu2 %v1714_v47  ;;  %v13602_v47 = vld [vmem:[#allocation13_spill] sm:$0xff] }
  0xa3   : > { %1486 = vmatpush.xpose.msrb.mxu0 %v13599_v4  ;;  %2001 = vmatpush.xpose.msra.mxu3 %v9636_v19 }
  0xa5   : > { %1547 = vmatpush.xpose.msrb.mxu1 %v13600_v23  ;;  %v702_v23 = vld [vmem:[%s13606_s5 + $0x30] sm:$0xff] }
  0xa6   : > { %1488 = vmatmul.f32.vlgmr.msrb.gmra.mxu0 %v9433_v30  ;;  %1944 = vmatpush.xpose.msra.mxu2 %v1720_v32  ;;  %v13604_v32 = vld [vmem:[#allocation16_spill] sm:$0xff] }
  0xa7   : > { %1773 = vmatpush.xpose.msra.mxu0 %v9477_v48  ;;  %2003 = vmatpush.xpose.msra.mxu3 %v9648_v20  ;;  %v9856_v6 = vpop.xlane.xlu2 %745 }
  0xa8   : > { %1249 = vmatmul.f32.gmra.mxu1 %v9768_v41  ;;  %1614 = vmatmul.f32.vlgmr.msrb.gmra.mxu2 %v13601_v42  ;;  %v9858_v48 = vpop.xlane.xlu1 %739  ;;  %v13608_v42 = vld [vmem:[#allocation15_spill] sm:$0xff] }
  0xa9   : > { %1549 = vmatpush.xpose.msrb.mxu1 %v13602_v47  ;;  %1731 = vmatmul.f32.vlgmr.msrb.gmra.mxu3 %v9433_v30  ;;  %v9860_v1 = vpop.xlane.xlu0 %733 }
  0xaa   : > { %13603 = vst [vmem:[#allocation12_spill] sm:$0xff] %v9860_v1  ;;  %1948 = vmatpush.xpose.msra.mxu2 %v1726_v57 }
  0xab   : > { %1776 = vmatpush.xpose.msra.mxu0 %v9508_v29  ;;  %2005 = vmatpush.xpose.msra.mxu3 %v9694_v33 }
  0xad   : > { %1551 = vmatpush.xpose.msrb.mxu1 %v13604_v32 }
  0xae   : > { %1492 = vmatmul.f32.gmra.mxu0 %v9494_v10 }
  0xaf   : > { %1779 = vmatpush.xpose.msra.mxu0 %v9553_v58  ;;  %v779_v29 = vpop.xlane.xlu2 %778 }
  0xb0   : > { %1553 = vmatmul.f32.vlgmr.msrb.gmra.mxu1 %v9433_v30  ;;  %1622 = vmatmul.f32.gmra.mxu2 %v9607_v13  ;;  %v9873_v36 = vpop.xlane.xlu1 %751 }
  0xb1   : > { %1845 = vmatpush.xpose.msra.mxu1 %v9452_v44  ;;  %1735 = vmatmul.f32.gmra.mxu3 %v9494_v10  ;;  %v9875_v57 = vpop.xlane.xlu0 %748  ;;  %v696_v44 = vld [vmem:[%s13606_s5] sm:$0xff] }
  0xb2   : > { %13605 = vst [vmem:[#allocation8_spill] sm:$0xff] %v9875_v57  ;;  %849 = vxpose.xlu2.b32.start [1/16] (narrow) %v779_v29, 8 }
  0xb3   : > { %1782 = vmatpush.xpose.msra.mxu0 %v9610_v60 }
  0xb5   : > { %1847 = vmatpush.xpose.msra.mxu1 %v9479_v35 }
  0xb6   : > { %1496 = vmatmul.f32.gmra.mxu0 %v9537_v55 }
  0xb7   : > { %1785 = vmatpush.xpose.msra.mxu0 %v9639_v22  ;;  %v788_v13 = vpop.xlane.xlu2 %787 }
  0xb8   : > { %1557 = vmatmul.f32.gmra.mxu1 %v9494_v10  ;;  %2093 = vxpose.xlu1.b32.start [1/16] (narrow) %v696_v44, 8  ;;  %v785_v35 = vpop.xlane.xlu1 %784 }
  0xb9   : > { %1849 = vmatpush.xpose.msra.mxu1 %v9525_v56  ;;  %1630 = vmatmul.f32.gmra.mxu2 %v9650_v28  ;;  %v782_v58 = vpop.xlane.xlu0 %781  ;;  %v697_v56 = vld [vmem:[%s13606_s5 + $0x8] sm:$0xff] }
  0xba   : > { %1739 = vmatmul.f32.gmra.mxu3 %v9537_v55  ;;  %850 = vxpose.xlu2.b32.cont [2/16] (narrow) %v782_v58, 8  ;;  %v703_v58 = vld [vmem:[%s13606_s5 + $0x38] sm:$0xff] }
  0xbb   : > { %1788 = vmatpush.xpose.msra.mxu0 %v9663_v52 }
  0xbd   : > { %1851 = vmatpush.xpose.msra.mxu1 %v9587_v38 }
  0xbe   : > { %1500 = vmatmul.f32.gmra.mxu0 %v9599_v21 }
  0xbf   : > { %1791 = vmatpush.xpose.msra.mxu0 %v9675_v49  ;;  %v797_v22 = vpop.xlane.xlu2 %796 }
  0xc0   : > { %1561 = vmatmul.f32.gmra.mxu1 %v9537_v55  ;;  %2094 = vxpose.xlu1.b32.cont [2/16] (narrow) %v697_v56, 8  ;;  %v794_v38 = vpop.xlane.xlu1 %793 }
  0xc1   : > { %1853 = vmatpush.xpose.msra.mxu1 %v9619_v40  ;;  %1638 = vmatmul.f32.gmra.mxu2 %v9701_v61  ;;  %v791_v60 = vpop.xlane.xlu0 %790  ;;  %v698_v40 = vld [vmem:[%s13606_s5 + $0x10] sm:$0xff]  ;;  %v699_v61 = vld [vmem:[%s13606_s5 + $0x18] sm:$0xff] }
  0xc2   : > { %1743 = vmatmul.f32.gmra.mxu3 %v9599_v21  ;;  %851 = vxpose.xlu2.b32.cont [3/16] (narrow) %v785_v35, 8 }
  0xc3   : > { %1794 = vmatpush.xpose.msra.mxu0 %v9715_v37 }
  0xc5   : > { %1855 = vmatpush.xpose.msra.mxu1 %v9636_v19  ;;  %v2273_v19 = vld [vmem:[%s13607_s6] sm:$0x1f] }
  0xc6   : > { %1504 = vmatmul.f32.gmra.mxu0 %v9644_v11 }
  0xc8   : > { %1565 = vmatmul.f32.gmra.mxu1 %v9599_v21  ;;  %2095 = vxpose.xlu1.b32.cont [3/16] (narrow) %v698_v40, 8  ;;  %v9912_v52 = vpop.xlane.xlu1 %802 }
  0xc9   : > { %1857 = vmatpush.xpose.msra.mxu1 %v9648_v20  ;;  %1646 = vmatmul.f32.gmra.mxu2 %v9741_v5  ;;  %v800_v28 = vpop.xlane.xlu0 %799  ;;  %v2349_v20 = vsel %vm13515_vm1, %v2273_v19, 0  ;;  %v9930_v5 = vpop.xlane.xlu2 %805 }
  0xca   : > { %1747 = vmatmul.f32.gmra.mxu3 %v9644_v11  ;;  %852 = vxpose.xlu2.b32.cont [4/16] (narrow) %v788_v13, 8  ;;  %v9916_v49 = vand.u32 4294901760, %v2349_v20 }
  0xcc   : > { %v2577_v37 = vsub.f32 %v2349_v20, %v9916_v49  ;;  %2834 = vmatpush.msrb.mxu3 %v9916_v49  ;;  %2367 = vmatpush.msrb.mxu0 %v9916_v49 }
  0xcd   : > { %1859 = vmatpush.xpose.msra.mxu1 %v9694_v33 }
  0xce   : > { %1508 = vmatmul.f32.gmra.mxu0 %v9699_v27  ;;  %2696 = vmatpush.msrb.mxu2 %v2577_v37  ;;  %v2578_v39 = vand.u32 4294901760, %v2577_v37 }
  0xd0   : > { %1569 = vmatmul.f32.gmra.mxu1 %v9644_v11  ;;  %2096 = vxpose.xlu1.b32.cont [4/16] (narrow) %v699_v61, 8  ;;  %v9932_v31 = vpop.xlane.xlu1 %811  ;;  %v2579_v34 = vsub.f32 %v2577_v37, %v2578_v39 }
  0xd1   : > { %1654 = vmatmul.f32.gmra.mxu2 %v9770_v16  ;;  %v9928_v33 = vpop.xlane.xlu0 %808  ;;  %v9943_v53 = vpop.xlane.xlu2 %814 }
  0xd2   : > { %1751 = vmatmul.f32.gmra.mxu3 %v9699_v27  ;;  %853 = vxpose.xlu2.b32.cont [5/16] (narrow) %v791_v60, 8  ;;  %v2580_v7 = vand.u32 4294901760, %v2579_v34 }
  0xd4   : > { %2581 = vmatpush.msrb.mxu1 %v2580_v7 }
  0xd6   : > { %1512 = vmatmul.f32.gmra.mxu0 %v9739_v24 }
  0xd8   : > { %1573 = vmatmul.f32.gmra.mxu1 %v9699_v27  ;;  %2097 = vxpose.xlu1.b32.cont [5/16] (narrow) %v700_v51, 8  ;;  %v9949_v17 = vpop.xlane.xlu1 %820 }
  0xd9   : > { %1662 = vmatmul.f32.gmra.mxu2 %v9794_v3  ;;  %v9941_v16 = vpop.xlane.xlu0 %817  ;;  %v9958_v47 = vpop.xlane.xlu2 %823 }
  0xda   : > { %1755 = vmatmul.f32.gmra.mxu3 %v9739_v24  ;;  %854 = vxpose.xlu2.b32.cont [6/16] (narrow) %v794_v38, 8  ;;  %v13609_v38 = vld [vmem:[#allocation18_spill] sm:$0xff] }
  0xde   : > { %1516 = vmatmul.f32.gmra.mxu0 %v9768_v41 }
  0xe0   : > { %1577 = vmatmul.f32.gmra.mxu1 %v9739_v24  ;;  %2098 = vxpose.xlu1.b32.cont [6/16] (narrow) %v701_v43, 8 }
  0xe1   : > { %1670 = vmatmul.f32.gmra.mxu2 %v9817_v2  ;;  %v830_v32 = vpop.xlane.xlu1 %829 }
  0xe2   : > { %1759 = vmatmul.f32.gmra.mxu3 %v9768_v41  ;;  %v827_v3 = vpop.xlane.xlu0 %826  ;;  %855 = vxpose.xlu2.b32.cont [7/16] (narrow) %v797_v22, 8 }
  0xe3   : > { %881 = vxpose.xlu0.b32.start [1/8] (short) (narrow) %v827_v3, 8  ;;  %v1065_v4 = vpop.f32.mrf.mxu0 }
  0xe6   : > { %1797 = vmatmul.f32.vlgmr.msra.gmra.mxu0 %v13608_v42  ;;  %v833_v60 = vpop.xlane.xlu2 %832 }
  0xe7   : > { %2998 = vmatpush.msra.mxu0 %v2578_v39 }
  0xe8   : > { %1581 = vmatmul.f32.gmra.mxu1 %v9768_v41  ;;  %2099 = vxpose.xlu1.b32.cont [7/16] (narrow) %v702_v23, 8 }
  0xe9   : > { %1950 = vmatmul.f32.vlgmr.msra.gmra.mxu2 %v9433_v30 }
  0xea   : > { %2007 = vmatmul.f32.vlgmr.msra.gmra.mxu3 %v9433_v30  ;;  %v1378_v2 = vpop.f32.mrf.mxu3  ;;  %856 = vxpose.xlu2.b32.cont [8/16] (narrow) %v800_v28, 8  ;;  %v704_v28 = vld [vmem:[%s13606_s5 + $0x40] sm:$0xff] }
  0xeb   : > { %882 = vxpose.xlu0.b32.cont [2/8] (short) (narrow) %v830_v32, 8  ;;  %v1073_v29 = vpop.f32.mrf.mxu0  ;;  %v1304_v44 = vpop.f32.mrf.mxu2 }
  0xed   : > { %v1222_v35 = vpop.f32.mrf.mxu1  ;;  %v836_v37 = vpop.xlane.xlu0 %835 }
  0xee   : > { %v1223_v56 = vadd.f32 %v1222_v35, %v1065_v4  ;;  %1802 = vmatmul.f32.gmra.mxu0 %v9521_v14  ;;  %v2249_v35 = vld [vmem:[%s13612_s28] sm:$0xff] }
  0xf0   : > { %v1305_v13 = vadd.f32 %v1304_v44, %v1223_v56  ;;  %1863 = vmatmul.f32.vlgmr.msra.gmra.mxu1 %v13609_v38  ;;  %2100 = vxpose.xlu1.b32.cont [8/16] (narrow) %v703_v58, 8  ;;  %v707_v56 = vld [vmem:[%s13606_s5 + $0x58] sm:$0xff]  ;;  %v2276_v38 = vsel %vm2274_vm2, %v2249_v35, 0 }
  0xf1   : > { %1954 = vmatmul.f32.gmra.mxu2 %v9494_v10  ;;  %3112 = vmatpush.msra.mxu1 %v9916_v49 }
  0xf2   : > { %2011 = vmatmul.f32.gmra.mxu3 %v9494_v10  ;;  %v9970_v30 = vadd.f32 %v1378_v2, %v1305_v13  ;;  %857 = vxpose.xlu2.b32.cont [9/16] (narrow) %v9912_v52, 8  ;;  %v13610_v10 = vld [vmem:[#allocation21_spill] sm:$0xff]  ;;  %v3210_v2 = vld [vmem:[%s13313_s7] sm:$0x1f] }
  0xf3   : > { %883 = vxpose.xlu0.b32.cont [3/8] (short) (narrow) %v833_v60, 8  ;;  %v1081_v40 = vpop.f32.mrf.mxu0  ;;  %v1309_v22 = vpop.f32.mrf.mxu2  ;;  %v3240_v44 = vsel %vm13515_vm1, %v3210_v2, 0 }
  0xf4   : > { %v1384_v19 = vpop.f32.mrf.mxu3 }
  0xf5   : > { %v1226_v14 = vpop.f32.mrf.mxu1 }
  0xf6   : > { %v1227_v20 = vadd.f32 %v1226_v14, %v1073_v29  ;;  %1807 = vmatmul.f32.gmra.mxu0 %v9571_v0  ;;  %v705_v0 = vld [vmem:[%s13606_s5 + $0x48] sm:$0xff] }
  0xf8   : > { %v1310_v61 = vadd.f32 %v1309_v22, %v1227_v20  ;;  %1869 = vmatmul.f32.gmra.mxu1 %v13610_v10  ;;  %2101 = vxpose.xlu1.b32.cont [9/16] (narrow) %v704_v28, 8  ;;  %v2250_v10 = vld [vmem:[%s13612_s28 + $0x8] sm:$0xff] }
  0xf9   : > { %1958 = vmatmul.f32.gmra.mxu2 %v9537_v55 }
  0xfa   : > { %2015 = vmatmul.f32.gmra.mxu3 %v9537_v55  ;;  %v9981_v52 = vadd.f32 %v1384_v19, %v1310_v61  ;;  %858 = vxpose.xlu2.b32.cont [10/16] (narrow) %v9930_v5, 8  ;;  %v839_v55 = vpop.xlane.xlu1 %838 }
  0xfb   : > { %884 = vxpose.xlu0.b32.cont [4/8] (short) (narrow) %v836_v37, 8  ;;  %v1089_v49 = vpop.f32.mrf.mxu0  ;;  %v1314_v39 = vpop.f32.mrf.mxu2  ;;  %v708_v37 = vld [vmem:[%s13606_s5 + $0x60] sm:$0xff] }
  0xfc   : > { %13611 = vst [vmem:[#allocation14_spill] sm:$0xff] %v9981_v52  ;;  %v1390_v34 = vpop.f32.mrf.mxu3 }
  0xfd   : > { %v1230_v51 = vpop.f32.mrf.mxu1 }
  0xfe   : > { %v1231_v7 = vadd.f32 %v1230_v51, %v1081_v40  ;;  %1812 = vmatmul.f32.gmra.mxu0 %v9627_v18  ;;  %v706_v18 = vld [vmem:[%s13606_s5 + $0x50] sm:$0xff]  ;;  %v845_v40 = vpop.xlane.xlu0 %844 }
 0x100   : > { %v1315_v43 = vadd.f32 %v1314_v39, %v1231_v7  ;;  %1875 = vmatmul.f32.gmra.mxu1 %v9613_v45  ;;  %2102 = vxpose.xlu1.b32.cont [10/16] (narrow) %v705_v0, 8 }
 0x101   : > { %1962 = vmatmul.f32.gmra.mxu2 %v9599_v21 }
 0x102   : > { %2019 = vmatmul.f32.gmra.mxu3 %v9599_v21  ;;  %v9991_v5 = vadd.f32 %v1390_v34, %v1315_v43  ;;  %859 = vxpose.xlu2.b32.cont [11/16] (narrow) %v9928_v33, 8  ;;  %v842_v21 = vpop.xlane.xlu2 %841  ;;  %v848_v51 = vpop.xlane.xlu1 %847 }
 0x103   : > { %885 = vxpose.xlu0.b32.cont [5/8] (short) (narrow) %v839_v55, 8  ;;  %v1097_v3 = vpop.f32.mrf.mxu0  ;;  %v1319_v4 = vpop.f32.mrf.mxu2 }
 0x104   : > { %v1396_v23 = vpop.f32.mrf.mxu3 }
 0x105   : > { %v1234_v42 = vpop.f32.mrf.mxu1 }
 0x106   : > { %v1235_v45 = vadd.f32 %v1234_v42, %v1089_v49  ;;  %1817 = vmatmul.f32.gmra.mxu0 %v9667_v54 }
 0x108   : > { %v1320_v32 = vadd.f32 %v1319_v4, %v1235_v45  ;;  %1881 = vmatmul.f32.gmra.mxu1 %v9654_v8  ;;  %2103 = vxpose.xlu1.b32.cont [11/16] (narrow) %v706_v18, 8 }
 0x109   : > { %1966 = vmatmul.f32.gmra.mxu2 %v9644_v11 }
 0x10a   : > { %2023 = vmatmul.f32.gmra.mxu3 %v9644_v11  ;;  %v10001_v33 = vadd.f32 %v1396_v23, %v1320_v32  ;;  %860 = vxpose.xlu2.b32.cont [12/16] (narrow) %v9932_v31, 8  ;;  %v10011_v11 = vand.u32 4294901760, %v3240_v44  ;;  %v712_v32 = vld [vmem:[%s13606_s5 + $0x80] sm:$0xff] }
 0x10b   : > { %886 = vxpose.xlu0.b32.cont [6/8] (short) (narrow) %v842_v21, 8  ;;  %v1105_v29 = vpop.f32.mrf.mxu0  ;;  %v1324_v54 = vpop.f32.mrf.mxu2 }
 0x10c   : > { %v1402_v8 = vpop.f32.mrf.mxu3  ;;  %3258 = vmatpush.msra.mxu2 %v10011_v11  ;;  %v10019_v31 = vsub.f32 %v3240_v44, %v10011_v11 }
 0x10d   : > { %v1238_v58 = vpop.f32.mrf.mxu1 }
 0x10e   : > { %v1239_v13 = vadd.f32 %v1238_v58, %v1097_v3  ;;  %1822 = vmatmul.f32.gmra.mxu0 %v9721_v26  ;;  %v13359_v22 = vand.u32 4294901760, %v10019_v31  ;;  %v10028_v26 = vand.u32 4294901760, %v2276_v38 }
 0x110   : > { %v1325_v60 = vadd.f32 %v1324_v54, %v1239_v13  ;;  %1887 = vmatmul.f32.gmra.mxu1 %v9704_v12  ;;  %2104 = vxpose.xlu1.b32.cont [12/16] (narrow) %v707_v56, 8  ;;  %v3342_v14 = vsub.f32 %v10019_v31, %v13359_v22  ;;  %v2369_v39 = vsub.f32 %v2276_v38, %v10028_v26 }
 0x111   : > { %1970 = vmatmul.f32.gmra.mxu2 %v9699_v27 }
 0x112   : > { %2027 = vmatmul.f32.gmra.mxu3 %v9699_v27  ;;  %v10026_v19 = vadd.f32 %v1402_v8, %v1325_v60  ;;  %861 = vxpose.xlu2.b32.cont [13/16] (narrow) %v9943_v53, 8  ;;  %v3343_v61 = vand.u32 4294901760, %v3342_v14  ;;  %v2279_v53 = vsel %vm2274_vm2, %v2250_v10, 0  ;;  %v2370_v7 = vand.u32 4294901760, %v2369_v39  ;;  %v2252_v8 = vld [vmem:[%s13612_s28 + $0x18] sm:$0xff]  ;;  %v713_v60 = vld [vmem:[%s13606_s5 + $0x88] sm:$0xff] }
 0x113   : > { %887 = vxpose.xlu0.b32.cont [7/8] (short) (narrow) %v845_v40, 8  ;;  %v1113_v12 = vpop.f32.mrf.mxu0  ;;  %v1329_v28 = vpop.f32.mrf.mxu2  ;;  %v10048_v43 = vand.u32 4294901760, %v2279_v53  ;;  %v2253_v10 = vld [vmem:[%s13612_s28 + $0x20] sm:$0xff] }
 0x114   : > { %v1408_v20 = vpop.f32.mrf.mxu3  ;;  %3344 = vmatpush.msra.mxu3 %v3343_v61  ;;  %v2371_v42 = vsub.f32 %v2369_v39, %v2370_v7 }
 0x115   : > { %v1242_v27 = vpop.f32.mrf.mxu1  ;;  %v2377_v18 = vsub.f32 %v2279_v53, %v10048_v43  ;;  %v2288_v53 = vsel %vm2274_vm2, %v2253_v10, 0 }
 0x116   : > { %v1243_v49 = vadd.f32 %v1242_v27, %v1105_v29  ;;  %1827 = vmatmul.f32.gmra.mxu0 %v9754_v9 }
 0x117   : > { %v2378_v2 = vand.u32 4294901760, %v2377_v18 }
 0x118   : > { %v1330_v34 = vadd.f32 %v1329_v28, %v1243_v49  ;;  %1893 = vmatmul.f32.gmra.mxu1 %v9744_v46  ;;  %2105 = vxpose.xlu1.b32.cont [13/16] (narrow) %v708_v37, 8  ;;  %v2251_v46 = vld [vmem:[%s13612_s28 + $0x10] sm:$0xff]  ;;  %v711_v49 = vld [vmem:[%s13606_s5 + $0x78] sm:$0xff] }
 0x119   : > { %1974 = vmatmul.f32.gmra.mxu2 %v9739_v24  ;;  %v2379_v56 = vsub.f32 %v2377_v18, %v2378_v2 }
 0x11a   : > { %2031 = vmatmul.f32.gmra.mxu3 %v9739_v24  ;;  %v10046_v0 = vadd.f32 %v1408_v20, %v1330_v34  ;;  %862 = vxpose.xlu2.b32.cont [14/16] (narrow) %v9941_v16, 8  ;;  %v709_v24 = vld [vmem:[%s13606_s5 + $0x68] sm:$0xff]  ;;  %v2282_v16 = vsel %vm2274_vm2, %v2251_v46, 0  ;;  %v714_v34 = vld [vmem:[%s13606_s5 + $0x90] sm:$0xff] }
 0x11b   : > { %888 = vxpose.xlu0.b32.end [8/8] (short) (narrow) %v848_v51, 8  ;;  %v1121_v9 = vpop.f32.mrf.mxu0  ;;  %v1334_v55 = vpop.f32.mrf.mxu2  ;;  %v10068_v29 = vand.u32 4294901760, %v2282_v16  ;;  %v2380_v14 = vand.u32 4294901760, %v2379_v56 }
 0x11c   : > { %v1414_v3 = vpop.f32.mrf.mxu3 }
 0x11d   : > { %v1246_v4 = vpop.f32.mrf.mxu1  ;;  %v2385_v13 = vsub.f32 %v2282_v16, %v10068_v29 }
 0x11e   : > { %v1247_v23 = vadd.f32 %v1246_v4, %v1113_v12  ;;  %1832 = vmatmul.f32.gmra.mxu0 %v9783_v62  ;;  %v2372_v62 = vand.u32 4294901760, %v2371_v42  ;;  %v2254_v4 = vld [vmem:[%s13612_s28 + $0x28] sm:$0xff] }
 0x11f   : > { %v2386_v12 = vand.u32 4294901760, %v2385_v13  ;;  %v2291_v16 = vsel %vm2274_vm2, %v2254_v4, 0 }
 0x120   : > { %v1335_v45 = vadd.f32 %v1334_v55, %v1247_v23  ;;  %1899 = vmatmul.f32.gmra.mxu1 %v9773_v59  ;;  %2106 = vxpose.xlu1.b32.cont [14/16] (narrow) %v709_v24, 8 }
 0x121   : > { %1978 = vmatmul.f32.gmra.mxu2 %v9768_v41 }
 0x122   : > { %2035 = vmatmul.f32.gmra.mxu3 %v9768_v41  ;;  %v10066_v21 = vadd.f32 %v1414_v3, %v1335_v45  ;;  %863 = vxpose.xlu2.b32.cont [15/16] (narrow) %v9949_v17, 8  ;;  %v710_v41 = vld [vmem:[%s13606_s5 + $0x70] sm:$0xff]  ;;  %v2285_v17 = vsel %vm2274_vm2, %v2252_v8, 0  ;;  %v715_v45 = vld [vmem:[%s13606_s5 + $0x98] sm:$0xff] }
 0x123   : > { %2125 = vxpose.xlu0.b32.start [1/8] (short) (narrow) %v712_v32, 8  ;;  %v1339_v54 = vpop.f32.mrf.mxu2  ;;  %v10071_v59 = vpop.f32.mrf.mxu0  ;;  %v10087_v28 = vand.u32 4294901760, %v2285_v17 }
 0x124   : > { %13613 = vst [vmem:[#allocation9_spill] sm:$0xff] %v10066_v21  ;;  %v1420_v44 = vpop.f32.mrf.mxu3 }
 0x125   : > { %v1250_v35 = vpop.f32.mrf.mxu1 }
 0x126   : > { %v1251_v58 = vadd.f32 %v1250_v35, %v1121_v9  ;;  %2373 = vmatmul.f32.vlgmr.msrb.gmra.mxu0 %v2372_v62  ;;  %v10110_v9 = vand.u32 4294901760, %v2288_v53  ;;  %v2255_v35 = vld [vmem:[%s13612_s28 + $0x30] sm:$0xff] }
 0x128   : > { %v1340_v38 = vadd.f32 %v1339_v54, %v1251_v58  ;;  %1905 = vmatmul.f32.gmra.mxu1 %v9797_v50  ;;  %2107 = vxpose.xlu1.b32.cont [15/16] (narrow) %v710_v41, 8  ;;  %13615 = vst [vmem:[#allocation10_spill] sm:$0xff] %v10110_v9 }
 0x129   : > { %2699 = vmatmul.f32.vlgmr.msrb.gmra.mxu2 %v2369_v39  ;;  %v2387_v39 = vsub.f32 %v2385_v13, %v2386_v12 }
 0x12a   : > { %2838 = vmatmul.f32.vlgmr.msrb.gmra.mxu3 %v2370_v7  ;;  %v10085_v40 = vadd.f32 %v1420_v44, %v1340_v38  ;;  %3395 = vmatpush.msrb.mxu2 %v10019_v31  ;;  %v716_v38 = vld [vmem:[%s13606_s5 + $0xa0] sm:$0xff] }
 0x12b   : > { %3453 = vmatpush.msrb.mxu3 %v10011_v11  ;;  %864 = vxpose.xlu2.b32.end [16/16] (narrow) %v9958_v47, 8  ;;  %v10092_v50 = vpop.f32.mrf.mxu0  ;;  %v1615_v20 = vpop.f32.mrf.mxu2  ;;  %v2393_v47 = vsub.f32 %v2285_v17, %v10087_v28  ;;  %v2388_v51 = vand.u32 4294901760, %v2387_v39  ;;  %v2294_v17 = vsel %vm2274_vm2, %v2255_v35, 0 }
 0x12c   : > { %2126 = vxpose.xlu0.b32.cont [2/8] (short) (narrow) %v713_v60, 8  ;;  %13614 = vst [vmem:[#allocation17_spill] sm:$0xff] %v10092_v50  ;;  %v1732_v61 = vpop.f32.mrf.mxu3 }
 0x12d   : > { %v10097_v27 = vpop.f32.mrf.mxu1  ;;  %v10099_v37 = vadd.f32 %v1732_v61, %v1615_v20  ;;  %v2394_v7 = vand.u32 4294901760, %v2393_v47 }
 0x12e   : > { %2381 = vmatmul.f32.gmra.mxu0 %v2380_v14 }
 0x12f   : > { %v2395_v42 = vsub.f32 %v2393_v47, %v2394_v7 }
 0x130   : > { %2583 = vmatmul.f32.vlgmr.msrb.gmra.mxu1 %v10028_v26  ;;  %2108 = vxpose.xlu1.b32.end [16/16] (narrow) %v711_v49, 8  ;;  %v2256_v49 = vld [vmem:[%s13612_s28 + $0x38] sm:$0xff] }
 0x131   : > { %2704 = vmatmul.f32.gmra.mxu2 %v2377_v18  ;;  %v2401_v18 = vsub.f32 %v2288_v53, %v10110_v9  ;;  %v2396_v32 = vand.u32 4294901760, %v2395_v42 }
 0x132   : > { %2844 = vmatmul.f32.gmra.mxu3 %v2378_v2  ;;  %v10127_v2 = vand.u32 4294901760, %v2291_v16 }
 0x133   : > { %v10112_v55 = vpop.f32.mrf.mxu0  ;;  %v1623_v3 = vpop.f32.mrf.mxu2  ;;  %v2402_v62 = vand.u32 4294901760, %v2401_v18 }
 0x134   : > { %2127 = vxpose.xlu0.b32.cont [3/8] (short) (narrow) %v714_v34, 8  ;;  %v1736_v46 = vpop.f32.mrf.mxu3  ;;  %13617 = vst [vmem:[#allocation11_spill] sm:$0xff] %v10127_v2 }
 0x135   : > { %v10117_v24 = vpop.f32.mrf.mxu1  ;;  %v10119_v23 = vadd.f32 %v1736_v46, %v1623_v3  ;;  %v2403_v56 = vsub.f32 %v2401_v18, %v2402_v62 }
 0x136   : > { %13616 = vst [vmem:[#allocation19_spill] sm:$0xff] %v10117_v24  ;;  %2389 = vmatmul.f32.gmra.mxu0 %v2388_v51  ;;  %v2297_v51 = vsel %vm2274_vm2, %v2256_v49, 0 }
 0x137   : > { %v2404_v60 = vand.u32 4294901760, %v2403_v56  ;;  %v10161_v4 = vand.u32 4294901760, %v2297_v51  ;;  %v718_v56 = vld [vmem:[%s13606_s5 + $0xb0] sm:$0xff] }
 0x138   : > { %2587 = vmatmul.f32.gmra.mxu1 %v10048_v43 }
 0x139   : > { %2709 = vmatmul.f32.gmra.mxu2 %v2385_v13  ;;  %v2409_v13 = vsub.f32 %v2291_v16, %v10127_v2  ;;  %13619 = vst [vmem:[#allocation13_spill] sm:$0xff] %v10161_v4 }
 0x13a   : > { %2850 = vmatmul.f32.gmra.mxu3 %v2386_v12  ;;  %v10144_v12 = vand.u32 4294901760, %v2294_v17 }
 0x13b   : > { %v10129_v54 = vpop.f32.mrf.mxu0  ;;  %v2410_v14 = vand.u32 4294901760, %v2409_v13 }
 0x13c   : > { %2128 = vxpose.xlu0.b32.cont [4/8] (short) (narrow) %v715_v45, 8  ;;  %v1631_v44 = vpop.f32.mrf.mxu2  ;;  %13618 = vst [vmem:[#allocation20_spill] sm:$0xff] %v10144_v12  ;;  %v2417_v34 = vsub.f32 %v2294_v17, %v10144_v12 }
 0x13d   : > { %v1740_v8 = vpop.f32.mrf.mxu3  ;;  %v10134_v41 = vpop.f32.mrf.mxu1 }
 0x13e   : > { %v10136_v58 = vadd.f32 %v1740_v8, %v1631_v44  ;;  %2397 = vmatmul.f32.gmra.mxu0 %v2396_v32  ;;  %v2418_v46 = vand.u32 4294901760, %v2417_v34  ;;  %v2257_v32 = vld [vmem:[%s13612_s28 + $0x40] sm:$0xff] }
 0x13f   : > { %v2300_v35 = vsel %vm2274_vm2, %v2257_v32, 0 }
 0x140   : > { %2591 = vmatmul.f32.gmra.mxu1 %v10068_v29 }
 0x141   : > { %2714 = vmatmul.f32.gmra.mxu2 %v2393_v47  ;;  %v2411_v47 = vsub.f32 %v2409_v13, %v2410_v14 }
 0x142   : > { %2856 = vmatmul.f32.gmra.mxu3 %v2394_v7  ;;  %v717_v7 = vld [vmem:[%s13606_s5 + $0xa8] sm:$0xff] }
 0x143   : > { %v10146_v20 = vpop.f32.mrf.mxu0  ;;  %v2412_v3 = vand.u32 4294901760, %v2411_v47  ;;  %v2258_v47 = vld [vmem:[%s13612_s28 + $0x48] sm:$0xff] }
 0x144   : > { %2129 = vxpose.xlu0.b32.cont [5/8] (short) (narrow) %v716_v38, 8  ;;  %v1639_v61 = vpop.f32.mrf.mxu2 }
 0x145   : > { %v1744_v10 = vpop.f32.mrf.mxu3  ;;  %v10151_v39 = vpop.f32.mrf.mxu1 }
 0x146   : > { %v10153_v53 = vadd.f32 %v1744_v10, %v1639_v61  ;;  %2405 = vmatmul.f32.gmra.mxu0 %v2404_v60  ;;  %v10178_v60 = vand.u32 4294901760, %v2300_v35 }
 0x148   : > { %2595 = vmatmul.f32.gmra.mxu1 %v10087_v28  ;;  %13620 = vst [vmem:[#allocation16_spill] sm:$0xff] %v10178_v60 }
 0x149   : > { %2719 = vmatmul.f32.gmra.mxu2 %v2401_v18  ;;  %v2419_v18 = vsub.f32 %v2417_v34, %v2418_v46 }
 0x14a   : > { %2862 = vmatmul.f32.gmra.mxu3 %v2402_v62  ;;  %v2425_v62 = vsub.f32 %v2297_v51, %v10161_v4 }
 0x14b   : > { %v10163_v42 = vpop.f32.mrf.mxu0  ;;  %v2420_v17 = vand.u32 4294901760, %v2419_v18 }
 0x14c   : > { %2130 = vxpose.xlu0.b32.cont [6/8] (short) (narrow) %v717_v7, 8  ;;  %v1647_v16 = vpop.f32.mrf.mxu2  ;;  %v2426_v38 = vand.u32 4294901760, %v2425_v62 }
 0x14d   : > { %v1748_v45 = vpop.f32.mrf.mxu3  ;;  %v10168_v44 = vpop.f32.mrf.mxu1 }
 0x14e   : > { %v10170_v8 = vadd.f32 %v1748_v45, %v1647_v16  ;;  %2413 = vmatmul.f32.gmra.mxu0 %v2412_v3  ;;  %v2303_v3 = vsel %vm2274_vm2, %v2258_v47, 0  ;;  %v719_v16 = vld [vmem:[%s13606_s5 + $0xb8] sm:$0xff] }
 0x14f   : > { %v10195_v18 = vand.u32 4294901760, %v2303_v3 }
 0x150   : > { %2599 = vmatmul.f32.gmra.mxu1 %v10110_v9 }
 0x151   : > { %2724 = vmatmul.f32.gmra.mxu2 %v2409_v13  ;;  %v2427_v13 = vsub.f32 %v2425_v62, %v2426_v38  ;;  %13622 = vst [vmem:[#allocation18_spill] sm:$0xff] %v10195_v18 }
 0x152   : > { %2868 = vmatmul.f32.gmra.mxu3 %v2410_v14  ;;  %v2433_v14 = vsub.f32 %v2300_v35, %v10178_v60  ;;  %v2259_v35 = vld [vmem:[%s13612_s28 + $0x50] sm:$0xff] }
 0x153   : > { %v10180_v61 = vpop.f32.mrf.mxu0  ;;  %v2428_v45 = vand.u32 4294901760, %v2427_v13  ;;  %v2306_v13 = vsel %vm2274_vm2, %v2259_v35, 0 }
 0x154   : > { %2131 = vxpose.xlu0.b32.cont [7/8] (short) (narrow) %v718_v56, 8  ;;  %13621 = vst [vmem:[#allocation15_spill] sm:$0xff] %v10180_v61  ;;  %v1655_v10 = vpop.f32.mrf.mxu2  ;;  %v2434_v32 = vand.u32 4294901760, %v2433_v14  ;;  %v10209_v57 = vand.u32 4294901760, %v2306_v13 }
 0x155   : > { %v1752_v49 = vpop.f32.mrf.mxu3  ;;  %v10185_v51 = vpop.f32.mrf.mxu1 }
 0x156   : > { %v10187_v7 = vadd.f32 %v1752_v49, %v1655_v10  ;;  %2421 = vmatmul.f32.gmra.mxu0 %v2420_v17  ;;  %13624 = vst [vmem:[#allocation22_spill] sm:$0xff] %v10209_v57 }
 0x158   : > { %2603 = vmatmul.f32.gmra.mxu1 %v10127_v2 }
 0x159   : > { %2729 = vmatmul.f32.gmra.mxu2 %v2417_v34  ;;  %v2435_v34 = vsub.f32 %v2433_v14, %v2434_v32 }
 0x15a   : > { %2874 = vmatmul.f32.gmra.mxu3 %v2418_v46  ;;  %v2441_v46 = vsub.f32 %v2303_v3, %v10195_v18 }
 0x15b   : > { %v10197_v56 = vpop.f32.mrf.mxu0 }
 0x15c   : > { %2132 = vxpose.xlu0.b32.end [8/8] (short) (narrow) %v719_v16, 8  ;;  %v1663_v17 = vpop.f32.mrf.mxu2  ;;  %v2436_v16 = vand.u32 4294901760, %v2435_v34  ;;  %v2442_v22 = vand.u32 4294901760, %v2441_v46 }
 0x15d   : > { %v1756_v10 = vpop.f32.mrf.mxu3  ;;  %v10202_v49 = vpop.f32.mrf.mxu1 }
 0x15e   : > { %13623 = vst [vmem:[#allocation21_spill] sm:$0xff] %v10202_v49  ;;  %v10204_v47 = vadd.f32 %v1756_v10, %v1663_v17  ;;  %2429 = vmatmul.f32.gmra.mxu0 %v2428_v45  ;;  %v2260_v45 = vld [vmem:[%s13612_s28 + $0x58] sm:$0xff]  ;;  %v2443_v10 = vsub.f32 %v2441_v46, %v2442_v22 }
 0x160   : > { %2607 = vmatmul.f32.gmra.mxu1 %v10144_v12  ;;  %v2444_v35 = vand.u32 4294901760, %v2443_v10 }
 0x161   : > { %2734 = vmatmul.f32.gmra.mxu2 %v2425_v62  ;;  %v2449_v62 = vsub.f32 %v2306_v13, %v10209_v57 }
 0x162   : > { %2880 = vmatmul.f32.gmra.mxu3 %v2426_v38  ;;  %v2309_v38 = vsel %vm2274_vm2, %v2260_v45, 0 }
 0x163   : > { %v1798_v61 = vpop.f32.mrf.mxu0  ;;  %v2450_v34 = vand.u32 4294901760, %v2449_v62  ;;  %v10221_v49 = vand.u32 4294901760, %v2309_v38 }
 0x164   : > { %v1671_v21 = vpop.f32.mrf.mxu2  ;;  %v1799_v50 = vadd.f32 %v1798_v61, %v10099_v37 }
 0x165   : > { %v1760_v1 = vpop.f32.mrf.mxu3  ;;  %v10214_v17 = vpop.f32.mrf.mxu1  ;;  %13625 = vst [vmem:[#allocation23_spill] sm:$0xff] %v10221_v49  ;;  %v2451_v45 = vsub.f32 %v2449_v62, %v2450_v34 }
 0x166   : > { %v10216_v3 = vadd.f32 %v1760_v1, %v1671_v21  ;;  %2437 = vmatmul.f32.gmra.mxu0 %v2436_v16  ;;  %v2261_v21 = vld [vmem:[%s13612_s28 + $0x60] sm:$0xff] }
 0x167   : > { %v2452_v61 = vand.u32 4294901760, %v2451_v45 }
 0x168   : > { %2611 = vmatmul.f32.gmra.mxu1 %v10161_v4 }
 0x169   : > { %2739 = vmatmul.f32.gmra.mxu2 %v2433_v14  ;;  %v2457_v14 = vsub.f32 %v2309_v38, %v10221_v49  ;;  %v2262_v38 = vld [vmem:[%s13612_s28 + $0x68] sm:$0xff] }
 0x16a   : > { %2886 = vmatmul.f32.gmra.mxu3 %v2434_v32  ;;  %v2312_v32 = vsel %vm2274_vm2, %v2261_v21, 0 }
 0x16b   : > { %v1803_v24 = vpop.f32.mrf.mxu0  ;;  %v2458_v4 = vand.u32 4294901760, %v2457_v14  ;;  %v10232_v12 = vand.u32 4294901760, %v2312_v32 }
 0x16c   : > { %v1951_v52 = vpop.f32.mrf.mxu2 }
 0x16d   : > { %v2008_v1 = vpop.f32.mrf.mxu3  ;;  %v1864_v13 = vpop.f32.mrf.mxu1  ;;  %13626 = vst [vmem:[#allocation24_spill] sm:$0xff] %v10232_v12 }
 0x16e   : > { %v1865_v16 = vadd.f32 %v1864_v13, %v1799_v50  ;;  %2445 = vmatmul.f32.gmra.mxu0 %v2444_v35  ;;  %v1804_v50 = vadd.f32 %v1803_v24, %v10119_v23 }
 0x170   : > { %v1952_v10 = vadd.f32 %v1951_v52, %v1865_v16  ;;  %2615 = vmatmul.f32.gmra.mxu1 %v10178_v60 }
 0x171   : > { %2744 = vmatmul.f32.gmra.mxu2 %v2441_v46  ;;  %v2459_v46 = vsub.f32 %v2457_v14, %v2458_v4 }
 0x172   : > { %2892 = vmatmul.f32.gmra.mxu3 %v2442_v22  ;;  %v10230_v37 = vadd.f32 %v2008_v1, %v1952_v10  ;;  %v2465_v22 = vsub.f32 %v2312_v32, %v10232_v12  ;;  %v2315_v1 = vsel %vm2274_vm2, %v2262_v38, 0  ;;  %v2263_v32 = vld [vmem:[%s13612_s28 + $0x70] sm:$0xff] }
 0x173   : > { %v1808_v2 = vpop.f32.mrf.mxu0  ;;  %v2460_v23 = vand.u32 4294901760, %v2459_v46  ;;  %v10243_v10 = vand.u32 4294901760, %v2315_v1 }
 0x174   : > { %v1955_v35 = vpop.f32.mrf.mxu2  ;;  %v2466_v45 = vand.u32 4294901760, %v2465_v22 }
 0x175   : > { %v2012_v13 = vpop.f32.mrf.mxu3  ;;  %v1870_v52 = vpop.f32.mrf.mxu1  ;;  %13628 = vst [vmem:[#allocation26_spill] sm:$0xff] %v10243_v10 }
 0x176   : > { %v1871_v21 = vadd.f32 %v1870_v52, %v1804_v50  ;;  %2453 = vmatmul.f32.gmra.mxu0 %v2452_v61  ;;  %v1809_v50 = vadd.f32 %v1808_v2, %v10136_v58 }
 0x178   : > { %v1956_v16 = vadd.f32 %v1955_v35, %v1871_v21  ;;  %2619 = vmatmul.f32.gmra.mxu1 %v10195_v18 }
 0x179   : > { %2749 = vmatmul.f32.gmra.mxu2 %v2449_v62  ;;  %v2467_v62 = vsub.f32 %v2465_v22, %v2466_v45 }
 0x17a   : > { %2898 = vmatmul.f32.gmra.mxu3 %v2450_v34  ;;  %v10241_v24 = vadd.f32 %v2012_v13, %v1956_v16  ;;  %v2473_v34 = vsub.f32 %v2315_v1, %v10243_v10  ;;  %v2318_v13 = vsel %vm2274_vm2, %v2263_v32, 0 }
 0x17b   : > { %v1813_v60 = vpop.f32.mrf.mxu0  ;;  %v2468_v58 = vand.u32 4294901760, %v2467_v62  ;;  %v10254_v16 = vand.u32 4294901760, %v2318_v13 }
 0x17c   : > { %13627 = vst [vmem:[#allocation25_spill] sm:$0xff] %v10241_v24  ;;  %v1959_v61 = vpop.f32.mrf.mxu2  ;;  %v2474_v46 = vand.u32 4294901760, %v2473_v34  ;;  %v1814_v1 = vadd.f32 %v1813_v60, %v10153_v53 }
 0x17d   : > { %v2016_v52 = vpop.f32.mrf.mxu3  ;;  %v1876_v35 = vpop.f32.mrf.mxu1  ;;  %13629 = vst [vmem:[#allocation27_spill] sm:$0xff] %v10254_v16  ;;  %v2481_v32 = vsub.f32 %v2318_v13, %v10254_v16 }
 0x17e   : > { %v1877_v38 = vadd.f32 %v1876_v35, %v1809_v50  ;;  %2461 = vmatmul.f32.gmra.mxu0 %v2460_v23  ;;  %v13370_v50 = vmov 0  }
 0x180   : > { %v1960_v21 = vadd.f32 %v1959_v61, %v1877_v38  ;;  %2623 = vmatmul.f32.gmra.mxu1 %v10209_v57  ;;  %v666_v38 = vld [vmem:[%s10262_s23 + $0x10] sm:$0xff] }
 0x181   : > { %2754 = vmatmul.f32.gmra.mxu2 %v2457_v14 }
 0x182   : > { %2904 = vmatmul.f32.gmra.mxu3 %v2458_v4  ;;  %v10252_v2 = vadd.f32 %v2016_v52, %v1960_v21  ;;  %v2264_v4 = vld [vmem:[%s13612_s28 + $0x78] sm:$0xff]  ;;  %v2475_v52 = vsub.f32 %v2473_v34, %v2474_v46 }
 0x183   : > { %v1818_v24 = vpop.f32.mrf.mxu0  ;;  %8491 = vset.pattern.permute.xlu1 %v13370_v50  ;;  %v2321_v53 = vsel %vm2274_vm2, %v2264_v4, 0  ;;  %v2482_v50 = vand.u32 4294901760, %v2481_v32 }
 0x184   : > { %v1963_v23 = vpop.f32.mrf.mxu2  ;;  %v2476_v21 = vand.u32 4294901760, %v2475_v52  ;;  %v10273_v57 = vand.u32 4294901760, %v2321_v53  ;;  %v669_v52 = vld [vmem:[%s10262_s23 + $0x28] sm:$0xff] }
 0x185   : > { %v2020_v35 = vpop.f32.mrf.mxu3  ;;  %v1882_v14 = vpop.f32.mrf.mxu1  ;;  %v2483_v4 = vsub.f32 %v2481_v32, %v2482_v50 }
 0x186   : > { %v1883_v61 = vadd.f32 %v1882_v14, %v1814_v1  ;;  %2469 = vmatmul.f32.gmra.mxu0 %v2468_v58  ;;  %13631 = vst [vmem:[#allocation28_spill] sm:$0xff] %v10273_v57  ;;  %v1819_v1 = vadd.f32 %v1818_v24, %v10170_v8  ;;  %v664_v8 = vld [vmem:[%s10262_s23] sm:$0xff] }
 0x188   : > { %v1964_v60 = vadd.f32 %v1963_v23, %v1883_v61  ;;  %2627 = vmatmul.f32.gmra.mxu1 %v10221_v49  ;;  %v2265_v23 = vld [vmem:[%s13612_s28 + $0x80] sm:$0xff]  ;;  %v2489_v61 = vsub.f32 %v2321_v53, %v10273_v57  ;;  %v2484_v49 = vand.u32 4294901760, %v2483_v4 }
 0x189   : > { %2759 = vmatmul.f32.gmra.mxu2 %v2465_v22 }
 0x18a   : > { %2910 = vmatmul.f32.gmra.mxu3 %v2466_v45  ;;  %v10271_v62 = vadd.f32 %v2020_v35, %v1964_v60  ;;  %2164 = vperm.xlu1 %8491, %v666_v38   ;;  %v13632_v45 = vmov 0   ;;  %v2324_v38 = vsel %vm2274_vm2, %v2265_v23, 0  ;;  %v2490_v18 = vand.u32 4294901760, %v2489_v61 }
 0x18b   : > { %v1823_v58 = vpop.f32.mrf.mxu0  ;;  %v10287_v9 = vand.u32 4294901760, %v2324_v38 }
 0x18c   : > { %v1967_v13 = vpop.f32.mrf.mxu2  ;;  %v1824_v53 = vadd.f32 %v1823_v58, %v10187_v7  ;;  %v667_v7 = vld [vmem:[%s10262_s23 + $0x18] sm:$0xff] }
 0x18d   : > { %v2024_v14 = vpop.f32.mrf.mxu3  ;;  %v1888_v22 = vpop.f32.mrf.mxu1  ;;  %8489 = vset.pattern.permute.xlu2 %v13632_v45  ;;  %13633 = vst [vmem:[#allocation29_spill] sm:$0xff] %v10287_v9 }
 0x18e   : > { %v1889_v35 = vadd.f32 %v1888_v22, %v1819_v1  ;;  %2477 = vmatmul.f32.gmra.mxu0 %v2476_v21  ;;  %v2497_v22 = vsub.f32 %v2324_v38, %v10287_v9 }
 0x190   : > { %v1968_v60 = vadd.f32 %v1967_v13, %v1889_v35  ;;  %2631 = vmatmul.f32.gmra.mxu1 %v10232_v12 }
 0x191   : > { %2764 = vmatmul.f32.gmra.mxu2 %v2473_v34  ;;  %v2266_v34 = vld [vmem:[%s13612_s28 + $0x88] sm:$0xff] }
 0x192   : > { %2916 = vmatmul.f32.gmra.mxu3 %v2474_v46  ;;  %v10285_v24 = vadd.f32 %v2024_v14, %v1968_v60  ;;  %2173 = vperm.xlu1 %8491, %v669_v52   ;;  %v2491_v14 = vsub.f32 %v2489_v61, %v2490_v18  ;;  %v2327_v35 = vsel %vm2274_vm2, %v2266_v34, 0  ;;  %v2498_v60 = vand.u32 4294901760, %v2497_v22 }
 0x193   : > { %v1828_v21 = vpop.f32.mrf.mxu0 }
 0x194   : > { %v1971_v1 = vpop.f32.mrf.mxu2  ;;  %2158 = vperm.xlu2 %8489, %v664_v8   ;;  %v2492_v52 = vand.u32 4294901760, %v2491_v14  ;;  %v10299_v8 = vand.u32 4294901760, %v2327_v35 }
 0x195   : > { %v2028_v23 = vpop.f32.mrf.mxu3  ;;  %v1894_v46 = vpop.f32.mrf.mxu1 }
 0x196   : > { %v1895_v13 = vadd.f32 %v1894_v46, %v1824_v53  ;;  %2485 = vmatmul.f32.gmra.mxu0 %v2484_v49  ;;  %13634 = vst [vmem:[#allocation30_spill] sm:$0xff] %v10299_v8  ;;  %v1829_v49 = vadd.f32 %v1828_v21, %v10204_v47  ;;  %v2505_v34 = vsub.f32 %v2327_v35, %v10299_v8  ;;  %v668_v47 = vld [vmem:[%s10262_s23 + $0x20] sm:$0xff] }
 0x198   : > { %v1972_v4 = vadd.f32 %v1971_v1, %v1895_v13  ;;  %2635 = vmatmul.f32.gmra.mxu1 %v10243_v10  ;;  %v2267_v1 = vld [vmem:[%s13612_s28 + $0x90] sm:$0xff] }
 0x199   : > { %2769 = vmatmul.f32.gmra.mxu2 %v2481_v32  ;;  %v2330_v46 = vsel %vm2274_vm2, %v2267_v1, 0 }
 0x19a   : > { %2922 = vmatmul.f32.gmra.mxu3 %v2482_v50  ;;  %v10297_v58 = vadd.f32 %v2028_v23, %v1972_v4  ;;  %v2499_v23 = vsub.f32 %v2497_v22, %v2498_v60  ;;  %v2506_v4 = vand.u32 4294901760, %v2505_v34 }
 0x19b   : > { %v1833_v12 = vpop.f32.mrf.mxu0 }
 0x19c   : > { %v1975_v53 = vpop.f32.mrf.mxu2  ;;  %2167 = vperm.xlu2 %8489, %v667_v7   ;;  %v2500_v14 = vand.u32 4294901760, %v2499_v23  ;;  %v10311_v7 = vand.u32 4294901760, %v2330_v46 }
 0x19d   : > { %v2032_v38 = vpop.f32.mrf.mxu3  ;;  %v1900_v32 = vpop.f32.mrf.mxu1 }
 0x19e   : > { %v1901_v50 = vadd.f32 %v1900_v32, %v1829_v49  ;;  %2493 = vmatmul.f32.gmra.mxu0 %v2492_v52  ;;  %13636 = vst [vmem:[#allocation32_spill] sm:$0xff] %v10311_v7  ;;  %v1834_v52 = vadd.f32 %v1833_v12, %v10216_v3  ;;  %v2513_v1 = vsub.f32 %v2330_v46, %v10311_v7  ;;  %v671_v12 = vld [vmem:[%s10262_s23 + $0x38] sm:$0xff]  ;;  %v2269_v46 = vld [vmem:[%s13612_s28 + $0xa0] sm:$0xff] }
 0x1a0   : > { %v1976_v13 = vadd.f32 %v1975_v53, %v1901_v50  ;;  %2639 = vmatmul.f32.gmra.mxu1 %v10254_v16  ;;  %v2268_v53 = vld [vmem:[%s13612_s28 + $0x98] sm:$0xff] }
 0x1a1   : > { %2774 = vmatmul.f32.gmra.mxu2 %v2489_v61  ;;  %v2333_v32 = vsel %vm2274_vm2, %v2268_v53, 0 }
 0x1a2   : > { %2928 = vmatmul.f32.gmra.mxu3 %v2490_v18  ;;  %v10309_v21 = vadd.f32 %v2032_v38, %v1976_v13  ;;  %v2507_v38 = vsub.f32 %v2505_v34, %v2506_v4  ;;  %v2514_v13 = vand.u32 4294901760, %v2513_v1 }
 0x1a3   : > { %v2374_v10 = vpop.f32.mrf.mxu0 }
 0x1a4   : > { %13635 = vst [vmem:[#allocation31_spill] sm:$0xff] %v10309_v21  ;;  %v1979_v49 = vpop.f32.mrf.mxu2  ;;  %2170 = vperm.xlu2 %8489, %v668_v47   ;;  %v2508_v23 = vand.u32 4294901760, %v2507_v38  ;;  %v10323_v47 = vand.u32 4294901760, %v2333_v32 }
 0x1a5   : > { %v2036_v35 = vpop.f32.mrf.mxu3  ;;  %v1906_v61 = vpop.f32.mrf.mxu1 }
 0x1a6   : > { %v1907_v18 = vadd.f32 %v1906_v61, %v1834_v52  ;;  %2501 = vmatmul.f32.gmra.mxu0 %v2500_v14  ;;  %13637 = vst [vmem:[#allocation33_spill] sm:$0xff] %v10323_v47 }
 0x1a8   : > { %v1980_v50 = vadd.f32 %v1979_v49, %v1907_v18  ;;  %2643 = vmatmul.f32.gmra.mxu1 %v10273_v57 }
 0x1a9   : > { %2779 = vmatmul.f32.gmra.mxu2 %v2497_v22  ;;  %v2515_v22 = vsub.f32 %v2513_v1, %v2514_v13 }
 0x1aa   : > { %2934 = vmatmul.f32.gmra.mxu3 %v2498_v60  ;;  %v10321_v3 = vadd.f32 %v2036_v35, %v1980_v50  ;;  %v2521_v60 = vsub.f32 %v2333_v32, %v10323_v47  ;;  %v2336_v35 = vsel %vm2274_vm2, %v2269_v46, 0  ;;  %v2270_v32 = vld [vmem:[%s13612_s28 + $0xa8] sm:$0xff] }
 0x1ab   : > { %v2382_v16 = vpop.f32.mrf.mxu0  ;;  %v2516_v38 = vand.u32 4294901760, %v2515_v22 }
 0x1ac   : > { %v2700_v52 = vpop.f32.mrf.mxu2  ;;  %2179 = vperm.xlu2 %8489, %v671_v12   ;;  %v2522_v50 = vand.u32 4294901760, %v2521_v60  ;;  %v10333_v12 = vand.u32 4294901760, %v2336_v35 }
 0x1ad   : > { %v2839_v14 = vpop.f32.mrf.mxu3  ;;  %v2584_v49 = vpop.f32.mrf.mxu1 }
 0x1ae   : > { %v2585_v53 = vadd.f32 %v2584_v49, %v2374_v10  ;;  %2509 = vmatmul.f32.gmra.mxu0 %v2508_v23  ;;  %13639 = vst [vmem:[#allocation35_spill] sm:$0xff] %v10333_v12 }
 0x1b0   : > { %v2701_v61 = vadd.f32 %v2700_v52, %v2585_v53  ;;  %2647 = vmatmul.f32.gmra.mxu1 %v10287_v9  ;;  %v2523_v52 = vsub.f32 %v2521_v60, %v2522_v50 }
 0x1b1   : > { %2784 = vmatmul.f32.gmra.mxu2 %v2505_v34  ;;  %v2529_v34 = vsub.f32 %v2336_v35, %v10333_v12 }
 0x1b2   : > { %2940 = vmatmul.f32.gmra.mxu3 %v2506_v4  ;;  %v10331_v18 = vadd.f32 %v2839_v14, %v2701_v61  ;;  %v2339_v4 = vsel %vm2274_vm2, %v2270_v32, 0  ;;  %v2524_v53 = vand.u32 4294901760, %v2523_v52 }
 0x1b3   : > { %v2390_v57 = vpop.f32.mrf.mxu0  ;;  %v2530_v22 = vand.u32 4294901760, %v2529_v34  ;;  %v10343_v61 = vand.u32 4294901760, %v2339_v4 }
 0x1b4   : > { %13638 = vst [vmem:[#allocation34_spill] sm:$0xff] %v10331_v18  ;;  %v2705_v21 = vpop.f32.mrf.mxu2 }
 0x1b5   : > { %v2845_v10 = vpop.f32.mrf.mxu3  ;;  %v2588_v23 = vpop.f32.mrf.mxu1  ;;  %13641 = vst [vmem:[#allocation37_spill] sm:$0xff] %v10343_v61 }
 0x1b6   : > { %v2589_v46 = vadd.f32 %v2588_v23, %v2382_v16  ;;  %2517 = vmatmul.f32.gmra.mxu0 %v2516_v38  ;;  %v2271_v16 = vld [vmem:[%s13612_s28 + $0xb0] sm:$0xff] }
 0x1b8   : > { %v2706_v14 = vadd.f32 %v2705_v21, %v2589_v46  ;;  %2651 = vmatmul.f32.gmra.mxu1 %v10299_v8  ;;  %v2531_v21 = vsub.f32 %v2529_v34, %v2530_v22 }
 0x1b9   : > { %2789 = vmatmul.f32.gmra.mxu2 %v2513_v1  ;;  %v2537_v1 = vsub.f32 %v2339_v4, %v10343_v61  ;;  %v2272_v4 = vld [vmem:[%s13612_s28 + $0xb8] sm:$0xff] }
 0x1ba   : > { %2946 = vmatmul.f32.gmra.mxu3 %v2514_v13  ;;  %v10341_v49 = vadd.f32 %v2845_v10, %v2706_v14  ;;  %v2342_v13 = vsel %vm2274_vm2, %v2271_v16, 0  ;;  %v2532_v14 = vand.u32 4294901760, %v2531_v21  ;;  %v2345_v21 = vsel %vm2274_vm2, %v2272_v4, 0 }
 0x1bb   : > { %v2398_v9 = vpop.f32.mrf.mxu0  ;;  %v10351_v46 = vand.u32 4294901760, %v2342_v13 }
 0x1bc   : > { %13640 = vst [vmem:[#allocation36_spill] sm:$0xff] %v10341_v49  ;;  %v2710_v38 = vpop.f32.mrf.mxu2 }
 0x1bd   : > { %v2851_v35 = vpop.f32.mrf.mxu3  ;;  %v2592_v23 = vpop.f32.mrf.mxu1  ;;  %13642 = vst [vmem:[#allocation38_spill] sm:$0xff] %v10351_v46 }
 0x1be   : > { %v2593_v32 = vadd.f32 %v2592_v23, %v2390_v57  ;;  %2525 = vmatmul.f32.gmra.mxu0 %v2524_v53  ;;  %v2538_v57 = vand.u32 4294901760, %v2537_v1 }
 0x1c0   : > { %v2711_v10 = vadd.f32 %v2710_v38, %v2593_v32  ;;  %2655 = vmatmul.f32.gmra.mxu1 %v10311_v7  ;;  %v2545_v32 = vsub.f32 %v2342_v13, %v10351_v46  ;;  %v10363_v7 = vand.u32 4294901760, %v2345_v21 }
 0x1c1   : > { %2794 = vmatmul.f32.gmra.mxu2 %v2521_v60 }
 0x1c2   : > { %2952 = vmatmul.f32.gmra.mxu3 %v2522_v50  ;;  %v10353_v52 = vadd.f32 %v2851_v35, %v2711_v10  ;;  %v665_v50 = vld [vmem:[%s10262_s23 + $0x8] sm:$0xff]  ;;  %v2539_v35 = vsub.f32 %v2537_v1, %v2538_v57 }
 0x1c3   : > { %8490 = vset.pattern.permute.xlu0 %v13632_v45  ;;  %v2406_v53 = vpop.f32.mrf.mxu0  ;;  %v2546_v45 = vand.u32 4294901760, %v2545_v32 }
 0x1c4   : > { %13643 = vst [vmem:[#allocation39_spill] sm:$0xff] %v10353_v52  ;;  %v2715_v16 = vpop.f32.mrf.mxu2  ;;  %v2540_v13 = vand.u32 4294901760, %v2539_v35  ;;  %v648_v35 = vld [vmem:[%s10371_s27] sm:$0xff] }
 0x1c5   : > { %v2857_v38 = vpop.f32.mrf.mxu3  ;;  %v2596_v23 = vpop.f32.mrf.mxu1 }
 0x1c6   : > { %v2597_v60 = vadd.f32 %v2596_v23, %v2398_v9  ;;  %2533 = vmatmul.f32.gmra.mxu0 %v2532_v14  ;;  %v13396_v23 = vlaneseq }
 0x1c8   : > { %v2716_v10 = vadd.f32 %v2715_v16, %v2597_v60  ;;  %2659 = vmatmul.f32.gmra.mxu1 %v10323_v47  ;;  %v2547_v16 = vsub.f32 %v2545_v32, %v2546_v45  ;;  %v2553_v60 = vsub.f32 %v2345_v21, %v10363_v7  ;;  %v3216_v21 = vsel %vm2274_vm2, %v648_v35, 0 }
 0x1c9   : > { %2799 = vmatmul.f32.gmra.mxu2 %v2529_v34 }
 0x1ca   : > { %2161 = vperm.xlu0 %8490, %v665_v50   ;;  %v10365_v52 = vadd.f32 %v2857_v38, %v2716_v10  ;;  %2958 = vmatmul.f32.gmra.mxu3 %v2530_v22  ;;  %v10375_v50 = vand.u32 127, %v13396_v23  ;;  %v670_v22 = vld [vmem:[%s10262_s23 + $0x30] sm:$0xff]  ;;  %v2554_v8 = vand.u32 4294901760, %v2553_v60 }
 0x1cb   : > { %v2414_v9 = vpop.f32.mrf.mxu0 }
 0x1cc   : > { %13644 = vst [vmem:[#allocation40_spill] sm:$0xff] %v10365_v52  ;;  %v2720_v14 = vpop.f32.mrf.mxu2  ;;  %v10381_v47 = vadd.s32 128, %v10375_v50  ;;  %v2548_v52 = vand.u32 4294901760, %v2547_v16  ;;  %v2555_v16 = vsub.f32 %v2553_v60, %v2554_v8 }
 0x1cd   : > { %v2863_v4 = vpop.f32.mrf.mxu3  ;;  %v2600_v34 = vpop.f32.mrf.mxu1 }
 0x1ce   : > { %v2601_v38 = vadd.f32 %v2600_v34, %v2406_v53  ;;  %2541 = vmatmul.f32.gmra.mxu0 %v2540_v13  ;;  %v10387_v53 = vcvt.s32.f32 %v10375_v50  ;;  %v10390_v13 = vcvt.s32.f32 %v10381_v47 }
 0x1d0   : > { %v2721_v10 = vadd.f32 %v2720_v14, %v2601_v38  ;;  %2663 = vmatmul.f32.gmra.mxu1 %v10333_v12  ;;  %13647 = vst [vmem:[#allocation42_spill] sm:$0xff] %v10387_v53 }
 0x1d1   : > { %2804 = vmatmul.f32.gmra.mxu2 %v2537_v1  ;;  %13648 = vst [vmem:[#allocation43_spill] sm:$0xff] %v10390_v13  ;;  %v10392_v1 = vand.u32 4294901760, %v3216_v21  ;;  %v2556_v13 = vand.u32 4294901760, %v2555_v16 }
 0x1d2   : > { %2176 = vperm.xlu0 %8490, %v670_v22   ;;  %v10383_v49 = vadd.f32 %v2863_v4, %v2721_v10  ;;  %2964 = vmatmul.f32.gmra.mxu3 %v2538_v57  ;;  %v649_v4 = vld [vmem:[%s10371_s27 + $0x8] sm:$0xff] }
 0x1d3   : > { %v2422_v14 = vpop.f32.mrf.mxu0  ;;  %13649 = vst [vmem:[#allocation44_spill] sm:$0xff] %v10392_v1  ;;  %v10397_v57 = vsub.f32 %v3216_v21, %v10392_v1  ;;  %v3219_v53 = vsel %vm2274_vm2, %v649_v4, 0  ;;  %v650_v21 = vld [vmem:[%s10371_s27 + $0x10] sm:$0xff] }
 0x1d4   : > { %13646 = vst [vmem:[#allocation41_spill] sm:$0xff] %v10383_v49  ;;  %v2725_v34 = vpop.f32.mrf.mxu2 }
 0x1d5   : > { %v2869_v38 = vpop.f32.mrf.mxu3  ;;  %v2604_v23 = vpop.f32.mrf.mxu1  ;;  %13650 = vst [vmem:[#allocation45_spill] sm:$0xff] %v10397_v57 }
 0x1d6   : > { %v2605_v22 = vadd.f32 %v2604_v23, %v2414_v9  ;;  %2549 = vmatmul.f32.gmra.mxu0 %v2548_v52  ;;  %v10403_v23 = vand.u32 4294901760, %v10397_v57 }
 0x1d8   : > { %v2726_v10 = vadd.f32 %v2725_v34, %v2605_v22  ;;  %2667 = vmatmul.f32.gmra.mxu1 %v10343_v61  ;;  %13652 = vst [vmem:[#allocation47_spill] sm:$0xff] %v10403_v23  ;;  %v10405_v34 = vand.u32 4294901760, %v3219_v53  ;;  %v897_v22 = vpop.trf.xlu0 }
 0x1d9   : > { %2809 = vmatmul.f32.gmra.mxu2 %v2545_v32  ;;  %v10444_v18 = vperm.slane %v897_v22, 0 }
 0x1da   : > { %v10399_v35 = vadd.f32 %v2869_v38, %v2726_v10  ;;  %2970 = vmatmul.f32.gmra.mxu3 %v2546_v45  ;;  %13653 = vst [vmem:[#allocation48_spill] sm:$0xff] %v10405_v34  ;;  %v3262_v45 = vsub.f32 %v10397_v57, %v10403_v23  ;;  %v10412_v16 = vsub.f32 %v3219_v53, %v10405_v34  ;;  %v3222_v10 = vsel %vm2274_vm2, %v650_v21, 0 }
 0x1db   : > { %v2430_v12 = vpop.f32.mrf.mxu0  ;;  %v13657_v53 = vlaneseq }
 0x1dc   : > { %13651 = vst [vmem:[#allocation46_spill] sm:$0xff] %v10399_v35  ;;  %v2730_v49 = vpop.f32.mrf.mxu2 }
 0x1dd   : > { %v2875_v9 = vpop.f32.mrf.mxu3  ;;  %v2608_v52 = vpop.f32.mrf.mxu1  ;;  %13654 = vst [vmem:[#allocation49_spill] sm:$0xff] %v10412_v16  ;;  %v10423_v61 = vshrl.u32 %v13657_v53, 7  ;;  %v1506_v53 = vadd.f32 %v10146_v20, %v10026_v19 }
 0x1de   : > { %v2609_v32 = vadd.f32 %v2608_v52, %v2422_v14  ;;  %2557 = vmatmul.f32.gmra.mxu0 %v2556_v13  ;;  %v865_v14 = vpop.trf.xlu2 }
 0x1df   : > { %v1571_v22 = vadd.f32 %v10168_v44, %v1506_v53 }
 0x1e0   : > { %v2731_v38 = vadd.f32 %v2730_v49, %v2609_v32  ;;  %2671 = vmatmul.f32.gmra.mxu1 %v10351_v46  ;;  %v1490_v49 = vadd.f32 %v10071_v59, %v9970_v30  ;;  %v10420_v46 = vand.u32 4294901760, %v3262_v45  ;;  %v10436_v30 = vstv %s13437_s20  ;;  %v651_v45 = vld [vmem:[%s10371_s27 + $0x18] sm:$0xff] }
 0x1e1   : > { %2814 = vmatmul.f32.gmra.mxu2 %v2553_v60  ;;  %v10438_v59 = vperm.slane %v865_v14, 0  ;;  %v2085_v14 = vadd.s32 %v10436_v30, %v10423_v61 }
 0x1e2   : > { %v10414_v4 = vadd.f32 %v2875_v9, %v2731_v38  ;;  %2976 = vmatmul.f32.gmra.mxu3 %v2554_v8  ;;  %13656 = vst [vmem:[#allocation51_spill] sm:$0xff] %v10420_v46  ;;  %v10426_v8 = vand.u32 4294901760, %v10412_v16  ;;  %v10428_v9 = vand.u32 4294901760, %v3222_v10  ;;  %v1555_v21 = vadd.f32 %v10097_v27, %v1490_v49 }
 0x1e3   : > { %v2438_v13 = vpop.f32.mrf.mxu0  ;;  %v1502_v38 = vadd.f32 %v10129_v54, %v10001_v33  ;;  %v2109_v33 = vpop.trf.xlu1  ;;  %vm2199_vm3 = vcmp.ne.s32.totalorder %v2085_v14, %v10375_v50  ;;  %vm2200_vm4 = vcmp.ne.s32.totalorder %v2085_v14, %v10381_v47 }
 0x1e4   : > { %13655 = vst [vmem:[#allocation50_spill] sm:$0xff] %v10414_v4  ;;  %v2735_v60 = vpop.f32.mrf.mxu2  ;;  %v2141_v54 = vpop.trf.xlu0  ;;  %v3270_v19 = vsub.f32 %v10412_v16, %v10426_v8  ;;  %v10455_v20 = vsub.f32 %v3222_v10, %v10428_v9  ;;  %v915_v10 = vadd.f32 %v10438_v59, %v9839_v25 }
 0x1e5   : > { %v2881_v52 = vpop.f32.mrf.mxu3  ;;  %v2612_v32 = vpop.f32.mrf.mxu1  ;;  %13658 = vst [vmem:[#allocation52_spill] sm:$0xff] %v10426_v8  ;;  %v1567_v35 = vadd.f32 %v10151_v39, %v1502_v38  ;;  %v2039_v39 = vmul.f32 2.0, %v1555_v21  ;;  %v10467_v38 = vperm.slane %v2141_v54, 0  ;;  %v652_v54 = vld [vmem:[%s10371_s27 + $0x20] sm:$0xff] }
 0x1e6   : > { %13659 = vst [vmem:[#allocation53_spill] sm:$0xff] %v10428_v9  ;;  %v2613_v4 = vadd.f32 %v2612_v32, %v2430_v12  ;;  %3000 = vmatmul.f32.vlgmr.msra.gmra.mxu0 %v10028_v26  ;;  %v1498_v12 = vadd.f32 %v10112_v55, %v9991_v5  ;;  %v3225_v5 = vsel %vm2274_vm2, %v651_v45, 0  ;;  %v13661_v55 = vand.u32 4294901760, %v10019_v31 }
 0x1e7   : > { %13660 = vst [vmem:[#allocation54_spill] sm:$0xff] %v10455_v20  ;;  %v10472_v44 = vmul.f32 2.0, %v1567_v35  ;;  %v2079_v45 = vadd.s32 24, %v10423_v61  ;;  %v10485_v35 = vand.u32 4294901760, %v3225_v5  ;;  %v3228_v14 = vsel %vm2274_vm2, %v652_v54, 0 }
 0x1e8   : > { %v2736_v27 = vadd.f32 %v2735_v60, %v2613_v4  ;;  %2675 = vmatmul.f32.gmra.mxu1 %v10363_v7  ;;  %v1563_v49 = vadd.f32 %v10134_v41, %v1498_v12  ;;  %v10465_v60 = vperm.slane %v2109_v33, 0  ;;  %v916_v41 = vadd.f32 %v10444_v18, %v9839_v25 }
 0x1e9   : > { %3264 = vmatmul.f32.vlgmr.msra.gmra.mxu2 %v10420_v46  ;;  %13664 = vst [vmem:[#allocation57_spill] sm:$0xff] %v10485_v35  ;;  %v10487_v33 = vmul.f32 2.0, %v1571_v22  ;;  %v2055_v12 = vsub.f32 %v915_v10, %v2039_v39 }
 0x1ea   : > { %v10458_v4 = vadd.f32 %v2881_v52, %v2736_v27  ;;  %3346 = vmatmul.f32.vlgmr.msra.gmra.mxu3 %v10392_v1  ;;  %3521 = vmatpush.msra.mxu2 %v13661_v55  ;;  %v1510_v52 = vadd.f32 %v10163_v42, %v10046_v0  ;;  %v10480_v27 = vand.u32 4294901760, %v3270_v19  ;;  %v2040_v0 = vmul.f32 2.0, %v10230_v37 }
 0x1eb   : > { %v2446_v32 = vpop.f32.mrf.mxu0  ;;  %3571 = vmatpush.msra.mxu3 %v10011_v11  ;;  %v10483_v11 = vand.u32 4294901760, %v10455_v20  ;;  %v921_v19 = vadd.f32 %v10438_v59, %v9858_v48  ;;  %v2088_v37 = vadd.s32 %v10436_v30, %v2079_v45 }
 0x1ec   : > { %v2740_v31 = vpop.f32.mrf.mxu2  ;;  %13662 = vst [vmem:[#allocation55_spill] sm:$0xff] %v10480_v27  ;;  %v2056_v22 = vsub.f32 %v916_v41, %v2040_v0  ;;  %v10524_v0 = vmul.f32 2.0, %v1563_v49  ;;  %v10536_v49 = vand.u32 4294901760, %v3228_v14 }
 0x1ed   : > { %v2887_v21 = vpop.f32.mrf.mxu3  ;;  %v2616_v53 = vpop.f32.mrf.mxu1  ;;  %13663 = vst [vmem:[#allocation56_spill] sm:$0xff] %v10483_v11  ;;  %v3278_v10 = vsub.f32 %v10455_v20, %v10483_v11  ;;  %vm2205_vm9 = vcmp.ne.s32.totalorder %v2088_v37, %v10375_v50  ;;  %vm2206_vm10 = vcmp.ne.s32.totalorder %v2088_v37, %v10381_v47 }
 0x1ee   : > { %v2617_v42 = vadd.f32 %v2616_v53, %v2438_v13  ;;  %v2159_v25 = vpop.permute.xlu2 %2158  ;;  %3004 = vmatmul.f32.gmra.mxu0 %v10048_v43  ;;  %v10503_v13 = vadd.f32 %v10438_v59, %v9837_v15  ;;  %v10522_v53 = vadd.f32 %v10438_v59, %v9835_v63  ;;  %13668 = vst [vmem:[#allocation61_spill] sm:$0xff] %v10536_v49 }
 0x1ef   : > { %vm2183_vm5 = vcmp.eq.s32.totalorder %v2159_v25, %v10465_v60  ;;  %vm2184_vm6 = vcmp.eq.s32.totalorder %v2159_v25, %v10467_v38  ;;  %v2061_v25 = vsub.f32 %v921_v19, %v10472_v44 }
 0x1f0   : > { %v2741_v55 = vadd.f32 %v2740_v31, %v2617_v42  ;;  %vm2215_vm7 = vmand %vm2183_vm5, %vm2199_vm3  ;;  %3114 = vmatmul.f32.vlgmr.msra.gmra.mxu1 %v10028_v26  ;;  %v10511_v31 = vsub.f32 %v3225_v5, %v10485_v35  ;;  %v1575_v26 = vadd.f32 %v10185_v51, %v1510_v52  ;;  %v10528_v5 = vadd.f32 %v10438_v59, %v9856_v6 }
 0x1f1   : > { %vm2216_vm8 = vmand %vm2184_vm6, %vm2200_vm4  ;;  %v10505_v39 = vsel %vm2215_vm7, %v2055_v12, 1e+30   ;;  %3272 = vmatmul.f32.gmra.mxu2 %v10480_v27  ;;  %v2078_v51 = vadd.s32 16, %v10423_v61  ;;  %v2046_v52 = vmul.f32 2.0, %v10271_v62  ;;  %v922_v12 = vadd.f32 %v10444_v18, %v9858_v48 }
 0x1f2   : > { %13665 = vst [vmem:[#allocation58_spill] sm:$0xff] %v10505_v39  ;;  %v10515_v41 = vadd.f32 %v2887_v21, %v2741_v55  ;;  %v10517_v45 = vsel %vm2216_vm8, %v2056_v22, 1e+30   ;;  %3350 = vmatmul.f32.gmra.mxu3 %v10405_v34  ;;  %v2080_v55 = vadd.s32 32, %v10423_v61  ;;  %v10539_v27 = vand.u32 4294901760, %v3278_v10 }
 0x1f3   : > { %13666 = vst [vmem:[#allocation59_spill] sm:$0xff] %v10511_v31  ;;  %v2454_v42 = vpop.f32.mrf.mxu0  ;;  %v2059_v44 = vsub.f32 %v10503_v13, %v10524_v0  ;;  %v10544_v62 = vand.u32 4294901760, %v10511_v31  ;;  %v10546_v19 = vmul.f32 2.0, %v1575_v26  ;;  %v2063_v39 = vsub.f32 %v10522_v53, %v10487_v33  ;;  %v653_v26 = vld [vmem:[%s10371_s27 + $0x28] sm:$0xff] }
 0x1f4   : > { %13667 = vst [vmem:[#allocation60_spill] sm:$0xff] %v10517_v45  ;;  %v2745_v21 = vpop.f32.mrf.mxu2  ;;  %v1518_v10 = vadd.f32 %v10197_v56, %v10085_v40  ;;  %v2087_v13 = vadd.s32 %v10436_v30, %v2078_v51  ;;  %v10563_v33 = vsub.f32 %v3228_v14, %v10536_v49  ;;  %v924_v40 = vadd.f32 %v10444_v18, %v9835_v63 }
 0x1f5   : > { %v2893_v54 = vpop.f32.mrf.mxu3  ;;  %v2620_v22 = vpop.f32.mrf.mxu1  ;;  %13669 = vst [vmem:[#allocation62_spill] sm:$0xff] %v10539_v27  ;;  %v2048_v53 = vmul.f32 2.0, %v10285_v24  ;;  %v3231_v63 = vsel %vm2274_vm2, %v653_v26, 0 }
 0x1f6   : > { %13670 = vst [vmem:[#allocation63_spill] sm:$0xff] %v10544_v62  ;;  %v2621_v46 = vadd.f32 %v2620_v22, %v2446_v32  ;;  %v2168_v48 = vpop.permute.xlu2 %2167  ;;  %3008 = vmatmul.f32.gmra.mxu0 %v10068_v29  ;;  %v2062_v32 = vsub.f32 %v922_v12, %v2046_v52  ;;  %v2089_v22 = vadd.s32 %v10436_v30, %v2080_v55  ;;  %v10593_v12 = vand.u32 4294901760, %v10563_v33 }
 0x1f7   : > { %vm2189_vm11 = vcmp.eq.s32.totalorder %v2168_v48, %v10465_v60  ;;  %vm2190_vm12 = vcmp.eq.s32.totalorder %v2168_v48, %v10467_v38  ;;  %13671 = vst [vmem:[#allocation64_spill] sm:$0xff] %v10563_v33  ;;  %v1583_v37 = vadd.f32 %v10214_v17, %v1518_v10  ;;  %vm2203_vm15 = vcmp.ne.s32.totalorder %v2087_v13, %v10375_v50 }
 0x1f8   : > { %v2746_v0 = vadd.f32 %v2745_v21, %v2621_v46  ;;  %vm2221_vm13 = vmand %vm2189_vm11, %vm2205_vm9  ;;  %3118 = vmatmul.f32.gmra.mxu1 %v10048_v43  ;;  %v920_v46 = vadd.f32 %v10444_v18, %v9837_v15  ;;  %v3286_v43 = vsub.f32 %v10511_v31, %v10544_v62  ;;  %v2081_v15 = vadd.s32 40, %v10423_v61  ;;  %13674 = vst [vmem:[#allocation67_spill] sm:$0xff] %v10593_v12 }
 0x1f9   : > { %vm2222_vm14 = vmand %vm2190_vm12, %vm2206_vm10  ;;  %v10569_v56 = vsel %vm2221_vm13, %v2061_v25, 1e+30   ;;  %3280 = vmatmul.f32.gmra.mxu2 %v10539_v27  ;;  %v2044_v25 = vmul.f32 2.0, %v10252_v2  ;;  %vm2204_vm0 = vcmp.ne.s32.totalorder %v2087_v13, %v10381_v47  ;;  %vm2207_vm3 = vcmp.ne.s32.totalorder %v2089_v22, %v10375_v50 }
 0x1fa   : > { %13672 = vst [vmem:[#allocation65_spill] sm:$0xff] %v10569_v56  ;;  %v10577_v14 = vadd.f32 %v2893_v54, %v2746_v0  ;;  %v10579_v51 = vsel %vm2222_vm14, %v2062_v32, 1e+30   ;;  %3354 = vmatmul.f32.gmra.mxu3 %v10428_v9  ;;  %v2083_v54 = vadd.s32 56, %v10423_v61  ;;  %v10597_v55 = vand.u32 4294901760, %v3286_v43 }
 0x1fb   : > { %13673 = vst [vmem:[#allocation66_spill] sm:$0xff] %v10579_v51  ;;  %v10585_v52 = vpop.f32.mrf.mxu0  ;;  %v10599_v48 = vand.u32 4294901760, %v3231_v63  ;;  %v2064_v10 = vsub.f32 %v924_v40, %v2048_v53  ;;  %v2060_v0 = vsub.f32 %v920_v46, %v2044_v25  ;;  %vm2208_vm7 = vcmp.ne.s32.totalorder %v2089_v22, %v10381_v47  ;;  %v654_v40 = vld [vmem:[%s10371_s27 + $0x30] sm:$0xff]  ;;  %v13696_v51 = vld [vmem:[#allocation16_spill] sm:$0xff] }
 0x1fc   : > { %v2750_v21 = vpop.f32.mrf.mxu2  ;;  %v2165_v24 = vpop.permute.xlu1 %2164  ;;  %13675 = vst [vmem:[#allocation68_spill] sm:$0xff] %v10597_v55  ;;  %v2092_v13 = vadd.s32 %v10436_v30, %v2083_v54  ;;  %v926_v53 = vadd.f32 %v10444_v18, %v9856_v6  ;;  %v3234_v6 = vsel %vm2274_vm2, %v654_v40, 0  ;;  %v2065_v22 = vsub.f32 %v10528_v5, %v10546_v19 }
 0x1fd   : > { %v2624_v17 = vpop.f32.mrf.mxu1  ;;  %vm2187_vm4 = vcmp.eq.s32.totalorder %v2165_v24, %v10465_v60  ;;  %vm2188_vm5 = vcmp.eq.s32.totalorder %v2165_v24, %v10467_v38  ;;  %v2899_v2 = vpop.f32.mrf.mxu3  ;;  %13676 = vst [vmem:[#allocation69_spill] sm:$0xff] %v10599_v48 }
 0x1fe   : > { %v2625_v26 = vadd.f32 %v2624_v17, %v2454_v42  ;;  %vm2219_vm6 = vmand %vm2187_vm4, %vm2203_vm15  ;;  %v2171_v32 = vpop.permute.xlu2 %2170  ;;  %3012 = vmatmul.f32.gmra.mxu0 %v10087_v28  ;;  %v2090_v42 = vadd.s32 %v10436_v30, %v2081_v15  ;;  %v10629_v15 = vsub.f32 %v3231_v63, %v10599_v48  ;;  %v2053_v17 = vmul.f32 2.0, %v1583_v37 }
 0x1ff   : > { %vm2220_vm8 = vmand %vm2188_vm5, %vm2204_vm0  ;;  %v10607_v24 = vsel %vm2219_vm6, %v2059_v44, 1e+30   ;;  %vm2191_vm9 = vcmp.eq.s32.totalorder %v2171_v32, %v10465_v60  ;;  %vm2192_vm10 = vcmp.eq.s32.totalorder %v2171_v32, %v10467_v38  ;;  %v3294_v44 = vsub.f32 %v10563_v33, %v10593_v12 }
 0x200   : > { %13677 = vst [vmem:[#allocation70_spill] sm:$0xff] %v10607_v24  ;;  %v2751_v46 = vadd.f32 %v2750_v21, %v2625_v26  ;;  %v10613_v43 = vsel %vm2220_vm8, %v2060_v0, 1e+30   ;;  %vm2223_vm11 = vmand %vm2191_vm9, %vm2207_vm3  ;;  %3122 = vmatmul.f32.gmra.mxu1 %v10068_v29  ;;  %v2050_v29 = vmul.f32 2.0, %v10297_v58  ;;  %vm2209_vm13 = vcmp.ne.s32.totalorder %v2090_v42, %v10375_v50 }
 0x201   : > { %13678 = vst [vmem:[#allocation71_spill] sm:$0xff] %v10613_v43  ;;  %vm2224_vm12 = vmand %vm2192_vm10, %vm2208_vm7  ;;  %v10625_v25 = vsel %vm2223_vm11, %v2063_v39, 1e+30   ;;  %3288 = vmatmul.f32.gmra.mxu2 %v10597_v55  ;;  %v929_v39 = vadd.f32 %v10438_v59, %v9873_v36  ;;  %v2054_v58 = vmul.f32 2.0, %v10321_v3  ;;  %vm2210_vm14 = vcmp.ne.s32.totalorder %v2090_v42, %v10381_v47 }
 0x202   : > { %13679 = vst [vmem:[#allocation72_spill] sm:$0xff] %v10625_v25  ;;  %v10632_v21 = vadd.f32 %v2899_v2, %v2751_v46  ;;  %v10634_v54 = vsel %vm2224_vm12, %v2064_v10, 1e+30   ;;  %3358 = vmatmul.f32.gmra.mxu3 %v10485_v35  ;;  %vm2213_vm15 = vcmp.ne.s32.totalorder %v2092_v13, %v10375_v50  ;;  %v10646_v10 = vand.u32 4294901760, %v3294_v44  ;;  %v13684_v44 = vld [vmem:[#allocation10_spill] sm:$0xff] }
 0x203   : > { %13680 = vst [vmem:[#allocation73_spill] sm:$0xff] %v10629_v15  ;;  %v2470_v26 = vpop.f32.mrf.mxu0  ;;  %v10651_v19 = vand.u32 4294901760, %v10629_v15  ;;  %v10653_v37 = vand.u32 4294901760, %v3234_v6  ;;  %v2066_v3 = vsub.f32 %v926_v53, %v2050_v29  ;;  %v930_v32 = vadd.f32 %v10444_v18, %v9873_v36  ;;  %v655_v36 = vld [vmem:[%s10371_s27 + $0x38] sm:$0xff] }
 0x204   : > { %v2755_v63 = vpop.f32.mrf.mxu2  ;;  %v2174_v2 = vpop.permute.xlu1 %2173  ;;  %13681 = vst [vmem:[#allocation74_spill] sm:$0xff] %v10646_v10  ;;  %vm2214_vm5 = vcmp.ne.s32.totalorder %v2092_v13, %v10381_v47  ;;  %v3237_v13 = vsel %vm2274_vm2, %v655_v36, 0 }
 0x205   : > { %v2628_v0 = vpop.f32.mrf.mxu1  ;;  %vm2193_vm0 = vcmp.eq.s32.totalorder %v2174_v2, %v10465_v60  ;;  %vm2194_vm3 = vcmp.eq.s32.totalorder %v2174_v2, %v10467_v38  ;;  %v2905_v5 = vpop.f32.mrf.mxu3  ;;  %13682 = vst [vmem:[#allocation75_spill] sm:$0xff] %v10651_v19  ;;  %v2069_v2 = vsub.f32 %v929_v39, %v2053_v17  ;;  %v3302_v42 = vsub.f32 %v10629_v15, %v10651_v19 }
 0x206   : > { %13683 = vst [vmem:[#allocation76_spill] sm:$0xff] %v10653_v37  ;;  %v2629_v40 = vadd.f32 %v2628_v0, %v10585_v52  ;;  %vm2225_vm4 = vmand %vm2193_vm0, %vm2209_vm13  ;;  %v2180_v46 = vpop.permute.xlu2 %2179  ;;  %3016 = vmatmul.f32.gmra.mxu0 %v13684_v44  ;;  %v2070_v52 = vsub.f32 %v930_v32, %v2054_v58 }
 0x207   : > { %vm2226_vm6 = vmand %vm2194_vm3, %vm2210_vm14  ;;  %v10664_v55 = vsel %vm2225_vm4, %v2065_v22, 1e+30   ;;  %vm2197_vm7 = vcmp.eq.s32.totalorder %v2180_v46, %v10465_v60  ;;  %vm2198_vm8 = vcmp.eq.s32.totalorder %v2180_v46, %v10467_v38  ;;  %v10680_v22 = vsub.f32 %v3234_v6, %v10653_v37 }
 0x208   : > { %v2756_v53 = vadd.f32 %v2755_v63, %v2629_v40  ;;  %v10669_v29 = vsel %vm2226_vm6, %v2066_v3, 1e+30   ;;  %vm2229_vm9 = vmand %vm2197_vm7, %vm2213_vm15  ;;  %3126 = vmatmul.f32.gmra.mxu1 %v10087_v28  ;;  %v10688_v32 = vand.u32 4294901760, %v3302_v42  ;;  %v10693_v46 = vand.u32 4294901760, %v3237_v13 }
 0x209   : > { %vm2230_vm10 = vmand %vm2198_vm8, %vm2214_vm5  ;;  %v10674_v39 = vsel %vm2229_vm9, %v2069_v2, 1e+30   ;;  %3296 = vmatmul.f32.gmra.mxu2 %v10646_v10  ;;  %13685 = vst [vmem:[#allocation10_spill] sm:$0xff] %v10680_v22  ;;  %v10691_v40 = vand.u32 4294901760, %v10680_v22 }
 0x20a   : > { %v10682_v17 = vadd.f32 %v2905_v5, %v2756_v53  ;;  %v10684_v58 = vsel %vm2230_vm10, %v2070_v52, 1e+30   ;;  %3362 = vmatmul.f32.gmra.mxu3 %v10536_v49  ;;  %13686 = vst [vmem:[#allocation77_spill] sm:$0xff] %v10688_v32  ;;  %v13689_v5 = vld [vmem:[#allocation11_spill] sm:$0xff]  ;;  %v10701_v52 = vsub.f32 %v3237_v13, %v10693_v46 }
 0x20b   : > { %v2478_v28 = vpop.f32.mrf.mxu0  ;;  %13687 = vst [vmem:[#allocation78_spill] sm:$0xff] %v10691_v40  ;;  %v3310_v36 = vsub.f32 %v10680_v22, %v10691_v40 }
 0x20c   : > { %v2760_v63 = vpop.f32.mrf.mxu2  ;;  %13688 = vst [vmem:[#allocation79_spill] sm:$0xff] %v10693_v46 }
 0x20d   : > { %v2632_v0 = vpop.f32.mrf.mxu1  ;;  %v2911_v3 = vpop.f32.mrf.mxu3  ;;  %13690 = vst [vmem:[#allocation11_spill] sm:$0xff] %v10701_v52  ;;  %v10706_v10 = vand.u32 4294901760, %v3310_v36 }
 0x20e   : > { %v2633_v6 = vadd.f32 %v2632_v0, %v2470_v26  ;;  %3020 = vmatmul.f32.gmra.mxu0 %v13689_v5 }
 0x20f   : > { %13691 = vst [vmem:[#allocation80_spill] sm:$0xff] %v10706_v10 }
 0x210   : > { %v2761_v2 = vadd.f32 %v2760_v63, %v2633_v6  ;;  %3130 = vmatmul.f32.gmra.mxu1 %v13684_v44  ;;  %v10709_v44 = vand.u32 4294901760, %v10701_v52  ;;  %v13693_v6 = vld [vmem:[#allocation20_spill] sm:$0xff] }
 0x211   : > { %3304 = vmatmul.f32.gmra.mxu2 %v10688_v32 }
 0x212   : > { %v10703_v53 = vadd.f32 %v2911_v3, %v2761_v2  ;;  %3366 = vmatmul.f32.gmra.mxu3 %v10599_v48  ;;  %13692 = vst [vmem:[#allocation81_spill] sm:$0xff] %v10709_v44  ;;  %v3318_v13 = vsub.f32 %v10701_v52, %v10709_v44 }
 0x213   : > { %v2486_v42 = vpop.f32.mrf.mxu0 }
 0x214   : > { %v2765_v27 = vpop.f32.mrf.mxu2  ;;  %v10719_v43 = vand.u32 4294901760, %v3318_v13 }
 0x215   : > { %v2636_v26 = vpop.f32.mrf.mxu1  ;;  %v2917_v0 = vpop.f32.mrf.mxu3 }
 0x216   : > { %v2637_v63 = vadd.f32 %v2636_v26, %v2478_v28  ;;  %3024 = vmatmul.f32.gmra.mxu0 %v13693_v6  ;;  %13694 = vst [vmem:[#allocation20_spill] sm:$0xff] %v10719_v43  ;;  %v13695_v26 = vld [vmem:[#allocation13_spill] sm:$0xff] }
 0x218   : > { %v2766_v32 = vadd.f32 %v2765_v27, %v2637_v63  ;;  %3134 = vmatmul.f32.gmra.mxu1 %v13689_v5 }
 0x219   : > { %3312 = vmatmul.f32.gmra.mxu2 %v10706_v10 }
 0x21a   : > { %v10716_v3 = vadd.f32 %v2917_v0, %v2766_v32  ;;  %3370 = vmatmul.f32.gmra.mxu3 %v10653_v37 }
 0x21b   : > { %v2494_v2 = vpop.f32.mrf.mxu0 }
 0x21c   : > { %v2770_v36 = vpop.f32.mrf.mxu2 }
 0x21d   : > { %v2640_v45 = vpop.f32.mrf.mxu1  ;;  %v2923_v24 = vpop.f32.mrf.mxu3 }
 0x21e   : > { %v2641_v28 = vadd.f32 %v2640_v45, %v2486_v42  ;;  %3028 = vmatmul.f32.gmra.mxu0 %v13695_v26 }
 0x220   : > { %v2771_v27 = vadd.f32 %v2770_v36, %v2641_v28  ;;  %3138 = vmatmul.f32.gmra.mxu1 %v13693_v6 }
 0x221   : > { %3320 = vmatmul.f32.gmra.mxu2 %v10719_v43 }
 0x222   : > { %v10724_v5 = vadd.f32 %v2923_v24, %v2771_v27  ;;  %3374 = vmatmul.f32.gmra.mxu3 %v10693_v46  ;;  %v13697_v27 = vld [vmem:[#allocation18_spill] sm:$0xff] }
 0x223   : > { %v2502_v32 = vpop.f32.mrf.mxu0 }
 0x224   : > { %v2775_v0 = vpop.f32.mrf.mxu2 }
 0x225   : > { %v2644_v63 = vpop.f32.mrf.mxu1  ;;  %v2929_v10 = vpop.f32.mrf.mxu3 }
 0x226   : > { %v2645_v56 = vadd.f32 %v2644_v63, %v2494_v2  ;;  %3032 = vmatmul.f32.gmra.mxu0 %v13696_v51  ;;  %v13698_v2 = vld [vmem:[#allocation14_spill] sm:$0xff] }
 0x228   : > { %v2776_v13 = vadd.f32 %v2775_v0, %v2645_v56  ;;  %3142 = vmatmul.f32.gmra.mxu1 %v13695_v26  ;;  %v13699_v26 = vld [vmem:[#allocation17_spill] sm:$0xff] }
 0x229   : > { %3398 = vmatmul.f32.vlgmr.msrb.gmra.mxu2 %v10397_v57  ;;  %v1494_v0 = vadd.f32 %v13699_v26, %v13698_v2  ;;  %v13704_v26 = vld [vmem:[#allocation15_spill] sm:$0xff] }
 0x22a   : > { %v10730_v45 = vadd.f32 %v2929_v10, %v2776_v13  ;;  %3457 = vmatmul.f32.vlgmr.msrb.gmra.mxu3 %v10403_v23  ;;  %v2077_v10 = vadd.s32 8, %v10423_v61  ;;  %v13700_v23 = vld [vmem:[#allocation19_spill] sm:$0xff] }
 0x22b   : > { %v2510_v24 = vpop.f32.mrf.mxu0 }
 0x22c   : > { %v2780_v42 = vpop.f32.mrf.mxu2 }
 0x22d   : > { %v2648_v6 = vpop.f32.mrf.mxu1  ;;  %v2935_v36 = vpop.f32.mrf.mxu3 }
 0x22e   : > { %v2649_v28 = vadd.f32 %v2648_v6, %v2502_v32  ;;  %3036 = vmatmul.f32.gmra.mxu0 %v13697_v27  ;;  %v1559_v32 = vadd.f32 %v13700_v23, %v1494_v0  ;;  %v13703_v23 = vld [vmem:[#allocation9_spill] sm:$0xff] }
 0x22f   : > { %v1514_v0 = vadd.f32 %v13704_v26, %v13703_v23 }
 0x230   : > { %v2781_v43 = vadd.f32 %v2780_v42, %v2649_v28  ;;  %3146 = vmatmul.f32.gmra.mxu1 %v13696_v51  ;;  %v13701_v28 = vld [vmem:[#allocation22_spill] sm:$0xff]  ;;  %v2086_v51 = vadd.s32 %v10436_v30, %v2077_v10  ;;  %v13705_v10 = vld [vmem:[#allocation25_spill] sm:$0xff] }
 0x231   : > { %3403 = vmatmul.f32.gmra.mxu2 %v10412_v16  ;;  %v2041_v16 = vmul.f32 2.0, %v1559_v32 }
 0x232   : > { %v10736_v56 = vadd.f32 %v2935_v36, %v2781_v43  ;;  %3463 = vmatmul.f32.gmra.mxu3 %v10426_v8  ;;  %v13702_v36 = vld [vmem:[#allocation12_spill] sm:$0xff]  ;;  %vm2201_vm2 = vcmp.ne.s32.totalorder %v2086_v51, %v10375_v50  ;;  %vm2202_vm11 = vcmp.ne.s32.totalorder %v2086_v51, %v10381_v47 }
 0x233   : > { %v2518_v63 = vpop.f32.mrf.mxu0  ;;  %v917_v8 = vadd.f32 %v10438_v59, %v13702_v36  ;;  %v918_v2 = vadd.f32 %v10444_v18, %v13702_v36 }
 0x234   : > { %v2785_v13 = vpop.f32.mrf.mxu2 }
 0x235   : > { %v2652_v6 = vpop.f32.mrf.mxu1  ;;  %v2941_v57 = vpop.f32.mrf.mxu3  ;;  %v2057_v36 = vsub.f32 %v917_v8, %v2041_v16  ;;  %v13708_v16 = vld [vmem:[#allocation8_spill] sm:$0xff] }
 0x236   : > { %v2653_v42 = vadd.f32 %v2652_v6, %v2510_v24  ;;  %3040 = vmatmul.f32.gmra.mxu0 %v13701_v28  ;;  %v927_v8 = vadd.f32 %v10438_v59, %v13708_v16 }
 0x238   : > { %v2786_v43 = vadd.f32 %v2785_v13, %v2653_v42  ;;  %3150 = vmatmul.f32.gmra.mxu1 %v13697_v27  ;;  %v2082_v27 = vadd.s32 48, %v10423_v61  ;;  %v2042_v13 = vmul.f32 2.0, %v13705_v10  ;;  %v13706_v42 = vld [vmem:[#allocation21_spill] sm:$0xff] }
 0x239   : > { %3408 = vmatmul.f32.gmra.mxu2 %v10455_v20  ;;  %v1579_v20 = vadd.f32 %v13706_v42, %v1514_v0 }
 0x23a   : > { %v10753_v24 = vadd.f32 %v2941_v57, %v2786_v43  ;;  %3469 = vmatmul.f32.gmra.mxu3 %v10483_v11  ;;  %v2058_v43 = vsub.f32 %v918_v2, %v2042_v13  ;;  %v13707_v11 = vld [vmem:[#allocation23_spill] sm:$0xff]  ;;  %v2091_v51 = vadd.s32 %v10436_v30, %v2082_v27  ;;  %v928_v30 = vadd.f32 %v10444_v18, %v13708_v16 }
 0x23b   : > { %v2526_v6 = vpop.f32.mrf.mxu0  ;;  %v2051_v0 = vmul.f32 2.0, %v1579_v20  ;;  %v13709_v2 = vld [vmem:[#allocation31_spill] sm:$0xff] }
 0x23c   : > { %v2162_v32 = vpop.permute.xlu0 %2161  ;;  %v2790_v57 = vpop.f32.mrf.mxu2  ;;  %v2052_v13 = vmul.f32 2.0, %v13709_v2  ;;  %vm2211_vm0 = vcmp.ne.s32.totalorder %v2091_v51, %v10375_v50  ;;  %vm2212_vm3 = vcmp.ne.s32.totalorder %v2091_v51, %v10381_v47 }
 0x23d   : > { %vm2185_vm12 = vcmp.eq.s32.totalorder %v2162_v32, %v10465_v60  ;;  %vm2186_vm13 = vcmp.eq.s32.totalorder %v2162_v32, %v10467_v38  ;;  %v2656_v23 = vpop.f32.mrf.mxu1  ;;  %v2947_v26 = vpop.f32.mrf.mxu3 }
 0x23e   : > { %vm2217_vm14 = vmand %vm2185_vm12, %vm2201_vm2  ;;  %v2657_v10 = vadd.f32 %v2656_v23, %v2518_v63  ;;  %3044 = vmatmul.f32.gmra.mxu0 %v13707_v11  ;;  %v2067_v63 = vsub.f32 %v927_v8, %v2051_v0  ;;  %v2068_v27 = vsub.f32 %v928_v30, %v2052_v13  ;;  %v13710_v23 = vld [vmem:[#allocation24_spill] sm:$0xff]  ;;  %v13711_v8 = vld [vmem:[#allocation26_spill] sm:$0xff] }
 0x23f   : > { %vm2218_vm15 = vmand %vm2186_vm13, %vm2202_vm11  ;;  %v10763_v61 = vsel %vm2217_vm14, %v2057_v36, 1e+30  }
 0x240   : > { %v10767_v25 = vsel %vm2218_vm15, %v2058_v43, 1e+30   ;;  %v2791_v32 = vadd.f32 %v2790_v57, %v2657_v10  ;;  %3154 = vmatmul.f32.gmra.mxu1 %v13701_v28 }
 0x241   : > { %3413 = vmatmul.f32.gmra.mxu2 %v10511_v31 }
 0x242   : > { %v10774_v42 = vadd.f32 %v2947_v26, %v2791_v32  ;;  %3475 = vmatmul.f32.gmra.mxu3 %v10544_v62 }
 0x243   : > { %v2534_v20 = vpop.f32.mrf.mxu0 }
 0x244   : > { %v2177_v59 = vpop.permute.xlu0 %2176  ;;  %v2795_v28 = vpop.f32.mrf.mxu2 }
 0x245   : > { %vm2195_vm4 = vcmp.eq.s32.totalorder %v2177_v59, %v10465_v60  ;;  %vm2196_vm5 = vcmp.eq.s32.totalorder %v2177_v59, %v10467_v38  ;;  %v2660_v36 = vpop.f32.mrf.mxu1  ;;  %v2953_v57 = vpop.f32.mrf.mxu3  ;;  %v13712_v59 = vld [vmem:[#allocation27_spill] sm:$0xff] }
 0x246   : > { %vm2227_vm6 = vmand %vm2195_vm4, %vm2211_vm0  ;;  %v2661_v43 = vadd.f32 %v2660_v36, %v2526_v6  ;;  %3048 = vmatmul.f32.gmra.mxu0 %v13710_v23 }
 0x247   : > { %vm2228_vm7 = vmand %vm2196_vm5, %vm2212_vm3  ;;  %v10783_v50 = vsel %vm2227_vm6, %v2067_v63, 1e+30  }
 0x248   : > { %v10786_v18 = vsel %vm2228_vm7, %v2068_v27, 1e+30   ;;  %v2796_v47 = vadd.f32 %v2795_v28, %v2661_v43  ;;  %3158 = vmatmul.f32.gmra.mxu1 %v13707_v11 }
 0x249   : > { %3418 = vmatmul.f32.gmra.mxu2 %v10563_v33 }
 0x24a   : > { %v10790_v60 = vadd.f32 %v2953_v57, %v2796_v47  ;;  %3481 = vmatmul.f32.gmra.mxu3 %v10593_v12 }
 0x24b   : > { %v2542_v38 = vpop.f32.mrf.mxu0 }
 0x24c   : > { %v2800_v26 = vpop.f32.mrf.mxu2 }
 0x24d   : > { %v2664_v10 = vpop.f32.mrf.mxu1  ;;  %v2959_v51 = vpop.f32.mrf.mxu3 }
 0x24e   : > { %v2665_v16 = vadd.f32 %v2664_v10, %v2534_v20  ;;  %3052 = vmatmul.f32.gmra.mxu0 %v13711_v8 }
 0x250   : > { %v2801_v6 = vadd.f32 %v2800_v26, %v2665_v16  ;;  %3162 = vmatmul.f32.gmra.mxu1 %v13710_v23  ;;  %v13713_v23 = vld [vmem:[#allocation28_spill] sm:$0xff] }
 0x251   : > { %3423 = vmatmul.f32.gmra.mxu2 %v10629_v15 }
 0x252   : > { %v10796_v0 = vadd.f32 %v2959_v51, %v2801_v6  ;;  %3487 = vmatmul.f32.gmra.mxu3 %v10651_v19  ;;  %v13714_v51 = vld [vmem:[#allocation34_spill] sm:$0xff] }
 0x253   : > { %v2550_v11 = vpop.f32.mrf.mxu0 }
 0x254   : > { %v2805_v32 = vpop.f32.mrf.mxu2 }
 0x255   : > { %v2668_v2 = vpop.f32.mrf.mxu1  ;;  %v2965_v13 = vpop.f32.mrf.mxu3 }
 0x256   : > { %v2669_v30 = vadd.f32 %v2668_v2, %v2542_v38  ;;  %3056 = vmatmul.f32.gmra.mxu0 %v13712_v59  ;;  %v13715_v2 = vld [vmem:[#allocation29_spill] sm:$0xff] }
 0x258   : > { %v2806_v63 = vadd.f32 %v2805_v32, %v2669_v30  ;;  %3166 = vmatmul.f32.gmra.mxu1 %v13711_v8 }
 0x259   : > { %3428 = vmatmul.f32.gmra.mxu2 %v10680_v22 }
 0x25a   : > { %v10802_v20 = vadd.f32 %v2965_v13, %v2806_v63  ;;  %3493 = vmatmul.f32.gmra.mxu3 %v10691_v40  ;;  %v10818_v13 = vld [vmem:[%s13314_s8] ss:$0 sm:$0xff] }
 0x25b   : > { %v2558_v28 = vpop.f32.mrf.mxu0  ;;  %v13716_v63 = vld [vmem:[#allocation36_spill] sm:$0xff] }
 0x25c   : > { %v2810_v27 = vpop.f32.mrf.mxu2 }
 0x25d   : > { %v2672_v36 = vpop.f32.mrf.mxu1  ;;  %v2971_v57 = vpop.f32.mrf.mxu3 }
 0x25e   : > { %v2673_v43 = vadd.f32 %v2672_v36, %v2550_v11  ;;  %3060 = vmatmul.f32.gmra.mxu0 %v13713_v23 }
 0x260   : > { %v2811_v47 = vadd.f32 %v2810_v27, %v2673_v43  ;;  %3170 = vmatmul.f32.gmra.mxu1 %v13712_v59 }
 0x261   : > { %3433 = vmatmul.f32.gmra.mxu2 %v10701_v52 }
 0x262   : > { %v10808_v38 = vadd.f32 %v2971_v57, %v2811_v47  ;;  %3499 = vmatmul.f32.gmra.mxu3 %v10709_v44  ;;  %v13718_v47 = vld [vmem:[#allocation30_spill] sm:$0xff] }
 0x263   : > { %v3001_v26 = vpop.f32.mrf.mxu0 }
 0x264   : > { %v2815_v10 = vpop.f32.mrf.mxu2  ;;  %v3002_v16 = vadd.f32 %v3001_v26, %v13714_v51  ;;  %v13719_v51 = vld [vmem:[#allocation39_spill] sm:$0xff] }
 0x265   : > { %v2676_v8 = vpop.f32.mrf.mxu1  ;;  %v2977_v6 = vpop.f32.mrf.mxu3 }
 0x266   : > { %v2677_v32 = vadd.f32 %v2676_v8, %v2558_v28  ;;  %3064 = vmatmul.f32.gmra.mxu0 %v13715_v2 }
 0x268   : > { %v2816_v11 = vadd.f32 %v2815_v10, %v2677_v32  ;;  %3174 = vmatmul.f32.gmra.mxu1 %v13713_v23 }
 0x269   : > { %3523 = vmatmul.f32.vlgmr.msra.gmra.mxu2 %v10392_v1 }
 0x26a   : > { %v10820_v30 = vadd.f32 %v2977_v6, %v2816_v11  ;;  %3573 = vmatmul.f32.vlgmr.msra.gmra.mxu3 %v10392_v1 }
 0x26b   : > { %v3005_v59 = vpop.f32.mrf.mxu0 }
 0x26c   : > { %v3006_v27 = vadd.f32 %v3005_v59, %v13716_v63  ;;  %v3265_v28 = vpop.f32.mrf.mxu2  ;;  %v13721_v63 = vld [vmem:[#allocation32_spill] sm:$0xff] }
 0x26d   : > { %v3115_v36 = vpop.f32.mrf.mxu1  ;;  %v3266_v57 = vadd.f32 %v10818_v13, %v3265_v28  ;;  %v3347_v43 = vpop.f32.mrf.mxu3 }
 0x26e   : > { %v10825_v23 = vadd.f32 %v3115_v36, %v3002_v16  ;;  %3068 = vmatmul.f32.gmra.mxu0 %v13718_v47  ;;  %v13722_v36 = vld [vmem:[#allocation40_spill] sm:$0xff] }
 0x26f   : > { %v10828_v26 = vadd.f32 %v3347_v43, %v3266_v57 }
 0x270   : > { %13717 = vst [vmem:[#allocation13_spill] sm:$0xff] %v10825_v23  ;;  %3178 = vmatmul.f32.gmra.mxu1 %v13715_v2 }
 0x271   : > { %3527 = vmatmul.f32.gmra.mxu2 %v10405_v34 }
 0x272   : > { %3577 = vmatmul.f32.gmra.mxu3 %v10405_v34 }
 0x273   : > { %v3009_v10 = vpop.f32.mrf.mxu0 }
 0x274   : > { %v3010_v8 = vadd.f32 %v3009_v10, %v13719_v51  ;;  %v3273_v6 = vpop.f32.mrf.mxu2 }
 0x275   : > { %v3119_v32 = vpop.f32.mrf.mxu1  ;;  %v3274_v11 = vadd.f32 %v10818_v13, %v3273_v6  ;;  %v3351_v59 = vpop.f32.mrf.mxu3 }
 0x276   : > { %v10835_v16 = vadd.f32 %v3119_v32, %v3006_v27  ;;  %3072 = vmatmul.f32.gmra.mxu0 %v13721_v63  ;;  %v13724_v32 = vld [vmem:[#allocation33_spill] sm:$0xff] }
 0x277   : > { %v10838_v28 = vadd.f32 %v3351_v59, %v3274_v11  ;;  %v13725_v59 = vld [vmem:[#allocation41_spill] sm:$0xff] }
 0x278   : > { %13720 = vst [vmem:[#allocation16_spill] sm:$0xff] %v10835_v16  ;;  %3182 = vmatmul.f32.gmra.mxu1 %v13718_v47 }
 0x279   : > { %3531 = vmatmul.f32.gmra.mxu2 %v10428_v9 }
 0x27a   : > { %3581 = vmatmul.f32.gmra.mxu3 %v10428_v9 }
 0x27b   : > { %v3013_v2 = vpop.f32.mrf.mxu0 }
 0x27c   : > { %v3014_v57 = vadd.f32 %v3013_v2, %v13722_v36  ;;  %v3281_v43 = vpop.f32.mrf.mxu2 }
 0x27d   : > { %v3123_v10 = vpop.f32.mrf.mxu1  ;;  %v3282_v51 = vadd.f32 %v10818_v13, %v3281_v43  ;;  %v3355_v6 = vpop.f32.mrf.mxu3 }
 0x27e   : > { %v10845_v27 = vadd.f32 %v3123_v10, %v3010_v8  ;;  %3076 = vmatmul.f32.gmra.mxu0 %v13724_v32  ;;  %v13727_v10 = vld [vmem:[#allocation35_spill] sm:$0xff] }
 0x27f   : > { %v10848_v11 = vadd.f32 %v3355_v6, %v3282_v51  ;;  %v13728_v6 = vld [vmem:[#allocation46_spill] sm:$0xff] }
 0x280   : > { %13723 = vst [vmem:[#allocation18_spill] sm:$0xff] %v10845_v27  ;;  %3186 = vmatmul.f32.gmra.mxu1 %v13721_v63 }
 0x281   : > { %3535 = vmatmul.f32.gmra.mxu2 %v10485_v35 }
 0x282   : > { %3585 = vmatmul.f32.gmra.mxu3 %v10485_v35 }
 0x283   : > { %v3017_v47 = vpop.f32.mrf.mxu0 }
 0x284   : > { %v3018_v2 = vadd.f32 %v3017_v47, %v13725_v59  ;;  %v3289_v36 = vpop.f32.mrf.mxu2 }
 0x285   : > { %v3127_v44 = vpop.f32.mrf.mxu1  ;;  %v3290_v43 = vadd.f32 %v10818_v13, %v3289_v36  ;;  %v3359_v40 = vpop.f32.mrf.mxu3 }
 0x286   : > { %v10855_v8 = vadd.f32 %v3127_v44, %v3014_v57  ;;  %3080 = vmatmul.f32.gmra.mxu0 %v13727_v10  ;;  %v13730_v57 = vld [vmem:[#allocation37_spill] sm:$0xff] }
 0x287   : > { %v10858_v51 = vadd.f32 %v3359_v40, %v3290_v43  ;;  %v13731_v43 = vld [vmem:[#allocation50_spill] sm:$0xff] }
 0x288   : > { %13726 = vst [vmem:[#allocation14_spill] sm:$0xff] %v10855_v8  ;;  %3190 = vmatmul.f32.gmra.mxu1 %v13724_v32 }
 0x289   : > { %3539 = vmatmul.f32.gmra.mxu2 %v10536_v49 }
 0x28a   : > { %3589 = vmatmul.f32.gmra.mxu3 %v10536_v49 }
 0x28b   : > { %v3021_v63 = vpop.f32.mrf.mxu0 }
 0x28c   : > { %v3022_v47 = vadd.f32 %v3021_v63, %v13728_v6  ;;  %v3297_v59 = vpop.f32.mrf.mxu2 }
 0x28d   : > { %v3131_v52 = vpop.f32.mrf.mxu1  ;;  %v3298_v36 = vadd.f32 %v10818_v13, %v3297_v59  ;;  %v3363_v19 = vpop.f32.mrf.mxu3 }
 0x28e   : > { %v10865_v44 = vadd.f32 %v3131_v52, %v3018_v2  ;;  %3084 = vmatmul.f32.gmra.mxu0 %v13730_v57  ;;  %v13733_v2 = vld [vmem:[#allocation38_spill] sm:$0xff] }
 0x28f   : > { %v10868_v40 = vadd.f32 %v3363_v19, %v3298_v36 }
 0x290   : > { %13729 = vst [vmem:[#allocation17_spill] sm:$0xff] %v10865_v44  ;;  %3194 = vmatmul.f32.gmra.mxu1 %v13727_v10 }
 0x291   : > { %3543 = vmatmul.f32.gmra.mxu2 %v10599_v48 }
 0x292   : > { %3593 = vmatmul.f32.gmra.mxu3 %v10599_v48 }
 0x293   : > { %v3025_v32 = vpop.f32.mrf.mxu0 }
 0x294   : > { %v3026_v63 = vadd.f32 %v3025_v32, %v13731_v43  ;;  %v3305_v6 = vpop.f32.mrf.mxu2 }
 0x295   : > { %v3135_v22 = vpop.f32.mrf.mxu1  ;;  %v3306_v59 = vadd.f32 %v10818_v13, %v3305_v6  ;;  %v3367_v12 = vpop.f32.mrf.mxu3 }
 0x296   : > { %v10875_v52 = vadd.f32 %v3135_v22, %v3022_v47  ;;  %3088 = vmatmul.f32.gmra.mxu0 %v13733_v2 }
 0x297   : > { %v10878_v19 = vadd.f32 %v3367_v12, %v3306_v59 }
 0x298   : > { %13732 = vst [vmem:[#allocation19_spill] sm:$0xff] %v10875_v52  ;;  %3198 = vmatmul.f32.gmra.mxu1 %v13730_v57 }
 0x299   : > { %3547 = vmatmul.f32.gmra.mxu2 %v10653_v37 }
 0x29a   : > { %3597 = vmatmul.f32.gmra.mxu3 %v10653_v37 }
 0x29b   : > { %v3029_v10 = vpop.f32.mrf.mxu0 }
 0x29c   : > { %v3030_v36 = vadd.f32 %v3029_v10, %v10458_v4  ;;  %v3313_v32 = vpop.f32.mrf.mxu2 }
 0x29d   : > { %v3139_v43 = vpop.f32.mrf.mxu1  ;;  %v3314_v6 = vadd.f32 %v10818_v13, %v3313_v32  ;;  %v3371_v15 = vpop.f32.mrf.mxu3 }
 0x29e   : > { %v10885_v22 = vadd.f32 %v3139_v43, %v3026_v63  ;;  %3092 = vmatmul.f32.gmra.mxu0 %v10363_v7 }
 0x29f   : > { %v10888_v12 = vadd.f32 %v3371_v15, %v3314_v6 }
 0x2a0   : > { %13734 = vst [vmem:[#allocation22_spill] sm:$0xff] %v10885_v22  ;;  %3202 = vmatmul.f32.gmra.mxu1 %v13733_v2 }
 0x2a1   : > { %3551 = vmatmul.f32.gmra.mxu2 %v10693_v46 }
 0x2a2   : > { %3601 = vmatmul.f32.gmra.mxu3 %v10693_v46 }
 0x2a3   : > { %v3033_v47 = vpop.f32.mrf.mxu0 }
 0x2a4   : > { %v3034_v4 = vadd.f32 %v3033_v47, %v10515_v41  ;;  %v3321_v57 = vpop.f32.mrf.mxu2 }
 0x2a5   : > { %v3143_v59 = vpop.f32.mrf.mxu1  ;;  %v3322_v10 = vadd.f32 %v10818_v13, %v3321_v57  ;;  %v3375_v32 = vpop.f32.mrf.mxu3 }
 0x2a6   : > { %v10895_v63 = vadd.f32 %v3143_v59, %v3030_v36 }
 0x2a7   : > { %v10897_v43 = vadd.f32 %v3375_v32, %v3322_v10 }
 0x2a8   : > { %13735 = vst [vmem:[#allocation12_spill] sm:$0xff] %v10895_v63  ;;  %3206 = vmatmul.f32.gmra.mxu1 %v10363_v7 }
 0x2ab   : > { %v3037_v15 = vpop.f32.mrf.mxu0 }
 0x2ac   : > { %v3038_v2 = vadd.f32 %v3037_v15, %v10577_v14  ;;  %v3399_v6 = vpop.f32.mrf.mxu2 }
 0x2ad   : > { %v3147_v62 = vpop.f32.mrf.mxu1  ;;  %v3400_v33 = vadd.f32 %v3399_v6, %v10828_v26  ;;  %v3458_v31 = vpop.f32.mrf.mxu3 }
 0x2ae   : > { %v10902_v41 = vadd.f32 %v3147_v62, %v3034_v4 }
 0x2af   : > { %v3459_v47 = vadd.f32 %v3458_v31, %v3400_v33 }
 0x2b0   : > { %13736 = vst [vmem:[#allocation9_spill] sm:$0xff] %v10902_v41 }
 0x2b3   : > { %v3041_v35 = vpop.f32.mrf.mxu0 }
 0x2b4   : > { %v3042_v13 = vadd.f32 %v3041_v35, %v10632_v21  ;;  %v3404_v36 = vpop.f32.mrf.mxu2 }
 0x2b5   : > { %v3151_v57 = vpop.f32.mrf.mxu1  ;;  %v3405_v59 = vadd.f32 %v3404_v36, %v10838_v28  ;;  %v3464_v10 = vpop.f32.mrf.mxu3 }
 0x2b6   : > { %v10906_v7 = vadd.f32 %v3151_v57, %v3038_v2 }
 0x2b7   : > { %v3465_v32 = vadd.f32 %v3464_v10, %v3405_v59 }
 0x2b8   : > { %13737 = vst [vmem:[#allocation15_spill] sm:$0xff] %v10906_v7 }
 0x2bb   : > { %v3045_v14 = vpop.f32.mrf.mxu0 }
 0x2bc   : > { %v3046_v15 = vadd.f32 %v3045_v14, %v10682_v17  ;;  %v3409_v46 = vpop.f32.mrf.mxu2 }
 0x2bd   : > { %v3155_v26 = vpop.f32.mrf.mxu1  ;;  %v3410_v62 = vadd.f32 %v3409_v46, %v10848_v11  ;;  %v3470_v4 = vpop.f32.mrf.mxu3 }
 0x2be   : > { %v10910_v31 = vadd.f32 %v3155_v26, %v3042_v13 }
 0x2bf   : > { %v3471_v33 = vadd.f32 %v3470_v4, %v3410_v62 }
 0x2c0   : > { %13738 = vst [vmem:[#allocation25_spill] sm:$0xff] %v10910_v31 }
 0x2c3   : > { %v3049_v35 = vpop.f32.mrf.mxu0 }
 0x2c4   : > { %v3050_v21 = vadd.f32 %v3049_v35, %v10703_v53  ;;  %v3414_v6 = vpop.f32.mrf.mxu2 }
 0x2c5   : > { %v3159_v28 = vpop.f32.mrf.mxu1  ;;  %v3415_v2 = vadd.f32 %v3414_v6, %v10858_v51  ;;  %v3476_v36 = vpop.f32.mrf.mxu3 }
 0x2c6   : > { %v10914_v57 = vadd.f32 %v3159_v28, %v3046_v15 }
 0x2c7   : > { %v3477_v59 = vadd.f32 %v3476_v36, %v3415_v2 }
 0x2c8   : > { %13739 = vst [vmem:[#allocation21_spill] sm:$0xff] %v10914_v57 }
 0x2cb   : > { %v3053_v17 = vpop.f32.mrf.mxu0 }
 0x2cc   : > { %v3054_v10 = vadd.f32 %v3053_v17, %v10716_v3  ;;  %v3419_v14 = vpop.f32.mrf.mxu2 }
 0x2cd   : > { %v3163_v46 = vpop.f32.mrf.mxu1  ;;  %v3420_v11 = vadd.f32 %v3419_v14, %v10868_v40  ;;  %v3482_v13 = vpop.f32.mrf.mxu3 }
 0x2ce   : > { %v10918_v26 = vadd.f32 %v3163_v46, %v3050_v21 }
 0x2cf   : > { %v10920_v62 = vadd.f32 %v3482_v13, %v3420_v11 }
 0x2d0   : > { %13740 = vst [vmem:[#allocation23_spill] sm:$0xff] %v10918_v26 }
 0x2d3   : > { %v3057_v53 = vpop.f32.mrf.mxu0 }
 0x2d4   : > { %v3058_v4 = vadd.f32 %v3057_v53, %v10724_v5  ;;  %v3424_v51 = vpop.f32.mrf.mxu2 }
 0x2d5   : > { %v3167_v35 = vpop.f32.mrf.mxu1  ;;  %v3425_v15 = vadd.f32 %v3424_v51, %v10878_v19  ;;  %v3488_v6 = vpop.f32.mrf.mxu3 }
 0x2d6   : > { %v10924_v28 = vadd.f32 %v3167_v35, %v3054_v10 }
 0x2d7   : > { %v10926_v3 = vadd.f32 %v3488_v6, %v3425_v15 }
 0x2d8   : > { %13741 = vst [vmem:[#allocation8_spill] sm:$0xff] %v10924_v28 }
 0x2db   : > { %v3061_v2 = vpop.f32.mrf.mxu0 }
 0x2dc   : > { %v3062_v40 = vadd.f32 %v3061_v2, %v10730_v45  ;;  %v3429_v36 = vpop.f32.mrf.mxu2 }
 0x2dd   : > { %v3171_v21 = vpop.f32.mrf.mxu1  ;;  %v3430_v17 = vadd.f32 %v3429_v36, %v10888_v12  ;;  %v3494_v14 = vpop.f32.mrf.mxu3 }
 0x2de   : > { %v10930_v46 = vadd.f32 %v3171_v21, %v3058_v4 }
 0x2df   : > { %v10932_v5 = vadd.f32 %v3494_v14, %v3430_v17 }
 0x2e0   : > { %13742 = vst [vmem:[#allocation31_spill] sm:$0xff] %v10930_v46 }
 0x2e3   : > { %v3065_v11 = vpop.f32.mrf.mxu0 }
 0x2e4   : > { %v10934_v13 = vpop.f32.mrf.mxu2  ;;  %v3066_v45 = vadd.f32 %v3065_v11, %v10736_v56 }
 0x2e5   : > { %v3175_v19 = vpop.f32.mrf.mxu1  ;;  %v10936_v10 = vpop.f32.mrf.mxu3 }
 0x2e6   : > { %v10938_v53 = vadd.f32 %v3175_v19, %v3062_v40 }
 0x2e8   : > { %13743 = vst [vmem:[#allocation24_spill] sm:$0xff] %v10938_v53 }
 0x2eb   : > { %v3069_v51 = vpop.f32.mrf.mxu0 }
 0x2ec   : > { %v3524_v35 = vpop.f32.mrf.mxu2  ;;  %v3070_v21 = vadd.f32 %v3069_v51, %v10753_v24 }
 0x2ed   : > { %v3179_v15 = vpop.f32.mrf.mxu1  ;;  %v3525_v6 = vadd.f32 %v3524_v35, %v3459_v47  ;;  %v3574_v12 = vpop.f32.mrf.mxu3 }
 0x2ee   : > { %v10941_v2 = vadd.f32 %v3179_v15, %v3066_v45 }
 0x2ef   : > { %v10943_v4 = vadd.f32 %v3574_v12, %v3525_v6 }
 0x2f0   : > { %13744 = vst [vmem:[#allocation26_spill] sm:$0xff] %v10941_v2 }
 0x2f1   : > { %13745 = vst [vmem:[#allocation27_spill] sm:$0xff] %v10943_v4 }
 0x2f3   : > { %v3073_v36 = vpop.f32.mrf.mxu0 }
 0x2f4   : > { %v3528_v17 = vpop.f32.mrf.mxu2  ;;  %v3074_v11 = vadd.f32 %v3073_v36, %v10774_v42  ;;  %v10963_v42 = vld [vmem:[%s13315_s9] sm:$0xff] }
 0x2f5   : > { %v3183_v14 = vpop.f32.mrf.mxu1  ;;  %v3529_v9 = vadd.f32 %v3528_v17, %v3465_v32  ;;  %v3578_v37 = vpop.f32.mrf.mxu3  ;;  %13752 = vst [vmem:[#allocation32_spill] sm:$0xff] %v10963_v42  ;;  %v10983_v36 = vld [vmem:[%s13316_s10] sm:$0x1] }
 0x2f6   : > { %v10946_v40 = vadd.f32 %v3183_v14, %v3070_v21  ;;  %13756 = vst [vmem:[#allocation35_spill] sm:$0xff] %v10983_v36 }
 0x2f7   : > { %v10948_v19 = vadd.f32 %v3578_v37, %v3529_v9 }
 0x2f8   : > { %13746 = vst [vmem:[#allocation28_spill] sm:$0xff] %v10946_v40 }
 0x2f9   : > { %13747 = vst [vmem:[#allocation34_spill] sm:$0xff] %v10948_v19 }
 0x2fb   : > { %v3077_v56 = vpop.f32.mrf.mxu0 }
 0x2fc   : > { %v3532_v47 = vpop.f32.mrf.mxu2  ;;  %v3078_v51 = vadd.f32 %v3077_v56, %v10790_v60  ;;  %v10973_v60 = vld [vmem:[%s13315_s9 + $0x10] sm:$0xff]  ;;  %v10988_v56 = vld [vmem:[%s13317_s11] sm:$0xff] }
 0x2fd   : > { %v3187_v35 = vpop.f32.mrf.mxu1  ;;  %v3533_v45 = vadd.f32 %v3532_v47, %v3471_v33  ;;  %v3582_v15 = vpop.f32.mrf.mxu3  ;;  %v10968_v33 = vld [vmem:[%s13315_s9 + $0x8] sm:$0xff]  ;;  %13754 = vst [vmem:[#allocation33_spill] sm:$0xff] %v10973_v60  ;;  %v10998_v47 = vld [vmem:[%s13317_s11 + $0x10] sm:$0xff] }
 0x2fe   : > { %v10951_v6 = vadd.f32 %v3187_v35, %v3074_v11  ;;  %13753 = vst [vmem:[#allocation40_spill] sm:$0xff] %v10968_v33  ;;  %v10993_v11 = vld [vmem:[%s13317_s11 + $0x8] sm:$0xff]  ;;  %v11003_v35 = vld [vmem:[%s13317_s11 + $0x18] sm:$0xff] }
 0x2ff   : > { %v10953_v12 = vadd.f32 %v3582_v15, %v3533_v45  ;;  %13757 = vst [vmem:[#allocation46_spill] sm:$0xff] %v10988_v56  ;;  %v11008_v45 = vld [vmem:[%s13318_s12] sm:$0x1] }
 0x300   : > { %13748 = vst [vmem:[#allocation29_spill] sm:$0xff] %v10951_v6 }
 0x301   : > { %13749 = vst [vmem:[#allocation36_spill] sm:$0xff] %v10953_v12 }
 0x302   : > { %13758 = vst [vmem:[#allocation37_spill] sm:$0xff] %v10993_v11 }
 0x303   : > { %v3081_v24 = vpop.f32.mrf.mxu0  ;;  %13759 = vst [vmem:[#allocation50_spill] sm:$0xff] %v10998_v47 }
 0x304   : > { %v3536_v32 = vpop.f32.mrf.mxu2  ;;  %13760 = vst [vmem:[#allocation38_spill] sm:$0xff] %v11003_v35  ;;  %v3082_v15 = vadd.f32 %v3081_v24, %v10796_v0 }
 0x305   : > { %v3191_v17 = vpop.f32.mrf.mxu1  ;;  %v3537_v21 = vadd.f32 %v3536_v32, %v3477_v59  ;;  %v3586_v14 = vpop.f32.mrf.mxu3  ;;  %v10978_v59 = vld [vmem:[%s13315_s9 + $0x18] sm:$0xff]  ;;  %13761 = vst [vmem:[#allocation82_spill] sm:$0xff] %v11008_v45 }
 0x306   : > { %v10956_v9 = vadd.f32 %v3191_v17, %v3078_v51  ;;  %13755 = vst [vmem:[#allocation41_spill] sm:$0xff] %v10978_v59 }
 0x307   : > { %v10958_v37 = vadd.f32 %v3586_v14, %v3537_v21 }
 0x308   : > { %13750 = vst [vmem:[#allocation30_spill] sm:$0xff] %v10956_v9 }
 0x309   : > { %13751 = vst [vmem:[#allocation39_spill] sm:$0xff] %v10958_v37 }
 0x30b   : > { %v3085_v51 = vpop.f32.mrf.mxu0 }
 0x30c   : > { %v3540_v32 = vpop.f32.mrf.mxu2  ;;  %v3086_v1 = vadd.f32 %v3085_v51, %v10802_v20  ;;  %v3435_v20 = vadd.f32 %v10934_v13, %v10897_v43  ;;  %v11041_v43 = vmov -1e+30   ;;  %v11043_v13 = vmov -1e+30  }
 0x30d   : > { %v3195_v17 = vpop.f32.mrf.mxu1  ;;  %v3541_v21 = vadd.f32 %v3540_v32, %v10920_v62  ;;  %v3590_v14 = vpop.f32.mrf.mxu3 }
 0x30e   : > { %v11012_v34 = vadd.f32 %v3195_v17, %v3082_v15 }
 0x30f   : > { %v11014_v48 = vadd.f32 %v3590_v14, %v3541_v21 }
 0x310   : > { %13762 = vst [vmem:[#allocation83_spill] sm:$0xff] %v11012_v34 }
 0x311   : > { %13763 = vst [vmem:[#allocation84_spill] sm:$0xff] %v11014_v48 }
 0x313   : > { %v3089_v0 = vpop.f32.mrf.mxu0 }
 0x314   : > { %v3544_v49 = vpop.f32.mrf.mxu2  ;;  %v3090_v36 = vadd.f32 %v3089_v0, %v10808_v38  ;;  %v11045_v0 = vmov -1e+30  }
 0x315   : > { %v3199_v56 = vpop.f32.mrf.mxu1  ;;  %v3545_v11 = vadd.f32 %v3544_v49, %v10926_v3  ;;  %v3594_v47 = vpop.f32.mrf.mxu3  ;;  %v3501_v3 = vadd.f32 %v10936_v10, %v3435_v20  ;;  %v11047_v10 = vmov -1e+30   ;;  %v13772_v20 = vld [vmem:[#allocation65_spill] sm:$0xff] }
 0x316   : > { %v11018_v45 = vadd.f32 %v3199_v56, %v3086_v1 }
 0x317   : > { %v11020_v24 = vadd.f32 %v3594_v47, %v3545_v11 }
 0x318   : > { %13764 = vst [vmem:[#allocation85_spill] sm:$0xff] %v11018_v45 }
 0x319   : > { %13765 = vst [vmem:[#allocation86_spill] sm:$0xff] %v11020_v24 }
 0x31b   : > { %v3093_v1 = vpop.f32.mrf.mxu0 }
 0x31c   : > { %v3548_v62 = vpop.f32.mrf.mxu2  ;;  %v3094_v56 = vadd.f32 %v3093_v1, %v10820_v30  ;;  %v11049_v30 = vmov -1e+30   ;;  %v13773_v1 = vld [vmem:[#allocation71_spill] sm:$0xff] }
 0x31d   : > { %v3203_v15 = vpop.f32.mrf.mxu1  ;;  %v3549_v32 = vadd.f32 %v3548_v62, %v10932_v5  ;;  %v3598_v17 = vpop.f32.mrf.mxu3  ;;  %v11051_v62 = vmov -1e+30  }
 0x31e   : > { %v11024_v21 = vadd.f32 %v3203_v15, %v3090_v36  ;;  %v11039_v36 = vmov -1e+30   ;;  %v11053_v15 = vmov -1e+30  }
 0x31f   : > { %v11028_v49 = vadd.f32 %v3598_v17, %v3549_v32  ;;  %v13770_v32 = vld [vmem:[#allocation72_spill] sm:$0xff]  ;;  %v13771_v17 = vld [vmem:[#allocation66_spill] sm:$0xff] }
 0x320   : > { %13766 = vst [vmem:[#allocation87_spill] sm:$0xff] %v11024_v21 }
 0x321   : > { %13767 = vst [vmem:[#allocation88_spill] sm:$0xff] %v11028_v49 }
 0x324   : > { %v3552_v11 = vpop.f32.mrf.mxu2 }
 0x325   : > { %v3207_v38 = vpop.f32.mrf.mxu1  ;;  %v3553_v47 = vadd.f32 %v3552_v11, %v3501_v3  ;;  %v3602_v51 = vpop.f32.mrf.mxu3  ;;  %v13774_v3 = vld [vmem:[#allocation70_spill] sm:$0xff] }
 0x326   : > { %v11032_v14 = vadd.f32 %v3207_v38, %v3094_v56  ;;  %v13775_v56 = vld [vmem:[#allocation60_spill] sm:$0xff]  ;;  %v13776_v11 = vld [vmem:[#allocation58_spill] sm:$0xff] }
 0x327   : > { %v11034_v5 = vadd.f32 %v3602_v51, %v3553_v47 }
 0x328   : > { %13768 = vst [vmem:[#allocation89_spill] sm:$0xff] %v11032_v14 }
 0x329   : > { %13769 = vst [vmem:[#allocation90_spill] sm:$0xff] %v11034_v5 }
 0x32a LB: >> { %v13777_v23 = vld [vmem:[#allocation13_spill] sm:$0xff]  ;;  %v13778_v21 = vld [vmem:[#allocation87_spill] sm:$0xff]  ;;  %v13780_v16 = vld [vmem:[#allocation16_spill] sm:$0xff]  ;;  %13795 = vst [vmem:[#allocation91_spill] sm:$0xff] %v8854_v36  ;;  %vm3645_vm8 = vcmask 523264   ;;  %s3620_s25 = sadd.s32 1, %s8950_s25   ;;  %v8922_v20 = vphi %v13772_v20, %v13994_v20   ;;  %v8918_v17 = vphi %v13771_v17, %v13991_v17   ;;  %v8914_v32 = vphi %v13770_v32, %v13990_v32   ;;  %v8910_v54 = vphi %v10634_v54, %v13987_v54   ;;  %v8906_v55 = vphi %v10664_v55, %v13986_v55   ;;  %v8902_v29 = vphi %v10669_v29, %v13983_v29   ;;  %v8898_v50 = vphi %v10783_v50, %v13982_v50   ;;  %v8894_v18 = vphi %v10786_v18, %v13979_v18   ;;  %v8890_v39 = vphi %v10674_v39, %v13978_v39   ;;  %v8886_v58 = vphi %v10684_v58, %v13975_v58   ;;  %v8882_v15 = vphi %v11053_v15, %v13974_v15   ;;  %v8878_v62 = vphi %v11051_v62, %v13973_v62   ;;  %v8874_v30 = vphi %v11049_v30, %v13972_v30   ;;  %v8870_v10 = vphi %v11047_v10, %v13971_v10   ;;  %v8866_v0 = vphi %v11045_v0, %v13970_v0   ;;  %v8862_v13 = vphi %v11043_v13, %v13969_v13   ;;  %v8858_v43 = vphi %v11041_v43, %v13968_v43   ;;  %v8854_v36 = vphi %v11039_v36, %v13967_v36   ;;  %s8950_s25 = sphi %s11103_s25, %s3620_s25   ;;  %v8946_v11 = vphi %v13776_v11, %v14006_v11   ;;  %v8942_v56 = vphi %v13775_v56, %v14003_v56   ;;  %v8938_v61 = vphi %v10763_v61, %v14002_v61   ;;  %v8934_v25 = vphi %v10767_v25, %v13999_v25   ;;  %v8930_v3 = vphi %v13774_v3, %v13998_v3   ;;  %v8926_v1 = vphi %v13773_v1, %v13995_v1  }
 0x32b   : >> { %v13781_v27 = vld [vmem:[#allocation18_spill] sm:$0xff]  ;;  %v13782_v44 = vld [vmem:[#allocation17_spill] sm:$0xff]  ;;  %v13784_v52 = vld [vmem:[#allocation19_spill] sm:$0xff]  ;;  %13796 = vst [vmem:[#allocation92_spill] sm:$0xff] %v8858_v43  ;;  %v3646_v38 = vsel %vm3645_vm8, %v8942_v56, inf  ;;  %v3654_v51 = vsel %vm3645_vm8, %v8926_v1, inf }
 0x32c   : >> { %v13783_v8 = vld [vmem:[#allocation14_spill] sm:$0xff]  ;;  %v13786_v63 = vld [vmem:[#allocation12_spill] sm:$0xff]  ;;  %v13787_v41 = vld [vmem:[#allocation9_spill] sm:$0xff]  ;;  %13797 = vst [vmem:[#allocation93_spill] sm:$0xff] %v8862_v13  ;;  %v3647_v47 = vmin.f32 %v8946_v11, %v3646_v38  ;;  %v3655_v36 = vmin.f32 %v8930_v3, %v3654_v51  ;;  %v3650_v43 = vsel %vm3645_vm8, %v8934_v25, inf  ;;  %v3662_v13 = vsel %vm3645_vm8, %v8910_v54, inf }
 0x32d   : >> { %v13785_v22 = vld [vmem:[#allocation22_spill] sm:$0xff]  ;;  %v13788_v7 = vld [vmem:[#allocation15_spill] sm:$0xff]  ;;  %v13789_v31 = vld [vmem:[#allocation25_spill] sm:$0xff]  ;;  %13798 = vst [vmem:[#allocation94_spill] sm:$0xff] %v8866_v0  ;;  %v3658_v0 = vsel %vm3645_vm8, %v8918_v17, inf  ;;  %v3651_v38 = vmin.f32 %v8938_v61, %v3650_v43  ;;  %v11250_v5 = vand.u32 4294901760, %v13786_v63 }
 0x32e   : >> { %v13790_v57 = vld [vmem:[#allocation21_spill] sm:$0xff]  ;;  %v13791_v26 = vld [vmem:[#allocation23_spill] sm:$0xff]  ;;  %v13792_v28 = vld [vmem:[#allocation8_spill] sm:$0xff]  ;;  %13799 = vst [vmem:[#allocation95_spill] sm:$0xff] %v8870_v10  ;;  %3648 = vmin.xlane.f32.xlu0 %v3647_v47  ;;  %3656 = vmin.xlane.f32.xlu1 %v3655_v36  ;;  %v3663_v10 = vmin.f32 %v8914_v32, %v3662_v13  ;;  %v3666_v47 = vsel %vm3645_vm8, %v8902_v29, inf  ;;  %v3670_v36 = vsel %vm3645_vm8, %v8894_v18, inf }
 0x32f   : >> { %v13779_v14 = vld [vmem:[#allocation89_spill] sm:$0xff]  ;;  %v13793_v46 = vld [vmem:[#allocation31_spill] sm:$0xff]  ;;  %v13794_v53 = vld [vmem:[#allocation24_spill] sm:$0xff]  ;;  %13800 = vst [vmem:[#allocation96_spill] sm:$0xff] %v8874_v30  ;;  %v3659_v30 = vmin.f32 %v8922_v20, %v3658_v0  ;;  %v3667_v51 = vmin.f32 %v8906_v55, %v3666_v47  ;;  %v11222_v47 = vand.u32 4294901760, %v13791_v26  ;;  %v11325_v59 = vand.u32 4294901760, %v13785_v22 }
 0x330   : >> { %13801 = vst [vmem:[#allocation97_spill] sm:$0xff] %v8878_v62  ;;  %3664 = vmin.xlane.f32.xlu2 %v3663_v10  ;;  %v3671_v62 = vmin.f32 %v8898_v50, %v3670_v36  ;;  %v11202_v13 = vand.u32 4294901760, %v13794_v53  ;;  %v11228_v36 = vand.u32 4294901760, %v13789_v31  ;;  %p12672_p11 = scmp.ge.s32.totalorder %s3620_s25, 7  }
 0x331   : >> { %13802 = vst [vmem:[#allocation98_spill] sm:$0xff] %v8882_v15  ;;  %v11246_v35 = vsub.f32 %v13791_v26, %v11222_v47  ;;  %s14040_s4 = sshll.u32 (%p12672_p11), %s9078_s1, 6  ;;  %s7994_s25 = sshll.u32 (%p12672_p11), %s11037_s22, 4  ;;  %s7995_s25 = int_to_ptr.vmem [resolvable:$true] %s7994_s25 }
 0x332   : >> { %13803 = vst [vmem:[#allocation99_spill] sm:$0xff] %v8886_v58  ;;  %v11206_v43 = vsub.f32 %v13794_v53, %v11202_v13  ;;  %4130 = vmatpush.msra.mxu3 %v11202_v13  ;;  %3815 = vmatpush.msra.mxu0 %v11202_v13  ;;  %v11231_v53 = vand.u32 4294901760, %v13788_v7  ;;  %s7993_s6 = scalar_lea.hbm (%p12672_p11), %s13325_s19, %s14040_s4  ;;  %s14041_s1 = sand.u32 (%p12672_p11), 1, %s8842_s30  }
 0x333   : >> { %13804 = vst [vmem:[#allocation72_spill] sm:$0xff] %v8890_v39  ;;  %s7996_s24 = sshll.u32 (%p12672_p11), %s7993_s6, 4  ;;  %s7982_s2 = scalar_lea.sflag (%p12672_p11), [#allocation3], %s14041_s1  ;;  %s7997_s24 = int_to_ptr.hbm [resolvable:$true] %s7996_s24 }
 0x334   : >> { %13805 = vst [vmem:[#allocation66_spill] sm:$0xff] %v8898_v50  ;;  %v13457_v0 = vand.u32 4294901760, %v11206_v43  ;;  %4042 = vmatpush.msra.mxu2 %v11206_v43  ;;  %s8702_s27 = sshra.s32 (%p12672_p11), %s7997_s24, 4  ;;  %s8708_s20 = scalar_lea.hbm (%p12672_p11), %s13325_s19, 192  ;;  %s8703_s27 = int_to_ptr.hbm [resolvable:$true] %s8702_s27 }
 0x335   : >> { %13806 = vst [vmem:[#allocation65_spill] sm:$0xff] %v8906_v55  ;;  %s8704_s23 = scalar_lea.hbm (%p12672_p11), %s8703_s27, 64  ;;  %p8709_p1 = scmp.lt.s32.totalorder (%p12672_p11), %s8703_s27, %s13325_s19 }
 0x336   : >> { %13807 = vst [vmem:[#allocation100_spill] sm:$0xff] %v8910_v54  ;;  %3652 = vmin.xlane.f32.xlu0 %v3651_v38  ;;  %3660 = vmin.xlane.f32.xlu1 %v3659_v30  ;;  %v3914_v10 = vsub.f32 %v11206_v43, %v13457_v0  ;;  %v11219_v38 = vand.u32 4294901760, %v13792_v28  ;;  %p8705_p12 = scmp.ne.s32.totalorder (%p12672_p11), %s8703_s27, %s8704_s23  ;;  %p8710_p2 = scmp.lt.s32.totalorder (%p12672_p11), %s8708_s20, %s8704_s23 }
 0x337   : >> { %13808 = vst [vmem:[#allocation71_spill] sm:$0xff] %v8914_v32 }
 0x338   : >> { %13809 = vst [vmem:[#allocation101_spill] sm:$0xff] %v8918_v17  ;;  %3668 = vmin.xlane.f32.xlu2 %v3667_v51  ;;  %v3915_v30 = vand.u32 4294901760, %v3914_v10  ;;  %v11225_v51 = vand.u32 4294901760, %v13790_v57  ;;  %v11234_v10 = vand.u32 4294901760, %v13787_v41  ;;  %v11242_v15 = vsub.f32 %v13792_v28, %v11219_v38  ;;  %p8706_p13 = pnand (%p12672_p11), %p8705_p12, %p9095_p5  ;;  %p8711_p3 = por (%p12672_p11), %p8710_p2, %p8709_p1 }
 0x339   : >> { %13810 = vst [vmem:[#allocation70_spill] sm:$0xff] %v8922_v20  ;;  %v11263_v28 = vsub.f32 %v13788_v7, %v11231_v53 }
 0x33a   : >> { %13811 = vst [vmem:[#allocation60_spill] sm:$0xff] %v8930_v3  ;;  %3916 = vmatpush.msra.mxu1 %v3915_v30  ;;  %v11254_v30 = vsub.f32 %v13790_v57, %v11225_v51  ;;  %v11267_v26 = vsub.f32 %v13787_v41, %v11234_v10  ;;  %v13815_v37 = vand.u32 4294901760, %v11242_v15  ;;  %p8707_p0 = pneg (%p12672_p11), %p8706_p13 }
 0x33b   : >> { %13812 = vst [vmem:[#allocation102_spill] sm:$0xff] %v8934_v25  ;;  %v13818_v4 = vand.u32 4294901760, %v11263_v28 }
 0x33c   : >> { %13813 = vst [vmem:[#allocation58_spill] sm:$0xff] %v8938_v61  ;;  %v3926_v12 = vsub.f32 %v11242_v15, %v13815_v37  ;;  %v13817_v41 = vand.u32 4294901760, %v11254_v30  ;;  %p8712_p4 = pnand (%p12672_p11), %p8711_p3, %p8707_p0 }
 0x33d   : >> { %13814 = vst [vmem:[#allocation103_spill] sm:$0xff] %v8946_v11 }
 0x33e   : >> { %3672 = vmin.xlane.f32.xlu1 %v3671_v62  ;;  %v11216_v62 = vand.u32 4294901760, %v13793_v46  ;;  %v3938_v24 = vsub.f32 %v11254_v30, %v13817_v41  ;;  %v3927_v19 = vand.u32 4294901760, %v3926_v12  ;;  %v11312_v41 = vsub.f32 %v11263_v28, %v13818_v4 }
 0x33f   : >> { %v11328_v4 = vand.u32 4294901760, %v13784_v52 }
 0x340   : >> { %v11238_v0 = vsub.f32 %v13793_v46, %v11216_v62  ;;  %4132 = vmatpush.msra.mxu3 %v11216_v62  ;;  %v11258_v46 = vsub.f32 %v13789_v31, %v11228_v36  ;;  %3817 = vmatpush.msra.mxu0 %v11216_v62  ;;  %v11276_v31 = vsub.f32 %v13786_v63, %v11250_v5  ;;  %v13816_v63 = vand.u32 4294901760, %v11246_v35 }
 0x341   : >> { %v3939_v60 = vand.u32 4294901760, %v3938_v24  ;;  %v13821_v24 = vld [vmem:[#allocation42_spill] sm:$0xff] }
 0x342   : >> { %v13468_v49 = vand.u32 4294901760, %v11238_v0  ;;  %4045 = vmatpush.msra.mxu2 %v11238_v0  ;;  %4134 = vmatpush.msra.mxu3 %v11219_v38  ;;  %v13469_v48 = vand.u32 4294901760, %v11258_v46  ;;  %v3932_v7 = vsub.f32 %v11246_v35, %v13816_v63  ;;  %v11307_v63 = vsel %vm3645_vm8, %v8886_v58, inf }
 0x343   : >> { %3819 = vmatpush.msra.mxu0 %v11219_v38  ;;  %v13825_v58 = vand.u32 4294901760, %v11276_v31 }
 0x344   : >> { %v3920_v57 = vsub.f32 %v11238_v0, %v13468_v49  ;;  %4048 = vmatpush.msra.mxu2 %v11242_v15  ;;  %4136 = vmatpush.msra.mxu3 %v11222_v47  ;;  %v11300_v49 = vsub.f32 %v11258_v46, %v13469_v48  ;;  %v13819_v48 = vand.u32 4294901760, %v11267_v26  ;;  %v3933_v33 = vand.u32 4294901760, %v3932_v7 }
 0x345   : >> { %3821 = vmatpush.msra.mxu0 %v11222_v47  ;;  %v11338_v7 = vand.u32 4294901760, %v13782_v44  ;;  %v3962_v45 = vsub.f32 %v11276_v31, %v13825_v58  ;;  %v3675_v58 = vmin.f32 %v8890_v39, %v11307_v63 }
 0x346   : >> { %v3921_v37 = vand.u32 4294901760, %v3920_v57  ;;  %4051 = vmatpush.msra.mxu2 %v11246_v35  ;;  %4138 = vmatpush.msra.mxu3 %v11225_v51  ;;  %v11317_v42 = vsub.f32 %v11267_v26, %v13819_v48  ;;  %v3945_v48 = vand.u32 4294901760, %v11300_v49  ;;  %v13822_v57 = vld [vmem:[#allocation43_spill] sm:$0xff]  ;;  %v11351_v49 = vsub.f32 %v13784_v52, %v11328_v4 }
 0x347   : >> { %3823 = vmatpush.msra.mxu0 %v11225_v51 }
 0x348   : >> { %3922 = vmatpush.msra.mxu1 %v3921_v37  ;;  %4054 = vmatpush.msra.mxu2 %v11254_v30 }
 0x349   : >> { %4140 = vmatpush.msra.mxu3 %v11228_v36  ;;  %3825 = vmatpush.msra.mxu0 %v11228_v36 }
 0x34a   : >> { %3928 = vmatpush.msra.mxu1 %v3927_v19  ;;  %4057 = vmatpush.msra.mxu2 %v11258_v46  ;;  %v11361_v19 = vand.u32 4294901760, %v13783_v8 }
 0x34b   : >> { %4142 = vmatpush.msra.mxu3 %v11231_v53  ;;  %3827 = vmatpush.msra.mxu0 %v11231_v53 }
 0x34c   : >> { %3934 = vmatpush.msra.mxu1 %v3933_v33  ;;  %4060 = vmatpush.msra.mxu2 %v11263_v28 }
 0x34d   : >> { %4144 = vmatpush.msra.mxu3 %v11234_v10  ;;  %3829 = vmatpush.msra.mxu0 %v11234_v10 }
 0x34e   : >> { %3940 = vmatpush.msra.mxu1 %v3939_v60  ;;  %4063 = vmatpush.msra.mxu2 %v11267_v26 }
 0x34f   : >> { %4146 = vmatpush.msra.mxu3 %v11250_v5  ;;  %3831 = vmatpush.msra.mxu0 %v11250_v5 }
 0x350   : >> { %3946 = vmatpush.msra.mxu1 %v3945_v48  ;;  %4066 = vmatpush.msra.mxu2 %v11276_v31  ;;  %v11408_v48 = vand.u32 4294901760, %v13781_v27 }
 0x351   : >> { %4148 = vmatpush.msra.mxu3 %v11325_v59  ;;  %3833 = vmatpush.msra.mxu0 %v11325_v59 }
 0x353   : >> { %4150 = vmatpush.msra.mxu3 %v11328_v4  ;;  %3835 = vmatpush.msra.mxu0 %v11328_v4 }
 0x355   : >> { %4152 = vmatpush.msra.mxu3 %v11338_v7  ;;  %3837 = vmatpush.msra.mxu0 %v11338_v7 }
 0x357   : >> { %4154 = vmatpush.msra.mxu3 %v11361_v19  ;;  %3839 = vmatpush.msra.mxu0 %v11361_v19 }
 0x359   : >> { %4156 = vmatpush.msra.mxu3 %v11408_v48  ;;  %3841 = vmatpush.msra.mxu0 %v11408_v48 }
 0x3a1   : >> { %v11321_v12 = vpop.xlane.xlu0 %3648  ;;  %v11342_v40 = vpop.xlane.xlu1 %3656 }
 0x3a2   : >> { %13820 = vst [vmem:[#allocation104_spill] sm:$0xff] %v11321_v12  ;;  %vm3679_vm9 = vcmp.le.f32.partialorder %v8942_v56, %v11321_v12  ;;  %vm3678_vm10 = vcmp.le.f32.partialorder %v8946_v11, %v11321_v12  ;;  %v11347_v12 = vsub.f32 %v13785_v22, %v11325_v59  ;;  %vm3683_vm2 = vcmp.le.f32.partialorder %v8926_v1, %v11342_v40 }
 0x3a3   : >> { %v3694_v37 = vsel %vm3678_vm10, %v13821_v24, 192.0  ;;  %v3695_v2 = vsel %vm3679_vm9, %v13822_v57, 192.0  ;;  %13823 = vst [vmem:[#allocation105_spill] sm:$0xff] %v11342_v40  ;;  %vm3682_vm11 = vcmp.le.f32.partialorder %v8930_v3, %v11342_v40  ;;  %v3699_v52 = vsel %vm3683_vm2, %v13822_v57, 192.0  ;;  %v11368_v40 = vpop.xlane.xlu2 %3664 }
 0x3a4   : >> { %v3710_v6 = vsel %vm3645_vm8, %v3695_v2, inf  ;;  %v3698_v9 = vsel %vm3682_vm11, %v13821_v24, 192.0  ;;  %v3718_v34 = vsel %vm3645_vm8, %v3699_v52, inf  ;;  %13824 = vst [vmem:[#allocation106_spill] sm:$0xff] %v11368_v40  ;;  %vm3687_vm12 = vcmp.le.f32.partialorder %v8910_v54, %v11368_v40  ;;  %4069 = vmatpush.msra.mxu2 %v11347_v12 }
 0x3a5   : >> { %v3711_v22 = vmin.f32 %v3694_v37, %v3710_v6  ;;  %v11376_v6 = vsub.f32 %v13782_v44, %v11338_v7  ;;  %v3719_v33 = vmin.f32 %v3698_v9, %v3718_v34  ;;  %v3951_v52 = vand.u32 4294901760, %v11312_v41 }
 0x3a6   : >> { %v11389_v2 = vsub.f32 %v13783_v8, %v11361_v19  ;;  %vm3686_vm13 = vcmp.le.f32.partialorder %v8914_v32, %v11368_v40  ;;  %v3957_v9 = vand.u32 4294901760, %v11317_v42  ;;  %v13827_v60 = vand.u32 4294901760, %v11347_v12  ;;  %4072 = vmatpush.msra.mxu2 %v11351_v49 }
 0x3a7   : >> { %3712 = vmin.xlane.f32.xlu0 %v3711_v22  ;;  %3720 = vmin.xlane.f32.xlu1 %v3719_v33  ;;  %v3703_v22 = vsel %vm3687_vm12, %v13822_v57, 192.0  ;;  %v3963_v37 = vand.u32 4294901760, %v3962_v45  ;;  %v13829_v8 = vand.u32 4294901760, %v11351_v49 }
 0x3a8   : >> { %v3968_v63 = vsub.f32 %v11347_v12, %v13827_v60  ;;  %3952 = vmatpush.msra.mxu1 %v3951_v52  ;;  %4075 = vmatpush.msra.mxu2 %v11376_v6 }
 0x3a9   : >> { %v11391_v34 = vpop.xlane.xlu0 %3652  ;;  %v11412_v60 = vpop.xlane.xlu1 %3660  ;;  %v3974_v44 = vsub.f32 %v11351_v49, %v13829_v8  ;;  %v3702_v8 = vsel %vm3686_vm13, %v13821_v24, 192.0 }
 0x3aa   : >> { %13826 = vst [vmem:[#allocation107_spill] sm:$0xff] %v11391_v34  ;;  %vm3681_vm14 = vcmp.le.f32.partialorder %v8934_v25, %v11391_v34  ;;  %vm3680_vm15 = vcmp.le.f32.partialorder %v8938_v61, %v11391_v34  ;;  %vm3685_vm0 = vcmp.le.f32.partialorder %v8918_v17, %v11412_v60  ;;  %vm3684_vm3 = vcmp.le.f32.partialorder %v8922_v20, %v11412_v60 }
 0x3ab   : >> { %v3696_v42 = vsel %vm3680_vm15, %v13821_v24, 192.0  ;;  %v3697_v33 = vsel %vm3681_vm14, %v13822_v57, 192.0  ;;  %13828 = vst [vmem:[#allocation108_spill] sm:$0xff] %v11412_v60  ;;  %v3701_v52 = vsel %vm3685_vm0, %v13822_v57, 192.0  ;;  %3958 = vmatpush.msra.mxu1 %v3957_v9  ;;  %v11433_v54 = vpop.xlane.xlu2 %3668  ;;  %v3969_v17 = vand.u32 4294901760, %v3968_v63  ;;  %4078 = vmatpush.msra.mxu2 %v11389_v2 }
 0x3ac   : >> { %v3714_v41 = vsel %vm3645_vm8, %v3697_v33, inf  ;;  %v3726_v33 = vsel %vm3645_vm8, %v3703_v22, inf  ;;  %13830 = vst [vmem:[#allocation109_spill] sm:$0xff] %v11433_v54  ;;  %v13831_v34 = vand.u32 4294901760, %v11376_v6  ;;  %v11445_v22 = vand.u32 4294901760, %v13780_v16 }
 0x3ad   : >> { %v3715_v45 = vmin.f32 %v3696_v42, %v3714_v41  ;;  %v11441_v41 = vsub.f32 %v13781_v27, %v11408_v48  ;;  %v3700_v9 = vsel %vm3684_vm3, %v13821_v24, 192.0  ;;  %vm3689_vm4 = vcmp.le.f32.partialorder %v8902_v29, %v11433_v54  ;;  %3964 = vmatpush.msra.mxu1 %v3963_v37 }
 0x3ae   : >> { %v3980_v25 = vsub.f32 %v11376_v6, %v13831_v34  ;;  %vm3688_vm5 = vcmp.le.f32.partialorder %v8906_v55, %v11433_v54  ;;  %v3975_v34 = vand.u32 4294901760, %v3974_v44  ;;  %v3722_v63 = vsel %vm3645_vm8, %v3701_v52, inf  ;;  %4158 = vmatpush.msra.mxu3 %v11445_v22  ;;  %3843 = vmatpush.msra.mxu0 %v11445_v22 }
 0x3af   : >> { %3676 = vmin.xlane.f32.xlu0 %v3675_v58  ;;  %3716 = vmin.xlane.f32.xlu2 %v3715_v45  ;;  %v3704_v42 = vsel %vm3688_vm5, %v13821_v24, 192.0  ;;  %v3705_v58 = vsel %vm3689_vm4, %v13822_v57, 192.0  ;;  %v13832_v45 = vand.u32 4294901760, %v11389_v2  ;;  %v3991_v60 = vand.u32 4294901760, %v11441_v41 }
 0x3b0   : >> { %v3730_v40 = vsel %vm3645_vm8, %v3705_v58, inf  ;;  %v11466_v44 = vsub.f32 %v13780_v16, %v11445_v22  ;;  %3970 = vmatpush.msra.mxu1 %v3969_v17  ;;  %v3981_v52 = vand.u32 4294901760, %v3980_v25  ;;  %v3727_v54 = vmin.f32 %v3702_v8, %v3726_v33  ;;  %4081 = vmatpush.msra.mxu2 %v11441_v41 }
 0x3b1   : >> { %v3986_v27 = vsub.f32 %v11389_v2, %v13832_v45  ;;  %v3731_v37 = vmin.f32 %v3704_v42, %v3730_v40  ;;  %v3723_v45 = vmin.f32 %v3700_v9, %v3722_v63  ;;  %v11471_v32 = vpop.xlane.xlu1 %3672  ;;  %v3992_v58 = vsub.f32 %v11441_v41, %v3991_v60 }
 0x3b2   : >> { %13833 = vst [vmem:[#allocation110_spill] sm:$0xff] %v11471_v32  ;;  %v3997_v16 = vand.u32 4294901760, %v11466_v44  ;;  %vm3691_vm6 = vcmp.le.f32.partialorder %v8894_v18, %v11471_v32  ;;  %3976 = vmatpush.msra.mxu1 %v3975_v34  ;;  %vm3690_vm7 = vcmp.le.f32.partialorder %v8898_v50, %v11471_v32  ;;  %4084 = vmatpush.msra.mxu2 %v11466_v44  ;;  %v3844_v63 = vand.u32 4294901760, %v13777_v23 }
 0x3b3   : >> { %3732 = vmin.xlane.f32.xlu1 %v3731_v37  ;;  %v3987_v25 = vand.u32 4294901760, %v3986_v27  ;;  %v3707_v40 = vsel %vm3691_vm6, %v13822_v57, 192.0  ;;  %v3993_v8 = vand.u32 4294901760, %v3992_v58  ;;  %v3706_v27 = vsel %vm3690_vm7, %v13821_v24, 192.0 }
 0x3b4   : >> { %v3998_v17 = vsub.f32 %v11466_v44, %v3997_v16  ;;  %3982 = vmatpush.msra.mxu1 %v3981_v52  ;;  %v3734_v33 = vsel %vm3645_vm8, %v3707_v40, inf  ;;  %4160 = vmatpush.msra.mxu3 %v3844_v63  ;;  %v13834_v42 = vand.u32 4294901760, %v11206_v43  ;;  %v13835_v44 = vand.u32 4294901760, %v11238_v0 }
 0x3b5   : >> { %v3735_v34 = vmin.f32 %v3706_v27, %v3734_v33  ;;  %3845 = vmatpush.msra.mxu0 %v3844_v63  ;;  %v13838_v40 = vand.u32 4294901760, %v11254_v30  ;;  %v13839_v43 = vand.u32 4294901760, %v11258_v46  ;;  %v13843_v46 = vand.u32 4294901760, %v11347_v12  ;;  %v13880_v12 = vld [vmem:[#allocation30_spill] sm:$0xff] }
 0x3b6   : >> { %3988 = vmatpush.msra.mxu1 %v3987_v25  ;;  %v3999_v9 = vand.u32 4294901760, %v3998_v17  ;;  %v13837_v25 = vand.u32 4294901760, %v11246_v35  ;;  %v13841_v35 = vand.u32 4294901760, %v11267_v26  ;;  %v13845_v26 = vand.u32 4294901760, %v11376_v6 }
 0x3b7   : >> { %3724 = vmin.xlane.f32.xlu2 %v3723_v45  ;;  %3728 = vmin.xlane.f32.xlu0 %v3727_v54  ;;  %v4002_v54 = vsub.f32 %v13777_v23, %v3844_v63  ;;  %v13836_v45 = vand.u32 4294901760, %v11242_v15  ;;  %v13840_v15 = vand.u32 4294901760, %v11263_v28  ;;  %v13844_v28 = vand.u32 4294901760, %v11351_v49 }
 0x3b8   : >> { %3994 = vmatpush.msra.mxu1 %v3993_v8  ;;  %4213 = vmatpush.msrb.mxu0 %v13834_v42  ;;  %v13503_v30 = vmov 0.0  }
 0x3b9   : >> { %v4003_v37 = vand.u32 4294901760, %v4002_v54  ;;  %4087 = vmatpush.msra.mxu2 %v4002_v54 }
 0x3ba   : >> { %4000 = vmatpush.msra.mxu1 %v3999_v9  ;;  %4217 = vmatpush.msrb.mxu0 %v13835_v44  ;;  %v13857_v9 = vld [vmem:[#allocation99_spill] sm:$0xff] }
 0x3bb   : >> { %v4004_v52 = vsub.f32 %v4002_v54, %v4003_v37 }
 0x3bc   : >> { %4221 = vmatpush.msrb.mxu0 %v13836_v45  ;;  %v13861_v45 = vld [vmem:[#allocation102_spill] sm:$0xff] }
 0x3bd   : >> { %v4005_v58 = vand.u32 4294901760, %v4004_v52  ;;  %v11736_v52 = vand.u32 4294901760, %v13880_v12 }
 0x3be   : >> { %4225 = vmatpush.msrb.mxu0 %v13837_v25 }
 0x3bf   : >> { %3736 = vmin.xlane.f32.xlu2 %v3735_v34  ;;  %4006 = vmatpush.msra.mxu1 %v4005_v58 }
 0x3c0   : >> { %4229 = vmatpush.msrb.mxu0 %v13838_v40 }
 0x3c1   : >> { %4308 = vmatpush.msrb.mxu1 %v11202_v13  ;;  %v13842_v13 = vand.u32 4294901760, %v11276_v31  ;;  %v13846_v31 = vand.u32 4294901760, %v11389_v2 }
 0x3c2   : >> { %4233 = vmatpush.msrb.mxu0 %v13839_v43 }
 0x3c3   : >> { %4310 = vmatpush.msrb.mxu1 %v11216_v62  ;;  %v11550_v62 = vand.u32 4294901760, %v13778_v21 }
 0x3c4   : >> { %4237 = vmatpush.msrb.mxu0 %v13840_v15 }
 0x3c5   : >> { %4312 = vmatpush.msrb.mxu1 %v11219_v38  ;;  %v11556_v38 = vsub.f32 %v13778_v21, %v11550_v62 }
 0x3c6   : >> { %4241 = vmatpush.msrb.mxu0 %v13841_v35 }
 0x3c7   : >> { %4314 = vmatpush.msrb.mxu1 %v11222_v47 }
 0x3c8   : >> { %4245 = vmatpush.msrb.mxu0 %v13842_v13 }
 0x3c9   : >> { %4316 = vmatpush.msrb.mxu1 %v11225_v51  ;;  %v13847_v51 = vmov 0 }
 0x3ca   : >> { %4249 = vmatpush.msrb.mxu0 %v13843_v46  ;;  %v13863_v46 = vld [vmem:[#allocation83_spill] sm:$0xff] }
 0x3cb   : >> { %4318 = vmatpush.msrb.mxu1 %v11228_v36  ;;  %v13502_v36 = vand.u32 4294901760, %v11556_v38 }
 0x3cc   : >> { %4253 = vmatpush.msrb.mxu0 %v13844_v28  ;;  %v11659_v28 = vand.u32 4294901760, %v13863_v46 }
 0x3cd   : >> { %4320 = vmatpush.msrb.mxu1 %v11231_v53  ;;  %v11534_v53 = vand.u32 4294901760, %v13779_v14 }
 0x3ce   : >> { %4257 = vmatpush.msrb.mxu0 %v13845_v26 }
 0x3cf   : >> { %4322 = vmatpush.msrb.mxu1 %v11234_v10  ;;  %4381 = vmatpush.msrb.mxu2 %v11534_v53  ;;  %v11540_v0 = vsub.f32 %v13779_v14, %v11534_v53  ;;  %v13505_v10 = vmov 1.0  }
 0x3d0   : >> { %4261 = vmatpush.msrb.mxu0 %v13846_v31  ;;  %v13864_v31 = vmov 0 }
 0x3d1   : >> { %4324 = vmatpush.msrb.mxu1 %v11250_v5  ;;  %4383 = vmatpush.msrb.mxu2 %v11550_v62 }
 0x3d2   : >> { %4265 = vmatpush.msrb.mxu0 %v3991_v60  ;;  %v13855_v60 = vld [vmem:[#allocation85_spill] sm:$0xff] }
 0x3d3   : >> { %4326 = vmatpush.msrb.mxu1 %v11325_v59  ;;  %v13501_v59 = vand.u32 4294901760, %v11540_v0  ;;  %v11608_v41 = vand.u32 4294901760, %v13855_v60 }
 0x3d4   : >> { %4269 = vmatpush.msrb.mxu0 %v3997_v16 }
 0x3d5   : >> { %4328 = vmatpush.msrb.mxu1 %v11328_v4  ;;  %v4472_v5 = vsub.f32 %v11540_v0, %v13501_v59  ;;  %4385 = vmatpush.msrb.mxu2 %v11608_v41  ;;  %v11618_v33 = vsub.f32 %v13855_v60, %v11608_v41 }
 0x3d6   : >> { %4273 = vmatpush.msrb.mxu0 %v4003_v37  ;;  %v13858_v37 = vmov 0 }
 0x3d7   : >> { %4330 = vmatpush.msrb.mxu1 %v11338_v7  ;;  %v4473_v16 = vand.u32 4294901760, %v4472_v5  ;;  %v13500_v43 = vand.u32 4294901760, %v11618_v33  ;;  %4387 = vmatpush.msrb.mxu2 %v11659_v28 }
 0x3d9   : >> { %4332 = vmatpush.msrb.mxu1 %v11361_v19  ;;  %4474 = vmatpush.msrb.mxu3 %v4473_v16  ;;  %v13851_v19 = vmov 0  ;;  %v4484_v26 = vsub.f32 %v11618_v33, %v13500_v43  ;;  %v13885_v43 = vld [vmem:[#allocation29_spill] sm:$0xff] }
 0x3da   : >> { %4389 = vmatpush.msrb.mxu2 %v11736_v52  ;;  %v13886_v59 = vmov %v13885_v43 }
 0x3db   : >> { %4334 = vmatpush.msrb.mxu1 %v11408_v48  ;;  %v4478_v48 = vsub.f32 %v11556_v38, %v13502_v36  ;;  %v11778_v36 = vand.u32 4294901760, %v13885_v43 }
 0x3dd   : >> { %4336 = vmatpush.msrb.mxu1 %v11445_v22  ;;  %v4479_v17 = vand.u32 4294901760, %v4478_v48  ;;  %v11690_v48 = vsub.f32 %v13863_v46, %v11659_v28  ;;  %4391 = vmatpush.msrb.mxu2 %v11778_v36 }
 0x3df   : >> { %4338 = vmatpush.msrb.mxu1 %v3844_v63  ;;  %4480 = vmatpush.msrb.mxu3 %v4479_v17  ;;  %v13868_v17 = vmov 0 }
 0x41a   : >> { %v11558_v47 = vpop.xlane.xlu0 %3712  ;;  %v11584_v7 = vpop.xlane.xlu1 %3720 }
 0x41b   : >> { %vm11562_vm9 = vcmp.eq.f32.partialorder %v13821_v24, %v11558_v47  ;;  %vm3743_vm10 = vcmp.eq.f32.partialorder %v13822_v57, %v11558_v47  ;;  %vm11588_vm2 = vcmp.eq.f32.partialorder %v13821_v24, %v11584_v7  ;;  %vm3747_vm11 = vcmp.eq.f32.partialorder %v13822_v57, %v11584_v7 }
 0x41c   : >> { %v13848_v51 = vsel %vm11562_vm9, 4294967295, %v13847_v51  ;;  %v11576_v56 = vsel %vm3743_vm10, 1e+30, %v8942_v56   ;;  %8188 = vmatmul.msk.f32.vlgmr.msra.gmra.mxu1 %vm11562_vm9, %v13505_v10  ;;  %v8172_v4 = vsel %vm11562_vm9, 1.0, %v13503_v30  ;;  %v13852_v19 = vsel %vm11588_vm2, 4294967295, %v13851_v19 }
 0x41d   : >> { %13849 = vst [vmem:[#allocation111_spill] sm:$0xff] %v13848_v51  ;;  %v3847_v49 = vsub.f32 %v8172_v4, %v8172_v4  ;;  %4632 = vmatpush.msra.mxu1 %v11534_v53  ;;  %v11602_v1 = vsel %vm3747_vm11, 1e+30, %v8926_v1   ;;  %v8176_v63 = vsel %vm11588_vm2, 1.0, %v13503_v30  ;;  %v13896_v47 = vmov 0 }
 0x41e   : >> { %13850 = vst [vmem:[#allocation112_spill] sm:$0xff] %v11576_v56  ;;  %v3863_v35 = vsub.f32 %v8176_v63, %v8176_v63 }
 0x41f   : >> { %13853 = vst [vmem:[#allocation113_spill] sm:$0xff] %v13852_v19  ;;  %4090 = vmatmul.f32.vlgmr.msra.gmra.mxu2 %v3847_v49  ;;  %v3848_v6 = vand.u32 4294901760, %v3847_v49  ;;  %4634 = vmatpush.msra.mxu1 %v11550_v62 }
 0x420   : >> { %13854 = vst [vmem:[#allocation114_spill] sm:$0xff] %v11602_v1  ;;  %v3864_v63 = vand.u32 4294901760, %v3863_v35 }
 0x421   : >> { %4164 = vmatmul.f32.vlgmr.msra.gmra.mxu3 %v3848_v6  ;;  %v3849_v22 = vsub.f32 %v3847_v49, %v3848_v6  ;;  %4636 = vmatpush.msra.mxu1 %v11608_v41  ;;  %v4485_v6 = vand.u32 4294901760, %v4484_v26 }
 0x422   : >> { %v11612_v8 = vpop.xlane.xlu0 %3676  ;;  %v11614_v27 = vpop.xlane.xlu2 %3716 }
 0x423   : >> { %13856 = vst [vmem:[#allocation115_spill] sm:$0xff] %v11612_v8  ;;  %vm3693_vm12 = vcmp.le.f32.partialorder %v13857_v9, %v11612_v8  ;;  %v3850_v34 = vand.u32 4294901760, %v3849_v22  ;;  %vm3692_vm13 = vcmp.le.f32.partialorder %v8890_v39, %v11612_v8  ;;  %vm11632_vm14 = vcmp.eq.f32.partialorder %v13821_v24, %v11614_v27  ;;  %4638 = vmatpush.msra.mxu1 %v11659_v28 }
 0x424   : >> { %v3708_v54 = vsel %vm3692_vm13, %v13821_v24, 192.0  ;;  %v3709_v42 = vsel %vm3693_vm12, %v13822_v57, 192.0  ;;  %v13859_v37 = vsel %vm11632_vm14, 4294967295, %v13858_v37  ;;  %vm3745_vm15 = vcmp.eq.f32.partialorder %v13822_v57, %v11614_v27  ;;  %8189 = vmatmul.msk.f32.gmra.mxu1 %vm11632_vm14, %v13505_v10  ;;  %4486 = vmatpush.msrb.mxu3 %v4485_v6 }
 0x425   : >> { %13860 = vst [vmem:[#allocation116_spill] sm:$0xff] %v13859_v37  ;;  %3851 = vmatmul.f32.vlgmr.msra.gmra.mxu0 %v3850_v34  ;;  %v3738_v44 = vsel %vm3645_vm8, %v3709_v42, inf  ;;  %v11646_v25 = vsel %vm3745_vm15, 1e+30, %v13861_v45   ;;  %v8174_v40 = vsel %vm11632_vm14, 1.0, %v13503_v30  ;;  %v13874_v45 = vmov 0  ;;  %4640 = vmatpush.msra.mxu1 %v11736_v52 }
 0x426   : >> { %13862 = vst [vmem:[#allocation117_spill] sm:$0xff] %v11646_v25  ;;  %v3739_v58 = vmin.f32 %v3708_v54, %v3738_v44  ;;  %4560 = vmatpush.msra.mxu0 %v11540_v0  ;;  %v3855_v15 = vsub.f32 %v8174_v40, %v8174_v40  ;;  %v11656_v13 = vpop.xlane.xlu1 %3732  ;;  %v13872_v54 = vld [vmem:[#allocation101_spill] sm:$0xff] }
 0x427   : >> { %vm11666_vm0 = vcmp.eq.f32.partialorder %v13821_v24, %v11656_v13  ;;  %vm3753_vm3 = vcmp.eq.f32.partialorder %v13822_v57, %v11656_v13  ;;  %4642 = vmatpush.msra.mxu1 %v11778_v36 }
 0x428   : >> { %3740 = vmin.xlane.f32.xlu0 %v3739_v58  ;;  %v13865_v31 = vsel %vm11666_vm0, 4294967295, %v13864_v31  ;;  %4563 = vmatpush.msra.mxu0 %v11556_v38  ;;  %v3856_v5 = vand.u32 4294901760, %v3855_v15  ;;  %v11680_v29 = vsel %vm3753_vm3, 1e+30, %v8902_v29  }
 0x429   : >> { %13866 = vst [vmem:[#allocation118_spill] sm:$0xff] %v13865_v31  ;;  %4095 = vmatmul.f32.gmra.mxu2 %v3855_v15 }
 0x42a   : >> { %13867 = vst [vmem:[#allocation119_spill] sm:$0xff] %v11680_v29  ;;  %v11683_v4 = vpop.xlane.xlu2 %3724  ;;  %v11685_v49 = vpop.xlane.xlu0 %3728  ;;  %4566 = vmatpush.msra.mxu0 %v11618_v33  ;;  %4170 = vmatmul.f32.gmra.mxu3 %v3856_v5  ;;  %v3857_v22 = vsub.f32 %v3855_v15, %v3856_v5  ;;  %v13878_v15 = vld [vmem:[#allocation100_spill] sm:$0xff]  ;;  %v3865_v5 = vsub.f32 %v3863_v35, %v3864_v63 }
 0x42b   : >> { %vm11695_vm4 = vcmp.eq.f32.partialorder %v13821_v24, %v11683_v4  ;;  %vm3749_vm5 = vcmp.eq.f32.partialorder %v13822_v57, %v11683_v4  ;;  %vm11715_vm6 = vcmp.eq.f32.partialorder %v13821_v24, %v11685_v49  ;;  %vm3751_vm7 = vcmp.eq.f32.partialorder %v13822_v57, %v11685_v49 }
 0x42c   : >> { %v13869_v17 = vsel %vm11695_vm4, 4294967295, %v13868_v17  ;;  %v8178_v44 = vsel %vm11695_vm4, 1.0, %v13503_v30  ;;  %v13875_v45 = vsel %vm11715_vm6, 4294967295, %v13874_v45  ;;  %4569 = vmatpush.msra.mxu0 %v11690_v48  ;;  %v3858_v58 = vand.u32 4294901760, %v3857_v22  ;;  %8190 = vmatmul.msk.f32.gmra.mxu1 %vm11588_vm2, %v13505_v10 }
 0x42d   : >> { %13870 = vst [vmem:[#allocation120_spill] sm:$0xff] %v13869_v17  ;;  %v11708_v17 = vsel %vm3749_vm5, 1e+30, %v13872_v54   ;;  %v11732_v54 = vsel %vm3751_vm7, 1e+30, %v13878_v15   ;;  %v3871_v6 = vsub.f32 %v8178_v44, %v8178_v44  ;;  %v13499_v22 = vand.u32 4294901760, %v11690_v48 }
 0x42e   : >> { %13873 = vst [vmem:[#allocation121_spill] sm:$0xff] %v11708_v17  ;;  %3859 = vmatmul.f32.gmra.mxu0 %v3858_v58  ;;  %v11746_v15 = vsub.f32 %v13880_v12, %v11736_v52  ;;  %v3866_v44 = vand.u32 4294901760, %v3865_v5  ;;  %v8180_v16 = vsel %vm11715_vm6, 1.0, %v13503_v30 }
 0x42f   : >> { %13876 = vst [vmem:[#allocation122_spill] sm:$0xff] %v13875_v45  ;;  %v4490_v2 = vsub.f32 %v11690_v48, %v13499_v22  ;;  %v3872_v58 = vand.u32 4294901760, %v3871_v6  ;;  %v3879_v22 = vsub.f32 %v8180_v16, %v8180_v16  ;;  %v13888_v16 = vmov 1.0  }
 0x430   : >> { %13879 = vst [vmem:[#allocation123_spill] sm:$0xff] %v11732_v54  ;;  %v13508_v5 = vand.u32 4294901760, %v11746_v15  ;;  %4572 = vmatpush.msra.mxu0 %v11746_v15 }
 0x431   : >> { %4100 = vmatmul.f32.gmra.mxu2 %v3863_v35  ;;  %v4491_v26 = vand.u32 4294901760, %v4490_v2  ;;  %v13881_v35 = vmov 0  ;;  %v3880_v12 = vand.u32 4294901760, %v3879_v22 }
 0x432   : >> { %v11741_v42 = vpop.xlane.xlu2 %3736  ;;  %4176 = vmatmul.f32.gmra.mxu3 %v3864_v63  ;;  %v4496_v2 = vsub.f32 %v11746_v15, %v13508_v5  ;;  %v3873_v63 = vsub.f32 %v3871_v6, %v3872_v58 }
 0x433   : >> { %vm11751_vm12 = vcmp.eq.f32.partialorder %v13821_v24, %v11741_v42  ;;  %vm3755_vm13 = vcmp.eq.f32.partialorder %v13822_v57, %v11741_v42  ;;  %4492 = vmatpush.msrb.mxu3 %v4491_v26  ;;  %v4500_v26 = vsub.f32 %v13886_v59, %v11778_v36 }
 0x434   : >> { %v13882_v35 = vsel %vm11751_vm12, 4294967295, %v13881_v35  ;;  %8191 = vmatmul.msk.f32.gmra.mxu1 %vm11695_vm4, %v13505_v10  ;;  %v11772_v18 = vsel %vm3755_vm13, 1e+30, %v8894_v18   ;;  %v4497_v30 = vand.u32 4294901760, %v4496_v2  ;;  %v3874_v10 = vand.u32 4294901760, %v3873_v63 }
 0x435   : >> { %13883 = vst [vmem:[#allocation124_spill] sm:$0xff] %v13882_v35  ;;  %v4501_v5 = vand.u32 4294901760, %v4500_v26  ;;  %4575 = vmatpush.msra.mxu0 %v4500_v26  ;;  %v3881_v2 = vsub.f32 %v3879_v22, %v3880_v12 }
 0x436   : >> { %13884 = vst [vmem:[#allocation125_spill] sm:$0xff] %v11772_v18  ;;  %3867 = vmatmul.f32.gmra.mxu0 %v3866_v44  ;;  %4498 = vmatpush.msrb.mxu3 %v4497_v30  ;;  %v13887_v44 = vmov 0.0  }
 0x437   : >> { %v8182_v43 = vsel %vm11666_vm0, 1.0, %v13887_v44  ;;  %v8184_v21 = vsel %vm11751_vm12, 1.0, %v13887_v44 }
 0x438   : >> { %v3887_v14 = vsub.f32 %v8182_v43, %v8182_v43 }
 0x439   : >> { %4105 = vmatmul.f32.gmra.mxu2 %v3871_v6  ;;  %v4502_v6 = vsub.f32 %v4500_v26, %v4501_v5  ;;  %v3895_v26 = vsub.f32 %v8184_v21, %v8184_v21  ;;  %v13890_v21 = vld [vmem:[#allocation26_spill] sm:$0xff] }
 0x43a   : >> { %4182 = vmatmul.f32.gmra.mxu3 %v3872_v58  ;;  %v3882_v58 = vand.u32 4294901760, %v3881_v2  ;;  %v3888_v63 = vand.u32 4294901760, %v3887_v14 }
 0x43b   : >> { %v4503_v30 = vand.u32 4294901760, %v4502_v6  ;;  %v3896_v43 = vand.u32 4294901760, %v3895_v26  ;;  %v13889_v6 = vld [vmem:[#allocation28_spill] sm:$0xff] }
 0x43c   : >> { %8192 = vmatmul.msk.f32.gmra.mxu1 %vm11715_vm6, %v13888_v16  ;;  %v3889_v23 = vsub.f32 %v3887_v14, %v3888_v63  ;;  %v4392_v2 = vand.u32 4294901760, %v13889_v6 }
 0x43d   : >> { %4504 = vmatpush.msrb.mxu3 %v4503_v30 }
 0x43e   : >> { %3875 = vmatmul.f32.gmra.mxu0 %v3874_v10  ;;  %v3890_v10 = vand.u32 4294901760, %v3889_v23  ;;  %4393 = vmatpush.msrb.mxu2 %v4392_v2  ;;  %v4506_v30 = vsub.f32 %v13889_v6, %v4392_v2  ;;  %v13893_v6 = vand.u32 4294901760, %v11618_v33  ;;  %v11835_v33 = vsel %vm3745_vm15, 1.0, %v13887_v44 }
 0x43f   : >> { %4644 = vmatpush.msra.mxu1 %v4392_v2 }
 0x440   : >> { %v4507_v23 = vand.u32 4294901760, %v4506_v30  ;;  %4578 = vmatpush.msra.mxu0 %v4506_v30 }
 0x441   : >> { %4110 = vmatmul.f32.gmra.mxu2 %v3879_v22 }
 0x442   : >> { %4188 = vmatmul.f32.gmra.mxu3 %v3880_v12  ;;  %v3897_v12 = vsub.f32 %v3895_v26, %v3896_v43 }
 0x444   : >> { %8193 = vmatmul.msk.f32.gmra.mxu1 %vm11666_vm0, %v13888_v16  ;;  %v3898_v22 = vand.u32 4294901760, %v3897_v12 }
 0x446   : >> { %3883 = vmatmul.f32.gmra.mxu0 %v3882_v58 }
 0x449   : >> { %4115 = vmatmul.f32.gmra.mxu2 %v3887_v14  ;;  %v4394_v14 = vand.u32 4294901760, %v13890_v21 }
 0x44a   : >> { %4194 = vmatmul.f32.gmra.mxu3 %v3888_v63  ;;  %v13891_v63 = vand.u32 4294901760, %v11540_v0  ;;  %v13895_v0 = vand.u32 4294901760, %v11746_v15 }
 0x44b   : >> { %4395 = vmatpush.msrb.mxu2 %v4394_v14  ;;  %v4512_v58 = vsub.f32 %v13890_v21, %v4394_v14  ;;  %4646 = vmatpush.msra.mxu1 %v4394_v14  ;;  %v13894_v21 = vand.u32 4294901760, %v11690_v48 }
 0x44c   : >> { %8194 = vmatmul.msk.f32.gmra.mxu1 %vm11751_vm12, %v13888_v16 }
 0x44d   : >> { %4707 = vmatpush.msra.mxu2 %v13891_v63  ;;  %4581 = vmatpush.msra.mxu0 %v4512_v58  ;;  %v11891_v63 = vsel %vm3749_vm5, 1.0, %v13887_v44 }
 0x44e   : >> { %3891 = vmatmul.f32.gmra.mxu0 %v3890_v10  ;;  %v4513_v10 = vand.u32 4294901760, %v4512_v58 }
 0x451   : >> { %4120 = vmatmul.f32.gmra.mxu2 %v3895_v26  ;;  %v4508_v26 = vsub.f32 %v4506_v30, %v4507_v23 }
 0x452   : >> { %4200 = vmatmul.f32.gmra.mxu3 %v3896_v43  ;;  %v13892_v43 = vand.u32 4294901760, %v11556_v38  ;;  %v11822_v38 = vsel %vm3743_vm10, 1.0, %v13887_v44 }
 0x453   : >> { %v4509_v12 = vand.u32 4294901760, %v4508_v26 }
 0x454   : >> { %4711 = vmatpush.msra.mxu2 %v13892_v43  ;;  %v3800_v43 = vsel %vm3645_vm8, %v11891_v63, 0 }
 0x455   : >> { %4510 = vmatpush.msrb.mxu3 %v4509_v12  ;;  %v11907_v12 = vsub.f32 %v3800_v43, %v3800_v43 }
 0x456   : >> { %3899 = vmatmul.f32.gmra.mxu0 %v3898_v22  ;;  %v4514_v22 = vsub.f32 %v4512_v58, %v4513_v10  ;;  %4715 = vmatpush.msra.mxu2 %v13893_v6  ;;  %v11872_v6 = vsel %vm3747_vm11, 1.0, %v13887_v44 }
 0x458   : >> { %v4515_v46 = vand.u32 4294901760, %v4514_v22  ;;  %4719 = vmatpush.msra.mxu2 %v13894_v21  ;;  %v11913_v22 = vsel %vm3751_vm7, 1.0, %v13887_v44 }
 0x45a   : >> { %4516 = vmatpush.msrb.mxu3 %v4515_v46  ;;  %4723 = vmatpush.msra.mxu2 %v13895_v0 }
 0x45c   : >> { %4778 = vmatpush.msra.mxu3 %v11534_v53  ;;  %4727 = vmatpush.msra.mxu2 %v4501_v5  ;;  %v3791_v53 = vsel %vm3645_vm8, %v11822_v38, 0 }
 0x45e   : >> { %4780 = vmatpush.msra.mxu3 %v11550_v62  ;;  %4731 = vmatpush.msra.mxu2 %v4507_v23  ;;  %v11827_v62 = vsub.f32 %v3791_v53, %v3791_v53  ;;  %v4422_v53 = vand.u32 4294901760, %v11907_v12 }
 0x460   : >> { %4782 = vmatpush.msra.mxu3 %v11608_v41  ;;  %4735 = vmatpush.msra.mxu2 %v4513_v10  ;;  %v4398_v46 = vand.u32 4294901760, %v11827_v62  ;;  %v4423_v49 = vsub.f32 %v11907_v12, %v4422_v53 }
 0x462   : >> { %4784 = vmatpush.msra.mxu3 %v11659_v28  ;;  %v3794_v28 = vsel %vm3645_vm8, %v11835_v33, 0 }
 0x463   : >> { %v11866_v5 = vsub.f32 %v3794_v28, %v3794_v28  ;;  %v11935_v28 = vsel %vm3753_vm3, 1.0, %v13887_v44  ;;  %vm4997_vm3 = vcmask 261120  }
 0x464   : >> { %4786 = vmatpush.msra.mxu3 %v11736_v52 }
 0x465   : >> { %v4406_v21 = vand.u32 4294901760, %v11866_v5 }
 0x466   : >> { %4788 = vmatpush.msra.mxu3 %v11778_v36 }
 0x467   : >> { %v4407_v7 = vsub.f32 %v11866_v5, %v4406_v21 }
 0x468   : >> { %4790 = vmatpush.msra.mxu3 %v4392_v2 }
 0x469   : >> { %v4408_v26 = vand.u32 4294901760, %v4407_v7 }
 0x46a   : >> { %4792 = vmatpush.msra.mxu3 %v4394_v14  ;;  %v3797_v14 = vsel %vm3645_vm8, %v11872_v6, 0 }
 0x46b   : >> { %v11885_v23 = vsub.f32 %v3797_v14, %v3797_v14 }
 0x46d   : >> { %v4414_v10 = vand.u32 4294901760, %v11885_v23 }
 0x46f   : >> { %v4415_v4 = vsub.f32 %v11885_v23, %v4414_v10 }
 0x471   : >> { %v4416_v0 = vand.u32 4294901760, %v4415_v4 }
 0x49b   : >> { %v11829_v41 = vpop.xlane.xlu0 %3740 }
 0x49c   : >> { %vm11839_vm10 = vcmp.eq.f32.partialorder %v13821_v24, %v11829_v41  ;;  %vm3757_vm1 = vcmp.eq.f32.partialorder %v13822_v57, %v11829_v41  ;;  %v12000_v41 = vpop.f32.mrf.mxu1 }
 0x49d   : >> { %v13897_v47 = vsel %vm11839_vm10, 4294967295, %v13896_v47  ;;  %v11852_v58 = vsel %vm3757_vm1, 1e+30, %v13857_v9   ;;  %8195 = vmatmul.msk.f32.gmra.mxu1 %vm11839_vm10, %v13888_v16  ;;  %v8186_v36 = vsel %vm11839_vm10, 1.0, %v13887_v44  ;;  %v4399_v9 = vsub.f32 %v11827_v62, %v4398_v46 }
 0x49e   : >> { %13898 = vst [vmem:[#allocation126_spill] sm:$0xff] %v13897_v47  ;;  %v3903_v27 = vsub.f32 %v8186_v36, %v8186_v36  ;;  %v3803_v36 = vsel %vm3645_vm8, %v11913_v22, 0  ;;  %v11979_v4 = vsel %vm3757_vm1, 1.0, %v13887_v44 }
 0x49f   : >> { %13899 = vst [vmem:[#allocation127_spill] sm:$0xff] %v11852_v58  ;;  %v4400_v30 = vand.u32 4294901760, %v4399_v9  ;;  %v3806_v9 = vsel %vm3645_vm8, %v11935_v28, 0 }
 0x4a0   : >> { %4125 = vmatmul.f32.gmra.mxu2 %v3903_v27  ;;  %v3904_v48 = vand.u32 4294901760, %v3903_v27 }
 0x4a2   : >> { %4206 = vmatmul.f32.gmra.mxu3 %v3904_v48  ;;  %v3905_v15 = vsub.f32 %v3903_v27, %v3904_v48  ;;  %v11929_v27 = vsub.f32 %v3803_v36, %v3803_v36  ;;  %v4424_v48 = vand.u32 4294901760, %v4423_v49  ;;  %v3812_v49 = vsel %vm3645_vm8, %v11979_v4, 0 }
 0x4a4   : >> { %v3906_v2 = vand.u32 4294901760, %v3905_v15  ;;  %v4430_v15 = vand.u32 4294901760, %v11929_v27 }
 0x4a5   : >> { %8204 = vmatmul.msk.f32.vlgmr.msrb.gmra.mxu1 %vm11562_vm9, %v13888_v16 }
 0x4a6   : >> { %3907 = vmatmul.f32.gmra.mxu0 %v3906_v2  ;;  %v11946_v2 = vsub.f32 %v3806_v9, %v3806_v9  ;;  %v4431_v13 = vsub.f32 %v11929_v27, %v4430_v15 }
 0x4a8   : >> { %4401 = vmatmul.f32.vlgmr.msrb.gmra.mxu2 %v4400_v30  ;;  %v11957_v30 = vsel %vm3755_vm13, 1.0, %v13887_v44  ;;  %v4432_v14 = vand.u32 4294901760, %v4431_v13  ;;  %v4438_v7 = vand.u32 4294901760, %v11946_v2 }
 0x4aa   : >> { %8212 = vmatmul.msk.f32.vlgmr.msrb.gmra.mxu3 %vm3645_vm8, %v11822_v38  ;;  %v4439_v42 = vsub.f32 %v11946_v2, %v4438_v7 }
 0x4ad   : >> { %8205 = vmatmul.msk.f32.gmra.mxu1 %vm11632_vm14, %v13888_v16 }
 0x4ae   : >> { %8196 = vmatmul.msk.f32.vlgmr.msrb.gmra.mxu0 %vm11562_vm9, %v13888_v16 }
 0x4b0   : >> { %4409 = vmatmul.f32.gmra.mxu2 %v4408_v26  ;;  %v3809_v26 = vsel %vm3645_vm8, %v11957_v30, 0 }
 0x4b1   : >> { %v11968_v43 = vsub.f32 %v3809_v26, %v3809_v26 }
 0x4b2   : >> { %8213 = vmatmul.msk.f32.gmra.mxu3 %vm3645_vm8, %v11835_v33 }
 0x4b3   : >> { %v13517_v36 = vand.u32 4294901760, %v11968_v43 }
 0x4b5   : >> { %8206 = vmatmul.msk.f32.gmra.mxu1 %vm11588_vm2, %v13888_v16  ;;  %v4447_v44 = vsub.f32 %v11968_v43, %v13517_v36 }
 0x4b6   : >> { %8197 = vmatmul.msk.f32.gmra.mxu0 %vm11632_vm14, %v13888_v16 }
 0x4b7   : >> { %v4448_v9 = vand.u32 4294901760, %v4447_v44  ;;  %v12025_v44 = vpop.f32.mrf.mxu3 }
 0x4b8   : >> { %4417 = vmatmul.f32.gmra.mxu2 %v4416_v0  ;;  %v4440_v0 = vand.u32 4294901760, %v4439_v42  ;;  %v12017_v42 = vpop.f32.mrf.mxu1 }
 0x4ba   : >> { %8214 = vmatmul.msk.f32.gmra.mxu3 %vm3645_vm8, %v11872_v6 }
 0x4bd   : >> { %8207 = vmatmul.msk.f32.gmra.mxu1 %vm11695_vm4, %v13888_v16 }
 0x4be   : >> { %8198 = vmatmul.msk.f32.gmra.mxu0 %vm11588_vm2, %v13888_v16 }
 0x4bf   : >> { %v12042_v52 = vpop.f32.mrf.mxu3 }
 0x4c0   : >> { %4425 = vmatmul.f32.gmra.mxu2 %v4424_v48  ;;  %v11990_v48 = vsub.f32 %v3812_v49, %v3812_v49  ;;  %v12021_v49 = vpop.f32.mrf.mxu2 }
 0x4c2   : >> { %8215 = vmatmul.msk.f32.gmra.mxu3 %vm3645_vm8, %v11891_v63  ;;  %v13516_v13 = vand.u32 4294901760, %v11990_v48  ;;  %v13901_v57 = vand.u32 4294901760, %v11990_v48 }
 0x4c5   : >> { %8208 = vmatmul.msk.f32.gmra.mxu1 %vm11715_vm6, %v13888_v16 }
 0x4c6   : >> { %8199 = vmatmul.msk.f32.gmra.mxu0 %vm11695_vm4, %v13888_v16 }
 0x4c8   : >> { %4433 = vmatmul.f32.gmra.mxu2 %v4432_v14  ;;  %v4455_v14 = vsub.f32 %v11990_v48, %v13516_v13 }
 0x4ca   : >> { %8216 = vmatmul.msk.f32.gmra.mxu3 %vm3645_vm8, %v11913_v22  ;;  %v4456_v26 = vand.u32 4294901760, %v4455_v14 }
 0x4cd   : >> { %8209 = vmatmul.msk.f32.gmra.mxu1 %vm11666_vm0, %v13888_v16 }
 0x4ce   : >> { %8200 = vmatmul.msk.f32.gmra.mxu0 %vm11715_vm6, %v13888_v16 }
 0x4d0   : >> { %4441 = vmatmul.f32.gmra.mxu2 %v4440_v0  ;;  %v12019_v0 = vpop.f32.mrf.mxu0 }
 0x4d1   : >> { %v4010_v58 = vadd.f32 %v12000_v41, %v12019_v0 }
 0x4d2   : >> { %8217 = vmatmul.msk.f32.gmra.mxu3 %vm3645_vm8, %v11935_v28 }
 0x4d3   : >> { %v4092_v32 = vadd.f32 %v12021_v49, %v4010_v58 }
 0x4d5   : >> { %8210 = vmatmul.msk.f32.gmra.mxu1 %vm11751_vm12, %v13888_v16 }
 0x4d6   : >> { %8201 = vmatmul.msk.f32.gmra.mxu0 %vm11666_vm0, %v13888_v16 }
 0x4d8   : >> { %4449 = vmatmul.f32.gmra.mxu2 %v4448_v9  ;;  %v12034_v9 = vpop.f32.mrf.mxu1  ;;  %v12036_v14 = vpop.f32.mrf.mxu0 }
 0x4da   : >> { %8218 = vmatmul.msk.f32.gmra.mxu3 %vm3645_vm8, %v11957_v30 }
 0x4dd   : >> { %8211 = vmatmul.msk.f32.gmra.mxu1 %vm11839_vm10, %v13888_v16 }
 0x4de   : >> { %8202 = vmatmul.msk.f32.gmra.mxu0 %vm11751_vm12, %v13888_v16 }
 0x4e0   : >> { %4457 = vmatmul.f32.gmra.mxu2 %v4456_v26  ;;  %v12038_v26 = vpop.f32.mrf.mxu2 }
 0x4e2   : >> { %8219 = vmatmul.msk.f32.gmra.mxu3 %vm3645_vm8, %v11979_v4 }
 0x4e5   : >> { %4650 = vmatmul.f32.vlgmr.msra.gmra.mxu1 %v4398_v46  ;;  %v12053_v46 = vpop.f32.mrf.mxu0 }
 0x4e6   : >> { %8203 = vmatmul.msk.f32.gmra.mxu0 %vm11839_vm10, %v13888_v16  ;;  %v12051_v16 = vpop.f32.mrf.mxu1  ;;  %v4018_v58 = vadd.f32 %v12034_v9, %v12053_v46 }
 0x4e8   : >> { %8220 = vmatmul.msk.f32.vlgmr.msra.gmra.mxu2 %vm3645_vm8, %v11822_v38  ;;  %v12055_v13 = vpop.f32.mrf.mxu2 }
 0x4ea   : >> { %8228 = vmatmul.msk.f32.vlgmr.msra.gmra.mxu3 %vm3645_vm8, %v11822_v38  ;;  %v12057_v38 = vpop.f32.mrf.mxu3 }
 0x4ed   : >> { %4656 = vmatmul.f32.gmra.mxu1 %v4406_v21 }
 0x4ee   : >> { %4584 = vmatmul.f32.vlgmr.msra.gmra.mxu0 %v11827_v62  ;;  %v12066_v62 = vpop.f32.mrf.mxu1 }
 0x4f0   : >> { %8221 = vmatmul.msk.f32.gmra.mxu2 %vm3645_vm8, %v11835_v33  ;;  %v12070_v21 = vpop.f32.mrf.mxu2 }
 0x4f2   : >> { %8229 = vmatmul.msk.f32.gmra.mxu3 %vm3645_vm8, %v11835_v33  ;;  %v12068_v33 = vpop.f32.mrf.mxu0 }
 0x4f3   : >> { %v4022_v9 = vadd.f32 %v12051_v16, %v12068_v33 }
 0x4f5   : >> { %4662 = vmatmul.f32.gmra.mxu1 %v4414_v10  ;;  %v12075_v10 = vpop.f32.mrf.mxu3 }
 0x4f6   : >> { %4589 = vmatmul.f32.gmra.mxu0 %v11866_v5  ;;  %v12084_v5 = vpop.f32.mrf.mxu1 }
 0x4f8   : >> { %8222 = vmatmul.msk.f32.gmra.mxu2 %vm3645_vm8, %v11872_v6 }
 0x4fa   : >> { %8230 = vmatmul.msk.f32.gmra.mxu3 %vm3645_vm8, %v11872_v6  ;;  %v12086_v6 = vpop.f32.mrf.mxu0 }
 0x4fd   : >> { %4668 = vmatmul.f32.gmra.mxu1 %v4422_v53  ;;  %v12088_v53 = vpop.f32.mrf.mxu2 }
 0x4fe   : >> { %4594 = vmatmul.f32.gmra.mxu0 %v11885_v23  ;;  %v12092_v23 = vpop.f32.mrf.mxu3 }
 0x500   : >> { %8223 = vmatmul.msk.f32.gmra.mxu2 %vm3645_vm8, %v11891_v63 }
 0x502   : >> { %8231 = vmatmul.msk.f32.gmra.mxu3 %vm3645_vm8, %v11891_v63  ;;  %v12101_v63 = vpop.f32.mrf.mxu1 }
 0x505   : >> { %4674 = vmatmul.f32.gmra.mxu1 %v4430_v15  ;;  %v12105_v15 = vpop.f32.mrf.mxu2 }
 0x506   : >> { %4599 = vmatmul.f32.gmra.mxu0 %v11907_v12  ;;  %v12103_v12 = vpop.f32.mrf.mxu0  ;;  %v12109_v36 = vpop.f32.mrf.mxu3 }
 0x508   : >> { %8224 = vmatmul.msk.f32.gmra.mxu2 %vm3645_vm8, %v11913_v22 }
 0x50a   : >> { %8232 = vmatmul.msk.f32.gmra.mxu3 %vm3645_vm8, %v11913_v22  ;;  %v13900_v22 = vand.u32 4294901760, %v11968_v43 }
 0x50d   : >> { %4680 = vmatmul.f32.gmra.mxu1 %v4438_v7  ;;  %v12122_v24 = vpop.f32.mrf.mxu2 }
 0x50e   : >> { %4604 = vmatmul.f32.gmra.mxu0 %v11929_v27  ;;  %v12120_v7 = vpop.f32.mrf.mxu0 }
 0x510   : >> { %8225 = vmatmul.msk.f32.gmra.mxu2 %vm3645_vm8, %v11935_v28 }
 0x512   : >> { %8233 = vmatmul.msk.f32.gmra.mxu3 %vm3645_vm8, %v11935_v28  ;;  %v12124_v28 = vpop.f32.mrf.mxu3 }
 0x515   : >> { %4686 = vmatmul.f32.gmra.mxu1 %v13900_v22 }
 0x516   : >> { %4609 = vmatmul.f32.gmra.mxu0 %v11946_v2 }
 0x518   : >> { %8226 = vmatmul.msk.f32.gmra.mxu2 %vm3645_vm8, %v11957_v30 }
 0x51a   : >> { %v12116_v27 = vpop.f32.mrf.mxu1  ;;  %8234 = vmatmul.msk.f32.gmra.mxu3 %vm3645_vm8, %v11957_v30 }
 0x51d   : >> { %4692 = vmatmul.f32.gmra.mxu1 %v13901_v57 }
 0x51e   : >> { %4614 = vmatmul.f32.gmra.mxu0 %v11968_v43 }
 0x520   : >> { %8227 = vmatmul.msk.f32.gmra.mxu2 %vm3645_vm8, %v11979_v4 }
 0x522   : >> { %v4341_v2 = vpop.f32.mrf.mxu1  ;;  %8235 = vmatmul.msk.f32.gmra.mxu3 %vm3645_vm8, %v11979_v4 }
 0x523   : >> { %v12133_v22 = vpop.f32.mrf.mxu0  ;;  %v12135_v30 = vpop.f32.mrf.mxu2 }
 0x524   : >> { %13902 = vst [vmem:[#allocation99_spill] sm:$0xff] %v12135_v30 }
 0x525   : >> { %v12137_v59 = vpop.f32.mrf.mxu3 }
 0x526   : >> { %13903 = vst [vmem:[#allocation102_spill] sm:$0xff] %v12137_v59  ;;  %4619 = vmatmul.f32.gmra.mxu0 %v11990_v48  ;;  %v13904_v48 = vld [vmem:[#allocation41_spill] sm:$0xff] }
 0x527   : >> { %v12153_v20 = vand.u32 4294901760, %v13904_v48 }
 0x529   : >> { %5035 = vmatpush.msrb.mxu0 %v12153_v20  ;;  %5254 = vmatpush.msrb.mxu3 %v12153_v20  ;;  %v12165_v45 = vsub.f32 %v13904_v48, %v12153_v20 }
 0x52a   : >> { %v4345_v60 = vpop.f32.mrf.mxu1 }
 0x52b   : >> { %v4276_v11 = vpop.f32.mrf.mxu0  ;;  %v4402_v57 = vpop.f32.mrf.mxu2  ;;  %v13540_v55 = vand.u32 4294901760, %v12165_v45  ;;  %5190 = vmatpush.msrb.mxu2 %v12165_v45 }
 0x52d   : >> { %v4519_v51 = vpop.f32.mrf.mxu3  ;;  %v5122_v50 = vsub.f32 %v12165_v45, %v13540_v55 }
 0x52f   : >> { %v5123_v18 = vand.u32 4294901760, %v5122_v50  ;;  %v4166_v50 = vadd.f32 %v12025_v44, %v4092_v32 }
 0x531   : >> { %5124 = vmatpush.msrb.mxu1 %v5123_v18  ;;  %v4014_v18 = vadd.f32 %v12017_v42, %v12036_v14  ;;  %v4102_v14 = vadd.f32 %v12055_v13, %v4018_v58  ;;  %v4107_v13 = vadd.f32 %v12070_v21, %v4022_v9 }
 0x532   : >> { %v12140_v43 = vpop.f32.mrf.mxu1 }
 0x533   : >> { %v4280_v56 = vpop.f32.mrf.mxu0  ;;  %v4410_v61 = vpop.f32.mrf.mxu2  ;;  %v4097_v41 = vadd.f32 %v12038_v26, %v4014_v18  ;;  %v4184_v58 = vadd.f32 %v12075_v10, %v4107_v13 }
 0x535   : >> { %v12142_v37 = vpop.f32.mrf.mxu3 }
 0x53a   : >> { %v12144_v25 = vpop.f32.mrf.mxu1 }
 0x53b   : >> { %v4284_v4 = vpop.f32.mrf.mxu0  ;;  %v12146_v3 = vpop.f32.mrf.mxu2 }
 0x53d   : >> { %v12148_v19 = vpop.f32.mrf.mxu3 }
 0x542   : >> { %v12150_v1 = vpop.f32.mrf.mxu1 }
 0x543   : >> { %v12155_v34 = vpop.f32.mrf.mxu0  ;;  %v12157_v17 = vpop.f32.mrf.mxu2 }
 0x545   : >> { %v12161_v40 = vpop.f32.mrf.mxu3 }
 0x54a   : >> { %v12167_v54 = vpop.f32.mrf.mxu1 }
 0x54b   : >> { %v12171_v31 = vpop.f32.mrf.mxu0  ;;  %v12173_v29 = vpop.f32.mrf.mxu2 }
 0x54d   : >> { %v12178_v35 = vpop.f32.mrf.mxu3 }
 0x552   : >> { %v12180_v48 = vpop.f32.mrf.mxu1 }
 0x553   : >> { %13905 = vst [vmem:[#allocation101_spill] sm:$0xff] %v12180_v48  ;;  %v12182_v39 = vpop.f32.mrf.mxu0  ;;  %v12184_v47 = vpop.f32.mrf.mxu2 }
 0x554   : >> { %13906 = vst [vmem:[#allocation100_spill] sm:$0xff] %v12184_v47  ;;  %v4277_v47 = vadd.f32 %v4276_v11, %v4166_v50 }
 0x555   : >> { %v12188_v8 = vpop.f32.mrf.mxu3 }
 0x556   : >> { %13907 = vst [vmem:[#allocation128_spill] sm:$0xff] %v12188_v8  ;;  %v4342_v0 = vadd.f32 %v4341_v2, %v4277_v47  ;;  %v4178_v47 = vadd.f32 %v12057_v38, %v4102_v14 }
 0x558   : >> { %v4403_v44 = vadd.f32 %v4402_v57, %v4342_v0 }
 0x55a   : >> { %v12191_v59 = vpop.f32.mrf.mxu1  ;;  %v4520_v11 = vadd.f32 %v4519_v51, %v4403_v44 }
 0x55b   : >> { %13908 = vst [vmem:[#allocation129_spill] sm:$0xff] %v12191_v59  ;;  %v12193_v55 = vpop.f32.mrf.mxu0  ;;  %v12195_v30 = vpop.f32.mrf.mxu2 }
 0x55c   : >> { %13909 = vst [vmem:[#allocation130_spill] sm:$0xff] %v12195_v30  ;;  %v4172_v30 = vadd.f32 %v12042_v52, %v4097_v41  ;;  %v13912_v52 = vld [vmem:[#allocation33_spill] sm:$0xff] }
 0x55d   : >> { %v12200_v48 = vpop.f32.mrf.mxu3  ;;  %v12217_v41 = vand.u32 4294901760, %v13912_v52 }
 0x55e   : >> { %13910 = vst [vmem:[#allocation131_spill] sm:$0xff] %v12200_v48  ;;  %v4281_v42 = vadd.f32 %v4280_v56, %v4172_v30 }
 0x55f   : >> { %5037 = vmatpush.msrb.mxu0 %v12217_v41  ;;  %v5126_v51 = vsub.f32 %v13912_v52, %v12217_v41  ;;  %5256 = vmatpush.msrb.mxu3 %v12217_v41  ;;  %v14010_v52 = vld [vmem:[#allocation77_spill] sm:$0xff] (%p12672_p11) }
 0x560   : >> { %v4346_v50 = vadd.f32 %v4345_v60, %v4281_v42  ;;  %v13913_v60 = vld [vmem:[#allocation40_spill] sm:$0xff] }
 0x561   : >> { %v12224_v38 = vand.u32 4294901760, %v13913_v60  ;;  %v5127_v30 = vand.u32 4294901760, %v5126_v51  ;;  %5193 = vmatpush.msrb.mxu2 %v5126_v51 }
 0x562   : >> { %v4651_v8 = vpop.f32.mrf.mxu1  ;;  %v4411_v57 = vadd.f32 %v4410_v61, %v4346_v50 }
 0x563   : >> { %v12205_v49 = vpop.f32.mrf.mxu0  ;;  %v12207_v59 = vpop.f32.mrf.mxu2  ;;  %5039 = vmatpush.msrb.mxu0 %v12224_v38  ;;  %v5132_v61 = vsub.f32 %v13913_v60, %v12224_v38  ;;  %5258 = vmatpush.msrb.mxu3 %v12224_v38  ;;  %v5128_v42 = vsub.f32 %v5126_v51, %v5127_v30  ;;  %v14011_v60 = vld [vmem:[#allocation61_spill] sm:$0xff] (%p12672_p11) }
 0x564   : >> { %13911 = vst [vmem:[#allocation132_spill] sm:$0xff] %v12207_v59  ;;  %v4285_v59 = vadd.f32 %v4284_v4, %v4178_v47  ;;  %v13914_v4 = vld [vmem:[#allocation32_spill] sm:$0xff] }
 0x565   : >> { %v12210_v32 = vpop.f32.mrf.mxu3  ;;  %v12233_v0 = vand.u32 4294901760, %v13914_v4  ;;  %v5133_v14 = vand.u32 4294901760, %v5132_v61  ;;  %5196 = vmatpush.msrb.mxu2 %v5132_v61 }
 0x566   : >> { %v4350_v33 = vadd.f32 %v12140_v43, %v4285_v59  ;;  %v4026_v59 = vadd.f32 %v12066_v62, %v12086_v6  ;;  %v5129_v62 = vand.u32 4294901760, %v5128_v42 }
 0x567   : >> { %5041 = vmatpush.msrb.mxu0 %v12233_v0  ;;  %5260 = vmatpush.msrb.mxu3 %v12233_v0  ;;  %v5134_v9 = vsub.f32 %v5132_v61, %v5133_v14 }
 0x568   : >> { %v4419_v10 = vadd.f32 %v12146_v3, %v4350_v33  ;;  %5130 = vmatpush.msrb.mxu1 %v5129_v62  ;;  %v4112_v51 = vadd.f32 %v12088_v53, %v4026_v59  ;;  %v13918_v62 = vld [vmem:[#allocation36_spill] sm:$0xff] }
 0x569   : >> { %v5135_v13 = vand.u32 4294901760, %v5134_v9 }
 0x56a   : >> { %v4657_v26 = vpop.f32.mrf.mxu1  ;;  %v4528_v61 = vadd.f32 %v12148_v19, %v4419_v10  ;;  %v4190_v53 = vadd.f32 %v12092_v23, %v4112_v51 }
 0x56b   : >> { %v4585_v46 = vpop.f32.mrf.mxu0  ;;  %v4738_v2 = vpop.f32.mrf.mxu2  ;;  %5136 = vmatpush.msrb.mxu1 %v5135_v13 }
 0x56c   : >> { %v4586_v18 = vadd.f32 %v4585_v46, %v4520_v11  ;;  %v13915_v11 = vld [vmem:[#allocation27_spill] sm:$0xff]  ;;  %v13916_v46 = vand.u32 4294901760, %v12165_v45 }
 0x56d   : >> { %v4795_v48 = vpop.f32.mrf.mxu3 }
 0x56e   : >> { %v4652_v56 = vadd.f32 %v4651_v8, %v4586_v18  ;;  %v4524_v8 = vadd.f32 %v12142_v37, %v4411_v57  ;;  %5325 = vmatpush.msra.mxu0 %v13916_v46 }
 0x570   : >> { %v4739_v16 = vadd.f32 %v4738_v2, %v4652_v56  ;;  %v4289_v2 = vadd.f32 %v12155_v34, %v4184_v58  ;;  %5329 = vmatpush.msra.mxu0 %v5127_v30  ;;  %v13917_v30 = vld [vmem:[#allocation34_spill] sm:$0xff] }
 0x572   : >> { %v4796_v21 = vadd.f32 %v4795_v48, %v4739_v16  ;;  %v5138_v48 = vsub.f32 %v13914_v4, %v12233_v0  ;;  %v4663_v47 = vpop.f32.mrf.mxu1  ;;  %5333 = vmatpush.msra.mxu0 %v5133_v14  ;;  %v4354_v45 = vadd.f32 %v12144_v25, %v4289_v2  ;;  %v14012_v4 = vld [vmem:[#allocation44_spill] sm:$0xff] (%p12672_p11) }
 0x573   : >> { %v4590_v43 = vpop.f32.mrf.mxu0  ;;  %v4742_v44 = vpop.f32.mrf.mxu2 }
 0x574   : >> { %v12240_v50 = vadd.f32 %v4796_v21, %v13915_v11  ;;  %v4591_v37 = vadd.f32 %v4590_v43, %v4524_v8  ;;  %v5139_v56 = vand.u32 4294901760, %v5138_v48  ;;  %5199 = vmatpush.msrb.mxu2 %v5138_v48  ;;  %v4427_v25 = vadd.f32 %v12157_v17, %v4354_v45  ;;  %v13919_v45 = vld [vmem:[#allocation39_spill] sm:$0xff] }
 0x575   : >> { %v4799_v6 = vpop.f32.mrf.mxu3 }
 0x576   : >> { %v4834_v18 = vsub.f32 0.0, %v12240_v50  ;;  %v4658_v57 = vadd.f32 %v4657_v26, %v4591_v37  ;;  %v5140_v33 = vsub.f32 %v5138_v48, %v5139_v56  ;;  %v4030_v26 = vadd.f32 %v12084_v5, %v12103_v12  ;;  %5337 = vmatpush.msra.mxu0 %v5139_v56 }
 0x578   : >> { %v4842_v3 = vmul.f32 1.442695, %v4834_v18  ;;  %v4743_v16 = vadd.f32 %v4742_v44, %v4658_v57  ;;  %v5141_v8 = vand.u32 4294901760, %v5140_v33  ;;  %v4293_v44 = vadd.f32 %v12171_v31, %v4190_v53 }
 0x579   : >> { %v4117_v12 = vadd.f32 %v12105_v15, %v4030_v26 }
 0x57a   : >> { %8493 = vpow2.f32 %v4842_v3  ;;  %v4800_v34 = vadd.f32 %v4799_v6, %v4743_v16  ;;  %5142 = vmatpush.msrb.mxu1 %v5141_v8  ;;  %v4669_v14 = vpop.f32.mrf.mxu1  ;;  %v4358_v17 = vadd.f32 %v12150_v1, %v4293_v44  ;;  %v13921_v8 = vld [vmem:[#allocation100_spill] sm:$0xff] }
 0x57b   : >> { %v4595_v21 = vpop.f32.mrf.mxu0  ;;  %v4746_v58 = vpop.f32.mrf.mxu2  ;;  %v4196_v10 = vadd.f32 %v12109_v36, %v4117_v12  ;;  %v13922_v12 = vld [vmem:[#allocation102_spill] sm:$0xff] }
 0x57c   : >> { %v12258_v59 = vadd.f32 %v4800_v34, %v13917_v30  ;;  %v4596_v43 = vadd.f32 %v4595_v21, %v4528_v61  ;;  %5384 = vmatpush.msra.mxu1 %v12153_v20  ;;  %v4532_v20 = vadd.f32 %v12161_v40, %v4427_v25  ;;  %v4435_v1 = vadd.f32 %v12173_v29, %v4358_v17 }
 0x57d   : >> { %v4803_v19 = vpop.f32.mrf.mxu3  ;;  %v4297_v40 = vadd.f32 %v12182_v39, %v4196_v10 }
 0x57e   : >> { %v4835_v42 = vsub.f32 0.0, %v12258_v59  ;;  %v4664_v5 = vadd.f32 %v4663_v47, %v4596_v43  ;;  %5386 = vmatpush.msra.mxu1 %v12217_v41  ;;  %v4034_v41 = vadd.f32 %v12101_v63, %v12120_v7  ;;  %v4038_v63 = vadd.f32 %v12116_v27, %v12133_v22 }
 0x57f   : >> { %v4362_v7 = vadd.f32 %v12167_v54, %v4297_v40  ;;  %v4536_v51 = vadd.f32 %v12178_v35, %v4435_v1  ;;  %v13920_v54 = vld [vmem:[#allocation99_spill] sm:$0xff] }
 0x580   : >> { %v8494_v23 = vpop.eup %8493  ;;  %v4844_v11 = vmul.f32 1.442695, %v4835_v42  ;;  %v4747_v37 = vadd.f32 %v4746_v58, %v4664_v5  ;;  %5388 = vmatpush.msra.mxu1 %v12224_v38  ;;  %v4122_v18 = vadd.f32 %v12122_v24, %v4034_v41  ;;  %v4127_v22 = vadd.f32 %v13920_v54, %v4038_v63 }
 0x581   : >> { %v4858_v48 = vadd.f32 1.0, %v8494_v23  ;;  %v4443_v26 = vadd.f32 %v13921_v8, %v4362_v7  ;;  %v13923_v23 = vld [vmem:[#allocation128_spill] sm:$0xff] }
 0x582   : >> { %8495 = vpow2.f32 %v4844_v11  ;;  %v4804_v31 = vadd.f32 %v4803_v19, %v4747_v37  ;;  %5390 = vmatpush.msra.mxu1 %v12233_v0  ;;  %v4675_v39 = vpop.f32.mrf.mxu1  ;;  %v4202_v33 = vadd.f32 %v12124_v28, %v4122_v18 }
 0x583   : >> { %8497 = vrcp.f32 %v4858_v48  ;;  %v4600_v47 = vpop.f32.mrf.mxu0  ;;  %v4750_v15 = vpop.f32.mrf.mxu2  ;;  %v4875_v21 = vand.u32 2147483647, %v4858_v48  ;;  %v4877_v35 = vand.u32 2147483648, %v4858_v48  ;;  %vm4871_vm8 = vweird.f32 %v4858_v48 }
 0x584   : >> { %v12274_v6 = vadd.f32 %v4804_v31, %v13918_v62  ;;  %v4601_v38 = vadd.f32 %v4600_v47, %v4532_v20  ;;  %v4301_v19 = vadd.f32 %v12193_v55, %v4202_v33  ;;  %v4540_v11 = vadd.f32 %v13923_v23, %v4443_v26  ;;  %v13924_v55 = vld [vmem:[#allocation101_spill] sm:$0xff]  ;;  %v13928_v26 = vld [vmem:[#allocation131_spill] sm:$0xff] }
 0x585   : >> { %v4807_v9 = vpop.f32.mrf.mxu3  ;;  %v4878_v37 = vor.u32 1.1754944e-38, %v4877_v35  ;;  %vm4876_vm15 = vcmp.eq.f32.partialorder %v4875_v21, 8.507059e+37 }
 0x586   : >> { %v4836_v46 = vsub.f32 0.0, %v12274_v6  ;;  %v4670_v36 = vadd.f32 %v4669_v14, %v4601_v38  ;;  %v4208_v14 = vadd.f32 %v13922_v12, %v4127_v22  ;;  %v4366_v10 = vadd.f32 %v13924_v55, %v4301_v19 }
 0x588   : >> { %v8496_v2 = vpop.eup %8495  ;;  %v4846_v57 = vmul.f32 1.442695, %v4836_v46  ;;  %v4751_v0 = vadd.f32 %v4750_v15, %v4670_v36  ;;  %v4305_v41 = vadd.f32 %v12205_v49, %v4208_v14 }
 0x589   : >> { %v8498_v56 = vpop.eup %8497  ;;  %v12283_v13 = vadd.f32 1.0, %v8496_v2 }
 0x58a   : >> { %v4867_v29 = vmul.f32 %v8498_v56, %v4858_v48  ;;  %8499 = vpow2.f32 %v4846_v57  ;;  %v4808_v3 = vadd.f32 %v4807_v9, %v4751_v0  ;;  %vm4872_vm1 = vweird.f32 %v8498_v56  ;;  %v4681_v48 = vpop.f32.mrf.mxu1  ;;  %v13925_v57 = vld [vmem:[#allocation84_spill] sm:$0xff] }
 0x58b   : >> { %8501 = vrcp.f32 %v12283_v13  ;;  %v4605_v16 = vpop.f32.mrf.mxu0  ;;  %v4754_v24 = vpop.f32.mrf.mxu2  ;;  %vm4873_vm11 = vmor %vm4871_vm8, %vm4872_vm1  ;;  %v4890_v9 = vand.u32 2147483647, %v12283_v13  ;;  %v4892_v1 = vand.u32 2147483648, %v12283_v13  ;;  %vm4886_vm7 = vweird.f32 %v12283_v13 }
 0x58c   : >> { %v4868_v61 = vsub.f32 1.0, %v4867_v29  ;;  %v12289_v34 = vadd.f32 %v4808_v3, %v13919_v45  ;;  %v4606_v27 = vadd.f32 %v4605_v16, %v4536_v51  ;;  %v13927_v51 = vld [vmem:[#allocation129_spill] sm:$0xff] }
 0x58d   : >> { %v4811_v58 = vpop.f32.mrf.mxu3  ;;  %v4370_v29 = vadd.f32 %v13927_v51, %v4305_v41  ;;  %vm4891_vm1 = vcmp.eq.f32.partialorder %v4890_v9, 8.507059e+37  ;;  %v13931_v51 = vld [vmem:[#allocation88_spill] sm:$0xff] }
 0x58e   : >> { %v4869_v53 = vmul.f32 %v8498_v56, %v4868_v61  ;;  %v4837_v30 = vsub.f32 0.0, %v12289_v34  ;;  %v4676_v43 = vadd.f32 %v4675_v39, %v4606_v27  ;;  %v4893_v61 = vor.u32 1.1754944e-38, %v4892_v1 }
 0x590   : >> { %v8500_v28 = vpop.eup %8499  ;;  %v4870_v25 = vadd.f32 %v8498_v56, %v4869_v53  ;;  %v4848_v44 = vmul.f32 1.442695, %v4837_v30  ;;  %v4755_v42 = vadd.f32 %v4754_v24, %v4676_v43  ;;  %v13929_v53 = vld [vmem:[#allocation132_spill] sm:$0xff] }
 0x591   : >> { %v8502_v5 = vpop.eup %8501  ;;  %v12297_v20 = vadd.f32 1.0, %v8500_v28  ;;  %v4459_v30 = vadd.f32 %v13929_v53, %v4370_v29 }
 0x592   : >> { %v4874_v17 = vsel %vm4873_vm11, %v8498_v56, %v4870_v25  ;;  %v4882_v31 = vmul.f32 %v8502_v5, %v12283_v13  ;;  %8503 = vpow2.f32 %v4848_v44  ;;  %v4812_v40 = vadd.f32 %v4811_v58, %v4755_v42  ;;  %v13926_v56 = vld [vmem:[#allocation130_spill] sm:$0xff]  ;;  %v4687_v44 = vpop.f32.mrf.mxu1 }
 0x593   : >> { %v4879_v47 = vsel %vm4876_vm15, %v4878_v37, %v4874_v17  ;;  %8505 = vrcp.f32 %v12297_v20  ;;  %v4610_v15 = vpop.f32.mrf.mxu0  ;;  %v4758_v36 = vpop.f32.mrf.mxu2  ;;  %vm4887_vm5 = vweird.f32 %v8502_v5  ;;  %v4451_v63 = vadd.f32 %v13926_v56, %v4366_v10  ;;  %v13930_v37 = vld [vmem:[#allocation86_spill] sm:$0xff] }
 0x594   : >> { %v4986_v62 = vmul.f32 %v4879_v47, %v12240_v50  ;;  %v4883_v38 = vsub.f32 1.0, %v4882_v31  ;;  %v4611_v46 = vadd.f32 %v4610_v15, %v4540_v11  ;;  %v12308_v0 = vadd.f32 %v4812_v40, %v13925_v57  ;;  %vm4888_vm13 = vmor %vm4886_vm7, %vm4887_vm5 }
 0x595   : >> { %v4815_v7 = vpop.f32.mrf.mxu3  ;;  %v4544_v21 = vadd.f32 %v13928_v26, %v4451_v63  ;;  %v4907_v28 = vand.u32 2147483648, %v12297_v20  ;;  %v4905_v23 = vand.u32 2147483647, %v12297_v20  ;;  %v4548_v10 = vadd.f32 %v12210_v32, %v4459_v30 }
 0x596   : >> { %v4999_v2 = vsel %vm4997_vm3, %v4986_v62, 0  ;;  %v4884_v18 = vmul.f32 %v8502_v5, %v4883_v38  ;;  %v4682_v50 = vadd.f32 %v4681_v48, %v4611_v46  ;;  %v4838_v16 = vsub.f32 0.0, %v12308_v0 }
 0x597   : >> { %v12311_v49 = vand.u32 4294901760, %v4999_v2  ;;  %vm4901_vm11 = vweird.f32 %v12297_v20  ;;  %v4908_v15 = vor.u32 1.1754944e-38, %v4907_v28  ;;  %vm4906_vm5 = vcmp.eq.f32.partialorder %v4905_v23, 8.507059e+37 }
 0x598   : >> { %v8504_v39 = vpop.eup %8503  ;;  %v4885_v3 = vadd.f32 %v8502_v5, %v4884_v18  ;;  %v4759_v27 = vadd.f32 %v4758_v36, %v4682_v50  ;;  %v4850_v8 = vmul.f32 1.442695, %v4838_v16 }
 0x599   : >> { %v8506_v24 = vpop.eup %8505  ;;  %v5043_v33 = vsub.f32 %v4999_v2, %v12311_v49  ;;  %v12317_v45 = vadd.f32 1.0, %v8504_v39  ;;  %5144 = vmatmul.f32.vlgmr.msrb.gmra.mxu1 %v12311_v49 }
 0x59a   : >> { %v4889_v54 = vsel %vm4888_vm13, %v8502_v5, %v4885_v3  ;;  %v4897_v22 = vmul.f32 %v8506_v24, %v12297_v20  ;;  %v4816_v42 = vadd.f32 %v4815_v7, %v4759_v27  ;;  %vm4902_vm8 = vweird.f32 %v8506_v24 }
 0x59b   : >> { %v5044_v13 = vand.u32 4294901760, %v5043_v33  ;;  %v4894_v35 = vsel %vm4891_vm1, %v4893_v61, %v4889_v54  ;;  %8507 = vrcp.f32 %v12317_v45  ;;  %v4615_v58 = vpop.f32.mrf.mxu0  ;;  %5202 = vmatmul.f32.vlgmr.msrb.gmra.mxu2 %v5043_v33  ;;  %v4762_v31 = vpop.f32.mrf.mxu2  ;;  %vm4903_vm15 = vmor %vm4901_vm11, %vm4902_vm8  ;;  %v4920_v32 = vand.u32 2147483647, %v12317_v45 }
 0x59c   : >> { %v4987_v43 = vmul.f32 %v4894_v35, %v12258_v59  ;;  %v4898_v19 = vsub.f32 1.0, %v4897_v22  ;;  %8509 = vpow2.f32 %v4850_v8  ;;  %v4616_v5 = vadd.f32 %v4615_v58, %v4544_v21 }
 0x59d   : >> { %v5045_v25 = vsub.f32 %v5043_v33, %v5044_v13  ;;  %5264 = vmatmul.f32.vlgmr.msrb.gmra.mxu3 %v5044_v13  ;;  %v12331_v17 = vadd.f32 %v4816_v42, %v13930_v37  ;;  %v4819_v38 = vpop.f32.mrf.mxu3  ;;  %v4922_v39 = vand.u32 2147483648, %v12317_v45  ;;  %vm4916_vm13 = vweird.f32 %v12317_v45  ;;  %v13932_v37 = vld [vmem:[#allocation90_spill] sm:$0xff] }
 0x59e   : >> { %v5002_v12 = vsel %vm4997_vm3, %v4987_v43, 0  ;;  %v4899_v14 = vmul.f32 %v8506_v24, %v4898_v19  ;;  %v4688_v59 = vadd.f32 %v4687_v44, %v4616_v5  ;;  %vm4921_vm8 = vcmp.eq.f32.partialorder %v4920_v32, 8.507059e+37 }
 0x59f   : >> { %v12328_v11 = vand.u32 4294901760, %v5002_v12  ;;  %v5046_v55 = vand.u32 4294901760, %v5045_v25  ;;  %v4839_v41 = vsub.f32 0.0, %v12331_v17  ;;  %v4923_v8 = vor.u32 1.1754944e-38, %v4922_v39 }
 0x5a0   : >> { %v4900_v47 = vadd.f32 %v8506_v24, %v4899_v14  ;;  %v4763_v62 = vadd.f32 %v4762_v31, %v4688_v59 }
 0x5a1   : >> { %v8508_v48 = vpop.eup %8507  ;;  %5047 = vmatmul.f32.vlgmr.msrb.gmra.mxu0 %v5046_v55  ;;  %5148 = vmatmul.f32.gmra.mxu1 %v12328_v11  ;;  %v5051_v40 = vsub.f32 %v5002_v12, %v12328_v11  ;;  %v4852_v36 = vmul.f32 1.442695, %v4839_v41 }
 0x5a2   : >> { %v4904_v9 = vsel %vm4903_vm15, %v8506_v24, %v4900_v47  ;;  %v4912_v1 = vmul.f32 %v8508_v48, %v12317_v45  ;;  %v8510_v46 = vpop.eup %8509  ;;  %v4820_v2 = vadd.f32 %v4819_v38, %v4763_v62  ;;  %vm4917_vm7 = vweird.f32 %v8508_v48 }
 0x5a3   : >> { %v4909_v20 = vsel %vm4906_vm5, %v4908_v15, %v4904_v9  ;;  %v4620_v18 = vpop.f32.mrf.mxu0  ;;  %5207 = vmatmul.f32.gmra.mxu2 %v5051_v40  ;;  %v5052_v57 = vand.u32 4294901760, %v5051_v40  ;;  %v12341_v50 = vadd.f32 1.0, %v8510_v46  ;;  %8511 = vpow2.f32 %v4852_v36  ;;  %vm4918_vm1 = vmor %vm4916_vm13, %vm4917_vm7  ;;  %v4766_v21 = vpop.f32.mrf.mxu2 }
 0x5a4   : >> { %v4988_v56 = vmul.f32 %v4909_v20, %v12274_v6  ;;  %v4913_v63 = vsub.f32 1.0, %v4912_v1  ;;  %v4621_v7 = vadd.f32 %v4620_v18, %v4548_v10  ;;  %v12345_v29 = vadd.f32 %v4820_v2, %v13931_v51  ;;  %v4693_v6 = vpop.f32.mrf.mxu1 }
 0x5a5   : >> { %5270 = vmatmul.f32.gmra.mxu3 %v5052_v57  ;;  %v5053_v3 = vsub.f32 %v5051_v40, %v5052_v57  ;;  %8513 = vrcp.f32 %v12341_v50  ;;  %v4823_v43 = vpop.f32.mrf.mxu3  ;;  %v4935_v31 = vand.u32 2147483647, %v12341_v50  ;;  %v4937_v55 = vand.u32 2147483648, %v12341_v50 }
 0x5a6   : >> { %v5005_v16 = vsel %vm4997_vm3, %v4988_v56, 0  ;;  %v4914_v24 = vmul.f32 %v8508_v48, %v4913_v63  ;;  %v4840_v61 = vsub.f32 0.0, %v12345_v29  ;;  %v4694_v54 = vadd.f32 %v4693_v6, %v4621_v7 }
 0x5a7   : >> { %v12349_v33 = vand.u32 4294901760, %v5005_v16  ;;  %v5054_v22 = vand.u32 4294901760, %v5053_v3  ;;  %vm4931_vm15 = vweird.f32 %v12341_v50  ;;  %v4938_v1 = vor.u32 1.1754944e-38, %v4937_v55 }
 0x5a8   : >> { %v4915_v27 = vadd.f32 %v8508_v48, %v4914_v24  ;;  %v4854_v26 = vmul.f32 1.442695, %v4840_v61  ;;  %v4767_v58 = vadd.f32 %v4766_v21, %v4694_v54  ;;  %vm4936_vm7 = vcmp.eq.f32.partialorder %v4935_v31, 8.507059e+37 }
 0x5a9   : >> { %5152 = vmatmul.f32.gmra.mxu1 %v12349_v33  ;;  %v5059_v13 = vsub.f32 %v5005_v16, %v12349_v33  ;;  %5055 = vmatmul.f32.gmra.mxu0 %v5054_v22  ;;  %v8512_v53 = vpop.eup %8511 }
 0x5aa   : >> { %v4919_v35 = vsel %vm4918_vm1, %v8508_v48, %v4915_v27  ;;  %8515 = vpow2.f32 %v4854_v26  ;;  %v4863_v25 = vadd.f32 1.0, %v8512_v53  ;;  %v4824_v44 = vadd.f32 %v4823_v43, %v4767_v58 }
 0x5ab   : >> { %v4924_v30 = vsel %vm4921_vm8, %v4923_v8, %v4919_v35  ;;  %5212 = vmatmul.f32.gmra.mxu2 %v5059_v13  ;;  %v5060_v45 = vand.u32 4294901760, %v5059_v13  ;;  %v8514_v19 = vpop.eup %8513 }
 0x5ac   : >> { %v4989_v28 = vmul.f32 %v4924_v30, %v12289_v34  ;;  %v4927_v42 = vmul.f32 %v8514_v19, %v12341_v50  ;;  %8517 = vrcp.f32 %v4863_v25  ;;  %v12361_v59 = vadd.f32 %v4824_v44, %v13932_v37 }
 0x5ad   : >> { %5276 = vmatmul.f32.gmra.mxu3 %v5060_v45  ;;  %v5061_v5 = vsub.f32 %v5059_v13, %v5060_v45  ;;  %vm4932_vm11 = vweird.f32 %v8514_v19  ;;  %v4952_v57 = vand.u32 2147483648, %v4863_v25  ;;  %v4950_v7 = vand.u32 2147483647, %v4863_v25 }
 0x5ae   : >> { %v5008_v12 = vsel %vm4997_vm3, %v4989_v28, 0  ;;  %v4928_v23 = vsub.f32 1.0, %v4927_v42  ;;  %v4841_v48 = vsub.f32 0.0, %v12361_v59  ;;  %vm4933_vm5 = vmor %vm4931_vm15, %vm4932_vm11  ;;  %vm4946_vm1 = vweird.f32 %v4863_v25 }
 0x5af   : >> { %v12358_v14 = vand.u32 4294901760, %v5008_v12  ;;  %v5062_v34 = vand.u32 4294901760, %v5061_v5  ;;  %v4953_v6 = vor.u32 1.1754944e-38, %v4952_v57  ;;  %vm4951_vm11 = vcmp.eq.f32.partialorder %v4950_v7, 8.507059e+37 }
 0x5b0   : >> { %v8516_v10 = vpop.eup %8515  ;;  %v4929_v47 = vmul.f32 %v8514_v19, %v4928_v23  ;;  %v4856_v38 = vmul.f32 1.442695, %v4841_v48 }
 0x5b1   : >> { %5156 = vmatmul.f32.gmra.mxu1 %v12358_v14  ;;  %v5067_v15 = vsub.f32 %v5008_v12, %v12358_v14  ;;  %v4864_v41 = vadd.f32 1.0, %v8516_v10  ;;  %5063 = vmatmul.f32.gmra.mxu0 %v5062_v34 }
 0x5b2   : >> { %v4930_v62 = vadd.f32 %v8514_v19, %v4929_v47  ;;  %v8518_v9 = vpop.eup %8517 }
 0x5b3   : >> { %5217 = vmatmul.f32.gmra.mxu2 %v5067_v15  ;;  %v5068_v40 = vand.u32 4294901760, %v5067_v15  ;;  %8519 = vrcp.f32 %v4864_v41  ;;  %v4942_v46 = vmul.f32 %v8518_v9, %v4863_v25  ;;  %vm4947_vm13 = vweird.f32 %v8518_v9 }
 0x5b4   : >> { %v4934_v32 = vsel %vm4933_vm5, %v8514_v19, %v4930_v62  ;;  %8521 = vpow2.f32 %v4856_v38  ;;  %vm4948_vm8 = vmor %vm4946_vm1, %vm4947_vm13  ;;  %v4965_v8 = vand.u32 2147483647, %v4864_v41  ;;  %v4967_v26 = vand.u32 2147483648, %v4864_v41 }
 0x5b5   : >> { %5282 = vmatmul.f32.gmra.mxu3 %v5068_v40  ;;  %v4939_v20 = vsel %vm4936_vm7, %v4938_v1, %v4934_v32  ;;  %v5069_v36 = vsub.f32 %v5067_v15, %v5068_v40  ;;  %v4943_v18 = vsub.f32 1.0, %v4942_v46  ;;  %vm4961_vm5 = vweird.f32 %v4864_v41 }
 0x5b6   : >> { %v4990_v2 = vmul.f32 %v4939_v20, %v12308_v0  ;;  %v4968_v45 = vor.u32 1.1754944e-38, %v4967_v26  ;;  %vm4966_vm13 = vcmp.eq.f32.partialorder %v4965_v8, 8.507059e+37  ;;  %v13934_v8 = vld [vmem:[#allocation35_spill] sm:$0xff] }
 0x5b7   : >> { %v5070_v56 = vand.u32 4294901760, %v5069_v36  ;;  %v4944_v50 = vmul.f32 %v8518_v9, %v4943_v18  ;;  %v12421_v26 = vperm.slane %v13934_v8, 0 }
 0x5b8   : >> { %v5011_v63 = vsel %vm4997_vm3, %v4990_v2, 0 }
 0x5b9   : >> { %v8520_v39 = vpop.eup %8519  ;;  %v12371_v51 = vand.u32 4294901760, %v5011_v63  ;;  %5071 = vmatmul.f32.gmra.mxu0 %v5070_v56  ;;  %v4945_v16 = vadd.f32 %v8518_v9, %v4944_v50 }
 0x5ba   : >> { %v8522_v3 = vpop.eup %8521  ;;  %v4957_v24 = vmul.f32 %v8520_v39, %v4864_v41  ;;  %vm4962_vm15 = vweird.f32 %v8520_v39 }
 0x5bb   : >> { %v4865_v61 = vadd.f32 1.0, %v8522_v3  ;;  %5160 = vmatmul.f32.gmra.mxu1 %v12371_v51  ;;  %v5075_v0 = vsub.f32 %v5011_v63, %v12371_v51  ;;  %v4949_v27 = vsel %vm4948_vm8, %v8518_v9, %v4945_v16  ;;  %vm4963_vm7 = vmor %vm4961_vm5, %vm4962_vm15 }
 0x5bc   : >> { %v4958_v54 = vsub.f32 1.0, %v4957_v24  ;;  %v4954_v22 = vsel %vm4951_vm11, %v4953_v6, %v4949_v27 }
 0x5bd   : >> { %8523 = vrcp.f32 %v4865_v61  ;;  %5222 = vmatmul.f32.gmra.mxu2 %v5075_v0  ;;  %v4991_v21 = vmul.f32 %v4954_v22, %v12331_v17  ;;  %v5076_v35 = vand.u32 4294901760, %v5075_v0  ;;  %v4982_v55 = vand.u32 2147483648, %v4865_v61 }
 0x5be   : >> { %v4959_v13 = vmul.f32 %v8520_v39, %v4958_v54  ;;  %v4980_v47 = vand.u32 2147483647, %v4865_v61  ;;  %vm4976_vm8 = vweird.f32 %v4865_v61 }
 0x5bf   : >> { %v5014_v58 = vsel %vm4997_vm3, %v4991_v21, 0  ;;  %5288 = vmatmul.f32.gmra.mxu3 %v5076_v35  ;;  %v5077_v30 = vsub.f32 %v5075_v0, %v5076_v35 }
 0x5c0   : >> { %v4960_v53 = vadd.f32 %v8520_v39, %v4959_v13  ;;  %v12377_v43 = vand.u32 4294901760, %v5014_v58  ;;  %vm4981_vm15 = vcmp.eq.f32.partialorder %v4980_v47, 8.507059e+37 }
 0x5c1   : >> { %v5078_v28 = vand.u32 4294901760, %v5077_v30 }
 0x5c2   : >> { %v4964_v19 = vsel %vm4963_vm7, %v8520_v39, %v4960_v53  ;;  %v5083_v17 = vsub.f32 %v5014_v58, %v12377_v43 }
 0x5c3   : >> { %v8524_v25 = vpop.eup %8523  ;;  %v4969_v44 = vsel %vm4966_vm13, %v4968_v45, %v4964_v19  ;;  %5164 = vmatmul.f32.gmra.mxu1 %v12377_v43  ;;  %5079 = vmatmul.f32.gmra.mxu0 %v5078_v28  ;;  %v13935_v19 = vld [vmem:[#allocation50_spill] sm:$0xff] }
 0x5c4   : >> { %v4992_v42 = vmul.f32 %v4969_v44, %v12345_v29  ;;  %v4972_v5 = vmul.f32 %v8524_v25, %v4865_v61  ;;  %v5084_v12 = vand.u32 4294901760, %v5083_v17  ;;  %vm4977_vm1 = vweird.f32 %v8524_v25 }
 0x5c5   : >> { %5227 = vmatmul.f32.gmra.mxu2 %v5083_v17  ;;  %vm4978_vm11 = vmor %vm4976_vm8, %vm4977_vm1  ;;  %v4983_v29 = vor.u32 1.1754944e-38, %v4982_v55  ;;  %v5625_v28 = vand.u32 4294901760, %v13935_v19 }
 0x5c6   : >> { %v5017_v23 = vsel %vm4997_vm3, %v4992_v42, 0  ;;  %v4973_v37 = vsub.f32 1.0, %v4972_v5  ;;  %v5085_v34 = vsub.f32 %v5083_v17, %v5084_v12  ;;  %v13936_v5 = vld [vmem:[#allocation37_spill] sm:$0xff] }
 0x5c7   : >> { %v5090_v31 = vand.u32 4294901760, %v5017_v23  ;;  %5294 = vmatmul.f32.gmra.mxu3 %v5084_v12  ;;  %v5715_v42 = vsub.f32 %v13935_v19, %v5625_v28  ;;  %v5627_v12 = vand.u32 4294901760, %v13936_v5  ;;  %v14014_v19 = vld [vmem:[#allocation80_spill] sm:$0xff] (%p12672_p11) }
 0x5c8   : >> { %v4974_v10 = vmul.f32 %v8524_v25, %v4973_v37  ;;  %v5086_v48 = vand.u32 4294901760, %v5085_v34 }
 0x5c9   : >> { %v5091_v15 = vsub.f32 %v5017_v23, %v5090_v31  ;;  %v5716_v23 = vand.u32 4294901760, %v5715_v42 }
 0x5ca   : >> { %v4975_v41 = vadd.f32 %v8524_v25, %v4974_v10 }
 0x5cb   : >> { %5168 = vmatmul.f32.gmra.mxu1 %v5090_v31  ;;  %v5092_v62 = vand.u32 4294901760, %v5091_v15  ;;  %5087 = vmatmul.f32.gmra.mxu0 %v5086_v48  ;;  %v5717_v47 = vsub.f32 %v5715_v42, %v5716_v23 }
 0x5cc   : >> { %v4979_v38 = vsel %vm4978_vm11, %v8524_v25, %v4975_v41 }
 0x5cd   : >> { %v4984_v40 = vsel %vm4981_vm15, %v4983_v29, %v4979_v38  ;;  %5232 = vmatmul.f32.gmra.mxu2 %v5091_v15  ;;  %v5093_v9 = vsub.f32 %v5091_v15, %v5092_v62  ;;  %v5718_v29 = vand.u32 4294901760, %v5717_v47 }
 0x5ce   : >> { %v4993_v1 = vmul.f32 %v4984_v40, %v12361_v59 }
 0x5cf   : >> { %5300 = vmatmul.f32.gmra.mxu3 %v5092_v62  ;;  %v5094_v46 = vand.u32 4294901760, %v5093_v9  ;;  %v13937_v62 = vld [vmem:[#allocation46_spill] sm:$0xff] }
 0x5d0   : >> { %v5020_v32 = vsel %vm4997_vm3, %v4993_v1, 0  ;;  %v13938_v38 = vmov %v13937_v62  ;;  %v5629_v40 = vand.u32 4294901760, %v13937_v62 }
 0x5d1   : >> { %v5098_v20 = vand.u32 4294901760, %v5020_v32 }
 0x5d3   : >> { %5172 = vmatmul.f32.gmra.mxu1 %v5098_v20  ;;  %v5099_v36 = vsub.f32 %v5020_v32, %v5098_v20  ;;  %5095 = vmatmul.f32.gmra.mxu0 %v5094_v46 }
 0x5d5   : >> { %5237 = vmatmul.f32.gmra.mxu2 %v5099_v36  ;;  %v5100_v2 = vand.u32 4294901760, %v5099_v36 }
 0x5d7   : >> { %v5101_v18 = vsub.f32 %v5099_v36, %v5100_v2  ;;  %5306 = vmatmul.f32.gmra.mxu3 %v5100_v2 }
 0x5d9   : >> { %v5102_v57 = vand.u32 4294901760, %v5101_v18 }
 0x5db   : >> { %5392 = vmatmul.f32.vlgmr.msra.gmra.mxu1 %v12311_v49  ;;  %5103 = vmatmul.f32.gmra.mxu0 %v5102_v57 }
 0x5e3   : >> { %5396 = vmatmul.f32.gmra.mxu1 %v12328_v11  ;;  %5339 = vmatmul.f32.vlgmr.msra.gmra.mxu0 %v12311_v49 }
 0x5eb   : >> { %5400 = vmatmul.f32.gmra.mxu1 %v12349_v33  ;;  %5343 = vmatmul.f32.gmra.mxu0 %v12328_v11 }
 0x5f3   : >> { %5404 = vmatmul.f32.gmra.mxu1 %v12358_v14  ;;  %5347 = vmatmul.f32.gmra.mxu0 %v12349_v33 }
 0x5fb   : >> { %5408 = vmatmul.f32.gmra.mxu1 %v12371_v51  ;;  %5351 = vmatmul.f32.gmra.mxu0 %v12358_v14  ;;  %v13933_v14 = vld [vmem:[#allocation38_spill] sm:$0xff] }
 0x5fc   : >> { %v12402_v7 = vand.u32 4294901760, %v13933_v14 }
 0x5fe   : >> { %5624 = vmatpush.msra.mxu2 %v12402_v7  ;;  %v5709_v3 = vsub.f32 %v13933_v14, %v12402_v7  ;;  %5843 = vmatpush.msrb.mxu1 %v12402_v7  ;;  %v14013_v14 = vld [vmem:[#allocation55_spill] sm:$0xff] (%p12672_p11) }
 0x600   : >> { %v5710_v16 = vand.u32 4294901760, %v5709_v3  ;;  %5779 = vmatpush.msrb.mxu0 %v5709_v3  ;;  %5626 = vmatpush.msra.mxu2 %v5625_v28 }
 0x601   : >> { %5845 = vmatpush.msrb.mxu1 %v5625_v28 }
 0x602   : >> { %v5711_v24 = vsub.f32 %v5709_v3, %v5710_v16  ;;  %5782 = vmatpush.msrb.mxu0 %v5715_v42  ;;  %5628 = vmatpush.msra.mxu2 %v5627_v12 }
 0x603   : >> { %5412 = vmatmul.f32.gmra.mxu1 %v12377_v43  ;;  %5355 = vmatmul.f32.gmra.mxu0 %v12371_v51 }
 0x604   : >> { %v5712_v6 = vand.u32 4294901760, %v5711_v24  ;;  %5847 = vmatpush.msrb.mxu1 %v5627_v12  ;;  %5630 = vmatpush.msra.mxu2 %v5629_v40 }
 0x606   : >> { %5713 = vmatpush.msra.mxu3 %v5712_v6  ;;  %5849 = vmatpush.msrb.mxu1 %v5629_v40 }
 0x607   : >> { %5914 = vmatpush.msrb.mxu2 %v5710_v16 }
 0x608   : >> { %5719 = vmatpush.msra.mxu3 %v5718_v29 }
 0x609   : >> { %5918 = vmatpush.msrb.mxu2 %v5716_v23 }
 0x60b   : >> { %5416 = vmatmul.f32.gmra.mxu1 %v5090_v31  ;;  %5359 = vmatmul.f32.gmra.mxu0 %v12377_v43 }
 0x613   : >> { %5420 = vmatmul.f32.gmra.mxu1 %v5098_v20  ;;  %5363 = vmatmul.f32.gmra.mxu0 %v5090_v31  ;;  %v5721_v31 = vsub.f32 %v13936_v5, %v5627_v12  ;;  %v14015_v5 = vld [vmem:[#allocation69_spill] sm:$0xff] (%p12672_p11) }
 0x615   : >> { %v5722_v15 = vand.u32 4294901760, %v5721_v31  ;;  %5785 = vmatpush.msrb.mxu0 %v5721_v31 }
 0x616   : >> { %v5145_v49 = vpop.f32.mrf.mxu1 }
 0x617   : >> { %v5723_v1 = vsub.f32 %v5721_v31, %v5722_v15  ;;  %5922 = vmatpush.msrb.mxu2 %v5722_v15 }
 0x619   : >> { %v5724_v2 = vand.u32 4294901760, %v5723_v1 }
 0x61b   : >> { %5367 = vmatmul.f32.gmra.mxu0 %v5098_v20  ;;  %v5727_v20 = vsub.f32 %v13938_v38, %v5629_v40  ;;  %5725 = vmatpush.msra.mxu3 %v5724_v2  ;;  %v14016_v38 = vld [vmem:[#allocation48_spill] sm:$0xff] (%p12672_p11) }
 0x61d   : >> { %v5728_v57 = vand.u32 4294901760, %v5727_v20  ;;  %5788 = vmatpush.msrb.mxu0 %v5727_v20 }
 0x61e   : >> { %v5048_v11 = vpop.f32.mrf.mxu0  ;;  %v5149_v59 = vpop.f32.mrf.mxu1 }
 0x61f   : >> { %v5203_v22 = vpop.f32.mrf.mxu2  ;;  %v5049_v58 = vadd.f32 %v5048_v11, %v12421_v26  ;;  %5926 = vmatpush.msrb.mxu2 %v5728_v57 }
 0x620   : >> { %v5265_v13 = vpop.f32.mrf.mxu3 }
 0x621   : >> { %v5146_v30 = vadd.f32 %v5145_v49, %v5049_v58 }
 0x623   : >> { %v5204_v17 = vadd.f32 %v5203_v22, %v5146_v30 }
 0x625   : >> { %v5266_v55 = vadd.f32 %v5265_v13, %v5204_v17 }
 0x626   : >> { %v12397_v56 = vpop.f32.mrf.mxu1  ;;  %v5056_v33 = vpop.f32.mrf.mxu0 }
 0x627   : >> { %v5208_v53 = vpop.f32.mrf.mxu2  ;;  %v5057_v25 = vadd.f32 %v5056_v33, %v12421_v26  ;;  %v5729_v33 = vsub.f32 %v5727_v20, %v5728_v57 }
 0x628   : >> { %v5271_v44 = vpop.f32.mrf.mxu3 }
 0x629   : >> { %v5150_v37 = vadd.f32 %v5149_v59, %v5057_v25  ;;  %v5730_v22 = vand.u32 4294901760, %v5729_v33 }
 0x62b   : >> { %v5209_v9 = vadd.f32 %v5208_v53, %v5150_v37  ;;  %5731 = vmatpush.msra.mxu3 %v5730_v22 }
 0x62d   : >> { %v5272_v49 = vadd.f32 %v5271_v44, %v5209_v9  ;;  %5973 = vmatpush.msrb.mxu3 %v12402_v7 }
 0x62e   : >> { %v5064_v63 = vpop.f32.mrf.mxu0  ;;  %v12399_v50 = vpop.f32.mrf.mxu1 }
 0x62f   : >> { %v5213_v34 = vpop.f32.mrf.mxu2  ;;  %v5065_v32 = vadd.f32 %v5064_v63, %v12421_v26  ;;  %5975 = vmatpush.msrb.mxu3 %v5625_v28 }
 0x630   : >> { %v5277_v36 = vpop.f32.mrf.mxu3 }
 0x631   : >> { %v5154_v11 = vadd.f32 %v12397_v56, %v5065_v32  ;;  %5977 = vmatpush.msrb.mxu3 %v5627_v12 }
 0x633   : >> { %v5214_v16 = vadd.f32 %v5213_v34, %v5154_v11  ;;  %5979 = vmatpush.msrb.mxu3 %v5629_v40 }
 0x635   : >> { %v5278_v30 = vadd.f32 %v5277_v36, %v5214_v16 }
 0x636   : >> { %v12404_v39 = vpop.f32.mrf.mxu0 }
 0x637   : >> { %v5218_v24 = vpop.f32.mrf.mxu2  ;;  %v5073_v8 = vadd.f32 %v12404_v39, %v12421_v26 }
 0x638   : >> { %v12406_v51 = vpop.f32.mrf.mxu1  ;;  %v5283_v58 = vpop.f32.mrf.mxu3 }
 0x640   : >> { %v12412_v61 = vpop.f32.mrf.mxu1  ;;  %v12414_v0 = vpop.f32.mrf.mxu0 }
 0x641   : >> { %v5223_v37 = vpop.f32.mrf.mxu2  ;;  %v5081_v28 = vadd.f32 %v12414_v0, %v12421_v26 }
 0x642   : >> { %v5289_v47 = vpop.f32.mrf.mxu3 }
 0x643   : >> { %v5162_v12 = vadd.f32 %v12406_v51, %v5081_v28 }
 0x645   : >> { %v5224_v0 = vadd.f32 %v5223_v37, %v5162_v12 }
 0x648   : >> { %v12416_v27 = vpop.f32.mrf.mxu1  ;;  %v12418_v54 = vpop.f32.mrf.mxu0 }
 0x649   : >> { %v5089_v9 = vadd.f32 %v12418_v54, %v12421_v26  ;;  %v5228_v20 = vpop.f32.mrf.mxu2 }
 0x64a   : >> { %v5295_v22 = vpop.f32.mrf.mxu3 }
 0x64b   : >> { %v5166_v33 = vadd.f32 %v12412_v61, %v5089_v9 }
 0x650   : >> { %v12423_v21 = vpop.f32.mrf.mxu1  ;;  %v12425_v35 = vpop.f32.mrf.mxu0 }
 0x658   : >> { %v5393_v43 = vpop.f32.mrf.mxu1  ;;  %v12428_v45 = vpop.f32.mrf.mxu0 }
 0x660   : >> { %v5397_v10 = vpop.f32.mrf.mxu1  ;;  %v5340_v48 = vpop.f32.mrf.mxu0 }
 0x661   : >> { %v5341_v41 = vadd.f32 %v5340_v48, %v5266_v55 }
 0x663   : >> { %v12437_v46 = vadd.f32 %v5393_v43, %v5341_v41  ;;  %v5158_v43 = vadd.f32 %v12399_v50, %v5073_v8  ;;  %v5097_v8 = vadd.f32 %v12425_v35, %v12421_v26 }
 0x665   : >> { %v5424_v18 = vsub.f32 0.0, %v12437_v46  ;;  %v5219_v23 = vadd.f32 %v5218_v24, %v5158_v43  ;;  %v5170_v35 = vadd.f32 %v12416_v27, %v5097_v8 }
 0x667   : >> { %v5432_v59 = vmul.f32 1.442695, %v5424_v18  ;;  %v5284_v50 = vadd.f32 %v5283_v58, %v5219_v23 }
 0x668   : >> { %v5344_v63 = vpop.f32.mrf.mxu0  ;;  %v5401_v3 = vpop.f32.mrf.mxu1 }
 0x669   : >> { %8525 = vpow2.f32 %v5432_v59  ;;  %v5345_v6 = vadd.f32 %v5344_v63, %v5272_v49  ;;  %v5290_v59 = vadd.f32 %v5289_v47, %v5224_v0 }
 0x66b   : >> { %v12444_v13 = vadd.f32 %v5397_v10, %v5345_v6 }
 0x66d   : >> { %v5425_v56 = vsub.f32 0.0, %v12444_v13 }
 0x66f   : >> { %v8526_v53 = vpop.eup %8525  ;;  %v5434_v25 = vmul.f32 1.442695, %v5425_v56 }
 0x670   : >> { %v5448_v44 = vadd.f32 1.0, %v8526_v53  ;;  %v5348_v17 = vpop.f32.mrf.mxu0  ;;  %v5405_v39 = vpop.f32.mrf.mxu1  ;;  %v5229_v53 = vadd.f32 %v5228_v20, %v5166_v33 }
 0x671   : >> { %8527 = vpow2.f32 %v5434_v25  ;;  %v5349_v42 = vadd.f32 %v5348_v17, %v5278_v30 }
 0x672   : >> { %8529 = vrcp.f32 %v5448_v44  ;;  %v5467_v1 = vand.u32 2147483648, %v5448_v44  ;;  %v5465_v36 = vand.u32 2147483647, %v5448_v44  ;;  %vm5461_vm7 = vweird.f32 %v5448_v44 }
 0x673   : >> { %v12449_v7 = vadd.f32 %v5401_v3, %v5349_v42 }
 0x674   : >> { %v5468_v63 = vor.u32 1.1754944e-38, %v5467_v1  ;;  %vm5466_vm1 = vcmp.eq.f32.partialorder %v5465_v36, 8.507059e+37  ;;  %v5301_v1 = vpop.f32.mrf.mxu3 }
 0x675   : >> { %v5426_v31 = vsub.f32 0.0, %v12449_v7 }
 0x677   : >> { %v8528_v55 = vpop.eup %8527  ;;  %v5436_v34 = vmul.f32 1.442695, %v5426_v31 }
 0x678   : >> { %v8530_v10 = vpop.eup %8529  ;;  %v12455_v48 = vadd.f32 1.0, %v8528_v55  ;;  %v5352_v15 = vpop.f32.mrf.mxu0  ;;  %v5296_v55 = vadd.f32 %v5295_v22, %v5229_v53 }
 0x679   : >> { %v5457_v41 = vmul.f32 %v8530_v10, %v5448_v44  ;;  %8531 = vpow2.f32 %v5436_v34  ;;  %v5353_v29 = vadd.f32 %v5352_v15, %v5284_v50  ;;  %v5409_v32 = vpop.f32.mrf.mxu1  ;;  %vm5462_vm5 = vweird.f32 %v8530_v10 }
 0x67a   : >> { %8533 = vrcp.f32 %v12455_v48  ;;  %vm5463_vm13 = vmor %vm5461_vm7, %vm5462_vm5  ;;  %v5480_v30 = vand.u32 2147483647, %v12455_v48  ;;  %v5482_v43 = vand.u32 2147483648, %v12455_v48  ;;  %vm5476_vm11 = vweird.f32 %v12455_v48 }
 0x67b   : >> { %v5458_v62 = vsub.f32 1.0, %v5457_v41  ;;  %v12458_v40 = vadd.f32 %v5405_v39, %v5353_v29 }
 0x67c   : >> { %v5483_v34 = vor.u32 1.1754944e-38, %v5482_v43  ;;  %vm5481_vm5 = vcmp.eq.f32.partialorder %v5480_v30, 8.507059e+37 }
 0x67d   : >> { %v5459_v51 = vmul.f32 %v8530_v10, %v5458_v62  ;;  %v5427_v2 = vsub.f32 0.0, %v12458_v40 }
 0x67f   : >> { %v8532_v18 = vpop.eup %8531  ;;  %v5460_v57 = vadd.f32 %v8530_v10, %v5459_v51  ;;  %v5438_v49 = vmul.f32 1.442695, %v5427_v2 }
 0x680   : >> { %v8534_v11 = vpop.eup %8533  ;;  %v12464_v3 = vadd.f32 1.0, %v8532_v18  ;;  %v5356_v54 = vpop.f32.mrf.mxu0 }
 0x681   : >> { %v5464_v24 = vsel %vm5463_vm13, %v8530_v10, %v5460_v57  ;;  %v5472_v6 = vmul.f32 %v8534_v11, %v12455_v48  ;;  %8535 = vpow2.f32 %v5438_v49  ;;  %v5357_v58 = vadd.f32 %v5356_v54, %v5290_v59  ;;  %v5413_v39 = vpop.f32.mrf.mxu1 }
 0x682   : >> { %v5469_v16 = vsel %vm5466_vm1, %v5468_v63, %v5464_v24  ;;  %8537 = vrcp.f32 %v12464_v3  ;;  %vm5477_vm8 = vweird.f32 %v8534_v11  ;;  %v5105_v48 = vadd.f32 %v12428_v45, %v12421_v26 }
 0x683   : >> { %v5576_v56 = vmul.f32 %v5469_v16, %v12437_v46  ;;  %v5473_v61 = vsub.f32 1.0, %v5472_v6  ;;  %v12474_v17 = vadd.f32 %v5409_v32, %v5357_v58  ;;  %v5233_v46 = vpop.f32.mrf.mxu2  ;;  %vm5478_vm15 = vmor %vm5476_vm11, %vm5477_vm8  ;;  %v5497_v20 = vand.u32 2147483648, %v12464_v3 }
 0x684   : >> { %v5234_v62 = vadd.f32 %v5233_v46, %v5170_v35  ;;  %v5495_v26 = vand.u32 2147483647, %v12464_v3  ;;  %v5174_v45 = vadd.f32 %v12423_v21, %v5105_v48  ;;  %vm5491_vm13 = vweird.f32 %v12464_v3 }
 0x685   : >> { %v5588_v25 = vsel %vm4997_vm3, %v5576_v56, 0  ;;  %v5474_v44 = vmul.f32 %v8534_v11, %v5473_v61  ;;  %v5428_v28 = vsub.f32 0.0, %v12474_v17  ;;  %v5498_v63 = vor.u32 1.1754944e-38, %v5497_v20 }
 0x686   : >> { %v12476_v42 = vand.u32 4294901760, %v5588_v25  ;;  %v5302_v49 = vadd.f32 %v5301_v1, %v5234_v62  ;;  %vm5496_vm8 = vcmp.eq.f32.partialorder %v5495_v26, 8.507059e+37 }
 0x687   : >> { %v8536_v23 = vpop.eup %8535  ;;  %v5475_v37 = vadd.f32 %v8534_v11, %v5474_v44  ;;  %v5440_v15 = vmul.f32 1.442695, %v5428_v28 }
 0x688   : >> { %v8538_v31 = vpop.eup %8537  ;;  %v5632_v50 = vsub.f32 %v5588_v25, %v12476_v42  ;;  %v12482_v10 = vadd.f32 1.0, %v8536_v23  ;;  %v5360_v12 = vpop.f32.mrf.mxu0  ;;  %5733 = vmatmul.f32.vlgmr.msra.gmra.mxu3 %v12476_v42 }
 0x689   : >> { %v5479_v47 = vsel %vm5478_vm15, %v8534_v11, %v5475_v37  ;;  %v5487_v27 = vmul.f32 %v8538_v31, %v12464_v3  ;;  %v5361_v51 = vadd.f32 %v5360_v12, %v5296_v55  ;;  %vm5492_vm7 = vweird.f32 %v8538_v31  ;;  %v5417_v24 = vpop.f32.mrf.mxu1 }
 0x68a   : >> { %v5633_v41 = vand.u32 4294901760, %v5632_v50  ;;  %v5484_v29 = vsel %vm5481_vm5, %v5483_v34, %v5479_v47  ;;  %8539 = vrcp.f32 %v12482_v10  ;;  %5791 = vmatmul.f32.vlgmr.msrb.gmra.mxu0 %v5632_v50  ;;  %vm12499_vm1 = vmor %vm5491_vm13, %vm5492_vm7  ;;  %v5510_v23 = vand.u32 2147483647, %v12482_v10 }
 0x68b   : >> { %v5577_v0 = vmul.f32 %v5484_v29, %v12444_v13  ;;  %v5488_v9 = vsub.f32 1.0, %v5487_v27  ;;  %8541 = vpow2.f32 %v5440_v15  ;;  %v12494_v18 = vadd.f32 %v5413_v39, %v5361_v51  ;;  %v5238_v22 = vpop.f32.mrf.mxu2 }
 0x68c   : >> { %v5634_v32 = vsub.f32 %v5632_v50, %v5633_v41  ;;  %5853 = vmatmul.f32.vlgmr.msrb.gmra.mxu1 %v5633_v41  ;;  %v5239_v61 = vadd.f32 %v5238_v22, %v5174_v45  ;;  %v5512_v35 = vand.u32 2147483648, %v12482_v10  ;;  %vm5506_vm15 = vweird.f32 %v12482_v10 }
 0x68d   : >> { %v5591_v36 = vsel %vm4997_vm3, %v5577_v0, 0  ;;  %v5489_v2 = vmul.f32 %v8538_v31, %v5488_v9  ;;  %v5429_v54 = vsub.f32 0.0, %v12494_v18  ;;  %vm5511_vm7 = vcmp.eq.f32.partialorder %v5510_v23, 8.507059e+37 }
 0x68e   : >> { %v5635_v57 = vand.u32 4294901760, %v5634_v32  ;;  %v12496_v13 = vand.u32 4294901760, %v5591_v36  ;;  %v5513_v47 = vor.u32 1.1754944e-38, %v5512_v35 }
 0x68f   : >> { %v5490_v11 = vadd.f32 %v8538_v31, %v5489_v2  ;;  %v5442_v53 = vmul.f32 1.442695, %v5429_v54 }
 0x690   : >> { %v8540_v59 = vpop.eup %8539  ;;  %v5364_v6 = vpop.f32.mrf.mxu0  ;;  %5636 = vmatmul.f32.vlgmr.msra.gmra.mxu2 %v5635_v57  ;;  %5737 = vmatmul.f32.gmra.mxu3 %v12496_v13  ;;  %v5640_v21 = vsub.f32 %v5591_v36, %v12496_v13 }
 0x691   : >> { %v5494_v16 = vsel %vm12499_vm1, %v8538_v31, %v5490_v11  ;;  %v5502_v3 = vmul.f32 %v8540_v59, %v12482_v10  ;;  %v5365_v8 = vadd.f32 %v5364_v6, %v5302_v49  ;;  %v8542_v56 = vpop.eup %8541  ;;  %8543 = vpow2.f32 %v5442_v53  ;;  %v5307_v31 = vpop.f32.mrf.mxu3 }
 0x692   : >> { %v5499_v58 = vsel %vm5496_vm8, %v5498_v63, %v5494_v16  ;;  %5796 = vmatmul.f32.gmra.mxu0 %v5640_v21  ;;  %v5641_v30 = vand.u32 4294901760, %v5640_v21  ;;  %v12510_v44 = vadd.f32 1.0, %v8542_v56  ;;  %vm5507_vm11 = vweird.f32 %v8540_v59  ;;  %v5421_v9 = vpop.f32.mrf.mxu1 }
 0x693   : >> { %v5578_v43 = vmul.f32 %v5499_v58, %v12449_v7  ;;  %v5503_v25 = vsub.f32 1.0, %v5502_v3  ;;  %v12512_v39 = vadd.f32 %v5417_v24, %v5365_v8  ;;  %v5308_v50 = vadd.f32 %v5307_v31, %v5239_v61  ;;  %vm5508_vm5 = vmor %vm5506_vm15, %vm5507_vm11 }
 0x694   : >> { %5859 = vmatmul.f32.gmra.mxu1 %v5641_v30  ;;  %v5642_v46 = vsub.f32 %v5640_v21, %v5641_v30  ;;  %8545 = vrcp.f32 %v12510_v44  ;;  %v5525_v49 = vand.u32 2147483647, %v12510_v44  ;;  %v5527_v11 = vand.u32 2147483648, %v12510_v44 }
 0x695   : >> { %v5594_v37 = vsel %vm4997_vm3, %v5578_v43, 0  ;;  %v5504_v28 = vmul.f32 %v8540_v59, %v5503_v25  ;;  %v5430_v7 = vsub.f32 0.0, %v12512_v39  ;;  %vm5521_vm1 = vweird.f32 %v12510_v44 }
 0x696   : >> { %v5643_v55 = vand.u32 4294901760, %v5642_v46  ;;  %v12520_v12 = vand.u32 4294901760, %v5594_v37  ;;  %v5528_v16 = vor.u32 1.1754944e-38, %v5527_v11  ;;  %vm5526_vm11 = vcmp.eq.f32.partialorder %v5525_v49, 8.507059e+37 }
 0x697   : >> { %v5505_v34 = vadd.f32 %v8540_v59, %v5504_v28  ;;  %v5444_v27 = vmul.f32 1.442695, %v5430_v7  ;;  %v8544_v62 = vpop.eup %8543 }
 0x698   : >> { %v5368_v15 = vpop.f32.mrf.mxu0  ;;  %5644 = vmatmul.f32.gmra.mxu2 %v5643_v55  ;;  %5741 = vmatmul.f32.gmra.mxu3 %v12520_v12  ;;  %v5648_v29 = vsub.f32 %v5594_v37, %v12520_v12  ;;  %v5453_v32 = vadd.f32 1.0, %v8544_v62 }
 0x699   : >> { %v5509_v48 = vsel %vm5508_vm5, %v8540_v59, %v5505_v34  ;;  %v5369_v41 = vadd.f32 %v5368_v15, %v5308_v50  ;;  %8547 = vpow2.f32 %v5444_v27 }
 0x69a   : >> { %v5514_v0 = vsel %vm5511_vm7, %v5513_v47, %v5509_v48  ;;  %v8546_v1 = vpop.eup %8545  ;;  %5801 = vmatmul.f32.gmra.mxu0 %v5648_v29  ;;  %v5649_v51 = vand.u32 4294901760, %v5648_v29  ;;  %8549 = vrcp.f32 %v5453_v32  ;;  %v5540_v43 = vand.u32 2147483647, %v5453_v32 }
 0x69b   : >> { %v5579_v10 = vmul.f32 %v5514_v0, %v12458_v40  ;;  %v12525_v20 = vadd.f32 %v5421_v9, %v5369_v41  ;;  %v5517_v36 = vmul.f32 %v8546_v1, %v12510_v44  ;;  %vm5522_vm13 = vweird.f32 %v8546_v1 }
 0x69c   : >> { %5865 = vmatmul.f32.gmra.mxu1 %v5649_v51  ;;  %v5650_v57 = vsub.f32 %v5648_v29, %v5649_v51  ;;  %vm5523_vm8 = vmor %vm5521_vm1, %vm5522_vm13  ;;  %v5542_v25 = vand.u32 2147483648, %v5453_v32  ;;  %vm5536_vm5 = vweird.f32 %v5453_v32  ;;  %vm5541_vm13 = vcmp.eq.f32.partialorder %v5540_v43, 8.507059e+37 }
 0x69d   : >> { %v5597_v2 = vsel %vm4997_vm3, %v5579_v10, 0  ;;  %v5518_v26 = vsub.f32 1.0, %v5517_v36  ;;  %v5431_v45 = vsub.f32 0.0, %v12525_v20 }
 0x69e   : >> { %v12532_v40 = vand.u32 4294901760, %v5597_v2  ;;  %v5651_v54 = vand.u32 4294901760, %v5650_v57 }
 0x69f   : >> { %v8548_v59 = vpop.eup %8547  ;;  %v5519_v33 = vmul.f32 %v8546_v1, %v5518_v26  ;;  %v5446_v63 = vmul.f32 1.442695, %v5431_v45 }
 0x6a0   : >> { %v5454_v24 = vadd.f32 1.0, %v8548_v59  ;;  %5745 = vmatmul.f32.gmra.mxu3 %v12532_v40  ;;  %v5656_v6 = vsub.f32 %v5597_v2, %v12532_v40  ;;  %5652 = vmatmul.f32.gmra.mxu2 %v5651_v54  ;;  %v8550_v22 = vpop.eup %8549 }
 0x6a1   : >> { %v5520_v21 = vadd.f32 %v8546_v1, %v5519_v33  ;;  %8551 = vpow2.f32 %v5446_v63  ;;  %v5532_v8 = vmul.f32 %v8550_v22, %v5453_v32  ;;  %vm5537_vm15 = vweird.f32 %v8550_v22 }
 0x6a2   : >> { %8553 = vrcp.f32 %v5454_v24  ;;  %5806 = vmatmul.f32.gmra.mxu0 %v5656_v6  ;;  %v5657_v56 = vand.u32 4294901760, %v5656_v6  ;;  %vm5538_vm7 = vmor %vm5536_vm5, %vm5537_vm15  ;;  %v5555_v15 = vand.u32 2147483647, %v5454_v24  ;;  %v5557_v48 = vand.u32 2147483648, %v5454_v24 }
 0x6a3   : >> { %v5524_v3 = vsel %vm5523_vm8, %v8546_v1, %v5520_v21  ;;  %v5533_v53 = vsub.f32 1.0, %v5532_v8  ;;  %vm5551_vm8 = vweird.f32 %v5454_v24 }
 0x6a4   : >> { %v5529_v61 = vsel %vm5526_vm11, %v5528_v16, %v5524_v3  ;;  %5871 = vmatmul.f32.gmra.mxu1 %v5657_v56  ;;  %v5658_v30 = vsub.f32 %v5656_v6, %v5657_v56  ;;  %v5558_v32 = vor.u32 1.1754944e-38, %v5557_v48  ;;  %vm5556_vm15 = vcmp.eq.f32.partialorder %v5555_v15, 8.507059e+37 }
 0x6a5   : >> { %v5580_v58 = vmul.f32 %v5529_v61, %v12474_v17  ;;  %v5534_v35 = vmul.f32 %v8550_v22, %v5533_v53  ;;  %v5543_v17 = vor.u32 1.1754944e-38, %v5542_v25 }
 0x6a6   : >> { %v5659_v46 = vand.u32 4294901760, %v5658_v30 }
 0x6a7   : >> { %v8552_v44 = vpop.eup %8551  ;;  %v5600_v23 = vsel %vm4997_vm3, %v5580_v58, 0  ;;  %v5535_v7 = vadd.f32 %v8550_v22, %v5534_v35 }
 0x6a8   : >> { %v8554_v37 = vpop.eup %8553  ;;  %v5455_v28 = vadd.f32 1.0, %v8552_v44  ;;  %v12539_v31 = vand.u32 4294901760, %v5600_v23  ;;  %5660 = vmatmul.f32.gmra.mxu2 %v5659_v46 }
 0x6a9   : >> { %v5547_v55 = vmul.f32 %v8554_v37, %v5454_v24  ;;  %v5539_v50 = vsel %vm5538_vm7, %v8550_v22, %v5535_v7  ;;  %vm5552_vm1 = vweird.f32 %v8554_v37 }
 0x6aa   : >> { %8555 = vrcp.f32 %v5455_v28  ;;  %5749 = vmatmul.f32.gmra.mxu3 %v12539_v31  ;;  %v5664_v47 = vsub.f32 %v5600_v23, %v12539_v31  ;;  %v5544_v27 = vsel %vm5541_vm13, %v5543_v17, %v5539_v50  ;;  %vm5553_vm11 = vmor %vm5551_vm8, %vm5552_vm1  ;;  %v5572_v11 = vand.u32 2147483648, %v5455_v28 }
 0x6ab   : >> { %v5548_v34 = vsub.f32 1.0, %v5547_v55  ;;  %v5581_v41 = vmul.f32 %v5544_v27, %v12494_v18  ;;  %v5570_v54 = vand.u32 2147483647, %v5455_v28  ;;  %vm5566_vm7 = vweird.f32 %v5455_v28 }
 0x6ac   : >> { %5811 = vmatmul.f32.gmra.mxu0 %v5664_v47  ;;  %v5665_v62 = vand.u32 4294901760, %v5664_v47  ;;  %v5573_v22 = vor.u32 1.1754944e-38, %v5572_v11 }
 0x6ad   : >> { %v5549_v29 = vmul.f32 %v8554_v37, %v5548_v34  ;;  %v5603_v0 = vsel %vm4997_vm3, %v5581_v41, 0  ;;  %vm5571_vm1 = vcmp.eq.f32.partialorder %v5570_v54, 8.507059e+37 }
 0x6ae   : >> { %5877 = vmatmul.f32.gmra.mxu1 %v5665_v62  ;;  %v5666_v1 = vsub.f32 %v5664_v47, %v5665_v62  ;;  %v5671_v51 = vand.u32 4294901760, %v5603_v0 }
 0x6af   : >> { %v5550_v9 = vadd.f32 %v8554_v37, %v5549_v29 }
 0x6b0   : >> { %v8556_v10 = vpop.eup %8555  ;;  %v5667_v26 = vand.u32 4294901760, %v5666_v1  ;;  %v5672_v18 = vsub.f32 %v5603_v0, %v5671_v51 }
 0x6b1   : >> { %v5554_v36 = vsel %vm5553_vm11, %v8554_v37, %v5550_v9  ;;  %v5562_v2 = vmul.f32 %v8556_v10, %v5455_v28  ;;  %vm5567_vm5 = vweird.f32 %v8556_v10 }
 0x6b2   : >> { %v5559_v45 = vsel %vm5556_vm15, %v5558_v32, %v5554_v36  ;;  %5753 = vmatmul.f32.gmra.mxu3 %v5671_v51  ;;  %5668 = vmatmul.f32.gmra.mxu2 %v5667_v26  ;;  %v5673_v59 = vand.u32 4294901760, %v5672_v18  ;;  %vm5568_vm13 = vmor %vm5566_vm7, %vm5567_vm5 }
 0x6b3   : >> { %v5582_v57 = vmul.f32 %v5559_v45, %v12512_v39  ;;  %v5563_v49 = vsub.f32 1.0, %v5562_v2 }
 0x6b4   : >> { %5816 = vmatmul.f32.gmra.mxu0 %v5672_v18  ;;  %v5674_v24 = vsub.f32 %v5672_v18, %v5673_v59 }
 0x6b5   : >> { %v5606_v33 = vsel %vm4997_vm3, %v5582_v57, 0  ;;  %v5564_v63 = vmul.f32 %v8556_v10, %v5563_v49 }
 0x6b6   : >> { %v5679_v6 = vand.u32 4294901760, %v5606_v33  ;;  %5883 = vmatmul.f32.gmra.mxu1 %v5673_v59  ;;  %v5675_v16 = vand.u32 4294901760, %v5674_v24 }
 0x6b7   : >> { %v5565_v21 = vadd.f32 %v8556_v10, %v5564_v63 }
 0x6b8   : >> { %v5680_v3 = vsub.f32 %v5606_v33, %v5679_v6 }
 0x6b9   : >> { %v5569_v39 = vsel %vm5568_vm13, %v8556_v10, %v5565_v21 }
 0x6ba   : >> { %v5574_v8 = vsel %vm5571_vm1, %v5573_v22, %v5569_v39  ;;  %5757 = vmatmul.f32.gmra.mxu3 %v5679_v6  ;;  %v5681_v56 = vand.u32 4294901760, %v5680_v3  ;;  %5676 = vmatmul.f32.gmra.mxu2 %v5675_v16 }
 0x6bb   : >> { %v5583_v61 = vmul.f32 %v5574_v8, %v12525_v20  ;;  %v13941_v20 = vld [vmem:[#allocation82_spill] sm:$0xff] }
 0x6bc   : >> { %v5682_v58 = vsub.f32 %v5680_v3, %v5681_v56  ;;  %5821 = vmatmul.f32.gmra.mxu0 %v5680_v3  ;;  %v12560_v46 = vperm.slane %v13941_v20, 0 }
 0x6bd   : >> { %v5609_v53 = vsel %vm4997_vm3, %v5583_v61, 0 }
 0x6be   : >> { %v5687_v30 = vand.u32 4294901760, %v5609_v53  ;;  %5889 = vmatmul.f32.gmra.mxu1 %v5681_v56  ;;  %v5683_v43 = vand.u32 4294901760, %v5682_v58 }
 0x6c0   : >> { %v5688_v25 = vsub.f32 %v5609_v53, %v5687_v30 }
 0x6c2   : >> { %5761 = vmatmul.f32.gmra.mxu3 %v5687_v30  ;;  %v5689_v44 = vand.u32 4294901760, %v5688_v25  ;;  %5684 = vmatmul.f32.gmra.mxu2 %v5683_v43 }
 0x6c4   : >> { %v5690_v23 = vsub.f32 %v5688_v25, %v5689_v44  ;;  %5826 = vmatmul.f32.gmra.mxu0 %v5688_v25 }
 0x6c6   : >> { %5895 = vmatmul.f32.gmra.mxu1 %v5689_v44  ;;  %v5691_v35 = vand.u32 4294901760, %v5690_v23 }
 0x6ca   : >> { %5981 = vmatmul.f32.vlgmr.msrb.gmra.mxu3 %v12476_v42  ;;  %5692 = vmatmul.f32.gmra.mxu2 %v5691_v35 }
 0x6d2   : >> { %5985 = vmatmul.f32.gmra.mxu3 %v12496_v13  ;;  %5928 = vmatmul.f32.vlgmr.msrb.gmra.mxu2 %v12476_v42 }
 0x6da   : >> { %5989 = vmatmul.f32.gmra.mxu3 %v12520_v12  ;;  %5932 = vmatmul.f32.gmra.mxu2 %v12496_v13 }
 0x6e2   : >> { %5993 = vmatmul.f32.gmra.mxu3 %v12532_v40  ;;  %5936 = vmatmul.f32.gmra.mxu2 %v12520_v12 }
 0x6ea   : >> { %5997 = vmatmul.f32.gmra.mxu3 %v12539_v31  ;;  %5940 = vmatmul.f32.gmra.mxu2 %v12532_v40 }
 0x6f2   : >> { %6001 = vmatmul.f32.gmra.mxu3 %v5671_v51  ;;  %5944 = vmatmul.f32.gmra.mxu2 %v12539_v31 }
 0x6fa   : >> { %6005 = vmatmul.f32.gmra.mxu3 %v5679_v6  ;;  %5948 = vmatmul.f32.gmra.mxu2 %v5671_v51 }
 0x702   : >> { %6009 = vmatmul.f32.gmra.mxu3 %v5687_v30  ;;  %5952 = vmatmul.f32.gmra.mxu2 %v5679_v6 }
 0x707   : >> { %v5792_v32 = vpop.f32.mrf.mxu0 }
 0x709   : >> { %v5854_v2 = vpop.f32.mrf.mxu1 }
 0x70a   : >> { %5956 = vmatmul.f32.gmra.mxu2 %v5687_v30 }
 0x70b   : >> { %v5734_v42 = vpop.f32.mrf.mxu3 }
 0x70f   : >> { %v5797_v57 = vpop.f32.mrf.mxu0 }
 0x711   : >> { %v5860_v33 = vpop.f32.mrf.mxu1 }
 0x713   : >> { %v5637_v13 = vpop.f32.mrf.mxu2  ;;  %v5738_v37 = vpop.f32.mrf.mxu3 }
 0x714   : >> { %v5638_v12 = vadd.f32 %v5637_v13, %v12560_v46 }
 0x716   : >> { %v5735_v28 = vadd.f32 %v5734_v42, %v5638_v12 }
 0x717   : >> { %v5802_v54 = vpop.f32.mrf.mxu0 }
 0x718   : >> { %v5793_v63 = vadd.f32 %v5792_v32, %v5735_v28 }
 0x719   : >> { %v5866_v16 = vpop.f32.mrf.mxu1 }
 0x71a   : >> { %v5855_v24 = vadd.f32 %v5854_v2, %v5793_v63 }
 0x71b   : >> { %v5645_v7 = vpop.f32.mrf.mxu2  ;;  %v5742_v55 = vpop.f32.mrf.mxu3 }
 0x71c   : >> { %v5646_v40 = vadd.f32 %v5645_v7, %v12560_v46 }
 0x71e   : >> { %v5739_v17 = vadd.f32 %v5738_v37, %v5646_v40 }
 0x71f   : >> { %v5807_v56 = vpop.f32.mrf.mxu0 }
 0x720   : >> { %v5798_v39 = vadd.f32 %v5797_v57, %v5739_v17 }
 0x721   : >> { %v5872_v23 = vpop.f32.mrf.mxu1 }
 0x722   : >> { %v5861_v58 = vadd.f32 %v5860_v33, %v5798_v39 }
 0x723   : >> { %v5746_v31 = vpop.f32.mrf.mxu3  ;;  %v5653_v50 = vpop.f32.mrf.mxu2 }
 0x724   : >> { %v5654_v34 = vadd.f32 %v5653_v50, %v12560_v46 }
 0x726   : >> { %v5743_v47 = vadd.f32 %v5742_v55, %v5654_v34 }
 0x728   : >> { %v5803_v44 = vadd.f32 %v5802_v54, %v5743_v47 }
 0x729   : >> { %v5812_v28 = vpop.f32.mrf.mxu0 }
 0x72a   : >> { %v5867_v13 = vadd.f32 %v5866_v16, %v5803_v44 }
 0x72b   : >> { %v5661_v27 = vpop.f32.mrf.mxu2  ;;  %v5878_v34 = vpop.f32.mrf.mxu1 }
 0x72c   : >> { %v5662_v15 = vadd.f32 %v5661_v27, %v12560_v46 }
 0x72d   : >> { %v5750_v48 = vpop.f32.mrf.mxu3 }
 0x72e   : >> { %v5747_v41 = vadd.f32 %v5746_v31, %v5662_v15 }
 0x730   : >> { %v5808_v17 = vadd.f32 %v5807_v56, %v5747_v41 }
 0x732   : >> { %v5873_v27 = vadd.f32 %v5872_v23, %v5808_v17  ;;  %v13942_v23 = vld [vmem:[#allocation98_spill] sm:$0xff] }
 0x733   : >> { %v5884_v16 = vpop.f32.mrf.mxu1 }
 0x735   : >> { %v5754_v29 = vpop.f32.mrf.mxu3  ;;  %v5669_v62 = vpop.f32.mrf.mxu2 }
 0x736   : >> { %v5670_v0 = vadd.f32 %v5669_v62, %v12560_v46 }
 0x738   : >> { %v12567_v9 = vadd.f32 %v5750_v48, %v5670_v0 }
 0x73a   : >> { %v5813_v41 = vadd.f32 %v5812_v28, %v12567_v9 }
 0x73d   : >> { %v5758_v1 = vpop.f32.mrf.mxu3  ;;  %v5677_v10 = vpop.f32.mrf.mxu2 }
 0x73e   : >> { %v5678_v51 = vadd.f32 %v5677_v10, %v12560_v46 }
 0x740   : >> { %v12570_v36 = vadd.f32 %v5754_v29, %v5678_v51 }
 0x745   : >> { %v12572_v26 = vpop.f32.mrf.mxu3  ;;  %v5685_v45 = vpop.f32.mrf.mxu2 }
 0x746   : >> { %v5686_v18 = vadd.f32 %v5685_v45, %v12560_v46 }
 0x748   : >> { %v12575_v49 = vadd.f32 %v5758_v1, %v5686_v18  ;;  %v5817_v1 = vpop.f32.mrf.mxu0 }
 0x74d   : >> { %v5982_v11 = vpop.f32.mrf.mxu3  ;;  %v12577_v59 = vpop.f32.mrf.mxu2 }
 0x750   : >> { %v5822_v44 = vpop.f32.mrf.mxu0 }
 0x755   : >> { %v5986_v6 = vpop.f32.mrf.mxu3  ;;  %v5929_v21 = vpop.f32.mrf.mxu2 }
 0x756   : >> { %v5930_v22 = vadd.f32 %v5929_v21, %v5855_v24  ;;  %v5879_v21 = vadd.f32 %v5878_v34, %v5813_v41 }
 0x758   : >> { %v12579_v3 = vadd.f32 %v5982_v11, %v5930_v22 }
 0x75a   : >> { %v6013_v8 = vsub.f32 0.0, %v12579_v3 }
 0x75c   : >> { %v6021_v61 = vmul.f32 1.442695, %v6013_v8 }
 0x75d   : >> { %v5933_v53 = vpop.f32.mrf.mxu2  ;;  %v5990_v30 = vpop.f32.mrf.mxu3 }
 0x75e   : >> { %8557 = vpow2.f32 %v6021_v61  ;;  %v5934_v43 = vadd.f32 %v5933_v53, %v5861_v58 }
 0x760   : >> { %v12582_v25 = vadd.f32 %v5986_v6, %v5934_v43  ;;  %v5818_v43 = vadd.f32 %v5817_v1, %v12570_v36  ;;  %v5694_v36 = vadd.f32 %v12577_v59, %v12560_v46 }
 0x762   : >> { %v6014_v35 = vsub.f32 0.0, %v12582_v25  ;;  %v5763_v59 = vadd.f32 %v12572_v26, %v5694_v36 }
 0x764   : >> { %v8558_v42 = vpop.eup %8557  ;;  %v6023_v20 = vmul.f32 1.442695, %v6014_v35 }
 0x765   : >> { %v6037_v37 = vadd.f32 1.0, %v8558_v42  ;;  %v5937_v12 = vpop.f32.mrf.mxu2  ;;  %v5994_v40 = vpop.f32.mrf.mxu3 }
 0x766   : >> { %8559 = vpow2.f32 %v6023_v20  ;;  %v5938_v7 = vadd.f32 %v5937_v12, %v5867_v13  ;;  %v13943_v13 = vld [vmem:[#allocation104_spill] sm:$0xff] }
 0x767   : >> { %8561 = vrcp.f32 %v6037_v37  ;;  %v6056_v51 = vand.u32 2147483648, %v6037_v37  ;;  %v6054_v18 = vand.u32 2147483647, %v6037_v37  ;;  %vm6050_vm11 = vweird.f32 %v6037_v37 }
 0x768   : >> { %v12585_v55 = vadd.f32 %v5990_v30, %v5938_v7  ;;  %vm6173_vm13 = vcmp.lt.f32.partialorder %v13943_v13, 5e+29 }
 0x769   : >> { %v6057_v24 = vor.u32 1.1754944e-38, %v6056_v51  ;;  %vm6055_vm5 = vcmp.eq.f32.partialorder %v6054_v18, 8.507059e+37  ;;  %v13945_v51 = vld [vmem:[#allocation97_spill] sm:$0xff]  ;;  %v13946_v18 = vld [vmem:[#allocation107_spill] sm:$0xff] }
 0x76a   : >> { %v6015_v31 = vsub.f32 0.0, %v12585_v55 }
 0x76c   : >> { %v8560_v50 = vpop.eup %8559  ;;  %v6025_v47 = vmul.f32 1.442695, %v6015_v31 }
 0x76d   : >> { %v8562_v15 = vpop.eup %8561  ;;  %v6038_v48 = vadd.f32 1.0, %v8560_v50  ;;  %v5941_v29 = vpop.f32.mrf.mxu2  ;;  %v5885_v50 = vadd.f32 %v5884_v16, %v5818_v43 }
 0x76e   : >> { %v6046_v62 = vmul.f32 %v8562_v15, %v6037_v37  ;;  %8563 = vpow2.f32 %v6025_v47  ;;  %v5942_v0 = vadd.f32 %v5941_v29, %v5873_v27  ;;  %v5998_v2 = vpop.f32.mrf.mxu3  ;;  %vm6051_vm8 = vweird.f32 %v8562_v15 }
 0x76f   : >> { %8565 = vrcp.f32 %v6038_v48  ;;  %vm6052_vm15 = vmor %vm6050_vm11, %vm6051_vm8  ;;  %v6069_v53 = vand.u32 2147483647, %v6038_v48  ;;  %v6071_v30 = vand.u32 2147483648, %v6038_v48  ;;  %vm6065_vm1 = vweird.f32 %v6038_v48 }
 0x770   : >> { %v6047_v10 = vsub.f32 1.0, %v6046_v62  ;;  %v12588_v32 = vadd.f32 %v5994_v40, %v5942_v0  ;;  %v5890_v62 = vpop.f32.mrf.mxu1 }
 0x771   : >> { %v6072_v17 = vor.u32 1.1754944e-38, %v6071_v30  ;;  %vm6070_vm11 = vcmp.eq.f32.partialorder %v6069_v53, 8.507059e+37 }
 0x772   : >> { %v6048_v45 = vmul.f32 %v8562_v15, %v6047_v10  ;;  %v6016_v57 = vsub.f32 0.0, %v12588_v32 }
 0x774   : >> { %v8564_v11 = vpop.eup %8563  ;;  %v6049_v33 = vadd.f32 %v8562_v15, %v6048_v45  ;;  %v6027_v63 = vmul.f32 1.442695, %v6016_v57 }
 0x775   : >> { %v8566_v54 = vpop.eup %8565  ;;  %v12592_v6 = vadd.f32 1.0, %v8564_v11  ;;  %v5945_v22 = vpop.f32.mrf.mxu2 }
 0x776   : >> { %v6053_v39 = vsel %vm6052_vm15, %v8562_v15, %v6049_v33  ;;  %v6061_v9 = vmul.f32 %v8566_v54, %v6038_v48  ;;  %8567 = vpow2.f32 %v6027_v63  ;;  %v5946_v58 = vadd.f32 %v5945_v22, %v5879_v21  ;;  %v6002_v37 = vpop.f32.mrf.mxu3  ;;  %v5827_v11 = vpop.f32.mrf.mxu0 }
 0x777   : >> { %v6058_v8 = vsel %vm6055_vm5, %v6057_v24, %v6053_v39  ;;  %8569 = vrcp.f32 %v12592_v6  ;;  %vm6066_vm7 = vweird.f32 %v8566_v54  ;;  %v5823_v48 = vadd.f32 %v5822_v44, %v12575_v49 }
 0x778   : >> { %v6165_v56 = vmul.f32 %v6058_v8, %v12579_v3  ;;  %v6062_v61 = vsub.f32 1.0, %v6061_v9  ;;  %v12598_v20 = vadd.f32 %v5998_v2, %v5946_v58  ;;  %vm6067_vm8 = vmor %vm6065_vm1, %vm6066_vm7  ;;  %v6086_v1 = vand.u32 2147483648, %v12592_v6 }
 0x779   : >> { %v6084_v45 = vand.u32 2147483647, %v12592_v6  ;;  %vm6174_vm5 = vcmp.lt.f32.partialorder %v13946_v18, 5e+29  ;;  %v5891_v49 = vadd.f32 %v5890_v62, %v5823_v48  ;;  %vm6080_vm7 = vweird.f32 %v12592_v6 }
 0x77a   : >> { %v6181_v35 = vmax.f32 %v13942_v23, %v6165_v56  ;;  %v6063_v42 = vmul.f32 %v8566_v54, %v6062_v61  ;;  %v6017_v7 = vsub.f32 0.0, %v12598_v20  ;;  %v6087_v63 = vor.u32 1.1754944e-38, %v6086_v1  ;;  %v13951_v1 = vld [vmem:[#allocation95_spill] sm:$0xff] }
 0x77b   : >> { %v5828_v22 = vadd.f32 %v5827_v11, %v5763_v59  ;;  %vm6085_vm1 = vcmp.eq.f32.partialorder %v6084_v45, 8.507059e+37 }
 0x77c   : >> { %v8568_v12 = vpop.eup %8567  ;;  %v12602_v15 = vsel %vm6173_vm13, %v6181_v35, %v13942_v23   ;;  %v6064_v3 = vadd.f32 %v8566_v54, %v6063_v42  ;;  %v6029_v29 = vmul.f32 1.442695, %v6017_v7  ;;  %v5896_v23 = vpop.f32.mrf.mxu1  ;;  %v13948_v35 = vld [vmem:[#allocation96_spill] sm:$0xff] }
 0x77d   : >> { %v13944_v28 = vmov %v12602_v15  ;;  %v8570_v40 = vpop.eup %8569  ;;  %v12607_v31 = vadd.f32 1.0, %v8568_v12  ;;  %v5949_v34 = vpop.f32.mrf.mxu2 }
 0x77e   : >> { %v6068_v47 = vsel %vm6067_vm8, %v8566_v54, %v6064_v3  ;;  %v6076_v27 = vmul.f32 %v8570_v40, %v12592_v6  ;;  %v5950_v10 = vadd.f32 %v5949_v34, %v5885_v50  ;;  %vm6081_vm15 = vweird.f32 %v8570_v40  ;;  %v6006_v24 = vpop.f32.mrf.mxu3 }
 0x77f   : >> { %v6073_v15 = vsel %vm6070_vm11, %v6072_v17, %v6068_v47  ;;  %8571 = vrcp.f32 %v12607_v31  ;;  %vm6082_vm13 = vmor %vm6080_vm7, %vm6081_vm15  ;;  %v6099_v43 = vand.u32 2147483647, %v12607_v31  ;;  %v6101_v44 = vand.u32 2147483648, %v12607_v31 }
 0x780   : >> { %v6166_v0 = vmul.f32 %v6073_v15, %v12582_v25  ;;  %v6077_v46 = vsub.f32 1.0, %v6076_v27  ;;  %8573 = vpow2.f32 %v6029_v29  ;;  %v12618_v57 = vadd.f32 %v6002_v37, %v5950_v10  ;;  %v13949_v37 = vld [vmem:[#allocation105_spill] sm:$0xff] }
 0x781   : >> { %vm6175_vm11 = vcmp.lt.f32.partialorder %v13949_v37, 5e+29  ;;  %v5897_v3 = vadd.f32 %v5896_v23, %v5828_v22  ;;  %vm6095_vm15 = vweird.f32 %v12607_v31  ;;  %v6102_v36 = vor.u32 1.1754944e-38, %v6101_v44 }
 0x782   : >> { %v6182_v2 = vmax.f32 %v13945_v51, %v6166_v0  ;;  %v6078_v41 = vmul.f32 %v8570_v40, %v6077_v46  ;;  %v6018_v54 = vsub.f32 0.0, %v12618_v57  ;;  %vm6100_vm7 = vcmp.eq.f32.partialorder %v6099_v43, 8.507059e+37 }
 0x784   : >> { %v12621_v62 = vsel %vm6174_vm5, %v6182_v2, %v13945_v51   ;;  %v6079_v25 = vadd.f32 %v8570_v40, %v6078_v41  ;;  %v6031_v58 = vmul.f32 1.442695, %v6018_v54  ;;  %v13952_v2 = vld [vmem:[#allocation108_spill] sm:$0xff] }
 0x785   : >> { %v13947_v33 = vmov %v12621_v62  ;;  %v8572_v26 = vpop.eup %8571  ;;  %v5953_v21 = vpop.f32.mrf.mxu2 }
 0x786   : >> { %v8574_v16 = vpop.eup %8573  ;;  %v6083_v39 = vsel %vm6082_vm13, %v8570_v40, %v6079_v25  ;;  %v6091_v9 = vmul.f32 %v8572_v26, %v12607_v31  ;;  %v5954_v8 = vadd.f32 %v5953_v21, %v5891_v49  ;;  %vm6096_vm8 = vweird.f32 %v8572_v26  ;;  %v6010_v15 = vpop.f32.mrf.mxu3 }
 0x787   : >> { %v6088_v56 = vsel %vm6085_vm1, %v6087_v63, %v6083_v39  ;;  %v6041_v61 = vadd.f32 1.0, %v8574_v16  ;;  %vm6097_vm5 = vmor %vm6095_vm15, %vm6096_vm8  ;;  %vm6176_vm13 = vcmp.lt.f32.partialorder %v13952_v2, 5e+29  ;;  %v13960_v2 = vld [vmem:[#allocation92_spill] sm:$0xff] }
 0x788   : >> { %v6167_v53 = vmul.f32 %v6088_v56, %v12585_v55  ;;  %v6092_v6 = vsub.f32 1.0, %v6091_v9  ;;  %v12627_v30 = vadd.f32 %v6006_v24, %v5954_v8  ;;  %v13954_v8 = vld [vmem:[#allocation94_spill] sm:$0xff] }
 0x789   : >> { %8575 = vrcp.f32 %v6041_v61  ;;  %v6114_v41 = vand.u32 2147483647, %v6041_v61  ;;  %v6116_v45 = vand.u32 2147483648, %v6041_v61  ;;  %vm6110_vm8 = vweird.f32 %v6041_v61 }
 0x78a   : >> { %v6183_v42 = vmax.f32 %v13948_v35, %v6167_v53  ;;  %v6093_v13 = vmul.f32 %v8572_v26, %v6092_v6  ;;  %8577 = vpow2.f32 %v6031_v58  ;;  %v6019_v12 = vsub.f32 0.0, %v12627_v30  ;;  %v13955_v53 = vld [vmem:[#allocation106_spill] sm:$0xff] }
 0x78b   : >> { %v6117_v54 = vor.u32 1.1754944e-38, %v6116_v45  ;;  %vm6115_vm15 = vcmp.eq.f32.partialorder %v6114_v41, 8.507059e+37  ;;  %v13961_v45 = vld [vmem:[#allocation110_spill] sm:$0xff] }
 0x78c   : >> { %v12635_v55 = vsel %vm6175_vm11, %v6183_v42, %v13948_v35   ;;  %v6094_v40 = vadd.f32 %v8572_v26, %v6093_v13  ;;  %v6033_v17 = vmul.f32 1.442695, %v6019_v12 }
 0x78d   : >> { %v13950_v7 = vmov %v12635_v55  ;;  %v5957_v50 = vpop.f32.mrf.mxu2 }
 0x78e   : >> { %v6098_v34 = vsel %vm6097_vm5, %v8572_v26, %v6094_v40  ;;  %v5958_v47 = vadd.f32 %v5957_v50, %v5897_v3  ;;  %8579 = vpow2.f32 %v6033_v17  ;;  %vm6177_vm5 = vcmp.lt.f32.partialorder %v13955_v53, 5e+29 }
 0x78f   : >> { %v8576_v27 = vpop.eup %8575  ;;  %v6103_v29 = vsel %vm6100_vm7, %v6102_v36, %v6098_v34 }
 0x790   : >> { %v8578_v48 = vpop.eup %8577  ;;  %v6168_v62 = vmul.f32 %v6103_v29, %v12588_v32  ;;  %v6106_v0 = vmul.f32 %v8576_v27, %v6041_v61  ;;  %v12639_v46 = vadd.f32 %v6010_v15, %v5958_v47  ;;  %vm6111_vm1 = vweird.f32 %v8576_v27  ;;  %v13957_v47 = vld [vmem:[#allocation93_spill] sm:$0xff] }
 0x791   : >> { %v6042_v59 = vadd.f32 1.0, %v8578_v48  ;;  %vm6112_vm11 = vmor %vm6110_vm8, %vm6111_vm1  ;;  %v13958_v48 = vld [vmem:[#allocation109_spill] sm:$0xff] }
 0x792   : >> { %v6184_v31 = vmax.f32 %v13951_v1, %v6168_v62  ;;  %v6107_v10 = vsub.f32 1.0, %v6106_v0  ;;  %v6020_v51 = vsub.f32 0.0, %v12639_v46 }
 0x793   : >> { %8581 = vrcp.f32 %v6042_v59  ;;  %v6131_v6 = vand.u32 2147483648, %v6042_v59  ;;  %v6129_v35 = vand.u32 2147483647, %v6042_v59 }
 0x794   : >> { %v12645_v18 = vsel %vm6176_vm13, %v6184_v31, %v13951_v1   ;;  %v6108_v11 = vmul.f32 %v8576_v27, %v6107_v10  ;;  %v6035_v32 = vmul.f32 1.442695, %v6020_v51  ;;  %v8580_v25 = vpop.eup %8579  ;;  %vm6125_vm13 = vweird.f32 %v6042_v59 }
 0x795   : >> { %v13953_v49 = vmov %v12645_v18  ;;  %v6043_v63 = vadd.f32 1.0, %v8580_v25  ;;  %vm6130_vm8 = vcmp.eq.f32.partialorder %v6129_v35, 8.507059e+37 }
 0x796   : >> { %v6109_v26 = vadd.f32 %v8576_v27, %v6108_v11  ;;  %8583 = vpow2.f32 %v6035_v32 }
 0x797   : >> { %8585 = vrcp.f32 %v6043_v63  ;;  %v6146_v3 = vand.u32 2147483648, %v6043_v63  ;;  %v6144_v36 = vand.u32 2147483647, %v6043_v63 }
 0x798   : >> { %v6113_v24 = vsel %vm6112_vm11, %v8576_v27, %v6109_v26 }
 0x799   : >> { %v8582_v21 = vpop.eup %8581  ;;  %v6118_v22 = vsel %vm6115_vm15, %v6117_v54, %v6113_v24  ;;  %vm6140_vm15 = vweird.f32 %v6043_v63  ;;  %v6147_v29 = vor.u32 1.1754944e-38, %v6146_v3  ;;  %v13964_v24 = vld [vmem:[#allocation115_spill] sm:$0xff]  ;;  %v13997_v3 = vld [vmem:[#allocation60_spill] sm:$0xff] }
 0x79a   : >> { %v6169_v16 = vmul.f32 %v6118_v22, %v12598_v20  ;;  %v6121_v39 = vmul.f32 %v8582_v21, %v6042_v59  ;;  %vm6126_vm7 = vweird.f32 %v8582_v21  ;;  %v6132_v20 = vor.u32 1.1754944e-38, %v6131_v6 }
 0x79b   : >> { %vm6127_vm1 = vmor %vm6125_vm13, %vm6126_vm7  ;;  %vm6178_vm7 = vcmp.lt.f32.partialorder %v13958_v48, 5e+29  ;;  %vm6145_vm13 = vcmp.eq.f32.partialorder %v6144_v36, 8.507059e+37  ;;  %v13998_v3 = vsel %vm11588_vm2, 1e+30, %v13997_v3   ;;  %vm14007_vm2 = vcmask (%p12672_p11), 1044480  }
 0x79c   : >> { %v8584_v9 = vpop.eup %8583  ;;  %v6185_v56 = vmax.f32 %v13954_v8, %v6169_v16  ;;  %v6122_v58 = vsub.f32 1.0, %v6121_v39  ;;  %v13977_v39 = vld [vmem:[#allocation72_spill] sm:$0xff]  ;;  %v14023_v3 = vld [vmem:[#allocation45_spill] sm:$0xff] (%p12672_p11) }
 0x79d   : >> { %v6044_v61 = vadd.f32 1.0, %v8584_v9  ;;  %v8586_v43 = vpop.eup %8585  ;;  %v13978_v39 = vsel %vm11839_vm10, 1e+30, %v13977_v39   ;;  %v14030_v48 = vld [vmem:[#allocation56_spill] sm:$0xff] (%p12672_p11) }
 0x79e   : >> { %v12651_v0 = vsel %vm6177_vm5, %v6185_v56, %v13954_v8   ;;  %v6123_v23 = vmul.f32 %v8582_v21, %v6122_v58  ;;  %v6136_v42 = vmul.f32 %v8586_v43, %v6043_v63  ;;  %vm6141_vm11 = vweird.f32 %v8586_v43  ;;  %v13963_v63 = vld [vmem:[#allocation91_spill] sm:$0xff]  ;;  %v13975_v58 = vld [vmem:[#allocation127_spill] sm:$0xff]  ;;  %v14003_v56 = vld [vmem:[#allocation112_spill] sm:$0xff] }
 0x79f   : >> { %v13956_v44 = vmov %v12651_v0  ;;  %8587 = vrcp.f32 %v6044_v61  ;;  %vm6142_vm5 = vmor %vm6140_vm15, %vm6141_vm11  ;;  %v6159_v51 = vand.u32 2147483647, %v6044_v61  ;;  %vm6155_vm11 = vweird.f32 %v6044_v61  ;;  %v14017_v39 = vld [vmem:[#allocation62_spill] sm:$0xff] (%p12672_p11)  ;;  %v14018_v58 = vld [vmem:[#allocation20_spill] sm:$0xff] (%p12672_p11) }
 0x7a0   : >> { %v6124_v13 = vadd.f32 %v8582_v21, %v6123_v23  ;;  %v6137_v37 = vsub.f32 1.0, %v6136_v42  ;;  %v6245_v23 = vld [vmem:[%s13319_s13] sm:$0x1f] (%p12672_p11)  ;;  %v6778_v8 = vld [vmem:[%s13321_s15 + $0x10] sm:$0xff] (%p12672_p11) }
 0x7a1   : > { %v6251_v35 = vsel (%p12672_p11), %vm14007_vm2, %v6245_v23, 0  ;;  %v12845_v53 = vand.u32 (%p12672_p11), 4294901760, %v6778_v8 }
 0x7a2   : >> { %v6128_v12 = vsel %vm6127_vm1, %v8582_v21, %v6124_v13  ;;  %v6138_v40 = vmul.f32 %v8586_v43, %v6137_v37  ;;  %v6268_v42 = vand.u32 (%p12672_p11), 4294901760, %v6251_v35 }
 0x7a3   : >> { %v6133_v55 = vsel %vm6130_vm8, %v6132_v20, %v6128_v12  ;;  %vm6179_vm8 = vcmp.lt.f32.partialorder %v13961_v45, 5e+29  ;;  %v13993_v20 = vld [vmem:[#allocation70_spill] sm:$0xff]  ;;  %v6779_v45 = vld [vmem:[%s13321_s15 + $0x18] sm:$0xff] (%p12672_p11) }
 0x7a4   : >> { %v6170_v17 = vmul.f32 %v6133_v55, %v12618_v57  ;;  %v6139_v34 = vadd.f32 %v8586_v43, %v6138_v40  ;;  %v6161_v57 = vand.u32 2147483648, %v6044_v61  ;;  %v13985_v55 = vld [vmem:[#allocation65_spill] sm:$0xff]  ;;  %v13994_v20 = vsel %vm11695_vm4, 1e+30, %v13993_v20   ;;  %8242 = vmatpush.msra.mxu2 (%p12672_p11), %v6268_v42  ;;  %6269 = vmatpush.msra.mxu0 (%p12672_p11), %v6268_v42  ;;  %v14008_v12 = vld [vmem:[#allocation74_spill] sm:$0xff] (%p12672_p11)  ;;  %v14009_v40 = vld [vmem:[#allocation51_spill] sm:$0xff] (%p12672_p11) }
 0x7a5   : >> { %v8588_v50 = vpop.eup %8587  ;;  %v13986_v55 = vsel %vm11666_vm0, 1e+30, %v13985_v55   ;;  %v6351_v37 = vsub.f32 (%p12672_p11), %v6251_v35, %v6268_v42  ;;  %6307 = vmatmul.f32.vlgmr.msra.gmra.mxu2 (%p12672_p11), %v14008_v12  ;;  %6275 = vmatmul.f32.vlgmr.msra.gmra.mxu0 (%p12672_p11), %v14009_v40  ;;  %v14022_v20 = vld [vmem:[#allocation79_spill] sm:$0xff] (%p12672_p11) }
 0x7a6   : >> { %v6186_v27 = vmax.f32 %v13957_v47, %v6170_v17  ;;  %v6151_v15 = vmul.f32 %v8588_v50, %v6044_v61  ;;  %v6143_v62 = vsel %vm6142_vm5, %v8586_v43, %v6139_v34  ;;  %vm6156_vm1 = vweird.f32 %v8588_v50  ;;  %v13991_v17 = vld [vmem:[#allocation121_spill] sm:$0xff]  ;;  %v14001_v61 = vld [vmem:[#allocation58_spill] sm:$0xff] }
 0x7a7   : >> { %v6148_v0 = vsel %vm6145_vm13, %v6147_v29, %v6143_v62  ;;  %vm6157_vm15 = vmor %vm6155_vm11, %vm6156_vm1  ;;  %v6162_v11 = vor.u32 1.1754944e-38, %v6161_v57  ;;  %vm6160_vm5 = vcmp.eq.f32.partialorder %v6159_v51, 8.507059e+37  ;;  %v13973_v62 = vmov %v13947_v33  ;;  %v13983_v29 = vld [vmem:[#allocation119_spill] sm:$0xff]  ;;  %6406 = vmatpush.msrb.mxu2 (%p12672_p11), %v6351_v37  ;;  %v14024_v55 = vld [vmem:[#allocation57_spill] sm:$0xff] (%p12672_p11) }
 0x7a8   : >> { %v12657_v13 = vsel %vm6178_vm7, %v6186_v27, %v13957_v47   ;;  %v6152_v1 = vsub.f32 1.0, %v6151_v15  ;;  %v6171_v31 = vmul.f32 %v6148_v0, %v12627_v30  ;;  %vm6180_vm7 = vcmp.lt.f32.partialorder %v13964_v24, 5e+29  ;;  %v14026_v17 = vld [vmem:[#allocation47_spill] sm:$0xff] (%p12672_p11)  ;;  %v14028_v29 = vld [vmem:[#allocation52_spill] sm:$0xff] (%p12672_p11)  ;;  %v14035_v57 = vld [vmem:[#allocation10_spill] sm:$0xff] (%p12672_p11) }
 0x7a9   : >> { %v13959_v59 = vmov %v12657_v13  ;;  %v13970_v0 = vmov %v13956_v44  ;;  %v13974_v15 = vmov %v13944_v28  ;;  %v14002_v61 = vsel %vm11632_vm14, 1e+30, %v14001_v61   ;;  %v14031_v62 = vld [vmem:[#allocation64_spill] sm:$0xff] (%p12672_p11)  ;;  %v14037_v51 = vld [vmem:[#allocation11_spill] sm:$0xff] (%p12672_p11) }
 0x7aa   : >> { %v6153_v10 = vmul.f32 %v8588_v50, %v6152_v1  ;;  %v6187_v41 = vmax.f32 %v13960_v2, %v6171_v31  ;;  %v13969_v13 = vmov %v13959_v59  ;;  %v13995_v1 = vld [vmem:[#allocation114_spill] sm:$0xff]  ;;  %v6352_v34 = vand.u32 (%p12672_p11), 4294901760, %v6351_v37  ;;  %v14019_v61 = vld [vmem:[#allocation76_spill] sm:$0xff] (%p12672_p11) }
 0x7ab   : > { %v14021_v13 = vld [vmem:[#allocation68_spill] sm:$0xff] (%p12672_p11)  ;;  %v14029_v15 = vld [vmem:[#allocation59_spill] sm:$0xff] (%p12672_p11)  ;;  %v14033_v1 = vld [vmem:[#allocation73_spill] sm:$0xff] (%p12672_p11) }
 0x7ac   : >> { %v6154_v18 = vadd.f32 %v8588_v50, %v6153_v10  ;;  %v12663_v43 = vsel %vm6179_vm8, %v6187_v41, %v13960_v2   ;;  %v13971_v10 = vmov %v13953_v49  ;;  %v6353_v47 = vsub.f32 (%p12672_p11), %v6351_v37, %v6352_v34  ;;  %6532 = vmatpush.msrb.mxu0 (%p12672_p11), %v6352_v34  ;;  %v14032_v0 = vld [vmem:[#allocation63_spill] sm:$0xff] (%p12672_p11)  ;;  %v14038_v2 = vld [vmem:[#allocation78_spill] sm:$0xff] (%p12672_p11)  ;;  %v14039_v41 = vld [vmem:[#allocation81_spill] sm:$0xff] (%p12672_p11) }
 0x7ad   : >> { %v13962_v26 = vmov %v12663_v43  ;;  %6315 = vmatmul.f32.gmra.mxu2 (%p12672_p11), %v14010_v52  ;;  %6283 = vmatmul.f32.gmra.mxu0 (%p12672_p11), %v14013_v14  ;;  %v14034_v31 = vld [vmem:[#allocation67_spill] sm:$0xff] (%p12672_p11) }
 0x7ae   : >> { %v6158_v32 = vsel %vm6157_vm15, %v8588_v50, %v6154_v18  ;;  %v13968_v43 = vmov %v13962_v26  ;;  %v13979_v18 = vld [vmem:[#allocation125_spill] sm:$0xff]  ;;  %v13981_v50 = vld [vmem:[#allocation66_spill] sm:$0xff]  ;;  %v6354_v27 = vand.u32 (%p12672_p11), 4294901760, %v6353_v47  ;;  %v14036_v10 = vld [vmem:[#allocation75_spill] sm:$0xff] (%p12672_p11) }
 0x7af   : >> { %v6163_v25 = vsel %vm6160_vm5, %v6162_v11, %v6158_v32  ;;  %v13982_v50 = vsel %vm11751_vm12, 1e+30, %v13981_v50   ;;  %v13989_v32 = vld [vmem:[#allocation71_spill] sm:$0xff]  ;;  %v14020_v43 = vld [vmem:[#allocation53_spill] sm:$0xff] (%p12672_p11)  ;;  %v12866_v47 = vld [vmem:[%s13320_s14] ss:$0 sm:$0xff] (%p12672_p11) }
 0x7b0   : >> { %v6172_v30 = vmul.f32 %v6163_v25, %v12639_v46  ;;  %v13990_v32 = vsel %vm11715_vm6, 1e+30, %v13989_v32   ;;  %v13999_v25 = vld [vmem:[#allocation117_spill] sm:$0xff]  ;;  %v14005_v11 = vld [vmem:[#allocation103_spill] sm:$0xff]  ;;  %8243 = vmatpush.msra.mxu3 (%p12672_p11), %v6354_v27  ;;  %6355 = vmatpush.msra.mxu1 (%p12672_p11), %v6354_v27  ;;  %v14027_v50 = vld [vmem:[#allocation54_spill] sm:$0xff] (%p12672_p11) }
 0x7b1   : >> { %v14006_v11 = vsel %vm11562_vm9, 1e+30, %v14005_v11   ;;  %6373 = vmatmul.f32.vlgmr.msra.gmra.mxu3 (%p12672_p11), %v14011_v60  ;;  %6357 = vmatmul.f32.vlgmr.msra.gmra.mxu1 (%p12672_p11), %v14012_v4 }
 0x7b2   : >> { %v6188_v54 = vmax.f32 %v13963_v63, %v6172_v30  ;;  %v13972_v30 = vmov %v13950_v7  ;;  %3619 = sbr.rel (!%p12672_p11) target bundleno = 810 (0x32a), region = 144  ;;  %6464 = vmatpush.msrb.mxu3 (%p12672_p11), %v6268_v42  ;;  %6582 = vmatpush.msrb.mxu1 (%p12672_p11), %v6268_v42  ;;  %v12831_v11 = vand.u32 (%p12672_p11), 4294901760, %v6779_v45 }
 0x7b4   : >> { %v12669_v36 = vsel %vm6180_vm7, %v6188_v54, %v13963_v63   ;;  %v13987_v54 = vld [vmem:[#allocation123_spill] sm:$0xff]  ;;  %6822 = vmatpush.msra.mxu2 (%p12672_p11), %v12831_v11  ;;  %v6907_v32 = vsub.f32 (%p12672_p11), %v6779_v45, %v12831_v11  ;;  %7041 = vmatpush.msra.mxu1 (%p12672_p11), %v12831_v11 }
 0x7b5   : >> { %v13965_v21 = vmov %v12669_v36  ;;  %6323 = vmatmul.f32.gmra.mxu2 (%p12672_p11), %v14014_v19  ;;  %6291 = vmatmul.f32.gmra.mxu0 (%p12672_p11), %v14017_v39  ;;  %v6777_v19 = vld [vmem:[%s13321_s15 + $0x8] sm:$0xff] (%p12672_p11) }
 0x7b6   : >> { %v13967_v36 = vmov %v13965_v21  ;;  %v6908_v25 = vand.u32 (%p12672_p11), 4294901760, %v6907_v32  ;;  %6977 = vmatpush.msra.mxu0 (%p12672_p11), %v6907_v32  ;;  %6824 = vmatpush.msra.mxu2 (%p12672_p11), %v12845_v53  ;;  %v6825_v39 = vand.u32 (%p12672_p11), 4294901760, %v6777_v19 }
 0x7b7   : > { %v14025_v36 = vld [vmem:[#allocation49_spill] sm:$0xff]  ;;  %7043 = vmatpush.msra.mxu1 %v12845_v53 }
 0x7b8   : > { %v6909_v63 = vsub.f32 %v6907_v32, %v6908_v25  ;;  %6826 = vmatpush.msra.mxu2 %v6825_v39 }
 0x7b9   : > { %6377 = vmatmul.f32.gmra.mxu3 %v14015_v5  ;;  %6361 = vmatmul.f32.gmra.mxu1 %v14016_v38 }
 0x7ba   : > { %v6910_v54 = vand.u32 4294901760, %v6909_v63  ;;  %7045 = vmatpush.msra.mxu1 %v6825_v39 }
 0x7bc   : > { %6911 = vmatpush.msra.mxu3 %v6910_v54 }
 0x7bd   : > { %6331 = vmatmul.f32.gmra.mxu2 %v14018_v58  ;;  %6299 = vmatmul.f32.gmra.mxu0 %v14021_v13 }
 0x7c1   : > { %6381 = vmatmul.f32.gmra.mxu3 %v14019_v61  ;;  %6365 = vmatmul.f32.gmra.mxu1 %v14020_v43 }
 0x7c5   : > { %6409 = vmatmul.f32.vlgmr.msrb.gmra.mxu2 %v14023_v3  ;;  %6534 = vmatmul.f32.vlgmr.msrb.gmra.mxu0 %v14012_v4  ;;  %v6776_v3 = vld [vmem:[%s13321_s15] sm:$0xff] }
 0x7c9   : > { %6385 = vmatmul.f32.gmra.mxu3 %v14022_v20  ;;  %6369 = vmatmul.f32.gmra.mxu1 %v14024_v55 }
 0x7cd   : > { %6414 = vmatmul.f32.gmra.mxu2 %v14025_v36  ;;  %6538 = vmatmul.f32.gmra.mxu0 %v14016_v38 }
 0x7d1   : > { %6468 = vmatmul.f32.vlgmr.msrb.gmra.mxu3 %v14026_v17  ;;  %6584 = vmatmul.f32.vlgmr.msrb.gmra.mxu1 %v14012_v4 }
 0x7d5   : > { %6419 = vmatmul.f32.gmra.mxu2 %v14027_v50  ;;  %6542 = vmatmul.f32.gmra.mxu0 %v14020_v43  ;;  %v6827_v50 = vand.u32 4294901760, %v6776_v3 }
 0x7d7   : > { %6828 = vmatpush.msra.mxu2 %v6827_v50  ;;  %7047 = vmatpush.msra.mxu1 %v6827_v50 }
 0x7d9   : > { %6474 = vmatmul.f32.gmra.mxu3 %v14028_v29  ;;  %6588 = vmatmul.f32.gmra.mxu1 %v14016_v38  ;;  %v6913_v38 = vsub.f32 %v6778_v8, %v12845_v53 }
 0x7da   : > { %7112 = vmatpush.msrb.mxu2 %v6908_v25 }
 0x7db   : > { %6980 = vmatpush.msra.mxu0 %v6913_v38 }
 0x7dd   : > { %6424 = vmatmul.f32.gmra.mxu2 %v14029_v15  ;;  %6546 = vmatmul.f32.gmra.mxu0 %v14024_v55 }
 0x7e1   : > { %6480 = vmatmul.f32.gmra.mxu3 %v14030_v48  ;;  %6592 = vmatmul.f32.gmra.mxu1 %v14020_v43 }
 0x7e5   : > { %6429 = vmatmul.f32.gmra.mxu2 %v14031_v62  ;;  %6550 = vmatmul.f32.gmra.mxu0 %v14011_v60 }
 0x7e9   : > { %6486 = vmatmul.f32.gmra.mxu3 %v14032_v0  ;;  %6596 = vmatmul.f32.gmra.mxu1 %v14024_v55  ;;  %v6925_v0 = vsub.f32 %v6776_v3, %v6827_v50 }
 0x7ed   : > { %6434 = vmatmul.f32.gmra.mxu2 %v14033_v1  ;;  %6554 = vmatmul.f32.gmra.mxu0 %v14015_v5 }
 0x7f1   : > { %6492 = vmatmul.f32.gmra.mxu3 %v14034_v31  ;;  %6600 = vmatmul.f32.gmra.mxu1 %v14011_v60 }
 0x7f5   : > { %6439 = vmatmul.f32.gmra.mxu2 %v14035_v57  ;;  %6558 = vmatmul.f32.gmra.mxu0 %v14019_v61 }
 0x7f9   : > { %6498 = vmatmul.f32.gmra.mxu3 %v14036_v10  ;;  %6604 = vmatmul.f32.gmra.mxu1 %v14015_v5 }
 0x7fd   : > { %6444 = vmatmul.f32.gmra.mxu2 %v14037_v51  ;;  %6562 = vmatmul.f32.gmra.mxu0 %v14022_v20  ;;  %v6926_v51 = vand.u32 4294901760, %v6925_v0 }
 0x801   : > { %6504 = vmatmul.f32.gmra.mxu3 %v14038_v2  ;;  %6608 = vmatmul.f32.gmra.mxu1 %v14019_v61  ;;  %v6914_v61 = vand.u32 4294901760, %v6913_v38 }
 0x803   : > { %v6915_v17 = vsub.f32 %v6913_v38, %v6914_v61  ;;  %7116 = vmatpush.msrb.mxu2 %v6914_v61 }
 0x805   : > { %v6916_v48 = vand.u32 4294901760, %v6915_v17 }
 0x807   : > { %6917 = vmatpush.msra.mxu3 %v6916_v48 }
 0x809   : > { %6510 = vmatmul.f32.gmra.mxu3 %v14039_v41  ;;  %6612 = vmatmul.f32.gmra.mxu1 %v14022_v20  ;;  %v6919_v20 = vsub.f32 %v6777_v19, %v6825_v39 }
 0x80b   : > { %v6920_v29 = vand.u32 4294901760, %v6919_v20  ;;  %6983 = vmatpush.msra.mxu0 %v6919_v20 }
 0x80d   : > { %v6921_v1 = vsub.f32 %v6919_v20, %v6920_v29  ;;  %6986 = vmatpush.msra.mxu0 %v6925_v0  ;;  %7120 = vmatpush.msrb.mxu2 %v6920_v29 }
 0x80f   : > { %v6922_v2 = vand.u32 4294901760, %v6921_v1  ;;  %7124 = vmatpush.msrb.mxu2 %v6926_v51 }
 0x811   : > { %6923 = vmatpush.msra.mxu3 %v6922_v2 }
 0x822   : > { %v6276_v18 = vpop.f32.mrf.mxu0 }
 0x823   : > { %v6277_v60 = vadd.f32 %v12866_v47, %v6276_v18  ;;  %v6927_v18 = vsub.f32 %v6925_v0, %v6926_v51 }
 0x828   : > { %v12836_v30 = vpop.f32.mrf.mxu2 }
 0x82a   : > { %v6284_v46 = vpop.f32.mrf.mxu0 }
 0x82b   : > { %v6285_v55 = vadd.f32 %v12866_v47, %v6284_v46  ;;  %v6928_v46 = vand.u32 4294901760, %v6927_v18 }
 0x82d   : > { %6929 = vmatpush.msra.mxu3 %v6928_v46 }
 0x82e   : > { %v6358_v24 = vpop.f32.mrf.mxu1 }
 0x82f   : > { %v6359_v5 = vadd.f32 %v6358_v24, %v6277_v60  ;;  %7171 = vmatpush.msrb.mxu3 %v12831_v11 }
 0x830   : > { %v12838_v22 = vpop.f32.mrf.mxu2 }
 0x831   : > { %7173 = vmatpush.msrb.mxu3 %v12845_v53 }
 0x832   : > { %v6292_v56 = vpop.f32.mrf.mxu0 }
 0x833   : > { %v6293_v54 = vadd.f32 %v12866_v47, %v6292_v56  ;;  %7175 = vmatpush.msrb.mxu3 %v6825_v39 }
 0x834   : > { %v12840_v16 = vpop.f32.mrf.mxu3 }
 0x835   : > { %7177 = vmatpush.msrb.mxu3 %v6827_v50 }
 0x836   : > { %v6362_v9 = vpop.f32.mrf.mxu1 }
 0x837   : > { %v6363_v31 = vadd.f32 %v6362_v9, %v6285_v55 }
 0x838   : > { %v12849_v6 = vpop.f32.mrf.mxu2 }
 0x83a   : > { %v12855_v42 = vpop.f32.mrf.mxu0 }
 0x83c   : > { %v12851_v23 = vpop.f32.mrf.mxu3 }
 0x83e   : > { %v12853_v35 = vpop.f32.mrf.mxu1 }
 0x840   : > { %v12857_v37 = vpop.f32.mrf.mxu2 }
 0x842   : > { %v6535_v34 = vpop.f32.mrf.mxu0 }
 0x844   : > { %v12859_v12 = vpop.f32.mrf.mxu3 }
 0x846   : > { %v12861_v40 = vpop.f32.mrf.mxu1 }
 0x848   : > { %v6410_v52 = vpop.f32.mrf.mxu2 }
 0x849   : > { %v6411_v58 = vadd.f32 %v6410_v52, %v6359_v5 }
 0x84a   : > { %v6539_v14 = vpop.f32.mrf.mxu0 }
 0x84c   : > { %v12868_v27 = vpop.f32.mrf.mxu3 }
 0x84e   : > { %v6585_v4 = vpop.f32.mrf.mxu1 }
 0x850   : > { %v6415_v43 = vpop.f32.mrf.mxu2 }
 0x851   : > { %v6416_v41 = vadd.f32 %v6415_v43, %v6363_v31 }
 0x852   : > { %v6543_v10 = vpop.f32.mrf.mxu0 }
 0x854   : > { %v6469_v13 = vpop.f32.mrf.mxu3 }
 0x855   : > { %v6470_v36 = vadd.f32 %v6469_v13, %v6411_v58 }
 0x856   : > { %v6589_v62 = vpop.f32.mrf.mxu1 }
 0x857   : > { %v6536_v15 = vadd.f32 %v6535_v34, %v6470_v36  ;;  %v6367_v34 = vadd.f32 %v12853_v35, %v6293_v54 }
 0x858   : > { %v6420_v32 = vpop.f32.mrf.mxu2 }
 0x859   : > { %v12879_v57 = vadd.f32 %v6585_v4, %v6536_v15  ;;  %v6421_v60 = vadd.f32 %v6420_v32, %v6367_v34 }
 0x85a   : > { %v6547_v56 = vpop.f32.mrf.mxu0 }
 0x85b   : > { %v6616_v45 = vsub.f32 0.0, %v12879_v57 }
 0x85c   : > { %v6475_v63 = vpop.f32.mrf.mxu3 }
 0x85d   : > { %v6624_v25 = vmul.f32 1.442695, %v6616_v45  ;;  %v6476_v24 = vadd.f32 %v6475_v63, %v6416_v41 }
 0x85e   : > { %v6593_v8 = vpop.f32.mrf.mxu1 }
 0x85f   : > { %8592 = vpow2.f32 %v6624_v25  ;;  %v6540_v9 = vadd.f32 %v6539_v14, %v6476_v24  ;;  %v6301_v14 = vadd.f32 %v12866_v47, %v12855_v42  ;;  %v6309_v42 = vadd.f32 %v12866_v47, %v12836_v30 }
 0x860   : > { %v6425_v19 = vpop.f32.mrf.mxu2 }
 0x861   : > { %v12885_v52 = vadd.f32 %v6589_v62, %v6540_v9  ;;  %v6371_v53 = vadd.f32 %v12861_v40, %v6301_v14  ;;  %v6375_v1 = vadd.f32 %v12840_v16, %v6309_v42  ;;  %v6317_v16 = vadd.f32 %v12866_v47, %v12838_v22 }
 0x862   : > { %v6551_v48 = vpop.f32.mrf.mxu0 }
 0x863   : > { %v6617_v4 = vsub.f32 0.0, %v12885_v52  ;;  %v6426_v20 = vadd.f32 %v6425_v19, %v6371_v53  ;;  %v6379_v14 = vadd.f32 %v12851_v23, %v6317_v16 }
 0x864   : > { %v6481_v5 = vpop.f32.mrf.mxu3 }
 0x865   : > { %v8593_v38 = vpop.eup %8592  ;;  %v6626_v58 = vmul.f32 1.442695, %v6617_v4  ;;  %v6482_v61 = vadd.f32 %v6481_v5, %v6421_v60 }
 0x866   : > { %v6640_v11 = vadd.f32 1.0, %v8593_v38  ;;  %v6597_v43 = vpop.f32.mrf.mxu1 }
 0x867   : > { %8594 = vpow2.f32 %v6626_v58  ;;  %v6544_v35 = vadd.f32 %v6543_v10, %v6482_v61 }
 0x868   : > { %8596 = vrcp.f32 %v6640_v11  ;;  %v6430_v39 = vpop.f32.mrf.mxu2  ;;  %v6657_v51 = vand.u32 2147483647, %v6640_v11  ;;  %v6659_v2 = vand.u32 2147483648, %v6640_v11  ;;  %vm6653_vm14 = vweird.f32 %v6640_v11 }
 0x869   : > { %v12892_v13 = vadd.f32 %v6593_v8, %v6544_v35  ;;  %v6431_v41 = vadd.f32 %v6430_v39, %v6375_v1  ;;  %v6325_v39 = vadd.f32 %v12866_v47, %v12849_v6 }
 0x86a   : > { %v6660_v9 = vor.u32 1.1754944e-38, %v6659_v2  ;;  %vm6658_vm4 = vcmp.eq.f32.partialorder %v6657_v51, 8.507059e+37 }
 0x86b   : > { %v6618_v3 = vsub.f32 0.0, %v12892_v13  ;;  %v6383_v1 = vadd.f32 %v12859_v12, %v6325_v39 }
 0x86c   : > { %v6487_v55 = vpop.f32.mrf.mxu3 }
 0x86d   : > { %v8595_v36 = vpop.eup %8594  ;;  %v6628_v17 = vmul.f32 1.442695, %v6618_v3  ;;  %v6488_v29 = vadd.f32 %v6487_v55, %v6426_v20 }
 0x86e   : > { %v8597_v50 = vpop.eup %8596  ;;  %v12897_v15 = vadd.f32 1.0, %v8595_v36  ;;  %v6601_v0 = vpop.f32.mrf.mxu1 }
 0x86f   : > { %v6649_v62 = vmul.f32 %v8597_v50, %v6640_v11  ;;  %8598 = vpow2.f32 %v6628_v17  ;;  %v6548_v40 = vadd.f32 %v6547_v56, %v6488_v29  ;;  %vm6654_vm9 = vweird.f32 %v8597_v50  ;;  %v6555_v56 = vpop.f32.mrf.mxu0 }
 0x870   : > { %8600 = vrcp.f32 %v12897_v15  ;;  %v6435_v18 = vpop.f32.mrf.mxu2  ;;  %vm6655_vm0 = vmor %vm6653_vm14, %vm6654_vm9  ;;  %v6672_v22 = vand.u32 2147483647, %v12897_v15  ;;  %v6674_v58 = vand.u32 2147483648, %v12897_v15  ;;  %vm6668_vm12 = vweird.f32 %v12897_v15 }
 0x871   : > { %v6650_v31 = vsub.f32 1.0, %v6649_v62  ;;  %v12901_v10 = vadd.f32 %v6597_v43, %v6548_v40  ;;  %v6436_v20 = vadd.f32 %v6435_v18, %v6379_v14 }
 0x872   : > { %v6675_v29 = vor.u32 1.1754944e-38, %v6674_v58  ;;  %vm6673_vm13 = vcmp.eq.f32.partialorder %v6672_v22, 8.507059e+37 }
 0x873   : > { %v6651_v30 = vmul.f32 %v8597_v50, %v6650_v31  ;;  %v6619_v45 = vsub.f32 0.0, %v12901_v10 }
 0x874   : > { %v6493_v32 = vpop.f32.mrf.mxu3 }
 0x875   : > { %v8599_v63 = vpop.eup %8598  ;;  %v6652_v54 = vadd.f32 %v8597_v50, %v6651_v30  ;;  %v6630_v25 = vmul.f32 1.442695, %v6619_v45  ;;  %v6494_v24 = vadd.f32 %v6493_v32, %v6431_v41 }
 0x876   : > { %v8601_v46 = vpop.eup %8600  ;;  %v12906_v8 = vadd.f32 1.0, %v8599_v63  ;;  %v6605_v61 = vpop.f32.mrf.mxu1 }
 0x877   : > { %v6656_v34 = vsel %vm6655_vm0, %v8597_v50, %v6652_v54  ;;  %v6664_v60 = vmul.f32 %v8601_v46, %v12897_v15  ;;  %8602 = vpow2.f32 %v6630_v25  ;;  %v6552_v38 = vadd.f32 %v6551_v48, %v6494_v24  ;;  %v6559_v18 = vpop.f32.mrf.mxu0 }
 0x878   : > { %v6661_v4 = vsel %vm6658_vm4, %v6660_v9, %v6656_v34  ;;  %8604 = vrcp.f32 %v12906_v8  ;;  %vm6669_vm6 = vweird.f32 %v8601_v46  ;;  %v6440_v36 = vpop.f32.mrf.mxu2  ;;  %v6333_v15 = vadd.f32 %v12866_v47, %v12857_v37 }
 0x879   : > { %v6768_v19 = vmul.f32 %v6661_v4, %v12879_v57  ;;  %v6665_v5 = vsub.f32 1.0, %v6664_v60  ;;  %v12915_v43 = vadd.f32 %v6601_v0, %v6552_v38  ;;  %vm6670_vm10 = vmor %vm6668_vm12, %vm6669_vm6  ;;  %v6687_v2 = vand.u32 2147483647, %v12906_v8 }
 0x87a   : > { %v6689_v30 = vand.u32 2147483648, %v12906_v8  ;;  %v6441_v47 = vadd.f32 %v6440_v36, %v6383_v1  ;;  %v6387_v24 = vadd.f32 %v12868_v27, %v6333_v15  ;;  %vm6683_vm8 = vweird.f32 %v12906_v8 }
 0x87b   : > { %v6786_v11 = vsel %vm4997_vm3, %v6768_v19, 0  ;;  %v6666_v35 = vmul.f32 %v8601_v46, %v6665_v5  ;;  %v6620_v55 = vsub.f32 0.0, %v12915_v43  ;;  %vm6688_vm15 = vcmp.eq.f32.partialorder %v6687_v2, 8.507059e+37 }
 0x87c   : > { %v12917_v53 = vand.u32 4294901760, %v6786_v11  ;;  %v6499_v3 = vpop.f32.mrf.mxu3  ;;  %v6690_v34 = vor.u32 1.1754944e-38, %v6689_v30 }
 0x87d   : > { %v8603_v57 = vpop.eup %8602  ;;  %v6667_v23 = vadd.f32 %v8601_v46, %v6666_v35  ;;  %v6500_v48 = vadd.f32 %v6499_v3, %v6436_v20  ;;  %v6632_v40 = vmul.f32 1.442695, %v6620_v55 }
 0x87e   : > { %v8605_v42 = vpop.eup %8604  ;;  %v6830_v17 = vsub.f32 %v6786_v11, %v12917_v53  ;;  %v12924_v50 = vadd.f32 1.0, %v8603_v57  ;;  %6931 = vmatmul.f32.vlgmr.msra.gmra.mxu3 %v12917_v53  ;;  %v6609_v25 = vpop.f32.mrf.mxu1 }
 0x87f   : > { %v6671_v62 = vsel %vm6670_vm10, %v8601_v46, %v6667_v23  ;;  %v6679_v6 = vmul.f32 %v8605_v42, %v12906_v8  ;;  %v6556_v41 = vadd.f32 %v6555_v56, %v6500_v48  ;;  %vm6684_vm1 = vweird.f32 %v8605_v42 }
 0x880   : > { %v6676_v0 = vsel %vm6673_vm13, %v6675_v29, %v6671_v62  ;;  %8606 = vrcp.f32 %v12924_v50  ;;  %6989 = vmatmul.f32.vlgmr.msra.gmra.mxu0 %v6830_v17  ;;  %v6831_v45 = vand.u32 4294901760, %v6830_v17  ;;  %vm6685_vm11 = vmor %vm6683_vm8, %vm6684_vm1  ;;  %v6445_v27 = vpop.f32.mrf.mxu2  ;;  %v6702_v20 = vand.u32 2147483647, %v12924_v50 }
 0x881   : > { %v6769_v31 = vmul.f32 %v6676_v0, %v12885_v52  ;;  %v6680_v51 = vsub.f32 1.0, %v6679_v6  ;;  %8608 = vpow2.f32 %v6632_v40  ;;  %v12938_v54 = vadd.f32 %v6605_v61, %v6556_v41 }
 0x882   : > { %7051 = vmatmul.f32.vlgmr.msra.gmra.mxu1 %v6831_v45  ;;  %v6832_v52 = vsub.f32 %v6830_v17, %v6831_v45  ;;  %v6704_v57 = vand.u32 2147483648, %v12924_v50  ;;  %v6446_v39 = vadd.f32 %v6445_v27, %v6387_v24  ;;  %v6563_v17 = vpop.f32.mrf.mxu0  ;;  %vm6698_vm7 = vweird.f32 %v12924_v50 }
 0x883   : > { %v6789_v32 = vsel %vm4997_vm3, %v6769_v31, 0  ;;  %v6681_v37 = vmul.f32 %v8605_v42, %v6680_v51  ;;  %v6621_v60 = vsub.f32 0.0, %v12938_v54  ;;  %vm6703_vm9 = vcmp.eq.f32.partialorder %v6702_v20, 8.507059e+37 }
 0x884   : > { %v12936_v63 = vand.u32 4294901760, %v6789_v32  ;;  %v6505_v12 = vpop.f32.mrf.mxu3  ;;  %v6833_v4 = vand.u32 4294901760, %v6832_v52  ;;  %v6705_v40 = vor.u32 1.1754944e-38, %v6704_v57 }
 0x885   : > { %v6682_v46 = vadd.f32 %v8605_v42, %v6681_v37  ;;  %v6506_v16 = vadd.f32 %v6505_v12, %v6441_v47  ;;  %v6634_v58 = vmul.f32 1.442695, %v6621_v60 }
 0x886   : > { %v8607_v9 = vpop.eup %8606  ;;  %6935 = vmatmul.f32.gmra.mxu3 %v12936_v63  ;;  %v6838_v56 = vsub.f32 %v6789_v32, %v12936_v63  ;;  %6834 = vmatmul.f32.vlgmr.msra.gmra.mxu2 %v6833_v4  ;;  %v6613_v0 = vpop.f32.mrf.mxu1 }
 0x887   : > { %v8609_v19 = vpop.eup %8608  ;;  %v6686_v5 = vsel %vm6685_vm11, %v8605_v42, %v6682_v46  ;;  %v6694_v38 = vmul.f32 %v8607_v9, %v12924_v50  ;;  %v6560_v14 = vadd.f32 %v6559_v18, %v6506_v16  ;;  %vm6699_vm5 = vweird.f32 %v8607_v9 }
 0x888   : > { %v6691_v22 = vsel %vm6688_vm15, %v6690_v34, %v6686_v5  ;;  %v12946_v8 = vadd.f32 1.0, %v8609_v19  ;;  %6994 = vmatmul.f32.gmra.mxu0 %v6838_v56  ;;  %v6839_v61 = vand.u32 4294901760, %v6838_v56  ;;  %vm6700_vm2 = vmor %vm6698_vm7, %vm6699_vm5 }
 0x889   : > { %v6770_v11 = vmul.f32 %v6691_v22, %v12892_v13  ;;  %v6695_v35 = vsub.f32 1.0, %v6694_v38  ;;  %v12950_v3 = vadd.f32 %v6609_v25, %v6560_v14 }
 0x88a   : > { %8610 = vrcp.f32 %v12946_v8  ;;  %7057 = vmatmul.f32.gmra.mxu1 %v6839_v61  ;;  %v6840_v29 = vsub.f32 %v6838_v56, %v6839_v61  ;;  %v6717_v46 = vand.u32 2147483647, %v12946_v8  ;;  %v6719_v16 = vand.u32 2147483648, %v12946_v8 }
 0x88b   : > { %v6792_v23 = vsel %vm4997_vm3, %v6770_v11, 0  ;;  %v6696_v55 = vmul.f32 %v8607_v9, %v6695_v35  ;;  %8612 = vpow2.f32 %v6634_v58  ;;  %v6622_v36 = vsub.f32 0.0, %v12950_v3 }
 0x88c   : > { %v12956_v42 = vand.u32 4294901760, %v6792_v23  ;;  %v6511_v13 = vpop.f32.mrf.mxu3  ;;  %v6841_v15 = vand.u32 4294901760, %v6840_v29  ;;  %vm6713_vm0 = vweird.f32 %v12946_v8  ;;  %v6720_v5 = vor.u32 1.1754944e-38, %v6719_v16 }
 0x88d   : > { %v6697_v48 = vadd.f32 %v8607_v9, %v6696_v55  ;;  %v6636_v62 = vmul.f32 1.442695, %v6622_v36  ;;  %v6512_v6 = vadd.f32 %v6511_v13, %v6446_v39  ;;  %vm6718_vm6 = vcmp.eq.f32.partialorder %v6717_v46, 8.507059e+37 }
 0x88e   : > { %6939 = vmatmul.f32.gmra.mxu3 %v12956_v42  ;;  %v6846_v1 = vsub.f32 %v6792_v23, %v12956_v42  ;;  %6842 = vmatmul.f32.gmra.mxu2 %v6841_v15 }
 0x88f   : > { %v6701_v31 = vsel %vm6700_vm2, %v8607_v9, %v6697_v48  ;;  %8614 = vpow2.f32 %v6636_v62  ;;  %v6564_v51 = vadd.f32 %v6563_v17, %v6512_v6 }
 0x890   : > { %v8611_v2 = vpop.eup %8610  ;;  %v6706_v30 = vsel %vm6703_vm9, %v6705_v40, %v6701_v31  ;;  %6999 = vmatmul.f32.gmra.mxu0 %v6846_v1  ;;  %v6847_v50 = vand.u32 4294901760, %v6846_v1 }
 0x891   : > { %v8613_v41 = vpop.eup %8612  ;;  %v6771_v45 = vmul.f32 %v6706_v30, %v12901_v10  ;;  %v6709_v18 = vmul.f32 %v8611_v2, %v12946_v8  ;;  %v12964_v32 = vadd.f32 %v6613_v0, %v6564_v51  ;;  %vm6714_vm14 = vweird.f32 %v8611_v2 }
 0x892   : > { %v6645_v37 = vadd.f32 1.0, %v8613_v41  ;;  %v6848_v47 = vsub.f32 %v6846_v1, %v6847_v50  ;;  %7063 = vmatmul.f32.gmra.mxu1 %v6847_v50  ;;  %vm6715_vm4 = vmor %vm6713_vm0, %vm6714_vm14 }
 0x893   : > { %v6795_v12 = vsel %vm4997_vm3, %v6771_v45, 0  ;;  %v6710_v52 = vsub.f32 1.0, %v6709_v18  ;;  %v6623_v25 = vsub.f32 0.0, %v12964_v32 }
 0x894   : > { %v12968_v24 = vand.u32 4294901760, %v6795_v12  ;;  %8616 = vrcp.f32 %v6645_v37  ;;  %v6849_v60 = vand.u32 4294901760, %v6848_v47  ;;  %v6732_v55 = vand.u32 2147483647, %v6645_v37 }
 0x895   : > { %v8615_v10 = vpop.eup %8614  ;;  %v6711_v9 = vmul.f32 %v8611_v2, %v6710_v52  ;;  %v6638_v34 = vmul.f32 1.442695, %v6623_v25  ;;  %v6734_v36 = vand.u32 2147483648, %v6645_v37  ;;  %vm6728_vm10 = vweird.f32 %v6645_v37 }
 0x896   : > { %v6646_v4 = vadd.f32 1.0, %v8615_v10  ;;  %6943 = vmatmul.f32.gmra.mxu3 %v12968_v24  ;;  %v6854_v56 = vsub.f32 %v6795_v12, %v12968_v24  ;;  %6850 = vmatmul.f32.gmra.mxu2 %v6849_v60  ;;  %vm6733_vm1 = vcmp.eq.f32.partialorder %v6732_v55, 8.507059e+37 }
 0x897   : > { %v6712_v19 = vadd.f32 %v8611_v2, %v6711_v9  ;;  %8618 = vpow2.f32 %v6638_v34  ;;  %v6735_v6 = vor.u32 1.1754944e-38, %v6734_v36 }
 0x898   : > { %8620 = vrcp.f32 %v6646_v4  ;;  %7004 = vmatmul.f32.gmra.mxu0 %v6854_v56  ;;  %v6855_v27 = vand.u32 4294901760, %v6854_v56  ;;  %v6747_v40 = vand.u32 2147483647, %v6646_v4  ;;  %v6749_v15 = vand.u32 2147483648, %v6646_v4 }
 0x899   : > { %v6716_v38 = vsel %vm6715_vm4, %v8611_v2, %v6712_v19  ;;  %vm6743_vm11 = vweird.f32 %v6646_v4 }
 0x89a   : > { %v8617_v14 = vpop.eup %8616  ;;  %v6721_v22 = vsel %vm6718_vm6, %v6720_v5, %v6716_v38  ;;  %v6856_v11 = vsub.f32 %v6854_v56, %v6855_v27  ;;  %7069 = vmatmul.f32.gmra.mxu1 %v6855_v27  ;;  %v6750_v45 = vor.u32 1.1754944e-38, %v6749_v15  ;;  %vm6748_vm5 = vcmp.eq.f32.partialorder %v6747_v40, 8.507059e+37 }
 0x89b   : > { %v6772_v58 = vmul.f32 %v6721_v22, %v12915_v43  ;;  %v6724_v61 = vmul.f32 %v8617_v14, %v6645_v37  ;;  %vm6729_vm12 = vweird.f32 %v8617_v14 }
 0x89c   : > { %v6857_v57 = vand.u32 4294901760, %v6856_v11  ;;  %vm6730_vm13 = vmor %vm6728_vm10, %vm6729_vm12 }
 0x89d   : > { %v8619_v35 = vpop.eup %8618  ;;  %v6798_v20 = vsel %vm4997_vm3, %v6772_v58, 0  ;;  %v6725_v8 = vsub.f32 1.0, %v6724_v61 }
 0x89e   : > { %v8621_v39 = vpop.eup %8620  ;;  %v12977_v23 = vand.u32 4294901760, %v6798_v20  ;;  %v6647_v13 = vadd.f32 1.0, %v8619_v35  ;;  %6858 = vmatmul.f32.gmra.mxu2 %v6857_v57 }
 0x89f   : > { %v6726_v17 = vmul.f32 %v8617_v14, %v6725_v8  ;;  %v6739_v29 = vmul.f32 %v8621_v39, %v6646_v4  ;;  %vm6744_vm8 = vweird.f32 %v8621_v39 }
 0x8a0   : > { %8622 = vrcp.f32 %v6647_v13  ;;  %6947 = vmatmul.f32.gmra.mxu3 %v12977_v23  ;;  %v6862_v62 = vsub.f32 %v6798_v20, %v12977_v23  ;;  %vm6745_vm15 = vmor %vm6743_vm11, %vm6744_vm8  ;;  %v6764_v10 = vand.u32 2147483648, %v6647_v13  ;;  %v6762_v60 = vand.u32 2147483647, %v6647_v13 }
 0x8a1   : > { %v6727_v43 = vadd.f32 %v8617_v14, %v6726_v17  ;;  %v6740_v48 = vsub.f32 1.0, %v6739_v29  ;;  %vm6758_vm2 = vweird.f32 %v6647_v13 }
 0x8a2   : > { %7009 = vmatmul.f32.gmra.mxu0 %v6862_v62  ;;  %v6863_v31 = vand.u32 4294901760, %v6862_v62  ;;  %v6765_v5 = vor.u32 1.1754944e-38, %v6764_v10  ;;  %vm6763_vm14 = vcmp.eq.f32.partialorder %v6762_v60, 8.507059e+37 }
 0x8a3   : > { %v6731_v0 = vsel %vm6730_vm13, %v8617_v14, %v6727_v43  ;;  %v6741_v1 = vmul.f32 %v8621_v39, %v6740_v48 }
 0x8a4   : > { %v6736_v51 = vsel %vm6733_vm1, %v6735_v6, %v6731_v0  ;;  %7075 = vmatmul.f32.gmra.mxu1 %v6863_v31  ;;  %v6864_v50 = vsub.f32 %v6862_v62, %v6863_v31 }
 0x8a5   : > { %v6773_v2 = vmul.f32 %v6736_v51, %v12938_v54  ;;  %v6742_v30 = vadd.f32 %v8621_v39, %v6741_v1 }
 0x8a6   : > { %v8623_v41 = vpop.eup %8622  ;;  %v6865_v25 = vand.u32 4294901760, %v6864_v50  ;;  %v13024_v50 = vld [vmem:[%s13322_s16] ss:$0 sm:$0xff] }
 0x8a7   : > { %v6801_v18 = vsel %vm4997_vm3, %v6773_v2, 0  ;;  %v6746_v37 = vsel %vm6745_vm15, %v8621_v39, %v6742_v30  ;;  %v6754_v47 = vmul.f32 %v8623_v41, %v6647_v13  ;;  %vm6759_vm7 = vweird.f32 %v8623_v41 }
 0x8a8   : > { %v6869_v12 = vand.u32 4294901760, %v6801_v18  ;;  %v6751_v52 = vsel %vm6748_vm5, %v6750_v45, %v6746_v37  ;;  %6866 = vmatmul.f32.gmra.mxu2 %v6865_v25  ;;  %vm6760_vm9 = vmor %vm6758_vm2, %vm6759_vm7  ;;  %v7373_v25 = vld [vmem:[%s13323_s17 + $0x10] sm:$0xff] }
 0x8a9   : > { %v6774_v46 = vmul.f32 %v6751_v52, %v12950_v3  ;;  %v6755_v16 = vsub.f32 1.0, %v6754_v47  ;;  %v7417_v10 = vand.u32 4294901760, %v7373_v25 }
 0x8aa   : > { %6951 = vmatmul.f32.gmra.mxu3 %v6869_v12  ;;  %v6870_v54 = vsub.f32 %v6801_v18, %v6869_v12 }
 0x8ab   : > { %v6804_v9 = vsel %vm4997_vm3, %v6774_v46, 0  ;;  %v6756_v34 = vmul.f32 %v8623_v41, %v6755_v16 }
 0x8ac   : > { %v6877_v4 = vand.u32 4294901760, %v6804_v9  ;;  %7014 = vmatmul.f32.gmra.mxu0 %v6870_v54  ;;  %v6871_v56 = vand.u32 4294901760, %v6870_v54 }
 0x8ad   : > { %v6757_v19 = vadd.f32 %v8623_v41, %v6756_v34  ;;  %v7507_v34 = vsub.f32 %v7373_v25, %v7417_v10 }
 0x8ae   : > { %7081 = vmatmul.f32.gmra.mxu1 %v6871_v56  ;;  %v6872_v38 = vsub.f32 %v6870_v54, %v6871_v56  ;;  %v6878_v3 = vsub.f32 %v6804_v9, %v6877_v4  ;;  %v7372_v9 = vld [vmem:[%s13323_s17 + $0x8] sm:$0xff] }
 0x8af   : > { %v6761_v27 = vsel %vm6760_vm9, %v8623_v41, %v6757_v19  ;;  %v7419_v60 = vand.u32 4294901760, %v7372_v9  ;;  %v7508_v56 = vand.u32 4294901760, %v7507_v34 }
 0x8b0   : > { %v6766_v14 = vsel %vm6763_vm14, %v6765_v5, %v6761_v27  ;;  %v6873_v22 = vand.u32 4294901760, %v6872_v38  ;;  %v6879_v58 = vand.u32 4294901760, %v6878_v3 }
 0x8b1   : > { %v6775_v61 = vmul.f32 %v6766_v14, %v12964_v32  ;;  %v7513_v19 = vsub.f32 %v7372_v9, %v7419_v60  ;;  %v7509_v14 = vsub.f32 %v7507_v34, %v7508_v56 }
 0x8b2   : > { %6874 = vmatmul.f32.gmra.mxu2 %v6873_v22  ;;  %6955 = vmatmul.f32.gmra.mxu3 %v6877_v4  ;;  %v6880_v11 = vsub.f32 %v6878_v3, %v6879_v58 }
 0x8b3   : > { %v6807_v35 = vsel %vm4997_vm3, %v6775_v61, 0  ;;  %v7514_v22 = vand.u32 4294901760, %v7513_v19 }
 0x8b4   : > { %v6885_v20 = vand.u32 4294901760, %v6807_v35  ;;  %7019 = vmatmul.f32.gmra.mxu0 %v6878_v3  ;;  %v6881_v8 = vand.u32 4294901760, %v6880_v11 }
 0x8b6   : > { %7087 = vmatmul.f32.gmra.mxu1 %v6879_v58  ;;  %v6886_v57 = vsub.f32 %v6807_v35, %v6885_v20  ;;  %v7371_v58 = vld [vmem:[%s13323_s17] sm:$0xff]  ;;  %v7510_v35 = vand.u32 4294901760, %v7509_v14 }
 0x8b7   : > { %v7421_v11 = vand.u32 4294901760, %v7371_v58 }
 0x8b8   : > { %v6887_v39 = vand.u32 4294901760, %v6886_v57 }
 0x8ba   : > { %6882 = vmatmul.f32.gmra.mxu2 %v6881_v8  ;;  %6959 = vmatmul.f32.gmra.mxu3 %v6885_v20  ;;  %v6888_v55 = vsub.f32 %v6886_v57, %v6887_v39  ;;  %v7515_v8 = vsub.f32 %v7513_v19, %v7514_v22 }
 0x8bc   : > { %7024 = vmatmul.f32.gmra.mxu0 %v6886_v57  ;;  %v6889_v36 = vand.u32 4294901760, %v6888_v55  ;;  %v7519_v55 = vsub.f32 %v7371_v58, %v7421_v11 }
 0x8be   : > { %7093 = vmatmul.f32.gmra.mxu1 %v6887_v39 }
 0x8c2   : > { %6890 = vmatmul.f32.gmra.mxu2 %v6889_v36  ;;  %7179 = vmatmul.f32.vlgmr.msrb.gmra.mxu3 %v12917_v53 }
 0x8ca   : > { %7126 = vmatmul.f32.vlgmr.msrb.gmra.mxu2 %v12917_v53  ;;  %7183 = vmatmul.f32.gmra.mxu3 %v12936_v63 }
 0x8d2   : > { %7130 = vmatmul.f32.gmra.mxu2 %v12936_v63  ;;  %7187 = vmatmul.f32.gmra.mxu3 %v12956_v42 }
 0x8da   : > { %7134 = vmatmul.f32.gmra.mxu2 %v12956_v42  ;;  %7191 = vmatmul.f32.gmra.mxu3 %v12968_v24 }
 0x8e2   : > { %7138 = vmatmul.f32.gmra.mxu2 %v12968_v24  ;;  %7195 = vmatmul.f32.gmra.mxu3 %v12977_v23  ;;  %v7374_v24 = vld [vmem:[%s13323_s17 + $0x18] sm:$0xff] }
 0x8ea   : > { %7142 = vmatmul.f32.gmra.mxu2 %v12977_v23  ;;  %7199 = vmatmul.f32.gmra.mxu3 %v6869_v12  ;;  %v13004_v23 = vand.u32 4294901760, %v7374_v24 }
 0x8ec   : > { %7416 = vmatpush.msrb.mxu0 %v13004_v23  ;;  %v7501_v62 = vsub.f32 %v7374_v24, %v13004_v23  ;;  %7635 = vmatpush.msra.mxu3 %v13004_v23 }
 0x8ee   : > { %v7502_v6 = vand.u32 4294901760, %v7501_v62  ;;  %7571 = vmatpush.msra.mxu2 %v7501_v62  ;;  %7418 = vmatpush.msrb.mxu0 %v7417_v10 }
 0x8ef   : > { %7637 = vmatpush.msra.mxu3 %v7417_v10 }
 0x8f0   : > { %v7503_v40 = vsub.f32 %v7501_v62, %v7502_v6  ;;  %7420 = vmatpush.msrb.mxu0 %v7419_v60  ;;  %7574 = vmatpush.msra.mxu2 %v7507_v34 }
 0x8f1   : > { %7639 = vmatpush.msra.mxu3 %v7419_v60 }
 0x8f2   : > { %7146 = vmatmul.f32.gmra.mxu2 %v6869_v12  ;;  %7203 = vmatmul.f32.gmra.mxu3 %v6877_v4  ;;  %v7504_v15 = vand.u32 4294901760, %v7503_v40 }
 0x8f3   : > { %7577 = vmatpush.msra.mxu2 %v7513_v19  ;;  %7422 = vmatpush.msrb.mxu0 %v7421_v11 }
 0x8f4   : > { %7505 = vmatpush.msrb.mxu1 %v7504_v15  ;;  %7641 = vmatpush.msra.mxu3 %v7421_v11 }
 0x8f5   : > { %7706 = vmatpush.msra.mxu0 %v7502_v6  ;;  %7580 = vmatpush.msra.mxu2 %v7519_v55 }
 0x8f6   : > { %7511 = vmatpush.msrb.mxu1 %v7510_v35 }
 0x8f7   : > { %7710 = vmatpush.msra.mxu0 %v7508_v56 }
 0x8f9   : > { %7714 = vmatpush.msra.mxu0 %v7514_v22 }
 0x8fa   : > { %7150 = vmatmul.f32.gmra.mxu2 %v6877_v4  ;;  %7207 = vmatmul.f32.gmra.mxu3 %v6885_v20 }
 0x8fd   : > { %v6990_v2 = vpop.f32.mrf.mxu0 }
 0x8ff   : > { %v7052_v30 = vpop.f32.mrf.mxu1 }
 0x901   : > { %v6932_v53 = vpop.f32.mrf.mxu3 }
 0x902   : > { %7154 = vmatmul.f32.gmra.mxu2 %v6885_v20 }
 0x905   : > { %v6995_v37 = vpop.f32.mrf.mxu0 }
 0x907   : > { %v7058_v46 = vpop.f32.mrf.mxu1 }
 0x909   : > { %v6936_v63 = vpop.f32.mrf.mxu3  ;;  %v6835_v32 = vpop.f32.mrf.mxu2 }
 0x90a   : > { %v6836_v18 = vadd.f32 %v13024_v50, %v6835_v32  ;;  %v7520_v32 = vand.u32 4294901760, %v7519_v55 }
 0x90c   : > { %v6933_v47 = vadd.f32 %v6932_v53, %v6836_v18  ;;  %v7516_v53 = vand.u32 4294901760, %v7515_v8  ;;  %7718 = vmatpush.msra.mxu0 %v7520_v32 }
 0x90d   : > { %v7000_v5 = vpop.f32.mrf.mxu0 }
 0x90e   : > { %v6991_v54 = vadd.f32 %v6990_v2, %v6933_v47  ;;  %7517 = vmatpush.msrb.mxu1 %v7516_v53 }
 0x90f   : > { %v7064_v36 = vpop.f32.mrf.mxu1 }
 0x910   : > { %v7053_v38 = vadd.f32 %v7052_v30, %v6991_v54 }
 0x911   : > { %v12997_v13 = vpop.f32.mrf.mxu3  ;;  %v6843_v42 = vpop.f32.mrf.mxu2 }
 0x912   : > { %v6844_v16 = vadd.f32 %v13024_v50, %v6843_v42 }
 0x914   : > { %v6937_v4 = vadd.f32 %v6936_v63, %v6844_v16 }
 0x915   : > { %v7005_v2 = vpop.f32.mrf.mxu0 }
 0x916   : > { %v6996_v20 = vadd.f32 %v6995_v37, %v6937_v4 }
 0x918   : > { %v7059_v62 = vadd.f32 %v7058_v46, %v6996_v20 }
 0x919   : > { %v12999_v17 = vpop.f32.mrf.mxu3  ;;  %v6851_v29 = vpop.f32.mrf.mxu2 }
 0x91a   : > { %v6852_v57 = vadd.f32 %v13024_v50, %v6851_v29  ;;  %v7521_v29 = vsub.f32 %v7519_v55, %v7520_v32 }
 0x91c   : > { %v6941_v42 = vadd.f32 %v12997_v13, %v6852_v57  ;;  %v7522_v18 = vand.u32 4294901760, %v7521_v29 }
 0x91e   : > { %v7001_v47 = vadd.f32 %v7000_v5, %v6941_v42  ;;  %7523 = vmatpush.msrb.mxu1 %v7522_v18 }
 0x91f   : > { %v7010_v56 = vpop.f32.mrf.mxu0 }
 0x920   : > { %7765 = vmatpush.msra.mxu1 %v13004_v23  ;;  %v7065_v54 = vadd.f32 %v7064_v36, %v7001_v47 }
 0x921   : > { %v13006_v43 = vpop.f32.mrf.mxu2 }
 0x922   : > { %v6860_v6 = vadd.f32 %v13024_v50, %v13006_v43  ;;  %7767 = vmatpush.msra.mxu1 %v7417_v10 }
 0x923   : > { %v13008_v48 = vpop.f32.mrf.mxu3 }
 0x924   : > { %v6945_v46 = vadd.f32 %v12999_v17, %v6860_v6  ;;  %7769 = vmatpush.msra.mxu1 %v7419_v60 }
 0x926   : > { %7771 = vmatpush.msra.mxu1 %v7421_v11  ;;  %v7006_v23 = vadd.f32 %v7005_v2, %v6945_v46 }
 0x929   : > { %v7015_v36 = vpop.f32.mrf.mxu0 }
 0x92b   : > { %v13013_v0 = vpop.f32.mrf.mxu2 }
 0x92c   : > { %v6868_v10 = vadd.f32 %v13024_v50, %v13013_v0 }
 0x92d   : > { %v13015_v1 = vpop.f32.mrf.mxu3 }
 0x92e   : > { %v6949_v60 = vadd.f32 %v13008_v48, %v6868_v10 }
 0x930   : > { %v7011_v55 = vadd.f32 %v7010_v56, %v6949_v60 }
 0x935   : > { %v13017_v31 = vpop.f32.mrf.mxu2  ;;  %v13019_v51 = vpop.f32.mrf.mxu3 }
 0x936   : > { %v6876_v0 = vadd.f32 %v13024_v50, %v13017_v31 }
 0x938   : > { %v6953_v29 = vadd.f32 %v13015_v1, %v6876_v0 }
 0x93d   : > { %v13026_v41 = vpop.f32.mrf.mxu2  ;;  %v13028_v45 = vpop.f32.mrf.mxu3 }
 0x945   : > { %v13031_v12 = vpop.f32.mrf.mxu2  ;;  %v7180_v52 = vpop.f32.mrf.mxu3 }
 0x94d   : > { %v7127_v3 = vpop.f32.mrf.mxu2  ;;  %v7184_v27 = vpop.f32.mrf.mxu3 }
 0x94e   : > { %v7128_v61 = vadd.f32 %v7127_v3, %v7053_v38 }
 0x950   : > { %v13044_v39 = vadd.f32 %v7180_v52, %v7128_v61  ;;  %v7070_v52 = vpop.f32.mrf.mxu1 }
 0x951   : > { %v7071_v3 = vadd.f32 %v7070_v52, %v7006_v23 }
 0x952   : > { %v7211_v63 = vsub.f32 0.0, %v13044_v39 }
 0x954   : > { %v7219_v24 = vmul.f32 1.442695, %v7211_v63 }
 0x955   : > { %v7131_v40 = vpop.f32.mrf.mxu2  ;;  %v7188_v15 = vpop.f32.mrf.mxu3 }
 0x956   : > { %8624 = vpow2.f32 %v7219_v24  ;;  %v7132_v30 = vadd.f32 %v7131_v40, %v7059_v62 }
 0x958   : > { %v13050_v37 = vadd.f32 %v7184_v27, %v7132_v30  ;;  %v7076_v14 = vpop.f32.mrf.mxu1 }
 0x959   : > { %v7077_v31 = vadd.f32 %v7076_v14, %v7011_v55 }
 0x95a   : > { %v7212_v13 = vsub.f32 0.0, %v13050_v37 }
 0x95c   : > { %v8625_v25 = vpop.eup %8624  ;;  %v7221_v16 = vmul.f32 1.442695, %v7212_v13  ;;  %v6884_v13 = vadd.f32 %v13024_v50, %v13026_v41  ;;  %v7020_v41 = vpop.f32.mrf.mxu0 }
 0x95d   : > { %v7235_v9 = vadd.f32 1.0, %v8625_v25  ;;  %v7135_v34 = vpop.f32.mrf.mxu2  ;;  %v7192_v4 = vpop.f32.mrf.mxu3 }
 0x95e   : > { %8626 = vpow2.f32 %v7221_v16  ;;  %v7136_v43 = vadd.f32 %v7135_v34, %v7065_v54  ;;  %v7016_v54 = vadd.f32 %v7015_v36, %v6953_v29 }
 0x95f   : > { %8628 = vrcp.f32 %v7235_v9  ;;  %v7254_v8 = vand.u32 2147483648, %v7235_v9  ;;  %v7252_v48 = vand.u32 2147483647, %v7235_v9  ;;  %vm7248_vm4 = vweird.f32 %v7235_v9 }
 0x960   : > { %v13055_v19 = vadd.f32 %v7188_v15, %v7136_v43  ;;  %v7082_v6 = vpop.f32.mrf.mxu1 }
 0x961   : > { %v7255_v40 = vor.u32 1.1754944e-38, %v7254_v8  ;;  %vm7253_vm12 = vcmp.eq.f32.partialorder %v7252_v48, 8.507059e+37  ;;  %v7083_v14 = vadd.f32 %v7082_v6, %v7016_v54 }
 0x962   : > { %v7213_v5 = vsub.f32 0.0, %v13055_v19 }
 0x964   : > { %v8627_v17 = vpop.eup %8626  ;;  %v7223_v38 = vmul.f32 1.442695, %v7213_v5  ;;  %v7025_v6 = vpop.f32.mrf.mxu0 }
 0x965   : > { %v8629_v27 = vpop.eup %8628  ;;  %v13061_v22 = vadd.f32 1.0, %v8627_v17  ;;  %v7139_v58 = vpop.f32.mrf.mxu2 }
 0x966   : > { %v7244_v61 = vmul.f32 %v8629_v27, %v7235_v9  ;;  %8630 = vpow2.f32 %v7223_v38  ;;  %v7140_v11 = vadd.f32 %v7139_v58, %v7071_v3  ;;  %v7196_v57 = vpop.f32.mrf.mxu3  ;;  %vm7249_vm0 = vweird.f32 %v8629_v27 }
 0x967   : > { %8632 = vrcp.f32 %v13061_v22  ;;  %vm7250_vm6 = vmor %vm7248_vm4, %vm7249_vm0  ;;  %v7267_v46 = vand.u32 2147483647, %v13061_v22  ;;  %v7269_v16 = vand.u32 2147483648, %v13061_v22  ;;  %vm7263_vm13 = vweird.f32 %v13061_v22 }
 0x968   : > { %v7245_v35 = vsub.f32 1.0, %v7244_v61  ;;  %v13064_v20 = vadd.f32 %v7192_v4, %v7140_v11  ;;  %v7088_v55 = vpop.f32.mrf.mxu1 }
 0x969   : > { %v7270_v3 = vor.u32 1.1754944e-38, %v7269_v16  ;;  %vm7268_vm8 = vcmp.eq.f32.partialorder %v7267_v46, 8.507059e+37 }
 0x96a   : > { %v7246_v53 = vmul.f32 %v8629_v27, %v7245_v35  ;;  %v7214_v63 = vsub.f32 0.0, %v13064_v20 }
 0x96c   : > { %v8631_v32 = vpop.eup %8630  ;;  %v7247_v42 = vadd.f32 %v8629_v27, %v7246_v53  ;;  %v7225_v24 = vmul.f32 1.442695, %v7214_v63 }
 0x96d   : > { %v8633_v62 = vpop.eup %8632  ;;  %v13070_v15 = vadd.f32 1.0, %v8631_v32  ;;  %v7143_v2 = vpop.f32.mrf.mxu2 }
 0x96e   : > { %v7251_v30 = vsel %vm7250_vm6, %v8629_v27, %v7247_v42  ;;  %v7259_v18 = vmul.f32 %v8633_v62, %v13061_v22  ;;  %8634 = vpow2.f32 %v7225_v24  ;;  %v7144_v25 = vadd.f32 %v7143_v2, %v7077_v31  ;;  %v7200_v56 = vpop.f32.mrf.mxu3 }
 0x96f   : > { %v7256_v47 = vsel %vm7253_vm12, %v7255_v40, %v7251_v30  ;;  %8636 = vrcp.f32 %v13070_v15  ;;  %vm7264_vm10 = vweird.f32 %v8633_v62  ;;  %v6892_v22 = vadd.f32 %v13024_v50, %v13031_v12 }
 0x970   : > { %v7363_v1 = vmul.f32 %v7256_v47, %v13044_v39  ;;  %v7260_v52 = vsub.f32 1.0, %v7259_v18  ;;  %v13080_v43 = vadd.f32 %v7196_v57, %v7144_v25  ;;  %v6957_v39 = vadd.f32 %v13019_v51, %v6884_v13  ;;  %vm7265_vm1 = vmor %vm7263_vm13, %vm7264_vm10 }
 0x971   : > { %v7284_v36 = vand.u32 2147483648, %v13070_v15  ;;  %v7282_v50 = vand.u32 2147483647, %v13070_v15  ;;  %v6961_v12 = vadd.f32 %v13028_v45, %v6892_v22  ;;  %vm7278_vm15 = vweird.f32 %v13070_v15 }
 0x972   : > { %v7380_v9 = vsel %vm4997_vm3, %v7363_v1, 0  ;;  %v7261_v34 = vmul.f32 %v8633_v62, %v7260_v52  ;;  %v7215_v5 = vsub.f32 0.0, %v13080_v43  ;;  %v7021_v57 = vadd.f32 %v7020_v41, %v6957_v39 }
 0x973   : > { %v13082_v4 = vand.u32 4294901760, %v7380_v9  ;;  %v7285_v31 = vor.u32 1.1754944e-38, %v7284_v36  ;;  %vm7283_vm7 = vcmp.eq.f32.partialorder %v7282_v50, 8.507059e+37  ;;  %v7026_v16 = vadd.f32 %v7025_v6, %v6961_v12 }
 0x974   : > { %v8635_v23 = vpop.eup %8634  ;;  %v7262_v10 = vadd.f32 %v8633_v62, %v7261_v34  ;;  %v7227_v61 = vmul.f32 1.442695, %v7215_v5  ;;  %v7089_v29 = vadd.f32 %v7088_v55, %v7021_v57 }
 0x975   : > { %v8637_v17 = vpop.eup %8636  ;;  %v7424_v38 = vsub.f32 %v7380_v9, %v13082_v4  ;;  %v13088_v27 = vadd.f32 1.0, %v8635_v23  ;;  %v7147_v60 = vpop.f32.mrf.mxu2  ;;  %7525 = vmatmul.f32.vlgmr.msrb.gmra.mxu1 %v13082_v4 }
 0x976   : > { %v7266_v58 = vsel %vm7265_vm1, %v8633_v62, %v7262_v10  ;;  %v7274_v51 = vmul.f32 %v8637_v17, %v13070_v15  ;;  %v7148_v53 = vadd.f32 %v7147_v60, %v7083_v14  ;;  %vm7279_vm11 = vweird.f32 %v8637_v17  ;;  %v7204_v30 = vpop.f32.mrf.mxu3 }
 0x977   : > { %v7425_v11 = vand.u32 4294901760, %v7424_v38  ;;  %v7271_v35 = vsel %vm7268_vm8, %v7270_v3, %v7266_v58  ;;  %8638 = vrcp.f32 %v13088_v27  ;;  %7583 = vmatmul.f32.vlgmr.msra.gmra.mxu2 %v7424_v38  ;;  %vm7280_vm5 = vmor %vm7278_vm15, %vm7279_vm11  ;;  %v7297_v23 = vand.u32 2147483647, %v13088_v27 }
 0x978   : > { %v7364_v0 = vmul.f32 %v7271_v35, %v13050_v37  ;;  %v7275_v8 = vsub.f32 1.0, %v7274_v51  ;;  %8640 = vpow2.f32 %v7227_v61  ;;  %v13102_v37 = vadd.f32 %v7200_v56, %v7148_v53 }
 0x979   : > { %7645 = vmatmul.f32.vlgmr.msra.gmra.mxu3 %v7425_v11  ;;  %v7426_v48 = vsub.f32 %v7424_v38, %v7425_v11  ;;  %v7299_v41 = vand.u32 2147483648, %v13088_v27  ;;  %vm7293_vm9 = vweird.f32 %v13088_v27  ;;  %vm7298_vm0 = vcmp.eq.f32.partialorder %v7297_v23, 8.507059e+37 }
 0x97a   : > { %v7383_v63 = vsel %vm4997_vm3, %v7364_v0, 0  ;;  %v7276_v32 = vmul.f32 %v8637_v17, %v7275_v8  ;;  %v7216_v2 = vsub.f32 0.0, %v13102_v37 }
 0x97b   : > { %v13100_v42 = vand.u32 4294901760, %v7383_v63  ;;  %v7427_v24 = vand.u32 4294901760, %v7426_v48  ;;  %v7300_v58 = vor.u32 1.1754944e-38, %v7299_v41 }
 0x97c   : > { %v7277_v62 = vadd.f32 %v8637_v17, %v7276_v32  ;;  %v7229_v25 = vmul.f32 1.442695, %v7216_v2 }
 0x97d   : > { %v8639_v40 = vpop.eup %8638  ;;  %v7151_v18 = vpop.f32.mrf.mxu2  ;;  %7428 = vmatmul.f32.vlgmr.msrb.gmra.mxu0 %v7427_v24  ;;  %7529 = vmatmul.f32.gmra.mxu1 %v13100_v42  ;;  %v7432_v45 = vsub.f32 %v7383_v63, %v13100_v42 }
 0x97e   : > { %v7281_v47 = vsel %vm7280_vm5, %v8637_v17, %v7277_v62  ;;  %v7289_v13 = vmul.f32 %v8639_v40, %v13088_v27  ;;  %v7152_v1 = vadd.f32 %v7151_v18, %v7089_v29  ;;  %v8641_v15 = vpop.eup %8640  ;;  %8642 = vpow2.f32 %v7229_v25  ;;  %v7094_v17 = vpop.f32.mrf.mxu1 }
 0x97f   : > { %v7286_v52 = vsel %vm7283_vm7, %v7285_v31, %v7281_v47  ;;  %7588 = vmatmul.f32.gmra.mxu2 %v7432_v45  ;;  %v7433_v46 = vand.u32 4294901760, %v7432_v45  ;;  %v13110_v34 = vadd.f32 1.0, %v8641_v15  ;;  %vm7294_vm2 = vweird.f32 %v8639_v40  ;;  %v7208_v57 = vpop.f32.mrf.mxu3 }
 0x980   : > { %v7365_v54 = vmul.f32 %v7286_v52, %v13055_v19  ;;  %v7290_v9 = vsub.f32 1.0, %v7289_v13  ;;  %v13112_v56 = vadd.f32 %v7204_v30, %v7152_v1  ;;  %v7095_v14 = vadd.f32 %v7094_v17, %v7026_v16  ;;  %vm7295_vm14 = vmor %vm7293_vm9, %vm7294_vm2 }
 0x981   : > { %7651 = vmatmul.f32.gmra.mxu3 %v7433_v46  ;;  %v7434_v39 = vsub.f32 %v7432_v45, %v7433_v46  ;;  %8644 = vrcp.f32 %v13110_v34  ;;  %v7312_v29 = vand.u32 2147483647, %v13110_v34  ;;  %vm7308_vm6 = vweird.f32 %v13110_v34 }
 0x982   : > { %v7386_v10 = vsel %vm4997_vm3, %v7365_v54, 0  ;;  %v7291_v5 = vmul.f32 %v8639_v40, %v7290_v9  ;;  %v7217_v38 = vsub.f32 0.0, %v13112_v56 }
 0x983   : > { %v13118_v19 = vand.u32 4294901760, %v7386_v10  ;;  %v7435_v60 = vand.u32 4294901760, %v7434_v39  ;;  %vm7313_vm10 = vcmp.eq.f32.partialorder %v7312_v29, 8.507059e+37 }
 0x984   : > { %v7292_v3 = vadd.f32 %v8639_v40, %v7291_v5  ;;  %v7231_v51 = vmul.f32 1.442695, %v7217_v38  ;;  %v8643_v0 = vpop.eup %8642 }
 0x985   : > { %v7155_v61 = vpop.f32.mrf.mxu2  ;;  %7533 = vmatmul.f32.gmra.mxu1 %v13118_v19  ;;  %v7440_v22 = vsub.f32 %v7386_v10, %v13118_v19  ;;  %7436 = vmatmul.f32.gmra.mxu0 %v7435_v60  ;;  %v7240_v53 = vadd.f32 1.0, %v8643_v0 }
 0x986   : > { %v7296_v11 = vsel %vm7295_vm14, %v8639_v40, %v7292_v3  ;;  %v7156_v35 = vadd.f32 %v7155_v61, %v7095_v14  ;;  %8646 = vpow2.f32 %v7231_v51  ;;  %v7314_v40 = vand.u32 2147483648, %v13110_v34 }
 0x987   : > { %v7301_v8 = vsel %vm7298_vm0, %v7300_v58, %v7296_v11  ;;  %7593 = vmatmul.f32.gmra.mxu2 %v7440_v22  ;;  %v7441_v27 = vand.u32 4294901760, %v7440_v22  ;;  %v8645_v55 = vpop.eup %8644  ;;  %8648 = vrcp.f32 %v7240_v53  ;;  %v7329_v23 = vand.u32 2147483648, %v7240_v53 }
 0x988   : > { %v7366_v36 = vmul.f32 %v7301_v8, %v13064_v20  ;;  %v13125_v48 = vadd.f32 %v7208_v57, %v7156_v35  ;;  %v7304_v63 = vmul.f32 %v8645_v55, %v13110_v34  ;;  %vm7309_vm4 = vweird.f32 %v8645_v55 }
 0x989   : > { %7657 = vmatmul.f32.gmra.mxu3 %v7441_v27  ;;  %v7442_v32 = vsub.f32 %v7440_v22, %v7441_v27  ;;  %vm7310_vm12 = vmor %vm7308_vm6, %vm7309_vm4  ;;  %v7315_v1 = vor.u32 1.1754944e-38, %v7314_v40  ;;  %v7327_v10 = vand.u32 2147483647, %v7240_v53  ;;  %vm7323_vm1 = vweird.f32 %v7240_v53 }
 0x98a   : > { %v7389_v50 = vsel %vm4997_vm3, %v7366_v36, 0  ;;  %v7305_v24 = vsub.f32 1.0, %v7304_v63  ;;  %v7218_v62 = vsub.f32 0.0, %v13125_v48  ;;  %v7330_v60 = vor.u32 1.1754944e-38, %v7329_v23 }
 0x98b   : > { %v13129_v12 = vand.u32 4294901760, %v7389_v50  ;;  %v7443_v20 = vand.u32 4294901760, %v7442_v32  ;;  %vm7328_vm11 = vcmp.eq.f32.partialorder %v7327_v10, 8.507059e+37  ;;  %vm6229_vm6 = vcmp.gt.f32.partialorder %v13944_v28, -5e+29 }
 0x98c   : > { %v8647_v31 = vpop.eup %8646  ;;  %v7306_v2 = vmul.f32 %v8645_v55, %v7305_v24  ;;  %v7233_v30 = vmul.f32 1.442695, %v7218_v62 }
 0x98d   : > { %7537 = vmatmul.f32.gmra.mxu1 %v13129_v12  ;;  %v7448_v18 = vsub.f32 %v7389_v50, %v13129_v12  ;;  %v7241_v45 = vadd.f32 1.0, %v8647_v31  ;;  %7444 = vmatmul.f32.gmra.mxu0 %v7443_v20  ;;  %v8649_v13 = vpop.eup %8648 }
 0x98e   : > { %v7307_v6 = vadd.f32 %v8645_v55, %v7306_v2  ;;  %8650 = vpow2.f32 %v7233_v30  ;;  %v7319_v52 = vmul.f32 %v8649_v13, %v7240_v53  ;;  %vm7324_vm13 = vweird.f32 %v8649_v13 }
 0x98f   : > { %7598 = vmatmul.f32.gmra.mxu2 %v7448_v18  ;;  %v7449_v47 = vand.u32 4294901760, %v7448_v18  ;;  %8652 = vrcp.f32 %v7241_v45  ;;  %vm7325_vm8 = vmor %vm7323_vm1, %vm7324_vm13  ;;  %v7342_v22 = vand.u32 2147483647, %v7241_v45  ;;  %v7344_v11 = vand.u32 2147483648, %v7241_v45 }
 0x990   : > { %v7311_v15 = vsel %vm7310_vm12, %v8645_v55, %v7307_v6  ;;  %v7320_v54 = vsub.f32 1.0, %v7319_v52  ;;  %vm7338_vm5 = vweird.f32 %v7241_v45 }
 0x991   : > { %7663 = vmatmul.f32.gmra.mxu3 %v7449_v47  ;;  %v7450_v25 = vsub.f32 %v7448_v18, %v7449_v47  ;;  %v7316_v46 = vsel %vm7313_vm10, %v7315_v1, %v7311_v15  ;;  %v7345_v63 = vor.u32 1.1754944e-38, %v7344_v11  ;;  %vm7343_vm2 = vcmp.eq.f32.partialorder %v7342_v22, 8.507059e+37 }
 0x992   : > { %v7367_v16 = vmul.f32 %v7316_v46, %v13080_v43  ;;  %v7321_v39 = vmul.f32 %v8649_v13, %v7320_v54 }
 0x993   : > { %v7451_v9 = vand.u32 4294901760, %v7450_v25 }
 0x994   : > { %v8651_v41 = vpop.eup %8650  ;;  %v7392_v34 = vsel %vm4997_vm3, %v7367_v16, 0  ;;  %v7322_v3 = vadd.f32 %v8649_v13, %v7321_v39 }
 0x995   : > { %v8653_v5 = vpop.eup %8652  ;;  %v13139_v17 = vand.u32 4294901760, %v7392_v34  ;;  %v7242_v38 = vadd.f32 1.0, %v8651_v41  ;;  %7452 = vmatmul.f32.gmra.mxu0 %v7451_v9 }
 0x996   : > { %v7334_v14 = vmul.f32 %v8653_v5, %v7241_v45  ;;  %v7326_v43 = vsel %vm7325_vm8, %v8649_v13, %v7322_v3  ;;  %vm7339_vm15 = vweird.f32 %v8653_v5  ;;  %vm6230_vm8 = vcmp.gt.f32.partialorder %v13947_v33, -5e+29 }
 0x997   : > { %8654 = vrcp.f32 %v7242_v38  ;;  %7541 = vmatmul.f32.gmra.mxu1 %v13139_v17  ;;  %v7456_v51 = vsub.f32 %v7392_v34, %v13139_v17  ;;  %v7331_v61 = vsel %vm7328_vm11, %v7330_v60, %v7326_v43  ;;  %vm7340_vm7 = vmor %vm7338_vm5, %vm7339_vm15  ;;  %v7359_v20 = vand.u32 2147483648, %v7242_v38 }
 0x998   : > { %v7335_v58 = vsub.f32 1.0, %v7334_v14  ;;  %v7368_v35 = vmul.f32 %v7331_v61, %v13102_v37  ;;  %v7357_v18 = vand.u32 2147483647, %v7242_v38  ;;  %vm7353_vm14 = vweird.f32 %v7242_v38  ;;  %v13168_v61 = vld [vmem:[%s13324_s18] ss:$0 sm:$0xff] }
 0x999   : > { %7603 = vmatmul.f32.gmra.mxu2 %v7456_v51  ;;  %v7457_v8 = vand.u32 4294901760, %v7456_v51  ;;  %v7360_v13 = vor.u32 1.1754944e-38, %v7359_v20 }
 0x99a   : > { %v7336_v0 = vmul.f32 %v8653_v5, %v7335_v58  ;;  %v7395_v57 = vsel %vm4997_vm3, %v7368_v35, 0  ;;  %vm7358_vm4 = vcmp.eq.f32.partialorder %v7357_v18, 8.507059e+37 }
 0x99b   : > { %7669 = vmatmul.f32.gmra.mxu3 %v7457_v8  ;;  %v7458_v55 = vsub.f32 %v7456_v51, %v7457_v8  ;;  %v7463_v53 = vand.u32 4294901760, %v7395_v57 }
 0x99c   : > { %v7337_v27 = vadd.f32 %v8653_v5, %v7336_v0 }
 0x99d   : > { %v8655_v36 = vpop.eup %8654  ;;  %v7459_v24 = vand.u32 4294901760, %v7458_v55  ;;  %v7464_v37 = vsub.f32 %v7395_v57, %v7463_v53 }
 0x99e   : > { %v7341_v32 = vsel %vm7340_vm7, %v8653_v5, %v7337_v27  ;;  %v7349_v50 = vmul.f32 %v8655_v36, %v7242_v38  ;;  %vm7354_vm9 = vweird.f32 %v8655_v36 }
 0x99f   : > { %v7346_v62 = vsel %vm7343_vm2, %v7345_v63, %v7341_v32  ;;  %7545 = vmatmul.f32.gmra.mxu1 %v7463_v53  ;;  %7460 = vmatmul.f32.gmra.mxu0 %v7459_v24  ;;  %v7465_v31 = vand.u32 4294901760, %v7464_v37  ;;  %vm7355_vm0 = vmor %vm7353_vm14, %vm7354_vm9  ;;  %vm6231_vm2 = vcmp.gt.f32.partialorder %v13950_v7, -5e+29 }
 0x9a0   : > { %v7369_v29 = vmul.f32 %v7346_v62, %v13112_v56  ;;  %v7350_v40 = vsub.f32 1.0, %v7349_v50 }
 0x9a1   : > { %7608 = vmatmul.f32.gmra.mxu2 %v7464_v37  ;;  %v7466_v6 = vsub.f32 %v7464_v37, %v7465_v31 }
 0x9a2   : > { %v7398_v2 = vsel %vm4997_vm3, %v7369_v29, 0  ;;  %v7351_v30 = vmul.f32 %v8655_v36, %v7350_v40 }
 0x9a3   : > { %v7471_v45 = vand.u32 4294901760, %v7398_v2  ;;  %7675 = vmatmul.f32.gmra.mxu3 %v7465_v31  ;;  %v7467_v1 = vand.u32 4294901760, %v7466_v6 }
 0x9a4   : > { %v7352_v47 = vadd.f32 %v8655_v36, %v7351_v30 }
 0x9a5   : > { %v7472_v15 = vsub.f32 %v7398_v2, %v7471_v45 }
 0x9a6   : > { %v7356_v56 = vsel %vm7355_vm0, %v8655_v36, %v7352_v47 }
 0x9a7   : > { %v7361_v52 = vsel %vm7358_vm4, %v7360_v13, %v7356_v56  ;;  %7549 = vmatmul.f32.gmra.mxu1 %v7471_v45  ;;  %v7473_v25 = vand.u32 4294901760, %v7472_v15  ;;  %7468 = vmatmul.f32.gmra.mxu0 %v7467_v1 }
 0x9a8   : > { %v7370_v46 = vmul.f32 %v7361_v52, %v13125_v48 }
 0x9a9   : > { %v7474_v16 = vsub.f32 %v7472_v15, %v7473_v25  ;;  %7613 = vmatmul.f32.gmra.mxu2 %v7472_v15 }
 0x9aa   : > { %v7401_v54 = vsel %vm4997_vm3, %v7370_v46, 0 }
 0x9ab   : > { %v7479_v9 = vand.u32 4294901760, %v7401_v54  ;;  %7681 = vmatmul.f32.gmra.mxu3 %v7473_v25  ;;  %v7475_v23 = vand.u32 4294901760, %v7474_v16 }
 0x9ad   : > { %v7480_v41 = vsub.f32 %v7401_v54, %v7479_v9 }
 0x9af   : > { %7553 = vmatmul.f32.gmra.mxu1 %v7479_v9  ;;  %v7481_v34 = vand.u32 4294901760, %v7480_v41  ;;  %7476 = vmatmul.f32.gmra.mxu0 %v7475_v23 }
 0x9b1   : > { %v7482_v39 = vsub.f32 %v7480_v41, %v7481_v34  ;;  %7618 = vmatmul.f32.gmra.mxu2 %v7480_v41 }
 0x9b3   : > { %7687 = vmatmul.f32.gmra.mxu3 %v7481_v34  ;;  %v7483_v10 = vand.u32 4294901760, %v7482_v39 }
 0x9b7   : > { %7773 = vmatmul.f32.vlgmr.msra.gmra.mxu1 %v13082_v4  ;;  %7484 = vmatmul.f32.gmra.mxu0 %v7483_v10 }
 0x9bf   : > { %7777 = vmatmul.f32.gmra.mxu1 %v13100_v42  ;;  %7720 = vmatmul.f32.vlgmr.msra.gmra.mxu0 %v13082_v4 }
 0x9c7   : > { %7781 = vmatmul.f32.gmra.mxu1 %v13118_v19  ;;  %7724 = vmatmul.f32.gmra.mxu0 %v13100_v42 }
 0x9cf   : > { %7785 = vmatmul.f32.gmra.mxu1 %v13129_v12  ;;  %7728 = vmatmul.f32.gmra.mxu0 %v13118_v19 }
 0x9d7   : > { %7789 = vmatmul.f32.gmra.mxu1 %v13139_v17  ;;  %7732 = vmatmul.f32.gmra.mxu0 %v13129_v12 }
 0x9df   : > { %7793 = vmatmul.f32.gmra.mxu1 %v7463_v53  ;;  %7736 = vmatmul.f32.gmra.mxu0 %v13139_v17 }
 0x9e7   : > { %7797 = vmatmul.f32.gmra.mxu1 %v7471_v45  ;;  %7740 = vmatmul.f32.gmra.mxu0 %v7463_v53 }
 0x9ef   : > { %7801 = vmatmul.f32.gmra.mxu1 %v7479_v9  ;;  %7744 = vmatmul.f32.gmra.mxu0 %v7471_v45 }
 0x9f2   : > { %v7526_v4 = vpop.f32.mrf.mxu1 }
 0x9f7   : > { %7748 = vmatmul.f32.gmra.mxu0 %v7479_v9 }
 0x9fa   : > { %v7429_v48 = vpop.f32.mrf.mxu0  ;;  %v7530_v5 = vpop.f32.mrf.mxu1 }
 0x9fb   : > { %v7584_v51 = vpop.f32.mrf.mxu2  ;;  %v7430_v0 = vadd.f32 %v13168_v61, %v7429_v48 }
 0x9fc   : > { %v7646_v11 = vpop.f32.mrf.mxu3 }
 0x9fd   : > { %v7527_v57 = vadd.f32 %v7526_v4, %v7430_v0 }
 0x9ff   : > { %v7585_v53 = vadd.f32 %v7584_v51, %v7527_v57 }
 0xa01   : > { %v7647_v32 = vadd.f32 %v7646_v11, %v7585_v53 }
 0xa02   : > { %v7534_v42 = vpop.f32.mrf.mxu1  ;;  %v7437_v38 = vpop.f32.mrf.mxu0 }
 0xa03   : > { %v7589_v8 = vpop.f32.mrf.mxu2  ;;  %v7438_v63 = vadd.f32 %v13168_v61, %v7437_v38 }
 0xa04   : > { %v7652_v36 = vpop.f32.mrf.mxu3 }
 0xa05   : > { %v7531_v50 = vadd.f32 %v7530_v5, %v7438_v63 }
 0xa07   : > { %v7590_v40 = vadd.f32 %v7589_v8, %v7531_v50 }
 0xa09   : > { %v7653_v18 = vadd.f32 %v7652_v36, %v7590_v40 }
 0xa0a   : > { %v7445_v3 = vpop.f32.mrf.mxu0  ;;  %v7538_v14 = vpop.f32.mrf.mxu1 }
 0xa0b   : > { %v7594_v62 = vpop.f32.mrf.mxu2  ;;  %v7446_v20 = vadd.f32 %v13168_v61, %v7445_v3 }
 0xa0c   : > { %v7658_v2 = vpop.f32.mrf.mxu3 }
 0xa0d   : > { %v7535_v45 = vadd.f32 %v7534_v42, %v7446_v20 }
 0xa0f   : > { %v7595_v56 = vadd.f32 %v7594_v62, %v7535_v45 }
 0xa11   : > { %v7659_v9 = vadd.f32 %v7658_v2, %v7595_v56 }
 0xa12   : > { %v7453_v19 = vpop.f32.mrf.mxu0 }
 0xa13   : > { %v7599_v15 = vpop.f32.mrf.mxu2  ;;  %v7454_v52 = vadd.f32 %v13168_v61, %v7453_v19 }
 0xa14   : > { %v7542_v60 = vpop.f32.mrf.mxu1  ;;  %v7664_v16 = vpop.f32.mrf.mxu3 }
 0xa15   : > { %v7539_v23 = vadd.f32 %v7538_v14, %v7454_v52 }
 0xa17   : > { %v7600_v48 = vadd.f32 %v7599_v15, %v7539_v23 }
 0xa19   : > { %v7665_v51 = vadd.f32 %v7664_v16, %v7600_v48 }
 0xa1c   : > { %v13159_v43 = vpop.f32.mrf.mxu1  ;;  %v7461_v12 = vpop.f32.mrf.mxu0 }
 0xa1d   : > { %v7462_v42 = vadd.f32 %v13168_v61, %v7461_v12  ;;  %v7604_v38 = vpop.f32.mrf.mxu2 }
 0xa1e   : > { %v7670_v8 = vpop.f32.mrf.mxu3 }
 0xa1f   : > { %v7543_v14 = vadd.f32 %v7542_v60, %v7462_v42 }
 0xa21   : > { %v7605_v12 = vadd.f32 %v7604_v38, %v7543_v14 }
 0xa23   : > { %v7671_v45 = vadd.f32 %v7670_v8, %v7605_v12 }
 0xa24   : > { %v13161_v58 = vpop.f32.mrf.mxu1  ;;  %v13163_v17 = vpop.f32.mrf.mxu0 }
 0xa25   : > { %v7470_v50 = vadd.f32 %v13168_v61, %v13163_v17  ;;  %v7609_v40 = vpop.f32.mrf.mxu2 }
 0xa26   : > { %v7676_v56 = vpop.f32.mrf.mxu3 }
 0xa2c   : > { %v13170_v22 = vpop.f32.mrf.mxu1  ;;  %v13172_v35 = vpop.f32.mrf.mxu0 }
 0xa2d   : > { %v7478_v52 = vadd.f32 %v13168_v61, %v13172_v35 }
 0xa34   : > { %v7774_v27 = vpop.f32.mrf.mxu1  ;;  %v13175_v55 = vpop.f32.mrf.mxu0 }
 0xa3c   : > { %v7778_v24 = vpop.f32.mrf.mxu1  ;;  %v7721_v37 = vpop.f32.mrf.mxu0 }
 0xa3d   : > { %v7722_v29 = vadd.f32 %v7721_v37, %v7647_v32 }
 0xa3f   : > { %v13179_v31 = vadd.f32 %v7774_v27, %v7722_v29 }
 0xa41   : > { %v7805_v30 = vsub.f32 0.0, %v13179_v31 }
 0xa43   : > { %v7813_v6 = vmul.f32 1.442695, %v7805_v30 }
 0xa44   : > { %v7725_v47 = vpop.f32.mrf.mxu0  ;;  %v7782_v13 = vpop.f32.mrf.mxu1 }
 0xa45   : > { %8656 = vpow2.f32 %v7813_v6  ;;  %v7726_v1 = vadd.f32 %v7725_v47, %v7653_v18  ;;  %v7547_v6 = vadd.f32 %v13159_v43, %v7470_v50  ;;  %v7682_v50 = vpop.f32.mrf.mxu3 }
 0xa47   : > { %v13183_v25 = vadd.f32 %v7778_v24, %v7726_v1  ;;  %v7610_v23 = vadd.f32 %v7609_v40, %v7547_v6 }
 0xa49   : > { %v7806_v46 = vsub.f32 0.0, %v13183_v25 }
 0xa4b   : > { %v8657_v54 = vpop.eup %8656  ;;  %v7815_v41 = vmul.f32 1.442695, %v7806_v46  ;;  %v6237_v46 = vsel %vm6229_vm6, %v13944_v28, 0.0  ;;  %v7551_v28 = vadd.f32 %v13161_v58, %v7478_v52 }
 0xa4c   : > { %v7829_v34 = vadd.f32 1.0, %v8657_v54  ;;  %v7729_v39 = vpop.f32.mrf.mxu0  ;;  %v7786_v4 = vpop.f32.mrf.mxu1 }
 0xa4d   : > { %8658 = vpow2.f32 %v7815_v41  ;;  %v7730_v10 = vadd.f32 %v7729_v39, %v7659_v9 }
 0xa4e   : > { %8660 = vrcp.f32 %v7829_v34  ;;  %v7848_v24 = vand.u32 2147483648, %v7829_v34  ;;  %v7846_v60 = vand.u32 2147483647, %v7829_v34  ;;  %vm7842_vm12 = vweird.f32 %v7829_v34 }
 0xa4f   : > { %v13186_v5 = vadd.f32 %v7782_v13, %v7730_v10 }
 0xa50   : > { %v7849_v17 = vor.u32 1.1754944e-38, %v7848_v24  ;;  %vm7847_vm13 = vcmp.eq.f32.partialorder %v7846_v60, 8.507059e+37 }
 0xa51   : > { %v7807_v3 = vsub.f32 0.0, %v13186_v5 }
 0xa53   : > { %v8659_v19 = vpop.eup %8658  ;;  %v7817_v11 = vmul.f32 1.442695, %v7807_v3  ;;  %v7677_v3 = vadd.f32 %v7676_v56, %v7610_v23 }
 0xa54   : > { %v8661_v0 = vpop.eup %8660  ;;  %v13190_v57 = vadd.f32 1.0, %v8659_v19  ;;  %v7733_v27 = vpop.f32.mrf.mxu0 }
 0xa55   : > { %v7838_v36 = vmul.f32 %v8661_v0, %v7829_v34  ;;  %8662 = vpow2.f32 %v7817_v11  ;;  %v7734_v53 = vadd.f32 %v7733_v27, %v7665_v51  ;;  %v7790_v62 = vpop.f32.mrf.mxu1  ;;  %vm7843_vm3 = vweird.f32 %v8661_v0  ;;  %v7614_v19 = vpop.f32.mrf.mxu2 }
 0xa56   : > { %8664 = vrcp.f32 %v13190_v57  ;;  %vm7844_vm10 = vmor %vm7842_vm12, %vm7843_vm3  ;;  %v7861_v41 = vand.u32 2147483647, %v13190_v57  ;;  %v7863_v34 = vand.u32 2147483648, %v13190_v57  ;;  %vm7857_vm11 = vweird.f32 %v13190_v57 }
 0xa57   : > { %v7839_v63 = vsub.f32 1.0, %v7838_v36  ;;  %v13193_v32 = vadd.f32 %v7786_v4, %v7734_v53  ;;  %v7615_v27 = vadd.f32 %v7614_v19, %v7551_v28  ;;  %v7486_v53 = vadd.f32 %v13168_v61, %v13175_v55 }
 0xa58   : > { %v7864_v51 = vor.u32 1.1754944e-38, %v7863_v34  ;;  %vm7862_vm5 = vcmp.eq.f32.partialorder %v7861_v41, 8.507059e+37  ;;  %vm6232_vm3 = vcmp.gt.f32.partialorder %v13953_v49, -5e+29 }
 0xa59   : > { %v7840_v37 = vmul.f32 %v8661_v0, %v7839_v63  ;;  %v7808_v29 = vsub.f32 0.0, %v13193_v32 }
 0xa5b   : > { %v8663_v20 = vpop.eup %8662  ;;  %v7841_v2 = vadd.f32 %v8661_v0, %v7840_v37  ;;  %v7819_v30 = vmul.f32 1.442695, %v7808_v29  ;;  %v7683_v29 = vadd.f32 %v7682_v50, %v7615_v27 }
 0xa5c   : > { %v8665_v18 = vpop.eup %8664  ;;  %v13200_v47 = vadd.f32 1.0, %v8663_v20  ;;  %v7737_v13 = vpop.f32.mrf.mxu0  ;;  %v7555_v20 = vadd.f32 %v13170_v22, %v7486_v53 }
 0xa5d   : > { %v7845_v1 = vsel %vm7844_vm10, %v8661_v0, %v7841_v2  ;;  %v7853_v15 = vmul.f32 %v8665_v18, %v13190_v57  ;;  %8666 = vpow2.f32 %v7819_v30  ;;  %v7738_v9 = vadd.f32 %v7737_v13, %v7671_v45  ;;  %v7794_v4 = vpop.f32.mrf.mxu1  ;;  %v7619_v22 = vpop.f32.mrf.mxu2 }
 0xa5e   : > { %v7850_v43 = vsel %vm7847_vm13, %v7849_v17, %v7845_v1  ;;  %8668 = vrcp.f32 %v13200_v47  ;;  %vm7858_vm1 = vweird.f32 %v8665_v18  ;;  %v6238_v57 = vsel %vm6230_vm8, %v13947_v33, 0.0 }
 0xa5f   : > { %v7957_v16 = vmul.f32 %v7850_v43, %v13179_v31  ;;  %v7854_v54 = vsub.f32 1.0, %v7853_v15  ;;  %v13212_v35 = vadd.f32 %v7790_v62, %v7738_v9  ;;  %vm7859_vm15 = vmor %vm7857_vm11, %vm7858_vm1  ;;  %v7878_v24 = vand.u32 2147483648, %v13200_v47 }
 0xa60   : > { %v7876_v33 = vand.u32 2147483647, %v13200_v47  ;;  %vm7872_vm9 = vweird.f32 %v13200_v47  ;;  %v6239_v1 = vsel %vm6231_vm2, %v13950_v7, 0.0  ;;  %v7620_v52 = vadd.f32 %v7619_v22, %v7555_v20  ;;  %v7688_v7 = vpop.f32.mrf.mxu3 }
 0xa61   : > { %v7965_v39 = vadd.f32 %v7957_v16, %v6237_v46  ;;  %v7855_v10 = vmul.f32 %v8665_v18, %v7854_v54  ;;  %v7809_v42 = vsub.f32 0.0, %v13212_v35  ;;  %vm6233_vm1 = vcmp.gt.f32.partialorder %v13956_v44, -5e+29 }
 0xa62   : > { %vm7877_vm0 = vcmp.eq.f32.partialorder %v7876_v33, 8.507059e+37 }
 0xa63   : > { %v8667_v48 = vpop.eup %8666  ;;  %7973 = vst [vmem:[%s11037_s22] sm:$0xff] %v7965_v39  ;;  %v7856_v31 = vadd.f32 %v8665_v18, %v7855_v10  ;;  %v7821_v8 = vmul.f32 1.442695, %v7809_v42  ;;  %v7689_v39 = vadd.f32 %v7688_v7, %v7620_v52 }
 0xa64   : > { %v8669_v38 = vpop.eup %8668  ;;  %v13219_v11 = vadd.f32 1.0, %v8667_v48  ;;  %v7741_v0 = vpop.f32.mrf.mxu0 }
 0xa65   : > { %v7860_v14 = vsel %vm7859_vm15, %v8665_v18, %v7856_v31  ;;  %v7868_v58 = vmul.f32 %v8669_v38, %v13200_v47  ;;  %v7742_v62 = vadd.f32 %v7741_v0, %v7677_v3  ;;  %vm7873_vm7 = vweird.f32 %v8669_v38  ;;  %v7798_v30 = vpop.f32.mrf.mxu1 }
 0xa66   : > { %v7865_v36 = vsel %vm7862_vm5, %v7864_v51, %v7860_v14  ;;  %8670 = vrcp.f32 %v13219_v11  ;;  %vm7874_vm14 = vmor %vm7872_vm9, %vm7873_vm7  ;;  %v7891_v54 = vand.u32 2147483647, %v13219_v11  ;;  %v7893_v9 = vand.u32 2147483648, %v13219_v11 }
 0xa67   : > { %v7958_v63 = vmul.f32 %v7865_v36, %v13183_v25  ;;  %v7869_v12 = vsub.f32 1.0, %v7868_v58  ;;  %8672 = vpow2.f32 %v7821_v8  ;;  %v13231_v40 = vadd.f32 %v7794_v4, %v7742_v62 }
 0xa68   : > { %v7879_v25 = vor.u32 1.1754944e-38, %v7878_v24  ;;  %vm7887_vm6 = vweird.f32 %v13219_v11  ;;  %v7894_v10 = vor.u32 1.1754944e-38, %v7893_v9  ;;  %vm7892_vm10 = vcmp.eq.f32.partialorder %v7891_v54, 8.507059e+37 }
 0xa69   : > { %v7966_v37 = vadd.f32 %v7958_v63, %v6238_v57  ;;  %v7870_v60 = vmul.f32 %v8669_v38, %v7869_v12  ;;  %v7810_v2 = vsub.f32 0.0, %v13231_v40  ;;  %vm6234_vm7 = vcmp.gt.f32.partialorder %v13959_v59, -5e+29 }
 0xa6a   : > { %v6242_v22 = vsel %vm6234_vm7, %v13959_v59, 0.0 }
 0xa6b   : > { %7974 = vst [vmem:[%s11037_s22 + $0x8] sm:$0xff] %v7966_v37  ;;  %v7871_v61 = vadd.f32 %v8669_v38, %v7870_v60  ;;  %v7823_v47 = vmul.f32 1.442695, %v7810_v2  ;;  %v6241_v60 = vsel %vm6233_vm1, %v13956_v44, 0.0 }
 0xa6c   : > { %v8671_v55 = vpop.eup %8670  ;;  %v7745_v18 = vpop.f32.mrf.mxu0 }
 0xa6d   : > { %v8673_v45 = vpop.eup %8672  ;;  %v7875_v6 = vsel %vm7874_vm14, %v8669_v38, %v7871_v61  ;;  %v7883_v17 = vmul.f32 %v8671_v55, %v13219_v11  ;;  %v7746_v13 = vadd.f32 %v7745_v18, %v7683_v29  ;;  %vm7888_vm4 = vweird.f32 %v8671_v55  ;;  %v7802_v19 = vpop.f32.mrf.mxu1 }
 0xa6e   : > { %v7880_v15 = vsel %vm7877_vm0, %v7879_v25, %v7875_v6  ;;  %v7833_v56 = vadd.f32 1.0, %v8673_v45  ;;  %vm7889_vm12 = vmor %vm7887_vm6, %vm7888_vm4  ;;  %v6240_v38 = vsel %vm6232_vm3, %v13953_v49, 0.0  ;;  %vm6235_vm4 = vcmp.gt.f32.partialorder %v13962_v26, -5e+29 }
 0xa6f   : > { %v7959_v46 = vmul.f32 %v7880_v15, %v13186_v5  ;;  %v7884_v43 = vsub.f32 1.0, %v7883_v17  ;;  %v13241_v16 = vadd.f32 %v7798_v30, %v7746_v13  ;;  %v6243_v7 = vsel %vm6235_vm4, %v13962_v26, 0.0 }
 0xa70   : > { %8674 = vrcp.f32 %v7833_v56  ;;  %v7908_v36 = vand.u32 2147483648, %v7833_v56  ;;  %v7906_v49 = vand.u32 2147483647, %v7833_v56  ;;  %vm7902_vm8 = vweird.f32 %v7833_v56 }
 0xa71   : > { %v7967_v23 = vadd.f32 %v7959_v46, %v6239_v1  ;;  %v7885_v41 = vmul.f32 %v8671_v55, %v7884_v43  ;;  %8676 = vpow2.f32 %v7823_v47  ;;  %v7811_v34 = vsub.f32 0.0, %v13241_v16 }
 0xa72   : > { %v7909_v24 = vor.u32 1.1754944e-38, %v7908_v36  ;;  %vm7907_vm15 = vcmp.eq.f32.partialorder %v7906_v49, 8.507059e+37 }
 0xa73   : > { %7975 = vst [vmem:[%s11037_s22 + $0x10] sm:$0xff] %v7967_v23  ;;  %v7886_v5 = vadd.f32 %v8671_v55, %v7885_v41  ;;  %v7825_v28 = vmul.f32 1.442695, %v7811_v34 }
 0xa74   : > { %v7749_v4 = vpop.f32.mrf.mxu0 }
 0xa75   : > { %v7890_v48 = vsel %vm7889_vm12, %v8671_v55, %v7886_v5  ;;  %v7750_v31 = vadd.f32 %v7749_v4, %v7689_v39  ;;  %8678 = vpow2.f32 %v7825_v28 }
 0xa76   : > { %v8675_v42 = vpop.eup %8674  ;;  %v7895_v3 = vsel %vm7892_vm10, %v7894_v10, %v7890_v48 }
 0xa77   : > { %v8677_v51 = vpop.eup %8676  ;;  %v7960_v0 = vmul.f32 %v7895_v3, %v13193_v32  ;;  %v7898_v14 = vmul.f32 %v8675_v42, %v7833_v56  ;;  %v13251_v58 = vadd.f32 %v7802_v19, %v7750_v31  ;;  %vm7903_vm13 = vweird.f32 %v8675_v42 }
 0xa78   : > { %v7834_v11 = vadd.f32 1.0, %v8677_v51  ;;  %vm7904_vm11 = vmor %vm7902_vm8, %vm7903_vm13  ;;  %vm6236_vm13 = vcmp.gt.f32.partialorder %v13965_v21, -5e+29 }
 0xa79   : > { %v7968_v8 = vadd.f32 %v7960_v0, %v6240_v38  ;;  %v7899_v27 = vsub.f32 1.0, %v7898_v14  ;;  %v7812_v57 = vsub.f32 0.0, %v13251_v58  ;;  %v6244_v31 = vsel %vm6236_vm13, %v13965_v21, 0.0 }
 0xa7a   : > { %8680 = vrcp.f32 %v7834_v11  ;;  %v7923_v2 = vand.u32 2147483648, %v7834_v11  ;;  %v7921_v6 = vand.u32 2147483647, %v7834_v11  ;;  %vm7917_vm2 = vweird.f32 %v7834_v11 }
 0xa7b   : > { %7976 = vst [vmem:[%s11037_s22 + $0x18] sm:$0xff] %v7968_v8  ;;  %v7900_v53 = vmul.f32 %v8675_v42, %v7899_v27  ;;  %v7827_v63 = vmul.f32 1.442695, %v7812_v57  ;;  %v8679_v12 = vpop.eup %8678 }
 0xa7c   : > { %v7835_v32 = vadd.f32 1.0, %v8679_v12  ;;  %v7924_v44 = vor.u32 1.1754944e-38, %v7923_v2  ;;  %vm7922_vm14 = vcmp.eq.f32.partialorder %v7921_v6, 8.507059e+37 }
 0xa7d   : > { %v7901_v50 = vadd.f32 %v8675_v42, %v7900_v53  ;;  %8682 = vpow2.f32 %v7827_v63 }
 0xa7e   : > { %8684 = vrcp.f32 %v7835_v32  ;;  %v7938_v15 = vand.u32 2147483648, %v7835_v32  ;;  %v7936_v52 = vand.u32 2147483647, %v7835_v32  ;;  %vm7932_vm3 = vweird.f32 %v7835_v32 }
 0xa7f   : > { %v7905_v62 = vsel %vm7904_vm11, %v8675_v42, %v7901_v50 }
 0xa80   : > { %v8681_v37 = vpop.eup %8680  ;;  %v7910_v33 = vsel %vm7907_vm15, %v7909_v24, %v7905_v62  ;;  %v7939_v23 = vor.u32 1.1754944e-38, %v7938_v15  ;;  %vm7937_vm12 = vcmp.eq.f32.partialorder %v7936_v52, 8.507059e+37 }
 0xa81   : > { %v7961_v29 = vmul.f32 %v7910_v33, %v13212_v35  ;;  %v7913_v20 = vmul.f32 %v8681_v37, %v7834_v11  ;;  %vm7918_vm5 = vweird.f32 %v8681_v37 }
 0xa82   : > { %vm7919_vm9 = vmor %vm7917_vm2, %vm7918_vm5 }
 0xa83   : > { %v8683_v61 = vpop.eup %8682  ;;  %v7969_v55 = vadd.f32 %v7961_v29, %v6241_v60  ;;  %v7914_v25 = vsub.f32 1.0, %v7913_v20 }
 0xa84   : > { %v7836_v30 = vadd.f32 1.0, %v8683_v61  ;;  %v8685_v18 = vpop.eup %8684 }
 0xa85   : > { %7977 = vst [vmem:[%s11037_s22 + $0x20] sm:$0xff] %v7969_v55  ;;  %v7915_v45 = vmul.f32 %v8681_v37, %v7914_v25  ;;  %v7928_v17 = vmul.f32 %v8685_v18, %v7835_v32  ;;  %vm7933_vm0 = vweird.f32 %v8685_v18 }
 0xa86   : > { %8686 = vrcp.f32 %v7836_v30  ;;  %vm7934_vm6 = vmor %vm7932_vm3, %vm7933_vm0  ;;  %v7953_v5 = vand.u32 2147483648, %v7836_v30  ;;  %v7951_v28 = vand.u32 2147483647, %v7836_v30  ;;  %vm7947_vm1 = vweird.f32 %v7836_v30 }
 0xa87   : > { %v7916_v13 = vadd.f32 %v8681_v37, %v7915_v45  ;;  %v7929_v35 = vsub.f32 1.0, %v7928_v17 }
 0xa88   : > { %v7954_v26 = vor.u32 1.1754944e-38, %v7953_v5  ;;  %vm7952_vm11 = vcmp.eq.f32.partialorder %v7951_v28, 8.507059e+37 }
 0xa89   : > { %v7920_v1 = vsel %vm7919_vm9, %v8681_v37, %v7916_v13  ;;  %v7930_v47 = vmul.f32 %v8685_v18, %v7929_v35 }
 0xa8a   : > { %v7925_v56 = vsel %vm7922_vm14, %v7924_v44, %v7920_v1 }
 0xa8b   : > { %v7962_v46 = vmul.f32 %v7925_v56, %v13231_v40  ;;  %v7931_v54 = vadd.f32 %v8685_v18, %v7930_v47 }
 0xa8c   : > { %v8687_v43 = vpop.eup %8686 }
 0xa8d   : > { %v7970_v9 = vadd.f32 %v7962_v46, %v6242_v22  ;;  %v7943_v59 = vmul.f32 %v8687_v43, %v7836_v30  ;;  %v7935_v41 = vsel %vm7934_vm6, %v8685_v18, %v7931_v54  ;;  %vm7948_vm10 = vweird.f32 %v8687_v43 }
 0xa8e   : > { %v7940_v34 = vsel %vm7937_vm12, %v7939_v23, %v7935_v41  ;;  %vm7949_vm8 = vmor %vm7947_vm1, %vm7948_vm10 }
 0xa8f   : > { %7978 = vst [vmem:[%s11037_s22 + $0x28] sm:$0xff] %v7970_v9  ;;  %v7944_v39 = vsub.f32 1.0, %v7943_v59  ;;  %v7963_v40 = vmul.f32 %v7940_v34, %v13241_v16 }
 0xa91   : > { %v7945_v10 = vmul.f32 %v8687_v43, %v7944_v39  ;;  %v7971_v4 = vadd.f32 %v7963_v40, %v6243_v7 }
 0xa93   : > { %v7946_v48 = vadd.f32 %v8687_v43, %v7945_v10  ;;  %7979 = vst [vmem:[%s11037_s22 + $0x30] sm:$0xff] %v7971_v4 }
 0xa95   : > { %v7950_v16 = vsel %vm7949_vm8, %v8687_v43, %v7946_v48 }
 0xa96   : > { %v7955_v42 = vsel %vm7952_vm11, %v7954_v26, %v7950_v16 }
 0xa97   : > { %v7964_v38 = vmul.f32 %v7955_v42, %v13251_v58 }
 0xa99   : > { %v7972_v3 = vadd.f32 %v7964_v38, %v6244_v31 }
 0xa9b   : > { %7980 = vst [vmem:[%s11037_s22 + $0x38] sm:$0xff] %v7972_v3 }
 0xa9c   : > { %8715 = shalt.err (!%p8712_p4)
}
 0xa9d   : > { %s8955_s22 = smov 128   ;;  %s8956_s1 = smov 8  }
 0xa9e   : > { %8244 = dma.vmem_to_hbm [thread:$0]  (%p9095_p5), %s7995_s25, 1024, %s7997_s24, %s7982_s2, %s8955_s22, %s8955_s22, %s8956_s1  }
 0xa9f PF: > { %p8250_p7 = scmp.ge.s32.totalorder %s8850_s21, 2  ;;  %s8011_s29 = sand.u32 1, %s8838_s0  }
 0xaa0   : > { %s8012_s4 = scalar_lea.sflag [#allocation3], %s8011_s29 }
 0xaa1   : > { %p8247_p8 = pnand %p8250_p7, %p9099_p6 }
 0xaa3   : > { %p8248_p9 = pneg %p8247_p8 }
 0xaa5   : > { %8833 = dma.done.wait (%p8248_p9), %s8012_s4, 1024  }
 0xaa6   : > { %8835 = vsyncadd (%p8248_p9), %s8012_s4, 4294966272  ;;  %s14042_s21 = sld [smem:[#allocation6_spill]]  ;;  %s14045_s0 = smov %s8842_s30 }
 0xaa7   : > { %s14043_s27 = sld [smem:[#allocation5_spill]] }
 0xaa8   : > { %s14044_s20 = sld [smem:[#allocation7_spill]] }
 0xaac   : > { %p29_p10 = scmp.ge.s32.totalorder %s14042_s21, 5  }
 0xaad   : > { %s14046_s30 = smov %s14043_s27 }
 0xaae   :  { %31 = sbr.rel (!%p29_p10) target bundleno = 11 (0xb), region = 155 }
 0xab3   :  { %8018 = vsyncpa [#allocation3], 1 }
 0xab4   :  { %8020 = vsyncpa [#allocation3 + $0x1], 1 }

</bundles_post_ra>
